<compile_context>
chip_gen: v6e
topology: v6e:2x2x1
jax: 0.10.0
libtpu: 0.0.40
codegen_flags: <defaults>
</compile_context>

<pallas_src>
import functools
import math

import numpy as np
import jax
import jax.numpy as jnp
from jax.experimental import pallas as pl
from jax.experimental.pallas import tpu as pltpu


# ----------------------------------------------------------------------------
# Pallas kernel: TemporalAttentionLayer.forward (eval mode, effective n_heads=1)
# ----------------------------------------------------------------------------
def temporal_attention_kernel(x_ref, w_ref, l_ref, b_ref, o_ref, *,
                              num_times, feat_dim, scale, residual):
    T, D = num_times, feat_dim
    TD = T * D

    x = x_ref[...]                                        # (TD, bn) bf16

    # ---- fused Q|K|V projection: single lane-dense bf16 MXU matmul ----------
    qkv = jnp.dot(w_ref[...], x,
                  preferred_element_type=jnp.float32)     # (3*TD, bn) f32

    qs = [qkv[t * D:(t + 1) * D, :] for t in range(T)]                 # (D, bn)
    ks = [qkv[TD + t * D:TD + (t + 1) * D, :] for t in range(T)]       # (D, bn)
    vs = [qkv[2 * TD + t * D:2 * TD + (t + 1) * D, :] for t in range(T)]

    # ---- causal attention over the tiny time axis: pure VPU/XLU/EUP ---------
    # masked (u > t) entries are skipped; in f32 their softmax weight is exactly 0.
    outs = [vs[0]]                                        # row t=0: softmax == [1,0,..]
    for t in range(1, T):
        s = [jnp.sum(qs[t] * ks[u], axis=0, keepdims=True) * scale
             for u in range(t + 1)]                       # (1, bn) each
        m = s[0]
        for u in range(1, t + 1):
            m = jnp.maximum(m, s[u])
        e = [jnp.exp(su - m) for su in s]
        den = e[0]
        for u in range(1, t + 1):
            den = den + e[u]
        acc = e[0] * vs[0]                                # (D, bn) f32 (unnormalized)
        for u in range(1, t + 1):
            acc = acc + e[u] * vs[u]
        inv = pl.reciprocal(den, approx=True)             # EUP slot (free-ish)
        outs.append(acc * inv)                            # normalize once per row
    att = jnp.concatenate(outs, axis=0)                   # (TD, bn) f32

    # ---- feedforward: relu(Linear(att)) + att  (block-diagonal, bf16 MXU) ---
    ff = jnp.dot(l_ref[...], att.astype(l_ref.dtype),
                 preferred_element_type=jnp.float32) + b_ref[...]
    y = jnp.maximum(ff, 0.0) + att
    if residual:
        y = y + x.astype(jnp.float32)

    o_ref[...] = y.astype(o_ref.dtype)                    # lane-dense store


def temporal_attention(x, qw, kw, vw, lw, lb, *, residual=True,
                       block_n=256, compute_dtype=jnp.bfloat16):
    """Pallas-backed TemporalAttentionLayer.forward.  x: [N, T, D] -> [N, T, D]."""
    N, T, D = x.shape
    TD = T * D
    assert block_n % 128 == 0, "node block must be lane-dense (multiple of 128)"
    assert TD % 8 == 0, "T*D must be a multiple of the 8-sublane tile"
    scale = 1.0 / math.sqrt(float(T))      # layer.num_time_steps == T here

    # Ragged node counts: pad N up to a multiple of block_n (sliced off at the end).
    n_pad = -(-N // block_n) * block_n
    x2d = x.reshape(N, TD)
    if n_pad != N:
        x2d = jnp.pad(x2d, ((0, n_pad - N), (0, 0)))
    # nodes-on-lanes layout for the kernel (one-time layout plumbing in HBM).
    xT = x2d.T.astype(compute_dtype)                      # (TD, n_pad)

    # Fused block-diagonal weights: one MXU matmul for Q|K|V, one for the FF Linear.
    eye = jnp.eye(T, dtype=jnp.float32)
    w_big = jnp.concatenate(
        [jnp.kron(eye, qw.T), jnp.kron(eye, kw.T), jnp.kron(eye, vw.T)],
        axis=0).astype(compute_dtype)                     # (3*TD, TD)
    l_big = jnp.kron(eye, lw).astype(compute_dtype)       # (TD, TD)
    b_big = jnp.tile(lb, T).reshape(TD, 1).astype(jnp.float32)

    kernel = functools.partial(temporal_attention_kernel, num_times=T,
                               feat_dim=D, scale=scale, residual=residual)

    out_t = pl.pallas_call(
        kernel,
        out_shape=jax.ShapeDtypeStruct((TD, n_pad), compute_dtype),
        grid_spec=pltpu.PrefetchScalarGridSpec(
            num_scalar_prefetch=0,
            grid=(n_pad // block_n,),
            in_specs=[
                pl.BlockSpec((TD, block_n), lambda i: (0, i)),   # xT node tile
                pl.BlockSpec((3 * TD, TD), lambda i: (0, 0)),    # fused QKV weights
                pl.BlockSpec((TD, TD), lambda i: (0, 0)),        # FF Linear weights
                pl.BlockSpec((TD, 1), lambda i: (0, 0)),         # FF bias
            ],
            out_specs=pl.BlockSpec((TD, block_n), lambda i: (0, i)),
        ),
        compiler_params=pltpu.CompilerParams(
            dimension_semantics=("parallel",)),
    )(xT, w_big, l_big, b_big)

    return out_t.T[:N].reshape(N, T, D)


# ----------------------------------------------------------------------------
# Glue (plain JAX): positional encoding + DySAT forward skeleton + reference
# ----------------------------------------------------------------------------
def get_positional_encoding(seq_len, d_model):
    pe = np.zeros((seq_len, d_model), dtype=np.float32)
    for pos in range(seq_len):
        for i in range(0, d_model, 2):
            pe[pos, i] = math.sin(pos / 10000 ** (2 * i / d_model))
            if i + 1 < d_model:
                pe[pos, i + 1] = math.cos(pos / 10000 ** (2 * i / d_model))
    return jnp.asarray(pe)


def reference_temporal_attention(x, qw, kw, vw, lw, lb, residual=True):
    """Pure-JAX f32 reference of TemporalAttentionLayer.forward (eval mode)."""
    N, T, D = x.shape
    q = jnp.einsum('ntf,fg->ntg', x, qw)
    k = jnp.einsum('ntf,fg->ntg', x, kw)
    v = jnp.einsum('ntf,fg->ntg', x, vw)
    s = jnp.einsum('ntf,nsf->nts', q, k) / math.sqrt(float(T))
    mask = jnp.tril(jnp.ones((T, T), jnp.float32))
    s = jnp.where(mask[None] == 0, jnp.float32(-2.0 ** 32 + 1.0), s)
    p = jax.nn.softmax(s, axis=2)
    out = jnp.einsum('nts,nsf->ntf', p, v)
    y = jax.nn.relu(jnp.einsum('ntf,gf->ntg', out, lw) + lb) + out
    if residual:
        y = y + x
    return y


if __name__ == "__main__":
    key = jax.random.PRNGKey(0)
    N = 512            # total nodes (users + items); padded internally if ragged
    time_length = 10   # -> T = time_length - 2 snapshots fed to temporal attn
    D = 32             # args.latent_dim == num_features
    T = time_length - 2

    k1, k2, k3, k4, k5, k6 = jax.random.split(key, 6)

    def bf16_values(a):   # round-trip so kernel (bf16 MXU feed) and f32 reference
        return a.astype(jnp.bfloat16).astype(jnp.float32)   # see identical values

    # Xavier-uniform Q/K/V embedding weights (deterministic).
    bound = math.sqrt(6.0 / (D + D))
    Qw = bf16_values(jax.random.uniform(k1, (D, D), jnp.float32, -bound, bound))
    Kw = bf16_values(jax.random.uniform(k2, (D, D), jnp.float32, -bound, bound))
    Vw = bf16_values(jax.random.uniform(k3, (D, D), jnp.float32, -bound, bound))

    # nn.Linear(D, D) weights/bias, PyTorch-style uniform(-1/sqrt(D), 1/sqrt(D)).
    lin_bound = 1.0 / math.sqrt(D)
    Lw = bf16_values(jax.random.uniform(k4, (D, D), jnp.float32, -lin_bound, lin_bound))
    Lb = jax.random.uniform(k5, (D,), jnp.float32, -lin_bound, lin_bound)

    # Synthetic stand-in for LightGCN structural outputs stacked over time: [N, T, D].
    # TODO(synk): LightGCN.computer() (graph propagation over datasetloder/graphs) is
    # external data machinery and is replaced by a synthetic tensor.
    x = bf16_values(jax.random.normal(k6, (N, T, D), jnp.float32))

    # DySAT.forward glue: positional encodings added to the permuted copy
    # (this tensor is only consumed by the BPR losses in the original code).
    pe = get_positional_encoding(time_length, D)
    structural_outputs_padded_pe = (
        jnp.transpose(x, (1, 0, 2)) + pe[:-2][:, None, :])

    # Temporal attention (the hot path) runs in the Pallas kernel; DySAT takes
    # the last timestep: temporal_out = temporal_attn(x)[:, -1, :].
    attn_out = temporal_attention(x, Qw, Kw, Vw, Lw, Lb, residual=True,
                                  block_n=256, compute_dtype=jnp.bfloat16)
    temporal_out = attn_out[:, -1, :]
    jax.block_until_ready(temporal_out)
    jax.block_until_ready(structural_outputs_padded_pe)

    # TODO(synk): DySAT.batch_loss / bpr_loss need UniformSample_original and the
    # dataset loader (host-side negative sampling + minibatching) -- no Pallas equivalent.

    # Correctness check against a pure-JAX f32 reference of the PyTorch math.
    # Tolerance covers bf16 MXU feeds / bf16 output rounding + approx EUP reciprocal.
    ref = reference_temporal_attention(x, Qw, Kw, Vw, Lw, Lb, residual=True)
    np.testing.assert_allclose(np.asarray(attn_out.astype(jnp.float32)),
                               np.asarray(ref), rtol=2e-2, atol=2e-2)

    print("KERNEL_OK")
</pallas_src>

<mosaic_0001>
module attributes {stable_mosaic.version = 11 : i64} {
  func.func @temporal_attention_kernel(%arg0: i32, %arg1: memref<256x256xbf16, #tpu.memory_space<vmem>>, %arg2: memref<768x256xbf16, #tpu.memory_space<vmem>>, %arg3: memref<256x256xbf16, #tpu.memory_space<vmem>>, %arg4: memref<256x1xf32, #tpu.memory_space<vmem>>, %arg5: memref<256x256xbf16, #tpu.memory_space<vmem>>) attributes {dimension_semantics = [#tpu.dimension_semantics<parallel>], iteration_bounds = array<i64: 2>, scalar_prefetch = 0 : i64, scratch_operands = 0 : i64, tpu.core_type = #tpu.core_type<tc>, window_params = [{transform_indices = @transform_0, window_bounds = array<i64: 256, 256>}, {pipeline_mode = #tpu.pipeline_mode<synchronous>, transform_indices = @transform_1, window_bounds = array<i64: 768, 256>}, {pipeline_mode = #tpu.pipeline_mode<synchronous>, transform_indices = @transform_2, window_bounds = array<i64: 256, 256>}, {pipeline_mode = #tpu.pipeline_mode<synchronous>, transform_indices = @transform_3, window_bounds = array<i64: 256, 1>}, {transform_indices = @transform_4, window_bounds = array<i64: 256, 256>}]} {
    %c0 = arith.constant 0 : index
    %c0_0 = arith.constant 0 : index
    %0 = vector.load %arg1[%c0, %c0_0] : memref<256x256xbf16, #tpu.memory_space<vmem>>, vector<256x256xbf16>
    %c0_1 = arith.constant 0 : index
    %c0_2 = arith.constant 0 : index
    %1 = vector.load %arg2[%c0_1, %c0_2] : memref<768x256xbf16, #tpu.memory_space<vmem>>, vector<768x256xbf16>
    %cst = arith.constant dense<0.000000e+00> : vector<768x256xf32>
    %2 = tpu.matmul %1, %0, %cst {dimension_numbers = #tpu.dot_dimension_numbers<[1], [0], [0], [1], [0, 0, 1, 1], [], []>} : vector<768x256xbf16>, vector<256x256xbf16>, vector<768x256xf32> -> vector<768x256xf32>
    %3 = vector.extract_strided_slice %2 {offsets = [32, 0], sizes = [32, 256], strides = [1, 1]} : vector<768x256xf32> to vector<32x256xf32>
    %4 = vector.extract_strided_slice %2 {offsets = [64, 0], sizes = [32, 256], strides = [1, 1]} : vector<768x256xf32> to vector<32x256xf32>
    %5 = vector.extract_strided_slice %2 {offsets = [96, 0], sizes = [32, 256], strides = [1, 1]} : vector<768x256xf32> to vector<32x256xf32>
    %6 = vector.extract_strided_slice %2 {offsets = [128, 0], sizes = [32, 256], strides = [1, 1]} : vector<768x256xf32> to vector<32x256xf32>
    %7 = vector.extract_strided_slice %2 {offsets = [160, 0], sizes = [32, 256], strides = [1, 1]} : vector<768x256xf32> to vector<32x256xf32>
    %8 = vector.extract_strided_slice %2 {offsets = [192, 0], sizes = [32, 256], strides = [1, 1]} : vector<768x256xf32> to vector<32x256xf32>
    %9 = vector.extract_strided_slice %2 {offsets = [224, 0], sizes = [32, 256], strides = [1, 1]} : vector<768x256xf32> to vector<32x256xf32>
    %10 = vector.extract_strided_slice %2 {offsets = [256, 0], sizes = [32, 256], strides = [1, 1]} : vector<768x256xf32> to vector<32x256xf32>
    %11 = vector.extract_strided_slice %2 {offsets = [288, 0], sizes = [32, 256], strides = [1, 1]} : vector<768x256xf32> to vector<32x256xf32>
    %12 = vector.extract_strided_slice %2 {offsets = [320, 0], sizes = [32, 256], strides = [1, 1]} : vector<768x256xf32> to vector<32x256xf32>
    %13 = vector.extract_strided_slice %2 {offsets = [352, 0], sizes = [32, 256], strides = [1, 1]} : vector<768x256xf32> to vector<32x256xf32>
    %14 = vector.extract_strided_slice %2 {offsets = [384, 0], sizes = [32, 256], strides = [1, 1]} : vector<768x256xf32> to vector<32x256xf32>
    %15 = vector.extract_strided_slice %2 {offsets = [416, 0], sizes = [32, 256], strides = [1, 1]} : vector<768x256xf32> to vector<32x256xf32>
    %16 = vector.extract_strided_slice %2 {offsets = [448, 0], sizes = [32, 256], strides = [1, 1]} : vector<768x256xf32> to vector<32x256xf32>
    %17 = vector.extract_strided_slice %2 {offsets = [480, 0], sizes = [32, 256], strides = [1, 1]} : vector<768x256xf32> to vector<32x256xf32>
    %18 = vector.extract_strided_slice %2 {offsets = [512, 0], sizes = [32, 256], strides = [1, 1]} : vector<768x256xf32> to vector<32x256xf32>
    %19 = vector.extract_strided_slice %2 {offsets = [544, 0], sizes = [32, 256], strides = [1, 1]} : vector<768x256xf32> to vector<32x256xf32>
    %20 = vector.extract_strided_slice %2 {offsets = [576, 0], sizes = [32, 256], strides = [1, 1]} : vector<768x256xf32> to vector<32x256xf32>
    %21 = vector.extract_strided_slice %2 {offsets = [608, 0], sizes = [32, 256], strides = [1, 1]} : vector<768x256xf32> to vector<32x256xf32>
    %22 = vector.extract_strided_slice %2 {offsets = [640, 0], sizes = [32, 256], strides = [1, 1]} : vector<768x256xf32> to vector<32x256xf32>
    %23 = vector.extract_strided_slice %2 {offsets = [672, 0], sizes = [32, 256], strides = [1, 1]} : vector<768x256xf32> to vector<32x256xf32>
    %24 = vector.extract_strided_slice %2 {offsets = [704, 0], sizes = [32, 256], strides = [1, 1]} : vector<768x256xf32> to vector<32x256xf32>
    %25 = vector.extract_strided_slice %2 {offsets = [736, 0], sizes = [32, 256], strides = [1, 1]} : vector<768x256xf32> to vector<32x256xf32>
    %26 = arith.mulf %3, %10 : vector<32x256xf32>
    %cst_3 = arith.constant dense<0.000000e+00> : vector<256xf32>
    %27 = vector.multi_reduction <add>, %26, %cst_3 [0] : vector<32x256xf32> to vector<256xf32>
    %28 = vector.shape_cast %27 : vector<256xf32> to vector<1x256xf32>
    %cst_4 = arith.constant 0.353553385 : f32
    %29 = vector.broadcast %cst_4 : f32 to vector<1x256xf32>
    %30 = arith.mulf %28, %29 : vector<1x256xf32>
    %31 = arith.mulf %3, %11 : vector<32x256xf32>
    %cst_5 = arith.constant dense<0.000000e+00> : vector<256xf32>
    %32 = vector.multi_reduction <add>, %31, %cst_5 [0] : vector<32x256xf32> to vector<256xf32>
    %33 = vector.shape_cast %32 : vector<256xf32> to vector<1x256xf32>
    %cst_6 = arith.constant 0.353553385 : f32
    %34 = vector.broadcast %cst_6 : f32 to vector<1x256xf32>
    %35 = arith.mulf %33, %34 : vector<1x256xf32>
    %36 = arith.maximumf %30, %35 : vector<1x256xf32>
    %37 = arith.subf %30, %36 : vector<1x256xf32>
    %38 = math.exp %37 : vector<1x256xf32>
    %39 = arith.subf %35, %36 : vector<1x256xf32>
    %40 = math.exp %39 : vector<1x256xf32>
    %41 = arith.addf %38, %40 : vector<1x256xf32>
    %42 = vector.broadcast %38 : vector<1x256xf32> to vector<32x256xf32>
    %43 = arith.mulf %42, %18 : vector<32x256xf32>
    %44 = vector.broadcast %40 : vector<1x256xf32> to vector<32x256xf32>
    %45 = arith.mulf %44, %19 : vector<32x256xf32>
    %46 = arith.addf %43, %45 : vector<32x256xf32>
    %47 = tpu.reciprocal %41 {approx = true} : vector<1x256xf32> -> vector<1x256xf32>
    %48 = vector.broadcast %47 : vector<1x256xf32> to vector<32x256xf32>
    %49 = arith.mulf %46, %48 : vector<32x256xf32>
    %50 = arith.mulf %4, %10 : vector<32x256xf32>
    %cst_7 = arith.constant dense<0.000000e+00> : vector<256xf32>
    %51 = vector.multi_reduction <add>, %50, %cst_7 [0] : vector<32x256xf32> to vector<256xf32>
    %52 = vector.shape_cast %51 : vector<256xf32> to vector<1x256xf32>
    %cst_8 = arith.constant 0.353553385 : f32
    %53 = vector.broadcast %cst_8 : f32 to vector<1x256xf32>
    %54 = arith.mulf %52, %53 : vector<1x256xf32>
    %55 = arith.mulf %4, %11 : vector<32x256xf32>
    %cst_9 = arith.constant dense<0.000000e+00> : vector<256xf32>
    %56 = vector.multi_reduction <add>, %55, %cst_9 [0] : vector<32x256xf32> to vector<256xf32>
    %57 = vector.shape_cast %56 : vector<256xf32> to vector<1x256xf32>
    %cst_10 = arith.constant 0.353553385 : f32
    %58 = vector.broadcast %cst_10 : f32 to vector<1x256xf32>
    %59 = arith.mulf %57, %58 : vector<1x256xf32>
    %60 = arith.mulf %4, %12 : vector<32x256xf32>
    %cst_11 = arith.constant dense<0.000000e+00> : vector<256xf32>
    %61 = vector.multi_reduction <add>, %60, %cst_11 [0] : vector<32x256xf32> to vector<256xf32>
    %62 = vector.shape_cast %61 : vector<256xf32> to vector<1x256xf32>
    %cst_12 = arith.constant 0.353553385 : f32
    %63 = vector.broadcast %cst_12 : f32 to vector<1x256xf32>
    %64 = arith.mulf %62, %63 : vector<1x256xf32>
    %65 = arith.maximumf %54, %59 : vector<1x256xf32>
    %66 = arith.maximumf %65, %64 : vector<1x256xf32>
    %67 = arith.subf %54, %66 : vector<1x256xf32>
    %68 = math.exp %67 : vector<1x256xf32>
    %69 = arith.subf %59, %66 : vector<1x256xf32>
    %70 = math.exp %69 : vector<1x256xf32>
    %71 = arith.subf %64, %66 : vector<1x256xf32>
    %72 = math.exp %71 : vector<1x256xf32>
    %73 = arith.addf %68, %70 : vector<1x256xf32>
    %74 = arith.addf %73, %72 : vector<1x256xf32>
    %75 = vector.broadcast %68 : vector<1x256xf32> to vector<32x256xf32>
    %76 = arith.mulf %75, %18 : vector<32x256xf32>
    %77 = vector.broadcast %70 : vector<1x256xf32> to vector<32x256xf32>
    %78 = arith.mulf %77, %19 : vector<32x256xf32>
    %79 = arith.addf %76, %78 : vector<32x256xf32>
    %80 = vector.broadcast %72 : vector<1x256xf32> to vector<32x256xf32>
    %81 = arith.mulf %80, %20 : vector<32x256xf32>
    %82 = arith.addf %79, %81 : vector<32x256xf32>
    %83 = tpu.reciprocal %74 {approx = true} : vector<1x256xf32> -> vector<1x256xf32>
    %84 = vector.broadcast %83 : vector<1x256xf32> to vector<32x256xf32>
    %85 = arith.mulf %82, %84 : vector<32x256xf32>
    %86 = arith.mulf %5, %10 : vector<32x256xf32>
    %cst_13 = arith.constant dense<0.000000e+00> : vector<256xf32>
    %87 = vector.multi_reduction <add>, %86, %cst_13 [0] : vector<32x256xf32> to vector<256xf32>
    %88 = vector.shape_cast %87 : vector<256xf32> to vector<1x256xf32>
    %cst_14 = arith.constant 0.353553385 : f32
    %89 = vector.broadcast %cst_14 : f32 to vector<1x256xf32>
    %90 = arith.mulf %88, %89 : vector<1x256xf32>
    %91 = arith.mulf %5, %11 : vector<32x256xf32>
    %cst_15 = arith.constant dense<0.000000e+00> : vector<256xf32>
    %92 = vector.multi_reduction <add>, %91, %cst_15 [0] : vector<32x256xf32> to vector<256xf32>
    %93 = vector.shape_cast %92 : vector<256xf32> to vector<1x256xf32>
    %cst_16 = arith.constant 0.353553385 : f32
    %94 = vector.broadcast %cst_16 : f32 to vector<1x256xf32>
    %95 = arith.mulf %93, %94 : vector<1x256xf32>
    %96 = arith.mulf %5, %12 : vector<32x256xf32>
    %cst_17 = arith.constant dense<0.000000e+00> : vector<256xf32>
    %97 = vector.multi_reduction <add>, %96, %cst_17 [0] : vector<32x256xf32> to vector<256xf32>
    %98 = vector.shape_cast %97 : vector<256xf32> to vector<1x256xf32>
    %cst_18 = arith.constant 0.353553385 : f32
    %99 = vector.broadcast %cst_18 : f32 to vector<1x256xf32>
    %100 = arith.mulf %98, %99 : vector<1x256xf32>
    %101 = arith.mulf %5, %13 : vector<32x256xf32>
    %cst_19 = arith.constant dense<0.000000e+00> : vector<256xf32>
    %102 = vector.multi_reduction <add>, %101, %cst_19 [0] : vector<32x256xf32> to vector<256xf32>
    %103 = vector.shape_cast %102 : vector<256xf32> to vector<1x256xf32>
    %cst_20 = arith.constant 0.353553385 : f32
    %104 = vector.broadcast %cst_20 : f32 to vector<1x256xf32>
    %105 = arith.mulf %103, %104 : vector<1x256xf32>
    %106 = arith.maximumf %90, %95 : vector<1x256xf32>
    %107 = arith.maximumf %106, %100 : vector<1x256xf32>
    %108 = arith.maximumf %107, %105 : vector<1x256xf32>
    %109 = arith.subf %90, %108 : vector<1x256xf32>
    %110 = math.exp %109 : vector<1x256xf32>
    %111 = arith.subf %95, %108 : vector<1x256xf32>
    %112 = math.exp %111 : vector<1x256xf32>
    %113 = arith.subf %100, %108 : vector<1x256xf32>
    %114 = math.exp %113 : vector<1x256xf32>
    %115 = arith.subf %105, %108 : vector<1x256xf32>
    %116 = math.exp %115 : vector<1x256xf32>
    %117 = arith.addf %110, %112 : vector<1x256xf32>
    %118 = arith.addf %117, %114 : vector<1x256xf32>
    %119 = arith.addf %118, %116 : vector<1x256xf32>
    %120 = vector.broadcast %110 : vector<1x256xf32> to vector<32x256xf32>
    %121 = arith.mulf %120, %18 : vector<32x256xf32>
    %122 = vector.broadcast %112 : vector<1x256xf32> to vector<32x256xf32>
    %123 = arith.mulf %122, %19 : vector<32x256xf32>
    %124 = arith.addf %121, %123 : vector<32x256xf32>
    %125 = vector.broadcast %114 : vector<1x256xf32> to vector<32x256xf32>
    %126 = arith.mulf %125, %20 : vector<32x256xf32>
    %127 = arith.addf %124, %126 : vector<32x256xf32>
    %128 = vector.broadcast %116 : vector<1x256xf32> to vector<32x256xf32>
    %129 = arith.mulf %128, %21 : vector<32x256xf32>
    %130 = arith.addf %127, %129 : vector<32x256xf32>
    %131 = tpu.reciprocal %119 {approx = true} : vector<1x256xf32> -> vector<1x256xf32>
    %132 = vector.broadcast %131 : vector<1x256xf32> to vector<32x256xf32>
    %133 = arith.mulf %130, %132 : vector<32x256xf32>
    %134 = arith.mulf %6, %10 : vector<32x256xf32>
    %cst_21 = arith.constant dense<0.000000e+00> : vector<256xf32>
    %135 = vector.multi_reduction <add>, %134, %cst_21 [0] : vector<32x256xf32> to vector<256xf32>
    %136 = vector.shape_cast %135 : vector<256xf32> to vector<1x256xf32>
    %cst_22 = arith.constant 0.353553385 : f32
    %137 = vector.broadcast %cst_22 : f32 to vector<1x256xf32>
    %138 = arith.mulf %136, %137 : vector<1x256xf32>
    %139 = arith.mulf %6, %11 : vector<32x256xf32>
    %cst_23 = arith.constant dense<0.000000e+00> : vector<256xf32>
    %140 = vector.multi_reduction <add>, %139, %cst_23 [0] : vector<32x256xf32> to vector<256xf32>
    %141 = vector.shape_cast %140 : vector<256xf32> to vector<1x256xf32>
    %cst_24 = arith.constant 0.353553385 : f32
    %142 = vector.broadcast %cst_24 : f32 to vector<1x256xf32>
    %143 = arith.mulf %141, %142 : vector<1x256xf32>
    %144 = arith.mulf %6, %12 : vector<32x256xf32>
    %cst_25 = arith.constant dense<0.000000e+00> : vector<256xf32>
    %145 = vector.multi_reduction <add>, %144, %cst_25 [0] : vector<32x256xf32> to vector<256xf32>
    %146 = vector.shape_cast %145 : vector<256xf32> to vector<1x256xf32>
    %cst_26 = arith.constant 0.353553385 : f32
    %147 = vector.broadcast %cst_26 : f32 to vector<1x256xf32>
    %148 = arith.mulf %146, %147 : vector<1x256xf32>
    %149 = arith.mulf %6, %13 : vector<32x256xf32>
    %cst_27 = arith.constant dense<0.000000e+00> : vector<256xf32>
    %150 = vector.multi_reduction <add>, %149, %cst_27 [0] : vector<32x256xf32> to vector<256xf32>
    %151 = vector.shape_cast %150 : vector<256xf32> to vector<1x256xf32>
    %cst_28 = arith.constant 0.353553385 : f32
    %152 = vector.broadcast %cst_28 : f32 to vector<1x256xf32>
    %153 = arith.mulf %151, %152 : vector<1x256xf32>
    %154 = arith.mulf %6, %14 : vector<32x256xf32>
    %cst_29 = arith.constant dense<0.000000e+00> : vector<256xf32>
    %155 = vector.multi_reduction <add>, %154, %cst_29 [0] : vector<32x256xf32> to vector<256xf32>
    %156 = vector.shape_cast %155 : vector<256xf32> to vector<1x256xf32>
    %cst_30 = arith.constant 0.353553385 : f32
    %157 = vector.broadcast %cst_30 : f32 to vector<1x256xf32>
    %158 = arith.mulf %156, %157 : vector<1x256xf32>
    %159 = arith.maximumf %138, %143 : vector<1x256xf32>
    %160 = arith.maximumf %159, %148 : vector<1x256xf32>
    %161 = arith.maximumf %160, %153 : vector<1x256xf32>
    %162 = arith.maximumf %161, %158 : vector<1x256xf32>
    %163 = arith.subf %138, %162 : vector<1x256xf32>
    %164 = math.exp %163 : vector<1x256xf32>
    %165 = arith.subf %143, %162 : vector<1x256xf32>
    %166 = math.exp %165 : vector<1x256xf32>
    %167 = arith.subf %148, %162 : vector<1x256xf32>
    %168 = math.exp %167 : vector<1x256xf32>
    %169 = arith.subf %153, %162 : vector<1x256xf32>
    %170 = math.exp %169 : vector<1x256xf32>
    %171 = arith.subf %158, %162 : vector<1x256xf32>
    %172 = math.exp %171 : vector<1x256xf32>
    %173 = arith.addf %164, %166 : vector<1x256xf32>
    %174 = arith.addf %173, %168 : vector<1x256xf32>
    %175 = arith.addf %174, %170 : vector<1x256xf32>
    %176 = arith.addf %175, %172 : vector<1x256xf32>
    %177 = vector.broadcast %164 : vector<1x256xf32> to vector<32x256xf32>
    %178 = arith.mulf %177, %18 : vector<32x256xf32>
    %179 = vector.broadcast %166 : vector<1x256xf32> to vector<32x256xf32>
    %180 = arith.mulf %179, %19 : vector<32x256xf32>
    %181 = arith.addf %178, %180 : vector<32x256xf32>
    %182 = vector.broadcast %168 : vector<1x256xf32> to vector<32x256xf32>
    %183 = arith.mulf %182, %20 : vector<32x256xf32>
    %184 = arith.addf %181, %183 : vector<32x256xf32>
    %185 = vector.broadcast %170 : vector<1x256xf32> to vector<32x256xf32>
    %186 = arith.mulf %185, %21 : vector<32x256xf32>
    %187 = arith.addf %184, %186 : vector<32x256xf32>
    %188 = vector.broadcast %172 : vector<1x256xf32> to vector<32x256xf32>
    %189 = arith.mulf %188, %22 : vector<32x256xf32>
    %190 = arith.addf %187, %189 : vector<32x256xf32>
    %191 = tpu.reciprocal %176 {approx = true} : vector<1x256xf32> -> vector<1x256xf32>
    %192 = vector.broadcast %191 : vector<1x256xf32> to vector<32x256xf32>
    %193 = arith.mulf %190, %192 : vector<32x256xf32>
    %194 = arith.mulf %7, %10 : vector<32x256xf32>
    %cst_31 = arith.constant dense<0.000000e+00> : vector<256xf32>
    %195 = vector.multi_reduction <add>, %194, %cst_31 [0] : vector<32x256xf32> to vector<256xf32>
    %196 = vector.shape_cast %195 : vector<256xf32> to vector<1x256xf32>
    %cst_32 = arith.constant 0.353553385 : f32
    %197 = vector.broadcast %cst_32 : f32 to vector<1x256xf32>
    %198 = arith.mulf %196, %197 : vector<1x256xf32>
    %199 = arith.mulf %7, %11 : vector<32x256xf32>
    %cst_33 = arith.constant dense<0.000000e+00> : vector<256xf32>
    %200 = vector.multi_reduction <add>, %199, %cst_33 [0] : vector<32x256xf32> to vector<256xf32>
    %201 = vector.shape_cast %200 : vector<256xf32> to vector<1x256xf32>
    %cst_34 = arith.constant 0.353553385 : f32
    %202 = vector.broadcast %cst_34 : f32 to vector<1x256xf32>
    %203 = arith.mulf %201, %202 : vector<1x256xf32>
    %204 = arith.mulf %7, %12 : vector<32x256xf32>
    %cst_35 = arith.constant dense<0.000000e+00> : vector<256xf32>
    %205 = vector.multi_reduction <add>, %204, %cst_35 [0] : vector<32x256xf32> to vector<256xf32>
    %206 = vector.shape_cast %205 : vector<256xf32> to vector<1x256xf32>
    %cst_36 = arith.constant 0.353553385 : f32
    %207 = vector.broadcast %cst_36 : f32 to vector<1x256xf32>
    %208 = arith.mulf %206, %207 : vector<1x256xf32>
    %209 = arith.mulf %7, %13 : vector<32x256xf32>
    %cst_37 = arith.constant dense<0.000000e+00> : vector<256xf32>
    %210 = vector.multi_reduction <add>, %209, %cst_37 [0] : vector<32x256xf32> to vector<256xf32>
    %211 = vector.shape_cast %210 : vector<256xf32> to vector<1x256xf32>
    %cst_38 = arith.constant 0.353553385 : f32
    %212 = vector.broadcast %cst_38 : f32 to vector<1x256xf32>
    %213 = arith.mulf %211, %212 : vector<1x256xf32>
    %214 = arith.mulf %7, %14 : vector<32x256xf32>
    %cst_39 = arith.constant dense<0.000000e+00> : vector<256xf32>
    %215 = vector.multi_reduction <add>, %214, %cst_39 [0] : vector<32x256xf32> to vector<256xf32>
    %216 = vector.shape_cast %215 : vector<256xf32> to vector<1x256xf32>
    %cst_40 = arith.constant 0.353553385 : f32
    %217 = vector.broadcast %cst_40 : f32 to vector<1x256xf32>
    %218 = arith.mulf %216, %217 : vector<1x256xf32>
    %219 = arith.mulf %7, %15 : vector<32x256xf32>
    %cst_41 = arith.constant dense<0.000000e+00> : vector<256xf32>
    %220 = vector.multi_reduction <add>, %219, %cst_41 [0] : vector<32x256xf32> to vector<256xf32>
    %221 = vector.shape_cast %220 : vector<256xf32> to vector<1x256xf32>
    %cst_42 = arith.constant 0.353553385 : f32
    %222 = vector.broadcast %cst_42 : f32 to vector<1x256xf32>
    %223 = arith.mulf %221, %222 : vector<1x256xf32>
    %224 = arith.maximumf %198, %203 : vector<1x256xf32>
    %225 = arith.maximumf %224, %208 : vector<1x256xf32>
    %226 = arith.maximumf %225, %213 : vector<1x256xf32>
    %227 = arith.maximumf %226, %218 : vector<1x256xf32>
    %228 = arith.maximumf %227, %223 : vector<1x256xf32>
    %229 = arith.subf %198, %228 : vector<1x256xf32>
    %230 = math.exp %229 : vector<1x256xf32>
    %231 = arith.subf %203, %228 : vector<1x256xf32>
    %232 = math.exp %231 : vector<1x256xf32>
    %233 = arith.subf %208, %228 : vector<1x256xf32>
    %234 = math.exp %233 : vector<1x256xf32>
    %235 = arith.subf %213, %228 : vector<1x256xf32>
    %236 = math.exp %235 : vector<1x256xf32>
    %237 = arith.subf %218, %228 : vector<1x256xf32>
    %238 = math.exp %237 : vector<1x256xf32>
    %239 = arith.subf %223, %228 : vector<1x256xf32>
    %240 = math.exp %239 : vector<1x256xf32>
    %241 = arith.addf %230, %232 : vector<1x256xf32>
    %242 = arith.addf %241, %234 : vector<1x256xf32>
    %243 = arith.addf %242, %236 : vector<1x256xf32>
    %244 = arith.addf %243, %238 : vector<1x256xf32>
    %245 = arith.addf %244, %240 : vector<1x256xf32>
    %246 = vector.broadcast %230 : vector<1x256xf32> to vector<32x256xf32>
    %247 = arith.mulf %246, %18 : vector<32x256xf32>
    %248 = vector.broadcast %232 : vector<1x256xf32> to vector<32x256xf32>
    %249 = arith.mulf %248, %19 : vector<32x256xf32>
    %250 = arith.addf %247, %249 : vector<32x256xf32>
    %251 = vector.broadcast %234 : vector<1x256xf32> to vector<32x256xf32>
    %252 = arith.mulf %251, %20 : vector<32x256xf32>
    %253 = arith.addf %250, %252 : vector<32x256xf32>
    %254 = vector.broadcast %236 : vector<1x256xf32> to vector<32x256xf32>
    %255 = arith.mulf %254, %21 : vector<32x256xf32>
    %256 = arith.addf %253, %255 : vector<32x256xf32>
    %257 = vector.broadcast %238 : vector<1x256xf32> to vector<32x256xf32>
    %258 = arith.mulf %257, %22 : vector<32x256xf32>
    %259 = arith.addf %256, %258 : vector<32x256xf32>
    %260 = vector.broadcast %240 : vector<1x256xf32> to vector<32x256xf32>
    %261 = arith.mulf %260, %23 : vector<32x256xf32>
    %262 = arith.addf %259, %261 : vector<32x256xf32>
    %263 = tpu.reciprocal %245 {approx = true} : vector<1x256xf32> -> vector<1x256xf32>
    %264 = vector.broadcast %263 : vector<1x256xf32> to vector<32x256xf32>
    %265 = arith.mulf %262, %264 : vector<32x256xf32>
    %266 = arith.mulf %8, %10 : vector<32x256xf32>
    %cst_43 = arith.constant dense<0.000000e+00> : vector<256xf32>
    %267 = vector.multi_reduction <add>, %266, %cst_43 [0] : vector<32x256xf32> to vector<256xf32>
    %268 = vector.shape_cast %267 : vector<256xf32> to vector<1x256xf32>
    %cst_44 = arith.constant 0.353553385 : f32
    %269 = vector.broadcast %cst_44 : f32 to vector<1x256xf32>
    %270 = arith.mulf %268, %269 : vector<1x256xf32>
    %271 = arith.mulf %8, %11 : vector<32x256xf32>
    %cst_45 = arith.constant dense<0.000000e+00> : vector<256xf32>
    %272 = vector.multi_reduction <add>, %271, %cst_45 [0] : vector<32x256xf32> to vector<256xf32>
    %273 = vector.shape_cast %272 : vector<256xf32> to vector<1x256xf32>
    %cst_46 = arith.constant 0.353553385 : f32
    %274 = vector.broadcast %cst_46 : f32 to vector<1x256xf32>
    %275 = arith.mulf %273, %274 : vector<1x256xf32>
    %276 = arith.mulf %8, %12 : vector<32x256xf32>
    %cst_47 = arith.constant dense<0.000000e+00> : vector<256xf32>
    %277 = vector.multi_reduction <add>, %276, %cst_47 [0] : vector<32x256xf32> to vector<256xf32>
    %278 = vector.shape_cast %277 : vector<256xf32> to vector<1x256xf32>
    %cst_48 = arith.constant 0.353553385 : f32
    %279 = vector.broadcast %cst_48 : f32 to vector<1x256xf32>
    %280 = arith.mulf %278, %279 : vector<1x256xf32>
    %281 = arith.mulf %8, %13 : vector<32x256xf32>
    %cst_49 = arith.constant dense<0.000000e+00> : vector<256xf32>
    %282 = vector.multi_reduction <add>, %281, %cst_49 [0] : vector<32x256xf32> to vector<256xf32>
    %283 = vector.shape_cast %282 : vector<256xf32> to vector<1x256xf32>
    %cst_50 = arith.constant 0.353553385 : f32
    %284 = vector.broadcast %cst_50 : f32 to vector<1x256xf32>
    %285 = arith.mulf %283, %284 : vector<1x256xf32>
    %286 = arith.mulf %8, %14 : vector<32x256xf32>
    %cst_51 = arith.constant dense<0.000000e+00> : vector<256xf32>
    %287 = vector.multi_reduction <add>, %286, %cst_51 [0] : vector<32x256xf32> to vector<256xf32>
    %288 = vector.shape_cast %287 : vector<256xf32> to vector<1x256xf32>
    %cst_52 = arith.constant 0.353553385 : f32
    %289 = vector.broadcast %cst_52 : f32 to vector<1x256xf32>
    %290 = arith.mulf %288, %289 : vector<1x256xf32>
    %291 = arith.mulf %8, %15 : vector<32x256xf32>
    %cst_53 = arith.constant dense<0.000000e+00> : vector<256xf32>
    %292 = vector.multi_reduction <add>, %291, %cst_53 [0] : vector<32x256xf32> to vector<256xf32>
    %293 = vector.shape_cast %292 : vector<256xf32> to vector<1x256xf32>
    %cst_54 = arith.constant 0.353553385 : f32
    %294 = vector.broadcast %cst_54 : f32 to vector<1x256xf32>
    %295 = arith.mulf %293, %294 : vector<1x256xf32>
    %296 = arith.mulf %8, %16 : vector<32x256xf32>
    %cst_55 = arith.constant dense<0.000000e+00> : vector<256xf32>
    %297 = vector.multi_reduction <add>, %296, %cst_55 [0] : vector<32x256xf32> to vector<256xf32>
    %298 = vector.shape_cast %297 : vector<256xf32> to vector<1x256xf32>
    %cst_56 = arith.constant 0.353553385 : f32
    %299 = vector.broadcast %cst_56 : f32 to vector<1x256xf32>
    %300 = arith.mulf %298, %299 : vector<1x256xf32>
    %301 = arith.maximumf %270, %275 : vector<1x256xf32>
    %302 = arith.maximumf %301, %280 : vector<1x256xf32>
    %303 = arith.maximumf %302, %285 : vector<1x256xf32>
    %304 = arith.maximumf %303, %290 : vector<1x256xf32>
    %305 = arith.maximumf %304, %295 : vector<1x256xf32>
    %306 = arith.maximumf %305, %300 : vector<1x256xf32>
    %307 = arith.subf %270, %306 : vector<1x256xf32>
    %308 = math.exp %307 : vector<1x256xf32>
    %309 = arith.subf %275, %306 : vector<1x256xf32>
    %310 = math.exp %309 : vector<1x256xf32>
    %311 = arith.subf %280, %306 : vector<1x256xf32>
    %312 = math.exp %311 : vector<1x256xf32>
    %313 = arith.subf %285, %306 : vector<1x256xf32>
    %314 = math.exp %313 : vector<1x256xf32>
    %315 = arith.subf %290, %306 : vector<1x256xf32>
    %316 = math.exp %315 : vector<1x256xf32>
    %317 = arith.subf %295, %306 : vector<1x256xf32>
    %318 = math.exp %317 : vector<1x256xf32>
    %319 = arith.subf %300, %306 : vector<1x256xf32>
    %320 = math.exp %319 : vector<1x256xf32>
    %321 = arith.addf %308, %310 : vector<1x256xf32>
    %322 = arith.addf %321, %312 : vector<1x256xf32>
    %323 = arith.addf %322, %314 : vector<1x256xf32>
    %324 = arith.addf %323, %316 : vector<1x256xf32>
    %325 = arith.addf %324, %318 : vector<1x256xf32>
    %326 = arith.addf %325, %320 : vector<1x256xf32>
    %327 = vector.broadcast %308 : vector<1x256xf32> to vector<32x256xf32>
    %328 = arith.mulf %327, %18 : vector<32x256xf32>
    %329 = vector.broadcast %310 : vector<1x256xf32> to vector<32x256xf32>
    %330 = arith.mulf %329, %19 : vector<32x256xf32>
    %331 = arith.addf %328, %330 : vector<32x256xf32>
    %332 = vector.broadcast %312 : vector<1x256xf32> to vector<32x256xf32>
    %333 = arith.mulf %332, %20 : vector<32x256xf32>
    %334 = arith.addf %331, %333 : vector<32x256xf32>
    %335 = vector.broadcast %314 : vector<1x256xf32> to vector<32x256xf32>
    %336 = arith.mulf %335, %21 : vector<32x256xf32>
    %337 = arith.addf %334, %336 : vector<32x256xf32>
    %338 = vector.broadcast %316 : vector<1x256xf32> to vector<32x256xf32>
    %339 = arith.mulf %338, %22 : vector<32x256xf32>
    %340 = arith.addf %337, %339 : vector<32x256xf32>
    %341 = vector.broadcast %318 : vector<1x256xf32> to vector<32x256xf32>
    %342 = arith.mulf %341, %23 : vector<32x256xf32>
    %343 = arith.addf %340, %342 : vector<32x256xf32>
    %344 = vector.broadcast %320 : vector<1x256xf32> to vector<32x256xf32>
    %345 = arith.mulf %344, %24 : vector<32x256xf32>
    %346 = arith.addf %343, %345 : vector<32x256xf32>
    %347 = tpu.reciprocal %326 {approx = true} : vector<1x256xf32> -> vector<1x256xf32>
    %348 = vector.broadcast %347 : vector<1x256xf32> to vector<32x256xf32>
    %349 = arith.mulf %346, %348 : vector<32x256xf32>
    %350 = arith.mulf %9, %10 : vector<32x256xf32>
    %cst_57 = arith.constant dense<0.000000e+00> : vector<256xf32>
    %351 = vector.multi_reduction <add>, %350, %cst_57 [0] : vector<32x256xf32> to vector<256xf32>
    %352 = vector.shape_cast %351 : vector<256xf32> to vector<1x256xf32>
    %cst_58 = arith.constant 0.353553385 : f32
    %353 = vector.broadcast %cst_58 : f32 to vector<1x256xf32>
    %354 = arith.mulf %352, %353 : vector<1x256xf32>
    %355 = arith.mulf %9, %11 : vector<32x256xf32>
    %cst_59 = arith.constant dense<0.000000e+00> : vector<256xf32>
    %356 = vector.multi_reduction <add>, %355, %cst_59 [0] : vector<32x256xf32> to vector<256xf32>
    %357 = vector.shape_cast %356 : vector<256xf32> to vector<1x256xf32>
    %cst_60 = arith.constant 0.353553385 : f32
    %358 = vector.broadcast %cst_60 : f32 to vector<1x256xf32>
    %359 = arith.mulf %357, %358 : vector<1x256xf32>
    %360 = arith.mulf %9, %12 : vector<32x256xf32>
    %cst_61 = arith.constant dense<0.000000e+00> : vector<256xf32>
    %361 = vector.multi_reduction <add>, %360, %cst_61 [0] : vector<32x256xf32> to vector<256xf32>
    %362 = vector.shape_cast %361 : vector<256xf32> to vector<1x256xf32>
    %cst_62 = arith.constant 0.353553385 : f32
    %363 = vector.broadcast %cst_62 : f32 to vector<1x256xf32>
    %364 = arith.mulf %362, %363 : vector<1x256xf32>
    %365 = arith.mulf %9, %13 : vector<32x256xf32>
    %cst_63 = arith.constant dense<0.000000e+00> : vector<256xf32>
    %366 = vector.multi_reduction <add>, %365, %cst_63 [0] : vector<32x256xf32> to vector<256xf32>
    %367 = vector.shape_cast %366 : vector<256xf32> to vector<1x256xf32>
    %cst_64 = arith.constant 0.353553385 : f32
    %368 = vector.broadcast %cst_64 : f32 to vector<1x256xf32>
    %369 = arith.mulf %367, %368 : vector<1x256xf32>
    %370 = arith.mulf %9, %14 : vector<32x256xf32>
    %cst_65 = arith.constant dense<0.000000e+00> : vector<256xf32>
    %371 = vector.multi_reduction <add>, %370, %cst_65 [0] : vector<32x256xf32> to vector<256xf32>
    %372 = vector.shape_cast %371 : vector<256xf32> to vector<1x256xf32>
    %cst_66 = arith.constant 0.353553385 : f32
    %373 = vector.broadcast %cst_66 : f32 to vector<1x256xf32>
    %374 = arith.mulf %372, %373 : vector<1x256xf32>
    %375 = arith.mulf %9, %15 : vector<32x256xf32>
    %cst_67 = arith.constant dense<0.000000e+00> : vector<256xf32>
    %376 = vector.multi_reduction <add>, %375, %cst_67 [0] : vector<32x256xf32> to vector<256xf32>
    %377 = vector.shape_cast %376 : vector<256xf32> to vector<1x256xf32>
    %cst_68 = arith.constant 0.353553385 : f32
    %378 = vector.broadcast %cst_68 : f32 to vector<1x256xf32>
    %379 = arith.mulf %377, %378 : vector<1x256xf32>
    %380 = arith.mulf %9, %16 : vector<32x256xf32>
    %cst_69 = arith.constant dense<0.000000e+00> : vector<256xf32>
    %381 = vector.multi_reduction <add>, %380, %cst_69 [0] : vector<32x256xf32> to vector<256xf32>
    %382 = vector.shape_cast %381 : vector<256xf32> to vector<1x256xf32>
    %cst_70 = arith.constant 0.353553385 : f32
    %383 = vector.broadcast %cst_70 : f32 to vector<1x256xf32>
    %384 = arith.mulf %382, %383 : vector<1x256xf32>
    %385 = arith.mulf %9, %17 : vector<32x256xf32>
    %cst_71 = arith.constant dense<0.000000e+00> : vector<256xf32>
    %386 = vector.multi_reduction <add>, %385, %cst_71 [0] : vector<32x256xf32> to vector<256xf32>
    %387 = vector.shape_cast %386 : vector<256xf32> to vector<1x256xf32>
    %cst_72 = arith.constant 0.353553385 : f32
    %388 = vector.broadcast %cst_72 : f32 to vector<1x256xf32>
    %389 = arith.mulf %387, %388 : vector<1x256xf32>
    %390 = arith.maximumf %354, %359 : vector<1x256xf32>
    %391 = arith.maximumf %390, %364 : vector<1x256xf32>
    %392 = arith.maximumf %391, %369 : vector<1x256xf32>
    %393 = arith.maximumf %392, %374 : vector<1x256xf32>
    %394 = arith.maximumf %393, %379 : vector<1x256xf32>
    %395 = arith.maximumf %394, %384 : vector<1x256xf32>
    %396 = arith.maximumf %395, %389 : vector<1x256xf32>
    %397 = arith.subf %354, %396 : vector<1x256xf32>
    %398 = math.exp %397 : vector<1x256xf32>
    %399 = arith.subf %359, %396 : vector<1x256xf32>
    %400 = math.exp %399 : vector<1x256xf32>
    %401 = arith.subf %364, %396 : vector<1x256xf32>
    %402 = math.exp %401 : vector<1x256xf32>
    %403 = arith.subf %369, %396 : vector<1x256xf32>
    %404 = math.exp %403 : vector<1x256xf32>
    %405 = arith.subf %374, %396 : vector<1x256xf32>
    %406 = math.exp %405 : vector<1x256xf32>
    %407 = arith.subf %379, %396 : vector<1x256xf32>
    %408 = math.exp %407 : vector<1x256xf32>
    %409 = arith.subf %384, %396 : vector<1x256xf32>
    %410 = math.exp %409 : vector<1x256xf32>
    %411 = arith.subf %389, %396 : vector<1x256xf32>
    %412 = math.exp %411 : vector<1x256xf32>
    %413 = arith.addf %398, %400 : vector<1x256xf32>
    %414 = arith.addf %413, %402 : vector<1x256xf32>
    %415 = arith.addf %414, %404 : vector<1x256xf32>
    %416 = arith.addf %415, %406 : vector<1x256xf32>
    %417 = arith.addf %416, %408 : vector<1x256xf32>
    %418 = arith.addf %417, %410 : vector<1x256xf32>
    %419 = arith.addf %418, %412 : vector<1x256xf32>
    %420 = vector.broadcast %398 : vector<1x256xf32> to vector<32x256xf32>
    %421 = arith.mulf %420, %18 : vector<32x256xf32>
    %422 = vector.broadcast %400 : vector<1x256xf32> to vector<32x256xf32>
    %423 = arith.mulf %422, %19 : vector<32x256xf32>
    %424 = arith.addf %421, %423 : vector<32x256xf32>
    %425 = vector.broadcast %402 : vector<1x256xf32> to vector<32x256xf32>
    %426 = arith.mulf %425, %20 : vector<32x256xf32>
    %427 = arith.addf %424, %426 : vector<32x256xf32>
    %428 = vector.broadcast %404 : vector<1x256xf32> to vector<32x256xf32>
    %429 = arith.mulf %428, %21 : vector<32x256xf32>
    %430 = arith.addf %427, %429 : vector<32x256xf32>
    %431 = vector.broadcast %406 : vector<1x256xf32> to vector<32x256xf32>
    %432 = arith.mulf %431, %22 : vector<32x256xf32>
    %433 = arith.addf %430, %432 : vector<32x256xf32>
    %434 = vector.broadcast %408 : vector<1x256xf32> to vector<32x256xf32>
    %435 = arith.mulf %434, %23 : vector<32x256xf32>
    %436 = arith.addf %433, %435 : vector<32x256xf32>
    %437 = vector.broadcast %410 : vector<1x256xf32> to vector<32x256xf32>
    %438 = arith.mulf %437, %24 : vector<32x256xf32>
    %439 = arith.addf %436, %438 : vector<32x256xf32>
    %440 = vector.broadcast %412 : vector<1x256xf32> to vector<32x256xf32>
    %441 = arith.mulf %440, %25 : vector<32x256xf32>
    %442 = arith.addf %439, %441 : vector<32x256xf32>
    %443 = tpu.reciprocal %419 {approx = true} : vector<1x256xf32> -> vector<1x256xf32>
    %444 = vector.broadcast %443 : vector<1x256xf32> to vector<32x256xf32>
    %445 = arith.mulf %442, %444 : vector<32x256xf32>
    %446 = tpu.concatenate %18, %49, %85, %133, %193, %265, %349, %445 in 0 : vector<32x256xf32>, vector<32x256xf32>, vector<32x256xf32>, vector<32x256xf32>, vector<32x256xf32>, vector<32x256xf32>, vector<32x256xf32>, vector<32x256xf32> -> vector<256x256xf32>
    %c0_73 = arith.constant 0 : index
    %c0_74 = arith.constant 0 : index
    %447 = vector.load %arg3[%c0_73, %c0_74] : memref<256x256xbf16, #tpu.memory_space<vmem>>, vector<256x256xbf16>
    %448 = arith.truncf %446 : vector<256x256xf32> to vector<256x256xbf16>
    %cst_75 = arith.constant dense<0.000000e+00> : vector<256x256xf32>
    %449 = tpu.matmul %447, %448, %cst_75 {dimension_numbers = #tpu.dot_dimension_numbers<[1], [0], [0], [1], [0, 0, 1, 1], [], []>} : vector<256x256xbf16>, vector<256x256xbf16>, vector<256x256xf32> -> vector<256x256xf32>
    %c0_76 = arith.constant 0 : index
    %c0_77 = arith.constant 0 : index
    %450 = vector.load %arg4[%c0_76, %c0_77] : memref<256x1xf32, #tpu.memory_space<vmem>>, vector<256x1xf32>
    %451 = vector.broadcast %450 : vector<256x1xf32> to vector<256x256xf32>
    %452 = arith.addf %449, %451 : vector<256x256xf32>
    %cst_78 = arith.constant 0.000000e+00 : f32
    %453 = vector.broadcast %cst_78 : f32 to vector<256x256xf32>
    %454 = arith.maximumf %452, %453 : vector<256x256xf32>
    %455 = arith.addf %454, %446 : vector<256x256xf32>
    %456 = arith.extf %0 : vector<256x256xbf16> to vector<256x256xf32>
    %457 = arith.addf %455, %456 : vector<256x256xf32>
    %458 = arith.truncf %457 : vector<256x256xf32> to vector<256x256xbf16>
    %c0_79 = arith.constant 0 : index
    %c0_80 = arith.constant 0 : index
    %459 = vector.load %arg5[%c0_79, %c0_80] : memref<256x256xbf16, #tpu.memory_space<vmem>>, vector<256x256xbf16>
    tpu.vector_store %arg5[%c0_79, %c0_80], %458 {strides = array<i32>} : memref<256x256xbf16, #tpu.memory_space<vmem>>, vector<256x256xbf16>,
    return
  }
  func.func @transform_0(%arg0: i32) -> (i32, i32) {
    %c0_i32 = arith.constant 0 : i32
    %c0_i32_0 = arith.constant 0 : i32
    return %c0_i32, %arg0 : i32, i32
  }
  func.func @transform_1(%arg0: i32) -> (i32, i32) {
    %c0_i32 = arith.constant 0 : i32
    %c0_i32_0 = arith.constant 0 : i32
    %c0_i32_1 = arith.constant 0 : i32
    return %c0_i32, %c0_i32_0 : i32, i32
  }
  func.func @transform_2(%arg0: i32) -> (i32, i32) {
    %c0_i32 = arith.constant 0 : i32
    %c0_i32_0 = arith.constant 0 : i32
    %c0_i32_1 = arith.constant 0 : i32
    return %c0_i32, %c0_i32_0 : i32, i32
  }
  func.func @transform_3(%arg0: i32) -> (i32, i32) {
    %c0_i32 = arith.constant 0 : i32
    %c0_i32_0 = arith.constant 0 : i32
    %c0_i32_1 = arith.constant 0 : i32
    return %c0_i32, %c0_i32_0 : i32, i32
  }
  func.func @transform_4(%arg0: i32) -> (i32, i32) {
    %c0_i32 = arith.constant 0 : i32
    %c0_i32_0 = arith.constant 0 : i32
    return %c0_i32, %arg0 : i32, i32
  }
}

</mosaic_0001>

<bundles_post_ra>
// kernel: tpu_custom_call.1
= control target key start
LH: loop header
LB: loop body
LE: loop exit
PB: predicated region body
PF: predicated region fallthrough
CT: control target
= control target key end

     0   :  { %9 = vsyncpa [#allocation3], 0  ;;  %s8193_s0 = inlined_call_operand.hbm [shape: bf16[256,512], index: 0, kind: input, shape index: {}]   ;;  %s8194_s1 = inlined_call_operand.hbm [shape: bf16[768,256], index: 1, kind: input, shape index: {}]   ;;  %s8195_s2 = inlined_call_operand.vmem [shape: bf16[256,256], index: 2, kind: input, shape index: {}]   ;;  %s8196_s3 = inlined_call_operand.vmem [shape: f32[256,1], index: 3, kind: input, shape index: {}]   ;;  %s8197_s4 = inlined_call_operand.hbm [shape: bf16[256,512], index: 4, kind: output, shape index: {}]  }
   0x1   :  { %11 = vsyncpa [#allocation3 + $0x1], 0 }
   0x2   :  { %12 = vsyncpa [#allocation6], 0 }
   0x3   :  { %13 = vsyncpa [#allocation4], 0 }
   0x4   :  { %15 = vsyncpa [#allocation4 + $0x1], 0  ;;  %s5491_s15 = smov 0   ;;  %s5493_s16 = smov 0  }
   0x5   :  { %s5495_s17 = smov 0   ;;  %s5497_s18 = smov 0  }
   0x6 LB: > { %s5512_s19 = sadd.s32 4294967295, %s5454_s18   ;;  %s4568_s20 = sadd.s32 4294967294, %s5454_s18   ;;  %s5454_s18 = sphi %s5497_s18, %s9265_s18   ;;  %s5450_s17 = sphi %s5495_s17, %s9264_s17   ;;  %s5446_s16 = sphi %s5493_s16, %s9263_s16   ;;  %s5442_s15 = sphi %s5491_s15, %s9262_s15  }
   0x7   : > { %s5516_s21 = sadd.s32 1, %s5454_s18   ;;  %s28_s22 = sadd.s32 1, %s5450_s17 }
   0x8   : > { %s25_s23 = ssub.s32 %s5454_s18, %s5516_s21  ;;  %p35_p0 = scmp.ne.s32.totalorder %s5450_s17, %s5446_s16 }
   0x9   : > { %p26_p1 = scmp.eq.s32.totalorder %s25_s23, 0  ;;  %p36_p2 = scmp.eq.s32.totalorder %s5454_s18, 0 }
   0xa   : > { %p41_p3 = scmp.ne.s32.totalorder %s5446_s16, %s5442_s15  ;;  %p8201_p4 = scmp.eq.s32.totalorder %s5512_s19, 0 }
   0xb   : > { %s5528_s24 = scalar_select %p26_p1, %s5450_s17, %s28_s22  }
   0xc   : > { %p5530_p5 = por %p36_p2, %p35_p0  ;;  %p5536_p6 = por %p8201_p4, %p41_p3 }
   0xd   : > { %p128_p7 = scmp.eq.s32.totalorder %s5512_s19, 1  ;;  %p134_p8 = scmp.eq.s32.totalorder %s4568_s20, 1 }
   0xe   : > { %s8517_s26 = scalar_select %p5536_p6, 1, 0 }
   0xf   : > { %p4569_p9 = scmp.ge.s32.totalorder %s5454_s18, 1  ;;  %p141_p10 = scmp.lt.s32.totalorder %s5454_s18, 3 }
  0x10   : > { %p5543_p11 = por %p128_p7, %p35_p0  ;;  %p5547_p12 = por %p134_p8, %p41_p3 }
  0x11   : > { %p5551_p13 = pnand %p4569_p9, %p141_p10  ;;  %s5456_s30 = smov [#allocation5]  }
  0x12   : > { %s8518_s27 = scalar_select %p5543_p11, 1, 0 }
  0x13   : > { %s8519_s28 = scalar_select %p5547_p12, 1, 0 }
  0x14   : > { %s8520_s29 = scalar_select %p5551_p13, 1, 0 }
  0x15   : > { %p4850_p1 = pneg %p5551_p13  ;;  %s153_s5 = sshll.u32 %s5456_s30, 4  ;;  %s154_s5 = int_to_ptr.vmem [resolvable:$true] %s153_s5 }
  0x16   : > { %p4863_p3 = scmp.lt.s32.totalorder %s5454_s18, 2  ;;  %s173_s7 = sand.u32 1, %s5450_s17  }
  0x17   : > { %p5559_p2 = pnand %p4850_p1, %p8201_p4  ;;  %s5343_s8 = scalar_lea.vmem %s154_s5, 12288 }
  0x18   : > { %p5344_p8 = scmp.ne.s32.totalorder %s154_s5, %s5343_s8  ;;  %p5351_p12 = scmp.lt.s32.totalorder %s154_s5, %s154_s5 }
  0x19   : > { %p5334_p7 = pneg %p5559_p2  ;;  %p5352_p11 = scmp.lt.s32.totalorder %s5343_s8, %s5343_s8 }
  0x1b   : > { %p5346_p9 = pnand %p5344_p8, %p5334_p7  ;;  %p5353_p6 = por %p5352_p11, %p5351_p12 }
  0x1d   : > { %p5347_p10 = pneg %p5346_p9 }
  0x1f   : > { %p5354_p13 = pnand %p5353_p6, %p5347_p10 }
  0x21   : > { %5357 = shalt.err (!%p5354_p13)
}
  0x22   : > { %s5457_s9 = smov 128   ;;  %s5458_s10 = smov 8  }
  0x23   : > { %4853 = dma.hbm_to_vmem [thread:$0]  (!%p5559_p2), %s8194_s1, 12288, %s154_s5, [#allocation6], %s5457_s9, %s5457_s9, %s5458_s10  }
  0x24   : > { %p5580_p1 = pnand %p4863_p3, %p5530_p5  ;;  %s4572_s14 = sshll.u32 %s173_s7, 8 }
  0x25   : > { %s4776_s20 = sshll.u32 %s5454_s18, 7  ;;  %s177_s6 = scalar_lea.vmem [#allocation2], %s4572_s14 }
  0x26   : > { %s5588_s30 = scalar_lea.hbm %s8193_s0, %s4776_s20  ;;  %s184_s8 = sshll.u32 %s177_s6, 4  ;;  %s5590_s8 = int_to_ptr.vmem [resolvable:$true] %s184_s8 }
  0x27   : > { %s5592_s25 = scalar_lea.sflag [#allocation3], %s173_s7  ;;  %s5358_s5 = scalar_lea.hbm %s5588_s30, 4096 }
  0x28   : > { %p5359_p5 = scmp.ne.s32.totalorder %s5588_s30, %s5358_s5  ;;  %p5360_p6 = pneg %p5580_p1 }
  0x29   : > { %s5363_s20 = scalar_lea.hbm %s8193_s0, 8192  ;;  %p5364_p13 = scmp.lt.s32.totalorder %s5588_s30, %s8193_s0 }
  0x2a   : > { %p5361_p11 = pnand %p5360_p6, %p5359_p5  ;;  %p5365_p2 = scmp.lt.s32.totalorder %s5363_s20, %s5358_s5 }
  0x2c   : > { %p5362_p12 = pneg %p5361_p11  ;;  %p5366_p3 = por %p5365_p2, %p5364_p13 }
  0x2e   : > { %p5367_p7 = pnand %p5366_p3, %p5362_p12 }
  0x30   : > { %5370 = shalt.err (!%p5367_p7)
}
  0x31   : > { %s5371_s7 = scalar_lea.vmem %s5590_s8, 4096  ;;  %s5459_s14 = smov [#allocation2]  }
  0x32   : > { %p5372_p8 = scmp.ne.s32.totalorder %s5590_s8, %s5371_s7  ;;  %s5376_s6 = sshll.u32 %s5459_s14, 4  ;;  %s5377_s6 = int_to_ptr.vmem [resolvable:$false] %s5376_s6 }
  0x33   : > { %s5378_s11 = scalar_lea.vmem %s5377_s6, 8192  ;;  %p5379_p5 = scmp.lt.s32.totalorder %s5590_s8, %s5377_s6 }
  0x34   : > { %p5374_p9 = pnand %p5372_p8, %p5360_p6  ;;  %p5380_p11 = scmp.lt.s32.totalorder %s5378_s11, %s5371_s7 }
  0x36   : > { %p5375_p10 = pneg %p5374_p9  ;;  %p5381_p0 = por %p5380_p11, %p5379_p5 }
  0x38   : > { %p5382_p4 = pnand %p5381_p0, %p5375_p10 }
  0x3a   : > { %5385 = shalt.err (!%p5382_p4)
}
  0x3b   : > { %s5460_s5 = smov 256   ;;  %p8523_p6 = scmp.ne.s32.totalorder %s8520_s29, 0 }
  0x3c   : > { %4857 = dma.hbm_to_vmem [thread:$0]  (!%p5580_p1), %s5588_s30, 4096, %s5590_s8, %s5592_s25, %s5460_s5, %s5457_s9, %s5458_s10  }
  0x3d   : > { %196 = sbr.rel (%p8523_p6) target bundleno = 1338 (0x53a), region = 36 }
  0x42   : > { %s5618_s12 = sand.u32 1, %s5446_s16   ;;  %p8524_p4 = scmp.ne.s32.totalorder %s8517_s26, 0 }
  0x43   : > { %s4576_s20 = sshll.u32 %s5618_s12, 8  ;;  %s199_s22 = scalar_lea.sflag [#allocation3], %s5618_s12 }
  0x44   : > { %s5624_s13 = scalar_lea.vmem [#allocation2], %s4576_s20 }
  0x45   : > { %5429 = dma.done.wait (%p8524_p4), %s199_s22, 4096  }
  0x46   : > { %5431 = vsyncadd (%p8524_p4), %s199_s22, 4294963200  ;;  %p8525_p0 = scmp.eq.s32.totalorder %s5512_s19, 0 }
  0x48   : > { %5433 = dma.done.wait (%p8525_p0), [#allocation6], 12288   ;;  %p8526_p1 = pmov %p8525_p0 }
  0x49   : > { %v247_v0 = vld [vmem:[%s5624_s13 + $0x70] sm:$0xff]  ;;  %v248_v1 = vld [vmem:[%s5624_s13 + $0x78] sm:$0xff]  ;;  %v245_v2 = vld [vmem:[%s5624_s13 + $0x60] sm:$0xff]  ;;  %s8019_s9 = scalar_lea.vmem [#allocation7], %s4576_s20  ;;  %s4809_s20 = sshll.u32 %s5512_s19, 7 }
  0x4a   : > { %5435 = vsyncadd (%p8526_p1), [#allocation6], 4294955008  ;;  %v4690_v3 = vcombine.high %v247_v0, %v248_v1  ;;  %v4689_v4 = vcombine.low %v247_v0, %v248_v1  ;;  %v246_v5 = vld [vmem:[%s5624_s13 + $0x68] sm:$0xff]  ;;  %v243_v7 = vld [vmem:[%s5624_s13 + $0x50] sm:$0xff]  ;;  %s4485_s10 = sshll.u32 %s8019_s9, 4  ;;  %s8147_s8 = scalar_lea.hbm %s8197_s4, %s4809_s20  ;;  %s8149_s10 = int_to_ptr.vmem [resolvable:$true] %s4485_s10 }
  0x4b   : > { %v4688_v6 = vcombine.high %v245_v2, %v246_v5  ;;  %v244_v8 = vld [vmem:[%s5624_s13 + $0x58] sm:$0xff]  ;;  %v4687_v9 = vcombine.low %v245_v2, %v246_v5  ;;  %v241_v11 = vld [vmem:[%s5624_s13 + $0x40] sm:$0xff]  ;;  %v242_v12 = vld [vmem:[%s5624_s13 + $0x48] sm:$0xff]  ;;  %s4472_s19 = scalar_lea.sflag [#allocation4], %s5618_s12  ;;  %s5386_s25 = scalar_lea.vmem %s8149_s10, 4096 }
  0x4c   : > { %1001 = vmatprep.subr.bf16.mxu0 %v4690_v3  ;;  %4810 = vmatprep.subr.bf16.mxu1 %v4690_v3  ;;  %v4686_v10 = vcombine.high %v243_v7, %v244_v8  ;;  %v4685_v13 = vcombine.low %v243_v7, %v244_v8  ;;  %v4684_v14 = vcombine.high %v241_v11, %v242_v12  ;;  %v239_v15 = vld [vmem:[%s5624_s13 + $0x30] sm:$0xff]  ;;  %v240_v16 = vld [vmem:[%s5624_s13 + $0x38] sm:$0xff]  ;;  %v4942_v17 = vld [vmem:[#allocation5 + $0x4] ss:$8 sps:$4 sm:$0xff]   ;;  %p5387_p12 = scmp.ne.s32.totalorder %s8149_s10, %s5386_s25  ;;  %p9259_p13 = scmp.ne.s32.totalorder %s8518_s27, 0 }
  0x4d   : > { %1002 = vmatpush1.bf16.msra.mxu0 %v4689_v4  ;;  %4826 = vmatpush1.bf16.msra.mxu1 %v4689_v4  ;;  %v4683_v18 = vcombine.low %v241_v11, %v242_v12  ;;  %v4682_v19 = vcombine.high %v239_v15, %v240_v16  ;;  %v237_v20 = vld [vmem:[%s5624_s13 + $0x20] sm:$0xff]  ;;  %v238_v21 = vld [vmem:[%s5624_s13 + $0x28] sm:$0xff]  ;;  %v4681_v22 = vcombine.low %v239_v15, %v240_v16  ;;  %v235_v24 = vld [vmem:[%s5624_s13 + $0x10] sm:$0xff]  ;;  %s5462_s23 = smov [#allocation7]  }
  0x4e   : > { %1003 = vmatprep.subr.bf16.mxu0 %v4688_v6  ;;  %4811 = vmatprep.subr.bf16.mxu1 %v4688_v6  ;;  %v4680_v23 = vcombine.high %v237_v20, %v238_v21  ;;  %v236_v25 = vld [vmem:[%s5624_s13 + $0x18] sm:$0xff]  ;;  %v4679_v26 = vcombine.low %v237_v20, %v238_v21  ;;  %v233_v28 = vld [vmem:[%s5624_s13] sm:$0xff]  ;;  %v234_v29 = vld [vmem:[%s5624_s13 + $0x8] sm:$0xff]  ;;  %p5388_p2 = pnand %p5387_p12, %p9259_p13  ;;  %s5390_s7 = sshll.u32 %s5462_s23, 4  ;;  %s5391_s7 = int_to_ptr.vmem [resolvable:$false] %s5390_s7 }
  0x4f   : > { %1033 = vmatprep.mubr.bf16.mxu0 %v4942_v17  ;;  %v4678_v27 = vcombine.high %v235_v24, %v236_v25  ;;  %v4677_v30 = vcombine.low %v235_v24, %v236_v25  ;;  %v4676_v31 = vcombine.high %v233_v28, %v234_v29  ;;  %v263_v32 = vld [vmem:[%s5624_s13 + $0xf0] sm:$0xff]  ;;  %v264_v33 = vld [vmem:[%s5624_s13 + $0xf8] sm:$0xff]  ;;  %v4675_v34 = vcombine.low %v233_v28, %v234_v29  ;;  %v261_v35 = vld [vmem:[%s5624_s13 + $0xe0] sm:$0xff]  ;;  %s5392_s14 = scalar_lea.vmem %s5391_s7, 8192  ;;  %p5393_p7 = scmp.lt.s32.totalorder %s8149_s10, %s5391_s7 }
  0x50   : > { %v262_v36 = vld [vmem:[%s5624_s13 + $0xe8] sm:$0xff]  ;;  %v4706_v37 = vcombine.high %v263_v32, %v264_v33  ;;  %v4705_v38 = vcombine.low %v263_v32, %v264_v33  ;;  %v259_v39 = vld [vmem:[%s5624_s13 + $0xd0] sm:$0xff]  ;;  %v260_v40 = vld [vmem:[%s5624_s13 + $0xd8] sm:$0xff]  ;;  %p5389_p3 = pneg %p5388_p2  ;;  %p5394_p8 = scmp.lt.s32.totalorder %s5392_s14, %s5386_s25 }
  0x51   : > { %1004 = vmatpush1.bf16.msra.mxu0 %v4687_v9  ;;  %4827 = vmatpush1.bf16.msra.mxu1 %v4687_v9  ;;  %v4704_v41 = vcombine.high %v261_v35, %v262_v36  ;;  %v4703_v42 = vcombine.low %v261_v35, %v262_v36  ;;  %v257_v43 = vld [vmem:[%s5624_s13 + $0xc0] sm:$0xff]  ;;  %v258_v44 = vld [vmem:[%s5624_s13 + $0xc8] sm:$0xff]  ;;  %v4702_v45 = vcombine.high %v259_v39, %v260_v40  ;;  %v255_v47 = vld [vmem:[%s5624_s13 + $0xb0] sm:$0xff] }
  0x52   : > { %1005 = vmatprep.subr.bf16.mxu0 %v4686_v10  ;;  %4812 = vmatprep.subr.bf16.mxu1 %v4686_v10  ;;  %v4701_v46 = vcombine.low %v259_v39, %v260_v40  ;;  %v256_v48 = vld [vmem:[%s5624_s13 + $0xb8] sm:$0xff]  ;;  %v4700_v49 = vcombine.high %v257_v43, %v258_v44  ;;  %v4699_v50 = vcombine.low %v257_v43, %v258_v44  ;;  %v253_v51 = vld [vmem:[%s5624_s13 + $0xa0] sm:$0xff]  ;;  %v254_v52 = vld [vmem:[%s5624_s13 + $0xa8] sm:$0xff]  ;;  %p5395_p9 = por %p5394_p8, %p5393_p7 }
  0x53   : > { %v4698_v53 = vcombine.high %v255_v47, %v256_v48  ;;  %v4697_v54 = vcombine.low %v255_v47, %v256_v48  ;;  %v251_v55 = vld [vmem:[%s5624_s13 + $0x90] sm:$0xff]  ;;  %v252_v56 = vld [vmem:[%s5624_s13 + $0x98] sm:$0xff]  ;;  %v4696_v57 = vcombine.high %v253_v51, %v254_v52  ;;  %v4695_v58 = vcombine.low %v253_v51, %v254_v52  ;;  %v249_v59 = vld [vmem:[%s5624_s13 + $0x80] sm:$0xff] }
  0x54   : > { %v250_v60 = vld [vmem:[%s5624_s13 + $0x88] sm:$0xff]  ;;  %v4694_v61 = vcombine.high %v251_v55, %v252_v56  ;;  %v4693_v62 = vcombine.low %v251_v55, %v252_v56  ;;  %v4943_v2 = vld [vmem:[#allocation5 + $0x14] ss:$8 sps:$4 sm:$0xff]   ;;  %v4945_v3 = vld [vmem:[#allocation5 + $0x10] ss:$8 sps:$4 sm:$0xff]   ;;  %p5396_p10 = pnand %p5395_p9, %p5389_p3 }
  0x55   : > { %1006 = vmatpush1.bf16.msra.mxu0 %v4685_v13  ;;  %4828 = vmatpush1.bf16.msra.mxu1 %v4685_v13  ;;  %v4692_v63 = vcombine.high %v249_v59, %v250_v60  ;;  %v4691_v0 = vcombine.low %v249_v59, %v250_v60  ;;  %v4940_v1 = vld [vmem:[#allocation5] ss:$8 sps:$4 sm:$0xff]   ;;  %v4946_v4 = vld [vmem:[#allocation5 + $0x24] ss:$8 sps:$4 sm:$0xff]   ;;  %v4949_v6 = vld [vmem:[#allocation5 + $0x34] ss:$8 sps:$4 sm:$0xff]  }
  0x56   : > { %1007 = vmatprep.subr.bf16.mxu0 %v4684_v14  ;;  %4813 = vmatprep.subr.bf16.mxu1 %v4684_v14  ;;  %v4948_v5 = vld [vmem:[#allocation5 + $0x20] ss:$8 sps:$4 sm:$0xff]   ;;  %v4951_v7 = vld [vmem:[#allocation5 + $0x30] ss:$8 sps:$4 sm:$0xff]   ;;  %v4952_v8 = vld [vmem:[#allocation5 + $0x44] ss:$8 sps:$4 sm:$0xff]  }
  0x57   : > { %v4954_v9 = vld [vmem:[#allocation5 + $0x40] ss:$8 sps:$4 sm:$0xff]   ;;  %v4955_v10 = vld [vmem:[#allocation5 + $0x54] ss:$8 sps:$4 sm:$0xff]   ;;  %v5005_v12 = vld [vmem:[#allocation5 + $0x204] ss:$8 sps:$4 sm:$0xff]  }
  0x58   : > { %v5003_v11 = vld [vmem:[#allocation5 + $0x200] ss:$8 sps:$4 sm:$0xff]   ;;  %1345 = vmatprep.mubr.bf16.mxu1 %v5005_v12  ;;  %v4957_v13 = vld [vmem:[#allocation5 + $0x50] ss:$8 sps:$4 sm:$0xff]   ;;  %v4958_v14 = vld [vmem:[#allocation5 + $0x64] ss:$8 sps:$4 sm:$0xff]  }
  0x59   : > { %1008 = vmatpush1.bf16.msra.mxu0 %v4683_v18  ;;  %4829 = vmatpush1.bf16.msra.mxu1 %v4683_v18  ;;  %v5009_v15 = vld [vmem:[#allocation5 + $0x214] ss:$8 sps:$4 sm:$0xff]   ;;  %v5011_v16 = vld [vmem:[#allocation5 + $0x210] ss:$8 sps:$4 sm:$0xff]   ;;  %v4960_v17 = vld [vmem:[#allocation5 + $0x60] ss:$8 sps:$4 sm:$0xff]  }
  0x5a   : > { %1009 = vmatprep.subr.bf16.mxu0 %v4682_v19  ;;  %4814 = vmatprep.subr.bf16.mxu1 %v4682_v19  ;;  %v4961_v18 = vld [vmem:[#allocation5 + $0x74] ss:$8 sps:$4 sm:$0xff]   ;;  %v5015_v19 = vld [vmem:[#allocation5 + $0x224] ss:$8 sps:$4 sm:$0xff]   ;;  %v5017_v20 = vld [vmem:[#allocation5 + $0x220] ss:$8 sps:$4 sm:$0xff]  }
  0x5b   : > { %v4963_v21 = vld [vmem:[#allocation5 + $0x70] ss:$8 sps:$4 sm:$0xff]   ;;  %v4966_v25 = vld [vmem:[#allocation5 + $0x80] ss:$8 sps:$4 sm:$0xff]   ;;  %v5039_v35 = vld [vmem:[#allocation5 + $0x264] ss:$8 sps:$4 sm:$0xff]  }
  0x5c   : > { %v5023_v24 = vld [vmem:[#allocation5 + $0x230] ss:$8 sps:$4 sm:$0xff]   ;;  %v5029_v29 = vld [vmem:[#allocation5 + $0x240] ss:$8 sps:$4 sm:$0xff]   ;;  %v5045_v39 = vld [vmem:[#allocation5 + $0x274] ss:$8 sps:$4 sm:$0xff]  }
  0x5d   : > { %1010 = vmatpush1.bf16.msra.mxu0 %v4681_v22  ;;  %4830 = vmatpush1.bf16.msra.mxu1 %v4681_v22  ;;  %v4964_v22 = vld [vmem:[#allocation5 + $0x84] ss:$8 sps:$4 sm:$0xff]   ;;  %v4969_v28 = vld [vmem:[#allocation5 + $0x90] ss:$8 sps:$4 sm:$0xff]   ;;  %v4972_v32 = vld [vmem:[#allocation5 + $0xa0] ss:$8 sps:$4 sm:$0xff]  }
  0x5e   : > { %1011 = vmatprep.subr.bf16.mxu0 %v4680_v23  ;;  %4815 = vmatprep.subr.bf16.mxu1 %v4680_v23  ;;  %v5021_v23 = vld [vmem:[#allocation5 + $0x234] ss:$8 sps:$4 sm:$0xff]   ;;  %v5035_v33 = vld [vmem:[#allocation5 + $0x250] ss:$8 sps:$4 sm:$0xff]   ;;  %v4978_v40 = vld [vmem:[#allocation5 + $0xc0] ss:$8 sps:$4 sm:$0xff]  }
  0x5f   : > { %v4975_v36 = vld [vmem:[#allocation5 + $0xb0] ss:$8 sps:$4 sm:$0xff]   ;;  %v5051_v43 = vld [vmem:[#allocation5 + $0x284] ss:$8 sps:$4 sm:$0xff]   ;;  %v5057_v47 = vld [vmem:[#allocation5 + $0x294] ss:$8 sps:$4 sm:$0xff]  }
  0x60   : > { %v4981_v44 = vld [vmem:[#allocation5 + $0xd0] ss:$8 sps:$4 sm:$0xff]   ;;  %v4984_v48 = vld [vmem:[#allocation5 + $0xe0] ss:$8 sps:$4 sm:$0xff]   ;;  %v5063_v51 = vld [vmem:[#allocation5 + $0x2a4] ss:$8 sps:$4 sm:$0xff]  }
  0x61   : > { %1012 = vmatpush1.bf16.msra.mxu0 %v4679_v26  ;;  %4831 = vmatpush1.bf16.msra.mxu1 %v4679_v26  ;;  %v4967_v26 = vld [vmem:[#allocation5 + $0x94] ss:$8 sps:$4 sm:$0xff]   ;;  %v4987_v52 = vld [vmem:[#allocation5 + $0xf0] ss:$8 sps:$4 sm:$0xff]   ;;  %v4990_v56 = vld [vmem:[#allocation5 + $0x100] ss:$8 sps:$4 sm:$0xff]  }
  0x62   : > { %1013 = vmatprep.subr.bf16.mxu0 %v4678_v27  ;;  %4816 = vmatprep.subr.bf16.mxu1 %v4678_v27  ;;  %v5027_v27 = vld [vmem:[#allocation5 + $0x244] ss:$8 sps:$4 sm:$0xff]   ;;  %v5069_v55 = vld [vmem:[#allocation5 + $0x2b4] ss:$8 sps:$4 sm:$0xff]   ;;  %v4993_v60 = vld [vmem:[#allocation5 + $0x110] ss:$8 sps:$4 sm:$0xff]  }
  0x63   : > { %v5072_v59 = vld [vmem:[#allocation5 + $0x2c4] ss:$8 sps:$4 sm:$0xff]  }
  0x64   : > { %v5012_v12 = vld [vmem:[#allocation5 + $0x164] ss:$8 sps:$4 sm:$0xff]  }
  0x65   : > { %1014 = vmatpush1.bf16.msra.mxu0 %v4677_v30  ;;  %4832 = vmatpush1.bf16.msra.mxu1 %v4677_v30  ;;  %v4970_v30 = vld [vmem:[#allocation5 + $0xa4] ss:$8 sps:$4 sm:$0xff]  }
  0x66   : > { %1015 = vmatprep.subr.bf16.mxu0 %v4676_v31  ;;  %4817 = vmatprep.subr.bf16.mxu1 %v4676_v31  ;;  %v5033_v31 = vld [vmem:[#allocation5 + $0x254] ss:$8 sps:$4 sm:$0xff]  }
  0x69   : > { %1016 = vmatpush1.bf16.msra.mxu0 %v4675_v34  ;;  %4833 = vmatpush1.bf16.msra.mxu1 %v4675_v34  ;;  %v4973_v34 = vld [vmem:[#allocation5 + $0xb4] ss:$8 sps:$4 sm:$0xff]  }
  0x6a   : > { %1017 = vmatprep.subr.bf16.mxu0 %v4706_v37  ;;  %4818 = vmatprep.subr.bf16.mxu1 %v4706_v37  ;;  %v5041_v37 = vld [vmem:[#allocation5 + $0x260] ss:$8 sps:$4 sm:$0xff]  }
  0x6d   : > { %1018 = vmatpush2.bf16.msra.mxu0 %v4705_v38  ;;  %4834 = vmatpush2.bf16.msra.mxu1 %v4705_v38  ;;  %v4976_v38 = vld [vmem:[#allocation5 + $0xc4] ss:$8 sps:$4 sm:$0xff]  }
  0x6e   : > { %1019 = vmatprep.subr.bf16.mxu0 %v4704_v41  ;;  %4819 = vmatprep.subr.bf16.mxu1 %v4704_v41  ;;  %v5047_v41 = vld [vmem:[#allocation5 + $0x270] ss:$8 sps:$4 sm:$0xff]  }
  0x71   : > { %1020 = vmatpush2.bf16.msra.mxu0 %v4703_v42  ;;  %4835 = vmatpush2.bf16.msra.mxu1 %v4703_v42  ;;  %v4979_v42 = vld [vmem:[#allocation5 + $0xd4] ss:$8 sps:$4 sm:$0xff]  }
  0x72   : > { %1021 = vmatprep.subr.bf16.mxu0 %v4702_v45  ;;  %4820 = vmatprep.subr.bf16.mxu1 %v4702_v45  ;;  %v5053_v45 = vld [vmem:[#allocation5 + $0x280] ss:$8 sps:$4 sm:$0xff]  }
  0x75   : > { %1022 = vmatpush2.bf16.msra.mxu0 %v4701_v46  ;;  %4836 = vmatpush2.bf16.msra.mxu1 %v4701_v46  ;;  %v4982_v46 = vld [vmem:[#allocation5 + $0xe4] ss:$8 sps:$4 sm:$0xff]  }
  0x76   : > { %1023 = vmatprep.subr.bf16.mxu0 %v4700_v49  ;;  %4821 = vmatprep.subr.bf16.mxu1 %v4700_v49  ;;  %v5059_v49 = vld [vmem:[#allocation5 + $0x290] ss:$8 sps:$4 sm:$0xff]  }
  0x79   : > { %1024 = vmatpush2.bf16.msra.mxu0 %v4699_v50  ;;  %4837 = vmatpush2.bf16.msra.mxu1 %v4699_v50  ;;  %v4985_v50 = vld [vmem:[#allocation5 + $0xf4] ss:$8 sps:$4 sm:$0xff]  }
  0x7a   : > { %1025 = vmatprep.subr.bf16.mxu0 %v4698_v53  ;;  %4822 = vmatprep.subr.bf16.mxu1 %v4698_v53  ;;  %v5065_v53 = vld [vmem:[#allocation5 + $0x2a0] ss:$8 sps:$4 sm:$0xff]  }
  0x7d   : > { %1026 = vmatpush2.bf16.msra.mxu0 %v4697_v54  ;;  %4838 = vmatpush2.bf16.msra.mxu1 %v4697_v54  ;;  %v4988_v54 = vld [vmem:[#allocation5 + $0x104] ss:$8 sps:$4 sm:$0xff]  }
  0x7e   : > { %1027 = vmatprep.subr.bf16.mxu0 %v4696_v57  ;;  %4823 = vmatprep.subr.bf16.mxu1 %v4696_v57  ;;  %v5071_v57 = vld [vmem:[#allocation5 + $0x2b0] ss:$8 sps:$4 sm:$0xff]  }
  0x81   : > { %1028 = vmatpush2.bf16.msra.mxu0 %v4695_v58  ;;  %4839 = vmatpush2.bf16.msra.mxu1 %v4695_v58  ;;  %v4991_v58 = vld [vmem:[#allocation5 + $0x114] ss:$8 sps:$4 sm:$0xff]  }
  0x82   : > { %1029 = vmatprep.subr.bf16.mxu0 %v4694_v61  ;;  %4824 = vmatprep.subr.bf16.mxu1 %v4694_v61  ;;  %v5074_v61 = vld [vmem:[#allocation5 + $0x2c0] ss:$8 sps:$4 sm:$0xff]  }
  0x85   : > { %1030 = vmatpush2.bf16.msra.mxu0 %v4693_v62  ;;  %4840 = vmatpush2.bf16.msra.mxu1 %v4693_v62  ;;  %v4994_v62 = vld [vmem:[#allocation5 + $0x124] ss:$8 sps:$4 sm:$0xff]  }
  0x86   : > { %1031 = vmatprep.subr.bf16.mxu0 %v4692_v63  ;;  %4825 = vmatprep.subr.bf16.mxu1 %v4692_v63  ;;  %v5075_v63 = vld [vmem:[#allocation5 + $0x2d4] ss:$8 sps:$4 sm:$0xff]  }
  0x89   : > { %1032 = vmatpush2.bf16.msra.mxu0 %v4691_v0  ;;  %4841 = vmatpush2.bf16.msra.mxu1 %v4691_v0  ;;  %v4996_v0 = vld [vmem:[#allocation5 + $0x120] ss:$8 sps:$4 sm:$0xff]  }
  0x8c   : > { %1034 = vmatmul.mubr.bf16.vlgmr.msra.gmra.mxu0 %v4940_v1  ;;  %1346 = vmatmul.mubr.bf16.vlgmr.msra.gmra.mxu1 %v5003_v11  ;;  %v5077_v1 = vld [vmem:[#allocation5 + $0x2d0] ss:$8 sps:$4 sm:$0xff]  }
  0x8d   : > { %1039 = vmatprep.mubr.bf16.mxu0 %v4943_v2  ;;  %1355 = vmatprep.mubr.bf16.mxu1 %v5009_v15  ;;  %v4997_v2 = vld [vmem:[#allocation5 + $0x134] ss:$8 sps:$4 sm:$0xff]   ;;  %v5008_v11 = vld [vmem:[#allocation5 + $0x150] ss:$8 sps:$4 sm:$0xff]  }
  0x8e   : > { %v5020_v15 = vld [vmem:[#allocation5 + $0x170] ss:$8 sps:$4 sm:$0xff]  }
  0x94   : > { %1040 = vmatmul.mubr.bf16.gmra.mxu0 %v4945_v3  ;;  %1356 = vmatmul.mubr.bf16.gmra.mxu1 %v5011_v16  ;;  %v5078_v3 = vld [vmem:[#allocation5 + $0x2e4] ss:$8 sps:$4 sm:$0xff]  }
  0x95   : > { %1045 = vmatprep.mubr.bf16.mxu0 %v4946_v4  ;;  %1365 = vmatprep.mubr.bf16.mxu1 %v5015_v19  ;;  %v4999_v4 = vld [vmem:[#allocation5 + $0x130] ss:$8 sps:$4 sm:$0xff]   ;;  %v5024_v16 = vld [vmem:[#allocation5 + $0x184] ss:$8 sps:$4 sm:$0xff]  }
  0x9c   : > { %1046 = vmatmul.mubr.bf16.gmra.mxu0 %v4948_v5  ;;  %1366 = vmatmul.mubr.bf16.gmra.mxu1 %v5017_v20  ;;  %v5080_v5 = vld [vmem:[#allocation5 + $0x2e0] ss:$8 sps:$4 sm:$0xff]  }
  0x9d   : > { %1055 = vmatprep.mubr.bf16.mxu0 %v4949_v6  ;;  %1375 = vmatprep.mubr.bf16.mxu1 %v5021_v23  ;;  %v5000_v6 = vld [vmem:[#allocation5 + $0x144] ss:$8 sps:$4 sm:$0xff]  }
  0x9e   : > { %v5036_v23 = vld [vmem:[#allocation5 + $0x1a4] ss:$8 sps:$4 sm:$0xff]  }
  0xa4   : > { %1056 = vmatmul.mubr.bf16.gmra.mxu0 %v4951_v7  ;;  %1376 = vmatmul.mubr.bf16.gmra.mxu1 %v5023_v24  ;;  %v5081_v7 = vld [vmem:[#allocation5 + $0x2f4] ss:$8 sps:$4 sm:$0xff]  }
  0xa5   : > { %1065 = vmatprep.mubr.bf16.mxu0 %v4952_v8  ;;  %1385 = vmatprep.mubr.bf16.mxu1 %v5027_v27  ;;  %v5002_v8 = vld [vmem:[#allocation5 + $0x140] ss:$8 sps:$4 sm:$0xff]  }
  0xac   : > { %1066 = vmatmul.mubr.bf16.gmra.mxu0 %v4954_v9  ;;  %1386 = vmatmul.mubr.bf16.gmra.mxu1 %v5029_v29  ;;  %v5083_v9 = vld [vmem:[#allocation5 + $0x2f0] ss:$8 sps:$4 sm:$0xff]   ;;  %v5042_v29 = vld [vmem:[#allocation5 + $0x1b4] ss:$8 sps:$4 sm:$0xff]  }
  0xad   : > { %1075 = vmatprep.mubr.bf16.mxu0 %v4955_v10  ;;  %1395 = vmatprep.mubr.bf16.mxu1 %v5033_v31  ;;  %v5006_v10 = vld [vmem:[#allocation5 + $0x154] ss:$8 sps:$4 sm:$0xff]  }
  0xb4   : > { %1076 = vmatmul.mubr.bf16.gmra.mxu0 %v4957_v13  ;;  %1396 = vmatmul.mubr.bf16.gmra.mxu1 %v5035_v33  ;;  %v5014_v13 = vld [vmem:[#allocation5 + $0x160] ss:$8 sps:$4 sm:$0xff]  }
  0xb5   : > { %1085 = vmatprep.mubr.bf16.mxu0 %v4958_v14  ;;  %1405 = vmatprep.mubr.bf16.mxu1 %v5039_v35  ;;  %v5018_v14 = vld [vmem:[#allocation5 + $0x174] ss:$8 sps:$4 sm:$0xff]   ;;  %v5050_v35 = vld [vmem:[#allocation5 + $0x1c4] ss:$8 sps:$4 sm:$0xff]  }
  0xbc   : > { %1086 = vmatmul.mubr.bf16.gmra.mxu0 %v4960_v17  ;;  %1406 = vmatmul.mubr.bf16.gmra.mxu1 %v5041_v37  ;;  %v5026_v17 = vld [vmem:[#allocation5 + $0x180] ss:$8 sps:$4 sm:$0xff]  }
  0xbd   : > { %1095 = vmatprep.mubr.bf16.mxu0 %v4961_v18  ;;  %1415 = vmatprep.mubr.bf16.mxu1 %v5045_v39  ;;  %v5030_v18 = vld [vmem:[#allocation5 + $0x194] ss:$8 sps:$4 sm:$0xff]  }
  0xc4   : > { %1096 = vmatmul.mubr.bf16.gmra.mxu0 %v4963_v21  ;;  %1416 = vmatmul.mubr.bf16.gmra.mxu1 %v5047_v41  ;;  %v5056_v41 = vld [vmem:[#allocation5 + $0x1d4] ss:$8 sps:$4 sm:$0xff]  }
  0xc5   : > { %1105 = vmatprep.mubr.bf16.mxu0 %v4964_v22  ;;  %1425 = vmatprep.mubr.bf16.mxu1 %v5051_v43  ;;  %v5032_v22 = vld [vmem:[#allocation5 + $0x190] ss:$8 sps:$4 sm:$0xff]  }
  0xcc   : > { %1106 = vmatmul.mubr.bf16.gmra.mxu0 %v4966_v25  ;;  %1426 = vmatmul.mubr.bf16.gmra.mxu1 %v5053_v45 }
  0xcd   : > { %1115 = vmatprep.mubr.bf16.mxu0 %v4967_v26  ;;  %1435 = vmatprep.mubr.bf16.mxu1 %v5057_v47  ;;  %v5062_v47 = vld [vmem:[#allocation5 + $0x1e4] ss:$8 sps:$4 sm:$0xff]  }
  0xd4   : > { %1116 = vmatmul.mubr.bf16.gmra.mxu0 %v4969_v28  ;;  %1436 = vmatmul.mubr.bf16.gmra.mxu1 %v5059_v49  ;;  %v5038_v28 = vld [vmem:[#allocation5 + $0x1a0] ss:$8 sps:$4 sm:$0xff]  }
  0xd5   : > { %1125 = vmatprep.mubr.bf16.mxu0 %v4970_v30  ;;  %1445 = vmatprep.mubr.bf16.mxu1 %v5063_v51 }
  0xdc   : > { %1126 = vmatmul.mubr.bf16.gmra.mxu0 %v4972_v32  ;;  %1446 = vmatmul.mubr.bf16.gmra.mxu1 %v5065_v53  ;;  %v5068_v53 = vld [vmem:[#allocation5 + $0x1f4] ss:$8 sps:$4 sm:$0xff]  }
  0xdd   : > { %1135 = vmatprep.mubr.bf16.mxu0 %v4973_v34  ;;  %1455 = vmatprep.mubr.bf16.mxu1 %v5069_v55  ;;  %v5044_v34 = vld [vmem:[#allocation5 + $0x1b0] ss:$8 sps:$4 sm:$0xff]  }
  0xe4   : > { %1136 = vmatmul.mubr.bf16.gmra.mxu0 %v4975_v36  ;;  %1456 = vmatmul.mubr.bf16.gmra.mxu1 %v5071_v57 }
  0xe5   : > { %1145 = vmatprep.mubr.bf16.mxu0 %v4976_v38  ;;  %1465 = vmatprep.mubr.bf16.mxu1 %v5072_v59 }
  0xec   : > { %1146 = vmatmul.mubr.bf16.gmra.mxu0 %v4978_v40  ;;  %1466 = vmatmul.mubr.bf16.gmra.mxu1 %v5074_v61  ;;  %v5048_v40 = vld [vmem:[#allocation5 + $0x1c0] ss:$8 sps:$4 sm:$0xff]  }
  0xed   : > { %1155 = vmatprep.mubr.bf16.mxu0 %v4979_v42  ;;  %1475 = vmatprep.mubr.bf16.mxu1 %v5075_v63 }
  0xf4   : > { %1156 = vmatmul.mubr.bf16.gmra.mxu0 %v4981_v44  ;;  %1476 = vmatmul.mubr.bf16.gmra.mxu1 %v5077_v1 }
  0xf5   : > { %1165 = vmatprep.mubr.bf16.mxu0 %v4982_v46  ;;  %1485 = vmatprep.mubr.bf16.mxu1 %v5078_v3  ;;  %v5054_v46 = vld [vmem:[#allocation5 + $0x1d0] ss:$8 sps:$4 sm:$0xff]  }
  0xfc   : > { %1166 = vmatmul.mubr.bf16.gmra.mxu0 %v4984_v48  ;;  %1486 = vmatmul.mubr.bf16.gmra.mxu1 %v5080_v5 }
  0xfd   : > { %1175 = vmatprep.mubr.bf16.mxu0 %v4985_v50  ;;  %1495 = vmatprep.mubr.bf16.mxu1 %v5081_v7 }
 0x104   : > { %1176 = vmatmul.mubr.bf16.gmra.mxu0 %v4987_v52  ;;  %1496 = vmatmul.mubr.bf16.gmra.mxu1 %v5083_v9  ;;  %v5060_v52 = vld [vmem:[#allocation5 + $0x1e0] ss:$8 sps:$4 sm:$0xff]  }
 0x105   : > { %1185 = vmatprep.mubr.bf16.mxu0 %v4988_v54 }
 0x10c   : > { %1186 = vmatmul.mubr.bf16.gmra.mxu0 %v4990_v56 }
 0x10d   : > { %1195 = vmatprep.mubr.bf16.mxu0 %v4991_v58  ;;  %v5066_v58 = vld [vmem:[#allocation5 + $0x1f0] ss:$8 sps:$4 sm:$0xff]  }
 0x114   : > { %1196 = vmatmul.mubr.bf16.gmra.mxu0 %v4993_v60 }
 0x115   : > { %1205 = vmatprep.mubr.bf16.mxu0 %v4994_v62 }
 0x11c   : > { %1206 = vmatmul.mubr.bf16.gmra.mxu0 %v4996_v0 }
 0x11d   : > { %1215 = vmatprep.mubr.bf16.mxu0 %v4997_v2 }
 0x124   : > { %1216 = vmatmul.mubr.bf16.gmra.mxu0 %v4999_v4 }
 0x125   : > { %1225 = vmatprep.mubr.bf16.mxu0 %v5000_v6 }
 0x12c   : > { %1226 = vmatmul.mubr.bf16.gmra.mxu0 %v5002_v8 }
 0x12d   : > { %1235 = vmatprep.mubr.bf16.mxu0 %v5006_v10 }
 0x134   : > { %1236 = vmatmul.mubr.bf16.gmra.mxu0 %v5008_v11 }
 0x135   : > { %1245 = vmatprep.mubr.bf16.mxu0 %v5012_v12 }
 0x13c   : > { %1246 = vmatmul.mubr.bf16.gmra.mxu0 %v5014_v13 }
 0x13d   : > { %1255 = vmatprep.mubr.bf16.mxu0 %v5018_v14 }
 0x144   : > { %1256 = vmatmul.mubr.bf16.gmra.mxu0 %v5020_v15 }
 0x145   : > { %1265 = vmatprep.mubr.bf16.mxu0 %v5024_v16 }
 0x14c   : > { %v1035_v19 = vpop.f32.mrf.mxu0  ;;  %1266 = vmatmul.mubr.bf16.gmra.mxu0 %v5026_v17 }
 0x14d   : > { %1275 = vmatprep.mubr.bf16.mxu0 %v5030_v18 }
 0x14e   : > { %v1036_v20 = vpop.f32.mrf.mxu0 }
 0x150   : > { %v1037_v21 = vpop.f32.mrf.mxu0 }
 0x152   : > { %v1038_v24 = vpop.f32.mrf.mxu0 }
 0x154   : > { %v1041_v25 = vpop.f32.mrf.mxu0  ;;  %1276 = vmatmul.mubr.bf16.gmra.mxu0 %v5032_v22 }
 0x155   : > { %1285 = vmatprep.mubr.bf16.mxu0 %v5036_v23 }
 0x156   : > { %v1042_v26 = vpop.f32.mrf.mxu0 }
 0x158   : > { %v1043_v27 = vpop.f32.mrf.mxu0 }
 0x15a   : > { %v1044_v30 = vpop.f32.mrf.mxu0 }
 0x15c   : > { %v5666_v31 = vpop.f32.mrf.mxu0  ;;  %1286 = vmatmul.mubr.bf16.gmra.mxu0 %v5038_v28 }
 0x15d   : > { %8527 = vst [vmem:[#allocation11_spill] sm:$0xff] %v5666_v31  ;;  %1295 = vmatprep.mubr.bf16.mxu0 %v5042_v29 }
 0x15e   : > { %v5668_v32 = vpop.f32.mrf.mxu0 }
 0x15f   : > { %8528 = vst [vmem:[#allocation12_spill] sm:$0xff] %v5668_v32 }
 0x160   : > { %v5670_v33 = vpop.f32.mrf.mxu0 }
 0x161   : > { %8529 = vst [vmem:[#allocation13_spill] sm:$0xff] %v5670_v33 }
 0x162   : > { %v5672_v36 = vpop.f32.mrf.mxu0 }
 0x164   : > { %v5674_v37 = vpop.f32.mrf.mxu0  ;;  %1296 = vmatmul.mubr.bf16.gmra.mxu0 %v5044_v34 }
 0x165   : > { %8530 = vst [vmem:[#allocation14_spill] sm:$0xff] %v5674_v37  ;;  %1305 = vmatprep.mubr.bf16.mxu0 %v5050_v35 }
 0x166   : > { %v5676_v38 = vpop.f32.mrf.mxu0 }
 0x168   : > { %v5678_v39 = vpop.f32.mrf.mxu0 }
 0x169   : > { %8531 = vst [vmem:[#allocation15_spill] sm:$0xff] %v5678_v39 }
 0x16a   : > { %v5680_v42 = vpop.f32.mrf.mxu0 }
 0x16b   : > { %8532 = vst [vmem:[#allocation16_spill] sm:$0xff] %v5680_v42 }
 0x16c   : > { %v5682_v43 = vpop.f32.mrf.mxu0  ;;  %1306 = vmatmul.mubr.bf16.gmra.mxu0 %v5048_v40 }
 0x16d   : > { %8533 = vst [vmem:[#allocation17_spill] sm:$0xff] %v5682_v43  ;;  %1315 = vmatprep.mubr.bf16.mxu0 %v5056_v41 }
 0x16e   : > { %v5684_v44 = vpop.f32.mrf.mxu0 }
 0x16f   : > { %8534 = vst [vmem:[#allocation18_spill] sm:$0xff] %v5684_v44 }
 0x170   : > { %v5686_v45 = vpop.f32.mrf.mxu0 }
 0x171   : > { %8535 = vst [vmem:[#allocation19_spill] sm:$0xff] %v5686_v45 }
 0x172   : > { %v5688_v48 = vpop.f32.mrf.mxu0 }
 0x174   : > { %v5690_v49 = vpop.f32.mrf.mxu0  ;;  %1316 = vmatmul.mubr.bf16.gmra.mxu0 %v5054_v46 }
 0x175   : > { %1325 = vmatprep.mubr.bf16.mxu0 %v5062_v47 }
 0x176   : > { %v5692_v50 = vpop.f32.mrf.mxu0 }
 0x177   : > { %8536 = vst [vmem:[#allocation20_spill] sm:$0xff] %v5692_v50 }
 0x178   : > { %v5694_v51 = vpop.f32.mrf.mxu0 }
 0x179   : > { %8537 = vst [vmem:[#allocation21_spill] sm:$0xff] %v5694_v51 }
 0x17a   : > { %v5696_v54 = vpop.f32.mrf.mxu0 }
 0x17b   : > { %8538 = vst [vmem:[#allocation22_spill] sm:$0xff] %v5696_v54 }
 0x17c   : > { %v5698_v55 = vpop.f32.mrf.mxu0  ;;  %1326 = vmatmul.mubr.bf16.gmra.mxu0 %v5060_v52 }
 0x17d   : > { %8539 = vst [vmem:[#allocation23_spill] sm:$0xff] %v5698_v55  ;;  %1335 = vmatprep.mubr.bf16.mxu0 %v5068_v53 }
 0x17e   : > { %v5700_v56 = vpop.f32.mrf.mxu0 }
 0x17f   : > { %8540 = vst [vmem:[#allocation24_spill] sm:$0xff] %v5700_v56 }
 0x180   : > { %v5702_v57 = vpop.f32.mrf.mxu0 }
 0x181   : > { %8541 = vst [vmem:[#allocation25_spill] sm:$0xff] %v5702_v57 }
 0x182   : > { %v5704_v59 = vpop.f32.mrf.mxu0 }
 0x184   : > { %v5706_v60 = vpop.f32.mrf.mxu0  ;;  %1336 = vmatmul.mubr.bf16.gmra.mxu0 %v5066_v58 }
 0x186   : > { %v5708_v61 = vpop.f32.mrf.mxu0 }
 0x187   : > { %8542 = vst [vmem:[#allocation26_spill] sm:$0xff] %v5708_v61 }
 0x188   : > { %v5710_v62 = vpop.f32.mrf.mxu0 }
 0x189   : > { %8543 = vst [vmem:[#allocation27_spill] sm:$0xff] %v5710_v62 }
 0x18a   : > { %v5712_v63 = vpop.f32.mrf.mxu0 }
 0x18b   : > { %8544 = vst [vmem:[#allocation28_spill] sm:$0xff] %v5712_v63 }
 0x18c   : > { %v5714_v0 = vpop.f32.mrf.mxu0 }
 0x18d   : > { %8545 = vst [vmem:[#allocation29_spill] sm:$0xff] %v5714_v0 }
 0x18e   : > { %v5716_v1 = vpop.f32.mrf.mxu0 }
 0x18f   : > { %8546 = vst [vmem:[#allocation30_spill] sm:$0xff] %v5716_v1 }
 0x190   : > { %v5718_v2 = vpop.f32.mrf.mxu0 }
 0x191   : > { %8547 = vst [vmem:[#allocation31_spill] sm:$0xff] %v5718_v2 }
 0x192   : > { %v5720_v3 = vpop.f32.mrf.mxu0 }
 0x194   : > { %v5722_v4 = vpop.f32.mrf.mxu0 }
 0x195   : > { %8548 = vst [vmem:[#allocation32_spill] sm:$0xff] %v5722_v4 }
 0x196   : > { %v5724_v5 = vpop.f32.mrf.mxu0 }
 0x197   : > { %8549 = vst [vmem:[#allocation33_spill] sm:$0xff] %v5724_v5 }
 0x198   : > { %v5726_v6 = vpop.f32.mrf.mxu0 }
 0x199   : > { %8550 = vst [vmem:[#allocation34_spill] sm:$0xff] %v5726_v6 }
 0x19a   : > { %v5728_v7 = vpop.f32.mrf.mxu0 }
 0x19b   : > { %8551 = vst [vmem:[#allocation35_spill] sm:$0xff] %v5728_v7 }
 0x19c   : > { %v5730_v8 = vpop.f32.mrf.mxu0 }
 0x19d   : > { %8552 = vst [vmem:[#allocation36_spill] sm:$0xff] %v5730_v8 }
 0x19e   : > { %v5732_v9 = vpop.f32.mrf.mxu0 }
 0x19f   : > { %8553 = vst [vmem:[#allocation37_spill] sm:$0xff] %v5732_v9 }
 0x1a0   : > { %v5734_v10 = vpop.f32.mrf.mxu0 }
 0x1a1   : > { %8554 = vst [vmem:[#allocation38_spill] sm:$0xff] %v5734_v10 }
 0x1a2   : > { %v5736_v11 = vpop.f32.mrf.mxu0 }
 0x1a4   : > { %v5738_v12 = vpop.f32.mrf.mxu0 }
 0x1a5   : > { %8555 = vst [vmem:[#allocation39_spill] sm:$0xff] %v5738_v12 }
 0x1a6   : > { %v5740_v13 = vpop.f32.mrf.mxu0 }
 0x1a7   : > { %8556 = vst [vmem:[#allocation40_spill] sm:$0xff] %v5740_v13 }
 0x1a8   : > { %v5742_v14 = vpop.f32.mrf.mxu0 }
 0x1a9   : > { %8557 = vst [vmem:[#allocation41_spill] sm:$0xff] %v5742_v14 }
 0x1aa   : > { %v5744_v15 = vpop.f32.mrf.mxu0 }
 0x1ab   : > { %8558 = vst [vmem:[#allocation42_spill] sm:$0xff] %v5744_v15 }
 0x1ac   : > { %v5746_v16 = vpop.f32.mrf.mxu0 }
 0x1ad   : > { %8559 = vst [vmem:[#allocation43_spill] sm:$0xff] %v5746_v16 }
 0x1ae   : > { %v5748_v17 = vpop.f32.mrf.mxu0 }
 0x1af   : > { %8560 = vst [vmem:[#allocation44_spill] sm:$0xff] %v5748_v17 }
 0x1b0   : > { %v5750_v18 = vpop.f32.mrf.mxu0 }
 0x1b1   : > { %8561 = vst [vmem:[#allocation45_spill] sm:$0xff] %v5750_v18 }
 0x1b2   : > { %v5752_v19 = vpop.f32.mrf.mxu0 }
 0x1b4   : > { %v5754_v20 = vpop.f32.mrf.mxu0 }
 0x1b5   : > { %8562 = vst [vmem:[#allocation46_spill] sm:$0xff] %v5754_v20 }
 0x1b6   : > { %v5756_v21 = vpop.f32.mrf.mxu0 }
 0x1b7   : > { %8563 = vst [vmem:[#allocation47_spill] sm:$0xff] %v5756_v21 }
 0x1b8   : > { %v5758_v22 = vpop.f32.mrf.mxu0 }
 0x1b9   : > { %8564 = vst [vmem:[#allocation48_spill] sm:$0xff] %v5758_v22 }
 0x1ba   : > { %v5760_v23 = vpop.f32.mrf.mxu0 }
 0x1bb   : > { %8565 = vst [vmem:[#allocation49_spill] sm:$0xff] %v5760_v23 }
 0x1bc   : > { %v5762_v24 = vpop.f32.mrf.mxu0 }
 0x1bd   : > { %8566 = vst [vmem:[#allocation50_spill] sm:$0xff] %v5762_v24 }
 0x1be   : > { %v5764_v25 = vpop.f32.mrf.mxu0 }
 0x1bf   : > { %8567 = vst [vmem:[#allocation51_spill] sm:$0xff] %v5764_v25 }
 0x1c0   : > { %v5766_v26 = vpop.f32.mrf.mxu0 }
 0x1c2   : > { %v5768_v27 = vpop.f32.mrf.mxu0 }
 0x1c4   : > { %v5770_v28 = vpop.f32.mrf.mxu0 }
 0x1c5   : > { %8568 = vst [vmem:[#allocation52_spill] sm:$0xff] %v5770_v28 }
 0x1c6   : > { %v5772_v29 = vpop.f32.mrf.mxu0 }
 0x1c7   : > { %8569 = vst [vmem:[#allocation53_spill] sm:$0xff] %v5772_v29 }
 0x1c8   : > { %v5774_v30 = vpop.f32.mrf.mxu0 }
 0x1c9   : > { %8570 = vst [vmem:[#allocation54_spill] sm:$0xff] %v5774_v30 }
 0x1ca   : > { %v5776_v34 = vpop.f32.mrf.mxu0 }
 0x1cb   : > { %8571 = vst [vmem:[#allocation55_spill] sm:$0xff] %v5776_v34 }
 0x1cc   : > { %v1187_v35 = vpop.f32.mrf.mxu0 }
 0x1cd   : > { %v1506_v40 = vmul.f32 %v1187_v35, %v5666_v31  ;;  %v1612_v41 = vmul.f32 %v1187_v35, %v5682_v43  ;;  %v1772_v46 = vmul.f32 %v1187_v35, %v5698_v55  ;;  %v1986_v47 = vmul.f32 %v1187_v35, %v5714_v0 }
 0x1ce   : > { %v2254_v52 = vmul.f32 %v1187_v35, %v5730_v8  ;;  %v1189_v53 = vpop.f32.mrf.mxu0  ;;  %v2576_v58 = vmul.f32 %v1187_v35, %v5746_v16  ;;  %v2952_v23 = vmul.f32 %v1187_v35, %v5762_v24 }
 0x1cf   : > { %v1507_v15 = vmul.f32 %v1189_v53, %v5668_v32  ;;  %v1613_v34 = vmul.f32 %v1189_v53, %v5684_v44  ;;  %v1773_v7 = vmul.f32 %v1189_v53, %v5700_v56  ;;  %v1987_v31 = vmul.f32 %v1189_v53, %v5716_v1 }
 0x1d0   : > { %v2255_v43 = vmul.f32 %v1189_v53, %v5732_v9  ;;  %v2577_v55 = vmul.f32 %v1189_v53, %v5748_v17  ;;  %v1191_v0 = vpop.f32.mrf.mxu0  ;;  %v2953_v32 = vmul.f32 %v1189_v53, %v5764_v25 }
 0x1d1   : > { %v1508_v8 = vmul.f32 %v1191_v0, %v5670_v33  ;;  %v1614_v63 = vmul.f32 %v1191_v0, %v5686_v45  ;;  %v1774_v16 = vmul.f32 %v1191_v0, %v5702_v57  ;;  %v1988_v35 = vmul.f32 %v1191_v0, %v5718_v2 }
 0x1d2   : > { %v2256_v44 = vmul.f32 %v1191_v0, %v5734_v10  ;;  %v2578_v56 = vmul.f32 %v1191_v0, %v5750_v18  ;;  %v2954_v1 = vmul.f32 %v1191_v0, %v5766_v26  ;;  %v1193_v9 = vpop.f32.mrf.mxu0 }
 0x1d3   : > { %v1514_v24 = vadd.f32 %v1508_v8, %v1506_v40  ;;  %v1620_v17 = vadd.f32 %v1614_v63, %v1612_v41  ;;  %v1780_v54 = vadd.f32 %v1774_v16, %v1772_v46  ;;  %v1994_v42 = vadd.f32 %v1988_v35, %v1986_v47 }
 0x1d4   : > { %v2262_v33 = vadd.f32 %v2256_v44, %v2254_v52  ;;  %v2584_v30 = vadd.f32 %v2578_v56, %v2576_v58  ;;  %v2960_v45 = vadd.f32 %v2954_v1, %v2952_v23  ;;  %v1509_v57 = vmul.f32 %v1193_v9, %v5672_v36  ;;  %v1197_v22 = vpop.f32.mrf.mxu0 }
 0x1d5   : > { %v1615_v2 = vmul.f32 %v1193_v9, %v5688_v48  ;;  %v1775_v53 = vmul.f32 %v1193_v9, %v5704_v59  ;;  %v1989_v10 = vmul.f32 %v1193_v9, %v5720_v3  ;;  %v2257_v18 = vmul.f32 %v1193_v9, %v5736_v11 }
 0x1d6   : > { %v1523_v0 = vadd.f32 %v1509_v57, %v1507_v15  ;;  %v2579_v8 = vmul.f32 %v1193_v9, %v5752_v19  ;;  %v2955_v63 = vmul.f32 %v1193_v9, %v5768_v27  ;;  %v1510_v44 = vmul.f32 %v1197_v22, %v5674_v37  ;;  %v1199_v56 = vpop.f32.mrf.mxu0 }
 0x1d7   : > { %v1629_v1 = vadd.f32 %v1615_v2, %v1613_v34  ;;  %v1789_v16 = vadd.f32 %v1775_v53, %v1773_v7  ;;  %v2003_v23 = vadd.f32 %v1989_v10, %v1987_v31  ;;  %v2271_v40 = vadd.f32 %v2257_v18, %v2255_v43 }
 0x1d8   : > { %v2593_v41 = vadd.f32 %v2579_v8, %v2577_v55  ;;  %v2969_v46 = vadd.f32 %v2955_v63, %v2953_v32  ;;  %v1515_v47 = vadd.f32 %v1514_v24, %v1510_v44  ;;  %v1616_v52 = vmul.f32 %v1197_v22, %v5690_v49  ;;  %v1201_v43 = vpop.f32.mrf.mxu0 }
 0x1d9   : > { %v1776_v58 = vmul.f32 %v1197_v22, %v5706_v60  ;;  %v1990_v57 = vmul.f32 %v1197_v22, %v5722_v4  ;;  %v2258_v15 = vmul.f32 %v1197_v22, %v5738_v12  ;;  %v2580_v9 = vmul.f32 %v1197_v22, %v5754_v20 }
 0x1da   : > { %v1621_v35 = vadd.f32 %v1620_v17, %v1616_v52  ;;  %v2956_v37 = vmul.f32 %v1197_v22, %v5770_v28  ;;  %v1511_v2 = vmul.f32 %v1199_v56, %v5676_v38  ;;  %v1617_v31 = vmul.f32 %v1199_v56, %v5692_v50 }
 0x1db   : > { %v1781_v32 = vadd.f32 %v1780_v54, %v1776_v58  ;;  %v1995_v55 = vadd.f32 %v1994_v42, %v1990_v57  ;;  %v2263_v7 = vadd.f32 %v2262_v33, %v2258_v15  ;;  %v2585_v10 = vadd.f32 %v2584_v30, %v2580_v9  ;;  %v8572_v15 = vld [vmem:[#allocation48_spill] sm:$0xff] }
 0x1dc   : > { %v2961_v18 = vadd.f32 %v2960_v45, %v2956_v37  ;;  %v1524_v24 = vadd.f32 %v1523_v0, %v1511_v2  ;;  %v5815_v34 = vadd.f32 %v1629_v1, %v1617_v31  ;;  %v1777_v53 = vmul.f32 %v1199_v56, %v5708_v61  ;;  %v5827_v45 = vpop.f32.mrf.mxu0  ;;  %v8573_v2 = vld [vmem:[#allocation54_spill] sm:$0xff] }
 0x1dd   : > { %v1991_v8 = vmul.f32 %v1199_v56, %v5724_v5  ;;  %v2259_v17 = vmul.f32 %v1199_v56, %v5740_v13  ;;  %v2581_v22 = vmul.f32 %v1199_v56, %v5756_v21  ;;  %v2957_v63 = vmul.f32 %v1199_v56, %v5772_v29 }
 0x1de   : > { %v5822_v44 = vadd.f32 %v1789_v16, %v1777_v53  ;;  %v1512_v42 = vmul.f32 %v1201_v43, %v5678_v39  ;;  %v1618_v33 = vmul.f32 %v1201_v43, %v5694_v51  ;;  %v1778_v37 = vmul.f32 %v1201_v43, %v5710_v62  ;;  %v8574_v53 = vld [vmem:[#allocation16_spill] sm:$0xff] }
 0x1df   : > { %v5829_v54 = vadd.f32 %v2003_v23, %v1991_v8  ;;  %v5831_v30 = vadd.f32 %v2271_v40, %v2259_v17  ;;  %v5833_v0 = vadd.f32 %v2593_v41, %v2581_v22  ;;  %v5835_v1 = vadd.f32 %v2969_v46, %v2957_v63 }
 0x1e0   : > { %v1516_v52 = vadd.f32 %v1515_v47, %v1512_v42  ;;  %v1622_v56 = vadd.f32 %v1621_v35, %v1618_v33  ;;  %v1782_v16 = vadd.f32 %v1781_v32, %v1778_v37  ;;  %v1992_v58 = vmul.f32 %v1201_v43, %v5726_v6 }
 0x1e1   : > { %v2260_v57 = vmul.f32 %v1201_v43, %v5742_v14  ;;  %v2582_v9 = vmul.f32 %v1201_v43, %v8572_v15  ;;  %v2958_v31 = vmul.f32 %v1201_v43, %v8573_v2  ;;  %v1513_v23 = vmul.f32 %v5827_v45, %v8574_v53 }
 0x1e2   : > { %v1517_v40 = vrot.slane %v1516_v52, 4  ;;  %v1623_v8 = vrot.slane %v1622_v56, 4  ;;  %v1783_v41 = vrot.slane %v1782_v16, 4  ;;  %v1996_v17 = vadd.f32 %v1995_v55, %v1992_v58 }
 0x1e3   : > { %v2264_v46 = vadd.f32 %v2263_v7, %v2260_v57  ;;  %v2586_v22 = vadd.f32 %v2585_v10, %v2582_v9  ;;  %v2962_v47 = vadd.f32 %v2961_v18, %v2958_v31  ;;  %v1525_v35 = vadd.f32 %v1524_v24, %v1513_v23 }
 0x1e4   : > { %v1518_v32 = vadd.f32 %v1517_v40, %v1516_v52  ;;  %v1624_v63 = vadd.f32 %v1623_v8, %v1622_v56  ;;  %v1784_v42 = vadd.f32 %v1783_v41, %v1782_v16  ;;  %v1997_v33 = vrot.slane %v1996_v17, 4 }
 0x1e5   : > { %v2265_v37 = vrot.slane %v2264_v46, 4  ;;  %v2587_v14 = vrot.slane %v2586_v22, 4  ;;  %v2963_v15 = vrot.slane %v2962_v47, 4  ;;  %v1526_v6 = vrot.slane %v1525_v35, 4 }
 0x1e6   : > { %v1519_v43 = vrot.slane %v1518_v32, 2  ;;  %v1625_v2 = vrot.slane %v1624_v63, 2  ;;  %v1785_v62 = vrot.slane %v1784_v42, 2  ;;  %v1998_v53 = vadd.f32 %v1997_v33, %v1996_v17 }
 0x1e7   : > { %v2266_v51 = vadd.f32 %v2265_v37, %v2264_v46  ;;  %v2588_v39 = vadd.f32 %v2587_v14, %v2586_v22  ;;  %v2964_v29 = vadd.f32 %v2963_v15, %v2962_v47  ;;  %v1527_v55 = vadd.f32 %v1526_v6, %v1525_v35  ;;  %v8580_v37 = vld [vmem:[#allocation22_spill] sm:$0xff] }
 0x1e8   : > { %v1520_v7 = vadd.f32 %v1519_v43, %v1518_v32  ;;  %v1626_v10 = vadd.f32 %v1625_v2, %v1624_v63  ;;  %v1786_v18 = vadd.f32 %v1785_v62, %v1784_v42  ;;  %v1999_v24 = vrot.slane %v1998_v53, 2 }
 0x1e9   : > { %v2267_v52 = vrot.slane %v2266_v51, 2  ;;  %v2589_v56 = vrot.slane %v2588_v39, 2  ;;  %v2965_v16 = vrot.slane %v2964_v29, 2  ;;  %v1528_v58 = vrot.slane %v1527_v55, 2 }
 0x1ea   : > { %v1521_v57 = vrot.slane %v1520_v7, 1  ;;  %v1627_v9 = vrot.slane %v1626_v10, 1  ;;  %v1787_v31 = vrot.slane %v1786_v18, 1  ;;  %v2000_v23 = vadd.f32 %v1999_v24, %v1998_v53  ;;  %v1207_v24 = vpop.f32.mrf.mxu0 }
 0x1eb   : > { %v2268_v40 = vadd.f32 %v2267_v52, %v2266_v51  ;;  %v2590_v8 = vadd.f32 %v2589_v56, %v2588_v39  ;;  %v2966_v41 = vadd.f32 %v2965_v16, %v2964_v29  ;;  %v1529_v17 = vadd.f32 %v1528_v58, %v1527_v55  ;;  %v8581_v55 = vld [vmem:[#allocation28_spill] sm:$0xff]  ;;  %v8585_v16 = vld [vmem:[#allocation42_spill] sm:$0xff] }
 0x1ec   : > { %v1522_v46 = vadd.f32 %v1521_v57, %v1520_v7  ;;  %v1628_v14 = vadd.f32 %v1627_v9, %v1626_v10  ;;  %v1788_v15 = vadd.f32 %v1787_v31, %v1786_v18  ;;  %v2001_v6 = vrot.slane %v2000_v23, 1  ;;  %v8582_v10 = vld [vmem:[#allocation35_spill] sm:$0xff]  ;;  %v8586_v57 = vld [vmem:[#allocation49_spill] sm:$0xff] }
 0x1ed   : > { %v2269_v22 = vrot.slane %v2268_v40, 1  ;;  %v2591_v2 = vrot.slane %v2590_v8, 1  ;;  %v2967_v62 = vrot.slane %v2966_v41, 1  ;;  %v1530_v47 = vrot.slane %v1529_v17, 1 }
 0x1ee   : > { %v5843_v35 = vmul.f32 0.35355338, %v1522_v46  ;;  %v5845_v32 = vmul.f32 0.35355338, %v1628_v14  ;;  %v5847_v63 = vmul.f32 0.35355338, %v1788_v15  ;;  %v2002_v42 = vadd.f32 %v2001_v6, %v2000_v23 }
 0x1ef   : > { %v2270_v53 = vadd.f32 %v2269_v22, %v2268_v40  ;;  %v5849_v51 = vadd.f32 %v2591_v2, %v2590_v8  ;;  %v5851_v39 = vadd.f32 %v2967_v62, %v2966_v41  ;;  %v1531_v29 = vadd.f32 %v1530_v47, %v1529_v17  ;;  %v8587_v8 = vld [vmem:[#allocation55_spill] sm:$0xff]  ;;  %v8589_v6 = vld [vmem:[#allocation17_spill] sm:$0xff] }
 0x1f0   : > { %8575 = vst [vmem:[#allocation56_spill] sm:$0xff] %v5845_v32  ;;  %8576 = vst [vmem:[#allocation57_spill] sm:$0xff] %v5847_v63  ;;  %v5853_v33 = vmul.f32 0.35355338, %v2002_v42  ;;  %v1619_v43 = vmul.f32 %v5827_v45, %v8580_v37  ;;  %v1779_v7 = vmul.f32 %v5827_v45, %v8581_v55  ;;  %v1993_v18 = vmul.f32 %v5827_v45, %v8582_v10  ;;  %v8588_v14 = vld [vmem:[#allocation11_spill] sm:$0xff] }
 0x1f1   : > { %8577 = vst [vmem:[#allocation58_spill] sm:$0xff] %v5849_v51  ;;  %8578 = vst [vmem:[#allocation59_spill] sm:$0xff] %v5851_v39  ;;  %v5861_v52 = vmul.f32 0.35355338, %v2270_v53  ;;  %v5863_v56 = vmul.f32 0.35355338, %v1531_v29  ;;  %v2261_v58 = vmul.f32 %v5827_v45, %v8585_v16  ;;  %v2583_v9 = vmul.f32 %v5827_v45, %v8586_v57 }
 0x1f2   : > { %8579 = vst [vmem:[#allocation60_spill] sm:$0xff] %v5853_v33  ;;  %v1631_v31 = vadd.f32 %v5815_v34, %v1619_v43  ;;  %v1791_v23 = vadd.f32 %v5822_v44, %v1779_v7  ;;  %v2005_v40 = vadd.f32 %v5829_v54, %v1993_v18  ;;  %v2959_v41 = vmul.f32 %v5827_v45, %v8587_v8  ;;  %v8590_v42 = vld [vmem:[#allocation23_spill] sm:$0xff]  ;;  %v8591_v45 = vld [vmem:[#allocation29_spill] sm:$0xff]  ;;  %v1209_v18 = vpop.f32.mrf.mxu0 }
 0x1f3   : > { %8583 = vst [vmem:[#allocation22_spill] sm:$0xff] %v5861_v52  ;;  %8584 = vst [vmem:[#allocation61_spill] sm:$0xff] %v5863_v56  ;;  %v2273_v17 = vadd.f32 %v5831_v30, %v2261_v58  ;;  %v2595_v46 = vadd.f32 %v5833_v0, %v2583_v9  ;;  %v5877_v15 = vmul.f32 %v1207_v24, %v8588_v14  ;;  %v8592_v14 = vld [vmem:[#allocation36_spill] sm:$0xff]  ;;  %v8593_v51 = vld [vmem:[#allocation43_spill] sm:$0xff] }
 0x1f4   : > { %v5880_v22 = vmul.f32 %v1207_v24, %v8589_v6  ;;  %v1632_v2 = vrot.slane %v1631_v31, 4  ;;  %v1792_v62 = vrot.slane %v1791_v23, 4  ;;  %v2006_v34 = vrot.slane %v2005_v40, 4 }
 0x1f5   : > { %v2971_v44 = vadd.f32 %v5835_v1, %v2959_v41  ;;  %v2274_v47 = vrot.slane %v2273_v17, 4  ;;  %v2596_v54 = vrot.slane %v2595_v46, 4  ;;  %v1800_v53 = vmul.f32 %v1207_v24, %v8590_v42  ;;  %v8594_v42 = vld [vmem:[#allocation50_spill] sm:$0xff] }
 0x1f6   : > { %v2014_v29 = vmul.f32 %v1207_v24, %v8591_v45  ;;  %v1633_v30 = vadd.f32 %v1632_v2, %v1631_v31  ;;  %v1793_v43 = vadd.f32 %v1792_v62, %v1791_v23  ;;  %v2007_v0 = vadd.f32 %v2006_v34, %v2005_v40  ;;  %v8595_v45 = vld [vmem:[#allocation12_spill] sm:$0xff]  ;;  %v8596_v34 = vld [vmem:[#allocation18_spill] sm:$0xff] }
 0x1f7   : > { %v2972_v7 = vrot.slane %v2971_v44, 4  ;;  %v2275_v58 = vadd.f32 %v2274_v47, %v2273_v17  ;;  %v2597_v9 = vadd.f32 %v2596_v54, %v2595_v46  ;;  %v2282_v39 = vmul.f32 %v1207_v24, %v8592_v14  ;;  %v8597_v54 = vld [vmem:[#allocation24_spill] sm:$0xff]  ;;  %v1211_v14 = vpop.f32.mrf.mxu0 }
 0x1f8   : > { %v2604_v52 = vmul.f32 %v1207_v24, %v8593_v51  ;;  %v1634_v33 = vrot.slane %v1633_v30, 2  ;;  %v1794_v63 = vrot.slane %v1793_v43, 2  ;;  %v2008_v1 = vrot.slane %v2007_v0, 2 }
 0x1f9   : > { %v2973_v41 = vadd.f32 %v2972_v7, %v2971_v44  ;;  %v2276_v32 = vrot.slane %v2275_v58, 2  ;;  %v2598_v6 = vrot.slane %v2597_v9, 2  ;;  %v2980_v8 = vmul.f32 %v1207_v24, %v8594_v42  ;;  %v8598_v24 = vld [vmem:[#allocation30_spill] sm:$0xff] }
 0x1fa   : > { %v1535_v31 = vmul.f32 %v1209_v18, %v8595_v45  ;;  %v1635_v23 = vadd.f32 %v1634_v33, %v1633_v30  ;;  %v1795_v40 = vadd.f32 %v1794_v63, %v1793_v43  ;;  %v2009_v2 = vadd.f32 %v2008_v1, %v2007_v0  ;;  %v8599_v45 = vld [vmem:[#allocation37_spill] sm:$0xff] }
 0x1fb   : > { %v2974_v62 = vrot.slane %v2973_v41, 2  ;;  %v2277_v17 = vadd.f32 %v2276_v32, %v2275_v58  ;;  %v2599_v46 = vadd.f32 %v2598_v6, %v2597_v9  ;;  %v1641_v47 = vmul.f32 %v1209_v18, %v8596_v34  ;;  %v8601_v58 = vld [vmem:[#allocation44_spill] sm:$0xff] }
 0x1fc   : > { %v1801_v51 = vmul.f32 %v1209_v18, %v8597_v54  ;;  %v1636_v56 = vrot.slane %v1635_v23, 1  ;;  %v1796_v57 = vrot.slane %v1795_v40, 1  ;;  %v2010_v44 = vrot.slane %v2009_v2, 1  ;;  %v1213_v54 = vpop.f32.mrf.mxu0 }
 0x1fd   : > { %v2975_v7 = vadd.f32 %v2974_v62, %v2973_v41  ;;  %v2278_v16 = vrot.slane %v2277_v17, 1  ;;  %v2600_v10 = vrot.slane %v2599_v46, 1  ;;  %v2015_v42 = vmul.f32 %v1209_v18, %v8598_v24 }
 0x1fe   : > { %v2283_v33 = vmul.f32 %v1209_v18, %v8599_v45  ;;  %v1637_v63 = vadd.f32 %v1636_v56, %v1635_v23  ;;  %v1797_v30 = vadd.f32 %v1796_v57, %v1795_v40  ;;  %v2011_v43 = vadd.f32 %v2010_v44, %v2009_v2  ;;  %v8607_v57 = vld [vmem:[#allocation13_spill] sm:$0xff] }
 0x1ff   : > { %v2976_v32 = vrot.slane %v2975_v7, 1  ;;  %v2279_v6 = vadd.f32 %v2278_v16, %v2277_v17  ;;  %v5893_v0 = vadd.f32 %v2600_v10, %v2599_v46  ;;  %v2605_v9 = vmul.f32 %v1209_v18, %v8601_v58  ;;  %v8608_v16 = vld [vmem:[#allocation19_spill] sm:$0xff]  ;;  %v8609_v40 = vld [vmem:[#allocation25_spill] sm:$0xff] }
 0x200   : > { %v2981_v1 = vmul.f32 %v1209_v18, %v5764_v25  ;;  %v5897_v34 = vmul.f32 0.35355338, %v1637_v63  ;;  %v5899_v41 = vmul.f32 0.35355338, %v1797_v30  ;;  %v5901_v62 = vmul.f32 0.35355338, %v2011_v43 }
 0x201   : > { %8600 = vst [vmem:[#allocation11_spill] sm:$0xff] %v5893_v0  ;;  %v5903_v24 = vadd.f32 %v2976_v32, %v2975_v7  ;;  %v5905_v56 = vmul.f32 0.35355338, %v2279_v6  ;;  %v1536_v23 = vmul.f32 %v1211_v14, %v8607_v57  ;;  %v1642_v10 = vmul.f32 %v1211_v14, %v8608_v16  ;;  %v8610_v17 = vld [vmem:[#allocation31_spill] sm:$0xff]  ;;  %v8611_v18 = vld [vmem:[#allocation38_spill] sm:$0xff]  ;;  %v8612_v63 = vld [vmem:[#allocation45_spill] sm:$0xff]  ;;  %v1217_v57 = vpop.f32.mrf.mxu0 }
 0x202   : > { %8602 = vst [vmem:[#allocation12_spill] sm:$0xff] %v5897_v34  ;;  %8603 = vst [vmem:[#allocation62_spill] sm:$0xff] %v5899_v41  ;;  %v1802_v2 = vmul.f32 %v1211_v14, %v8609_v40  ;;  %v2016_v46 = vmul.f32 %v1211_v14, %v8610_v17  ;;  %v2284_v44 = vmul.f32 %v1211_v14, %v8611_v18 }
 0x203   : > { %8604 = vst [vmem:[#allocation63_spill] sm:$0xff] %v5901_v62  ;;  %8605 = vst [vmem:[#allocation64_spill] sm:$0xff] %v5903_v24  ;;  %v2606_v0 = vmul.f32 %v1211_v14, %v8612_v63  ;;  %v2982_v30 = vmul.f32 %v1211_v14, %v5766_v26  ;;  %v1542_v43 = vadd.f32 %v1536_v23, %v5877_v15 }
 0x204   : > { %8606 = vst [vmem:[#allocation65_spill] sm:$0xff] %v5905_v56  ;;  %v1648_v7 = vadd.f32 %v1642_v10, %v5880_v22  ;;  %v1808_v32 = vadd.f32 %v1802_v2, %v1800_v53  ;;  %v1537_v6 = vmul.f32 %v1213_v54, %v5672_v36  ;;  %v2022_v24 = vadd.f32 %v2016_v46, %v2014_v29  ;;  %v8613_v53 = vld [vmem:[#allocation14_spill] sm:$0xff] }
 0x205   : > { %v2290_v56 = vadd.f32 %v2284_v44, %v2282_v39  ;;  %v2612_v62 = vadd.f32 %v2606_v0, %v2604_v52  ;;  %v2988_v41 = vadd.f32 %v2982_v30, %v2980_v8  ;;  %v1643_v17 = vmul.f32 %v1213_v54, %v5688_v48  ;;  %v1219_v8 = vpop.f32.mrf.mxu0 }
 0x206   : > { %v1551_v34 = vadd.f32 %v1537_v6, %v1535_v31  ;;  %v1803_v18 = vmul.f32 %v1213_v54, %v5704_v59  ;;  %v2017_v63 = vmul.f32 %v1213_v54, %v5720_v3  ;;  %v2285_v14 = vmul.f32 %v1213_v54, %v5736_v11 }
 0x207   : > { %v2607_v15 = vmul.f32 %v1213_v54, %v5752_v19  ;;  %v2983_v22 = vmul.f32 %v1213_v54, %v5768_v27  ;;  %v1538_v36 = vmul.f32 %v1217_v57, %v8613_v53  ;;  %v1657_v23 = vadd.f32 %v1643_v17, %v1641_v47  ;;  %v8614_v53 = vld [vmem:[#allocation53_spill] sm:$0xff] }
 0x208   : > { %v1817_v29 = vadd.f32 %v1803_v18, %v1801_v51  ;;  %v2031_v39 = vadd.f32 %v2017_v63, %v2015_v42  ;;  %v1644_v52 = vmul.f32 %v1217_v57, %v5690_v49  ;;  %v2299_v31 = vadd.f32 %v2285_v14, %v2283_v33  ;;  %v1221_v18 = vpop.f32.mrf.mxu0 }
 0x209   : > { %v2621_v0 = vadd.f32 %v2607_v15, %v2605_v9  ;;  %v2997_v10 = vadd.f32 %v2983_v22, %v2981_v1  ;;  %v1543_v2 = vadd.f32 %v1542_v43, %v1538_v36  ;;  %v1804_v44 = vmul.f32 %v1217_v57, %v5706_v60  ;;  %v8616_v36 = vld [vmem:[#allocation21_spill] sm:$0xff] }
 0x20a   : > { %v1649_v46 = vadd.f32 %v1648_v7, %v1644_v52  ;;  %v2018_v30 = vmul.f32 %v1217_v57, %v5722_v4  ;;  %v2286_v6 = vmul.f32 %v1217_v57, %v5738_v12  ;;  %v2608_v54 = vmul.f32 %v1217_v57, %v5754_v20 }
 0x20b   : > { %v2984_v47 = vmul.f32 %v1217_v57, %v5770_v28  ;;  %v1539_v51 = vmul.f32 %v1219_v8, %v5676_v38  ;;  %v1645_v42 = vmul.f32 %v1219_v8, %v5692_v50  ;;  %v1809_v17 = vadd.f32 %v1808_v32, %v1804_v44  ;;  %v8617_v44 = vld [vmem:[#allocation27_spill] sm:$0xff] }
 0x20c   : > { %v2023_v33 = vadd.f32 %v2022_v24, %v2018_v30  ;;  %v2291_v9 = vadd.f32 %v2290_v56, %v2286_v6  ;;  %v1805_v1 = vmul.f32 %v1219_v8, %v5708_v61  ;;  %v2613_v63 = vadd.f32 %v2612_v62, %v2608_v54  ;;  %v8615_v24 = vld [vmem:[#allocation15_spill] sm:$0xff]  ;;  %v5951_v6 = vpop.f32.mrf.mxu0 }
 0x20d   : > { %v2989_v43 = vadd.f32 %v2988_v41, %v2984_v47  ;;  %v1552_v7 = vadd.f32 %v1551_v34, %v1539_v51  ;;  %v5933_v14 = vadd.f32 %v1657_v23, %v1645_v42  ;;  %v2019_v22 = vmul.f32 %v1219_v8, %v5724_v5 }
 0x20e   : > { %v5935_v15 = vadd.f32 %v1817_v29, %v1805_v1  ;;  %v2287_v57 = vmul.f32 %v1219_v8, %v5740_v13  ;;  %v2609_v38 = vmul.f32 %v1219_v8, %v5756_v21  ;;  %v2985_v32 = vmul.f32 %v1219_v8, %v8614_v53  ;;  %v8618_v29 = vld [vmem:[#allocation34_spill] sm:$0xff]  ;;  %v8619_v1 = vld [vmem:[#allocation41_spill] sm:$0xff] }
 0x20f   : > { %v1540_v56 = vmul.f32 %v1221_v18, %v8615_v24  ;;  %v1646_v52 = vmul.f32 %v1221_v18, %v8616_v36  ;;  %v1806_v62 = vmul.f32 %v1221_v18, %v8617_v44  ;;  %v5944_v41 = vadd.f32 %v2031_v39, %v2019_v22  ;;  %v8620_v36 = vld [vmem:[#allocation48_spill] sm:$0xff]  ;;  %v8621_v39 = vld [vmem:[#allocation54_spill] sm:$0xff] }
 0x210   : > { %v5946_v34 = vadd.f32 %v2299_v31, %v2287_v57  ;;  %v5948_v23 = vadd.f32 %v2621_v0, %v2609_v38  ;;  %v2020_v30 = vmul.f32 %v1221_v18, %v8618_v29  ;;  %v5953_v54 = vadd.f32 %v2997_v10, %v2985_v32  ;;  %v8622_v38 = vld [vmem:[#allocation16_spill] sm:$0xff] }
 0x211   : > { %v1544_v47 = vadd.f32 %v1543_v2, %v1540_v56  ;;  %v1650_v8 = vadd.f32 %v1649_v46, %v1646_v52  ;;  %v1810_v51 = vadd.f32 %v1809_v17, %v1806_v62  ;;  %v2288_v24 = vmul.f32 %v1221_v18, %v8619_v1 }
 0x212   : > { %v2024_v42 = vadd.f32 %v2023_v33, %v2020_v30  ;;  %v2610_v44 = vmul.f32 %v1221_v18, %v8620_v36  ;;  %v2986_v22 = vmul.f32 %v1221_v18, %v8621_v39  ;;  %v1541_v29 = vmul.f32 %v5951_v6, %v8622_v38 }
 0x213   : > { %v1545_v31 = vrot.slane %v1544_v47, 4  ;;  %v1651_v57 = vrot.slane %v1650_v8, 4  ;;  %v1811_v0 = vrot.slane %v1810_v51, 4  ;;  %v2292_v21 = vadd.f32 %v2291_v9, %v2288_v24 }
 0x214   : > { %v2025_v53 = vrot.slane %v2024_v42, 4  ;;  %v2614_v10 = vadd.f32 %v2613_v63, %v2610_v44  ;;  %v2990_v32 = vadd.f32 %v2989_v43, %v2986_v22  ;;  %v1553_v33 = vadd.f32 %v1552_v7, %v1541_v29 }
 0x215   : > { %v1546_v2 = vadd.f32 %v1545_v31, %v1544_v47  ;;  %v1652_v46 = vadd.f32 %v1651_v57, %v1650_v8  ;;  %v1812_v17 = vadd.f32 %v1811_v0, %v1810_v51  ;;  %v2293_v52 = vrot.slane %v2292_v21, 4 }
 0x216   : > { %v2026_v56 = vadd.f32 %v2025_v53, %v2024_v42  ;;  %v2615_v62 = vrot.slane %v2614_v10, 4  ;;  %v2991_v30 = vrot.slane %v2990_v32, 4  ;;  %v1554_v1 = vrot.slane %v1553_v33, 4 }
 0x217   : > { %v1547_v36 = vrot.slane %v1546_v2, 2  ;;  %v1653_v18 = vrot.slane %v1652_v46, 2  ;;  %v1813_v39 = vrot.slane %v1812_v17, 2  ;;  %v2294_v5 = vadd.f32 %v2293_v52, %v2292_v21 }
 0x218   : > { %v2027_v13 = vrot.slane %v2026_v56, 2  ;;  %v2616_v61 = vadd.f32 %v2615_v62, %v2614_v10  ;;  %v2992_v38 = vadd.f32 %v2991_v30, %v2990_v32  ;;  %v1555_v43 = vadd.f32 %v1554_v1, %v1553_v33 }
 0x219   : > { %v1548_v50 = vadd.f32 %v1547_v36, %v1546_v2  ;;  %v1654_v9 = vadd.f32 %v1653_v18, %v1652_v46  ;;  %v1814_v63 = vadd.f32 %v1813_v39, %v1812_v17  ;;  %v2295_v47 = vrot.slane %v2294_v5, 2 }
 0x21a   : > { %v2028_v44 = vadd.f32 %v2027_v13, %v2026_v56  ;;  %v2617_v8 = vrot.slane %v2616_v61, 2  ;;  %v2993_v7 = vrot.slane %v2992_v38, 2  ;;  %v1556_v42 = vrot.slane %v1555_v43, 2 }
 0x21b   : > { %v1549_v53 = vrot.slane %v1548_v50, 1  ;;  %v1655_v29 = vrot.slane %v1654_v9, 1  ;;  %v1815_v51 = vrot.slane %v1814_v63, 1  ;;  %v2296_v22 = vadd.f32 %v2295_v47, %v2294_v5  ;;  %v8630_v47 = vld [vmem:[#allocation49_spill] sm:$0xff] }
 0x21c   : > { %v2029_v24 = vrot.slane %v2028_v44, 1  ;;  %v2618_v31 = vadd.f32 %v2617_v8, %v2616_v61  ;;  %v2994_v57 = vadd.f32 %v2993_v7, %v2992_v38  ;;  %v1557_v32 = vadd.f32 %v1556_v42, %v1555_v43  ;;  %v8629_v43 = vld [vmem:[#allocation42_spill] sm:$0xff] }
 0x21d   : > { %v1550_v0 = vadd.f32 %v1549_v53, %v1548_v50  ;;  %v1656_v21 = vadd.f32 %v1655_v29, %v1654_v9  ;;  %v1816_v10 = vadd.f32 %v1815_v51, %v1814_v63  ;;  %v2297_v2 = vrot.slane %v2296_v22, 1  ;;  %v8628_v9 = vld [vmem:[#allocation35_spill] sm:$0xff] }
 0x21e   : > { %v2030_v36 = vadd.f32 %v2029_v24, %v2028_v44  ;;  %v2619_v39 = vrot.slane %v2618_v31, 1  ;;  %v2995_v1 = vrot.slane %v2994_v57, 1  ;;  %v1647_v33 = vmul.f32 %v5951_v6, %v8580_v37 }
 0x21f   : > { %v1560_v13 = vmul.f32 0.35355338, %v1550_v0  ;;  %v5960_v46 = vmul.f32 0.35355338, %v1656_v21  ;;  %v5962_v17 = vmul.f32 0.35355338, %v1816_v10  ;;  %v2298_v61 = vadd.f32 %v2297_v2, %v2296_v22 }
 0x220   : > { %v5966_v56 = vmul.f32 0.35355338, %v2030_v36  ;;  %v5968_v5 = vadd.f32 %v2619_v39, %v2618_v31  ;;  %v5970_v50 = vadd.f32 %v2995_v1, %v2994_v57  ;;  %v1558_v62 = vrot.slane %v1557_v32, 1  ;;  %v1227_v31 = vpop.f32.mrf.mxu0 }
 0x221   : > { %8623 = vst [vmem:[#allocation13_spill] sm:$0xff] %v5962_v17  ;;  %v1562_v52 = vmax.f32 %v5843_v35, %v1560_v13  ;;  %v1659_v30 = vadd.f32 %v5933_v14, %v1647_v33  ;;  %v1807_v18 = vmul.f32 %v5951_v6, %v8581_v55  ;;  %v5976_v38 = vmul.f32 0.35355338, %v2298_v61 }
 0x222   : > { %8624 = vst [vmem:[#allocation19_spill] sm:$0xff] %v5966_v56  ;;  %8625 = vst [vmem:[#allocation14_spill] sm:$0xff] %v5968_v5  ;;  %v2021_v63 = vmul.f32 %v5951_v6, %v8628_v9  ;;  %v2289_v44 = vmul.f32 %v5951_v6, %v8629_v43  ;;  %v2611_v8 = vmul.f32 %v5951_v6, %v8630_v47  ;;  %v1229_v61 = vpop.f32.mrf.mxu0  ;;  %v8649_v5 = vld [vmem:[#allocation38_spill] sm:$0xff] }
 0x223   : > { %8626 = vst [vmem:[#allocation15_spill] sm:$0xff] %v5970_v50  ;;  %8627 = vst [vmem:[#allocation16_spill] sm:$0xff] %v5976_v38  ;;  %v1564_v7 = vsub.f32 %v5843_v35, %v1562_v52  ;;  %v1570_v53 = vsub.f32 %v1560_v13, %v1562_v52  ;;  %v1559_v29 = vadd.f32 %v1558_v62, %v1557_v32  ;;  %v1660_v51 = vrot.slane %v1659_v30, 4  ;;  %v8631_v32 = vld [vmem:[#allocation61_spill] sm:$0xff] }
 0x224   : > { %v1819_v14 = vadd.f32 %v5935_v15, %v1807_v18  ;;  %v2033_v42 = vadd.f32 %v5944_v41, %v2021_v63  ;;  %v2301_v24 = vadd.f32 %v5946_v34, %v2289_v44  ;;  %v2623_v22 = vadd.f32 %v5948_v23, %v2611_v8  ;;  %v8632_v15 = vld [vmem:[#allocation55_spill] sm:$0xff] }
 0x225   : > { %v1566_v57 = vmul.f32 1.442695, %v1564_v7  ;;  %v1572_v0 = vmul.f32 1.442695, %v1570_v53  ;;  %v1561_v21 = vmul.f32 0.35355338, %v1559_v29  ;;  %v1661_v10 = vadd.f32 %v1660_v51, %v1659_v30 }
 0x226   : > { %v1820_v36 = vrot.slane %v1819_v14, 4  ;;  %v2034_v2 = vrot.slane %v2033_v42, 4  ;;  %v2302_v39 = vrot.slane %v2301_v24, 4  ;;  %v2624_v35 = vrot.slane %v2623_v22, 4 }
 0x227   : > { %5132 = vpow2.f32 %v1566_v57  ;;  %v1563_v1 = vmax.f32 %v8631_v32, %v1561_v21  ;;  %v1662_v13 = vrot.slane %v1661_v10, 2  ;;  %v2987_v41 = vmul.f32 %v5951_v6, %v8632_v15 }
 0x228   : > { %5134 = vpow2.f32 %v1572_v0  ;;  %v1821_v34 = vadd.f32 %v1820_v36, %v1819_v14  ;;  %v2035_v33 = vadd.f32 %v2034_v2, %v2033_v42  ;;  %v2303_v23 = vadd.f32 %v2302_v39, %v2301_v24  ;;  %v1231_v24 = vpop.f32.mrf.mxu0 }
 0x229   : > { %v1565_v52 = vsub.f32 %v8631_v32, %v1563_v1  ;;  %v1571_v62 = vsub.f32 %v1561_v21, %v1563_v1  ;;  %v1663_v30 = vadd.f32 %v1662_v13, %v1661_v10  ;;  %v2625_v18 = vadd.f32 %v2624_v35, %v2623_v22  ;;  %v8633_v21 = vld [vmem:[#allocation17_spill] sm:$0xff]  ;;  %v8634_v13 = vld [vmem:[#allocation23_spill] sm:$0xff] }
 0x22a   : > { %v1822_v63 = vrot.slane %v1821_v34, 2  ;;  %v2036_v44 = vrot.slane %v2035_v33, 2  ;;  %v2304_v8 = vrot.slane %v2303_v23, 2  ;;  %v2999_v7 = vadd.f32 %v5953_v54, %v2987_v41 }
 0x22b   : > { %v1568_v53 = vmul.f32 1.442695, %v1565_v52  ;;  %v1574_v29 = vmul.f32 1.442695, %v1571_v62  ;;  %v1664_v51 = vrot.slane %v1663_v30, 1  ;;  %v2626_v57 = vrot.slane %v2625_v18, 2 }
 0x22c   : > { %v1823_v6 = vadd.f32 %v1822_v63, %v1821_v34  ;;  %v2037_v0 = vadd.f32 %v2036_v44, %v2035_v33  ;;  %v2305_v14 = vadd.f32 %v2304_v8, %v2303_v23  ;;  %v3000_v42 = vrot.slane %v2999_v7, 4  ;;  %v8635_v52 = vld [vmem:[#allocation29_spill] sm:$0xff]  ;;  %v1233_v63 = vpop.f32.mrf.mxu0  ;;  %v8637_v44 = vld [vmem:[#allocation36_spill] sm:$0xff] }
 0x22d   : > { %5136 = vpow2.f32 %v1568_v53  ;;  %v1665_v36 = vadd.f32 %v1664_v51, %v1663_v30  ;;  %v2627_v2 = vadd.f32 %v2626_v57, %v2625_v18  ;;  %v1668_v10 = vmul.f32 %v1227_v31, %v8633_v21  ;;  %v8638_v53 = vld [vmem:[#allocation43_spill] sm:$0xff]  ;;  %v8644_v21 = vld [vmem:[#allocation24_spill] sm:$0xff] }
 0x22e   : > { %5138 = vpow2.f32 %v1574_v29  ;;  %v1824_v22 = vrot.slane %v1823_v6, 1  ;;  %v2038_v39 = vrot.slane %v2037_v0, 1  ;;  %v2306_v35 = vrot.slane %v2305_v14, 1 }
 0x22f   : > { %v5995_v32 = vmul.f32 0.35355338, %v1665_v36  ;;  %v2628_v54 = vrot.slane %v2627_v2, 1  ;;  %v3001_v1 = vadd.f32 %v3000_v42, %v2999_v7  ;;  %v1828_v41 = vmul.f32 %v1227_v31, %v8634_v13  ;;  %v8642_v42 = vld [vmem:[#allocation50_spill] sm:$0xff] }
 0x230   : > { %v1825_v34 = vadd.f32 %v1824_v22, %v1823_v6  ;;  %v2039_v33 = vadd.f32 %v2038_v39, %v2037_v0  ;;  %v2307_v23 = vadd.f32 %v2306_v35, %v2305_v14  ;;  %v2042_v62 = vmul.f32 %v1227_v31, %v8635_v52  ;;  %v8643_v14 = vld [vmem:[#allocation18_spill] sm:$0xff] }
 0x231   : > { %v5999_v30 = vadd.f32 %v2628_v54, %v2627_v2  ;;  %v3002_v18 = vrot.slane %v3001_v1, 2  ;;  %v2310_v8 = vmul.f32 %v1227_v31, %v8637_v44  ;;  %v2632_v29 = vmul.f32 %v1227_v31, %v8638_v53  ;;  %v8645_v2 = vld [vmem:[#allocation30_spill] sm:$0xff] }
 0x232   : > { %v6003_v51 = vmul.f32 0.35355338, %v1825_v34  ;;  %v6005_v57 = vmul.f32 0.35355338, %v2039_v33  ;;  %v6007_v7 = vmul.f32 0.35355338, %v2307_v23  ;;  %v3008_v6 = vmul.f32 %v1227_v31, %v8642_v42 }
 0x233   : > { %8636 = vst [vmem:[#allocation61_spill] sm:$0xff] %v5999_v30  ;;  %v3003_v0 = vadd.f32 %v3002_v18, %v3001_v1  ;;  %v1669_v36 = vmul.f32 %v1229_v61, %v8643_v14  ;;  %v1829_v22 = vmul.f32 %v1229_v61, %v8644_v21  ;;  %v2043_v39 = vmul.f32 %v1229_v61, %v8645_v2  ;;  %v1237_v30 = vpop.f32.mrf.mxu0  ;;  %v8648_v18 = vld [vmem:[#allocation31_spill] sm:$0xff] }
 0x234   : > { %8639 = vst [vmem:[#allocation17_spill] sm:$0xff] %v6003_v51  ;;  %8640 = vst [vmem:[#allocation23_spill] sm:$0xff] %v6005_v57  ;;  %v6013_v35 = vpop.eup %5132  ;;  %v2311_v54 = vmul.f32 %v1229_v61, %v8599_v45  ;;  %v2633_v34 = vmul.f32 %v1229_v61, %v8601_v58  ;;  %v3009_v33 = vmul.f32 %v1229_v61, %v5764_v25 }
 0x235   : > { %8641 = vst [vmem:[#allocation29_spill] sm:$0xff] %v6007_v7  ;;  %8646 = vst [vmem:[#allocation36_spill] sm:$0xff] %v6013_v35  ;;  %v1670_v23 = vmul.f32 %v1231_v24, %v8608_v16  ;;  %v6019_v50 = vpop.eup %5134  ;;  %v3004_v31 = vrot.slane %v3003_v0, 1  ;;  %v1830_v1 = vmul.f32 %v1231_v24, %v8609_v40  ;;  %v2044_v14 = vmul.f32 %v1231_v24, %v8648_v18  ;;  %v8650_v35 = vld [vmem:[#allocation45_spill] sm:$0xff]  ;;  %v1239_v18 = vpop.f32.mrf.mxu0 }
 0x236   : > { %8647 = vst [vmem:[#allocation43_spill] sm:$0xff] %v6019_v50  ;;  %v2312_v7 = vmul.f32 %v1231_v24, %v8649_v5  ;;  %v2634_v57 = vmul.f32 %v1231_v24, %v8650_v35  ;;  %v3010_v51 = vmul.f32 %v1231_v24, %v5766_v26  ;;  %v1671_v56 = vmul.f32 %v1233_v63, %v5688_v48 }
 0x237   : > { %v1676_v38 = vadd.f32 %v1670_v23, %v1668_v10  ;;  %v6027_v61 = vadd.f32 %v3004_v31, %v3003_v0  ;;  %v1836_v16 = vadd.f32 %v1830_v1, %v1828_v41  ;;  %v2050_v17 = vadd.f32 %v2044_v14, %v2042_v62  ;;  %v1241_v1 = vpop.f32.mrf.mxu0 }
 0x238   : > { %v2318_v25 = vadd.f32 %v2312_v7, %v2310_v8  ;;  %v2640_v50 = vadd.f32 %v2634_v57, %v2632_v29  ;;  %v3016_v58 = vadd.f32 %v3010_v51, %v3008_v6  ;;  %v1685_v45 = vadd.f32 %v1671_v56, %v1669_v36 }
 0x239   : > { %8651 = vst [vmem:[#allocation50_spill] sm:$0xff] %v6027_v61  ;;  %v1831_v40 = vmul.f32 %v1233_v63, %v5704_v59  ;;  %v2045_v5 = vmul.f32 %v1233_v63, %v5720_v3  ;;  %v2313_v10 = vmul.f32 %v1233_v63, %v5736_v11  ;;  %v2635_v23 = vmul.f32 %v1233_v63, %v5752_v19 }
 0x23a   : > { %v3011_v24 = vmul.f32 %v1233_v63, %v5768_v27  ;;  %v6034_v48 = vpop.eup %5136  ;;  %v1672_v41 = vmul.f32 %v1237_v30, %v5690_v49  ;;  %v1832_v62 = vmul.f32 %v1237_v30, %v5706_v60  ;;  %v2046_v56 = vmul.f32 %v1237_v30, %v5722_v4 }
 0x23b   : > { %8652 = vst [vmem:[#allocation18_spill] sm:$0xff] %v6034_v48  ;;  %v1845_v0 = vadd.f32 %v1831_v40, %v1829_v22  ;;  %v6039_v8 = vpop.eup %5138  ;;  %v2059_v29 = vadd.f32 %v2045_v5, %v2043_v39  ;;  %v2327_v51 = vadd.f32 %v2313_v10, %v2311_v54  ;;  %v2649_v57 = vadd.f32 %v2635_v23, %v2633_v34  ;;  %v8654_v22 = vld [vmem:[#allocation20_spill] sm:$0xff]  ;;  %v8655_v48 = vld [vmem:[#allocation26_spill] sm:$0xff]  ;;  %v8658_v34 = vld [vmem:[#allocation47_spill] sm:$0xff] }
 0x23c   : > { %8653 = vst [vmem:[#allocation24_spill] sm:$0xff] %v6039_v8  ;;  %v3025_v7 = vadd.f32 %v3011_v24, %v3009_v33  ;;  %v1677_v6 = vadd.f32 %v1676_v38, %v1672_v41  ;;  %v1837_v36 = vadd.f32 %v1836_v16, %v1832_v62  ;;  %v2051_v31 = vadd.f32 %v2050_v17, %v2046_v56  ;;  %v8656_v8 = vld [vmem:[#allocation33_spill] sm:$0xff]  ;;  %v8657_v39 = vld [vmem:[#allocation40_spill] sm:$0xff]  ;;  %v6056_v56 = vpop.f32.mrf.mxu0 }
 0x23d   : > { %v2314_v63 = vmul.f32 %v1237_v30, %v5738_v12  ;;  %v2636_v40 = vmul.f32 %v1237_v30, %v5754_v20  ;;  %v3012_v49 = vmul.f32 %v1237_v30, %v5770_v28  ;;  %v1673_v14 = vmul.f32 %v1239_v18, %v8654_v22  ;;  %v8659_v41 = vld [vmem:[#allocation53_spill] sm:$0xff]  ;;  %v8661_v22 = vld [vmem:[#allocation56_spill] sm:$0xff] }
 0x23e   : > { %v1833_v61 = vmul.f32 %v1239_v18, %v8655_v48  ;;  %v2047_v5 = vmul.f32 %v1239_v18, %v8656_v8  ;;  %v2315_v54 = vmul.f32 %v1239_v18, %v8657_v39  ;;  %v2637_v38 = vmul.f32 %v1239_v18, %v8658_v34  ;;  %v8662_v34 = vld [vmem:[#allocation27_spill] sm:$0xff] }
 0x23f   : > { %v2319_v4 = vadd.f32 %v2318_v25, %v2314_v63  ;;  %v2641_v33 = vadd.f32 %v2640_v50, %v2636_v40  ;;  %v3017_v17 = vadd.f32 %v3016_v58, %v3012_v49  ;;  %v1686_v16 = vadd.f32 %v1685_v45, %v1673_v14  ;;  %v8660_v25 = vld [vmem:[#allocation21_spill] sm:$0xff]  ;;  %v8663_v58 = vld [vmem:[#allocation34_spill] sm:$0xff] }
 0x240   : > { %v1846_v10 = vadd.f32 %v1845_v0, %v1833_v61  ;;  %v6049_v23 = vadd.f32 %v2059_v29, %v2047_v5  ;;  %v6051_v24 = vadd.f32 %v2327_v51, %v2315_v54  ;;  %v6053_v30 = vadd.f32 %v2649_v57, %v2637_v38  ;;  %v8664_v0 = vld [vmem:[#allocation41_spill] sm:$0xff]  ;;  %v8665_v51 = vld [vmem:[#allocation48_spill] sm:$0xff]  ;;  %v8666_v40 = vld [vmem:[#allocation54_spill] sm:$0xff] }
 0x241   : > { %v3013_v62 = vmul.f32 %v1239_v18, %v8659_v41  ;;  %v1674_v63 = vmul.f32 %v1241_v1, %v8660_v25  ;;  %v1834_v50 = vmul.f32 %v1241_v1, %v8662_v34  ;;  %v2048_v45 = vmul.f32 %v1241_v1, %v8663_v58  ;;  %v8667_v34 = vld [vmem:[#allocation12_spill] sm:$0xff] }
 0x242   : > { %v2316_v29 = vmul.f32 %v1241_v1, %v8664_v0  ;;  %v2638_v57 = vmul.f32 %v1241_v1, %v8665_v51  ;;  %v3014_v49 = vmul.f32 %v1241_v1, %v8666_v40  ;;  %v1675_v54 = vmul.f32 %v6056_v56, %v8580_v37 }
 0x243   : > { %v6063_v61 = vadd.f32 %v3025_v7, %v3013_v62  ;;  %v1678_v18 = vadd.f32 %v1677_v6, %v1674_v63  ;;  %v1838_v14 = vadd.f32 %v1837_v36, %v1834_v50  ;;  %v2052_v5 = vadd.f32 %v2051_v31, %v2048_v45 }
 0x244   : > { %v2320_v38 = vadd.f32 %v2319_v4, %v2316_v29  ;;  %v2642_v25 = vadd.f32 %v2641_v33, %v2638_v57  ;;  %v3018_v39 = vadd.f32 %v3017_v17, %v3014_v49  ;;  %v1687_v0 = vadd.f32 %v1686_v16, %v1675_v54 }
 0x245   : > { %v1679_v7 = vrot.slane %v1678_v18, 4  ;;  %v1839_v62 = vrot.slane %v1838_v14, 4  ;;  %v2053_v41 = vrot.slane %v2052_v5, 4  ;;  %v1835_v6 = vmul.f32 %v6056_v56, %v8581_v55 }
 0x246   : > { %v2321_v8 = vrot.slane %v2320_v38, 4  ;;  %v2643_v51 = vrot.slane %v2642_v25, 4  ;;  %v3019_v48 = vrot.slane %v3018_v39, 4  ;;  %v1688_v37 = vrot.slane %v1687_v0, 4 }
 0x247   : > { %v1680_v36 = vadd.f32 %v1679_v7, %v1678_v18  ;;  %v1840_v31 = vadd.f32 %v1839_v62, %v1838_v14  ;;  %v2054_v1 = vadd.f32 %v2053_v41, %v2052_v5  ;;  %v1847_v63 = vadd.f32 %v1846_v10, %v1835_v6  ;;  %v6074_v10 = vpop.f32.mrf.mxu1 }
 0x248   : > { %v2322_v4 = vadd.f32 %v2321_v8, %v2320_v38  ;;  %v2644_v33 = vadd.f32 %v2643_v51, %v2642_v25  ;;  %v3020_v17 = vadd.f32 %v3019_v48, %v3018_v39  ;;  %v1689_v57 = vadd.f32 %v1688_v37, %v1687_v0  ;;  %8668 = vst [vmem:[#allocation30_spill] sm:$0xff] %v6074_v10 }
 0x249   : > { %v1681_v50 = vrot.slane %v1680_v36, 2  ;;  %v1841_v45 = vrot.slane %v1840_v31, 2  ;;  %v2055_v29 = vrot.slane %v2054_v1, 2  ;;  %v1848_v58 = vrot.slane %v1847_v63, 4 }
 0x24a   : > { %v2323_v49 = vrot.slane %v2322_v4, 2  ;;  %v2645_v16 = vrot.slane %v2644_v33, 2  ;;  %v3021_v54 = vrot.slane %v3020_v17, 2  ;;  %v1690_v55 = vrot.slane %v1689_v57, 2 }
 0x24b   : > { %v1682_v40 = vadd.f32 %v1681_v50, %v1680_v36  ;;  %v1842_v28 = vadd.f32 %v1841_v45, %v1840_v31  ;;  %v2056_v20 = vadd.f32 %v2055_v29, %v2054_v1  ;;  %v1849_v5 = vadd.f32 %v1848_v58, %v1847_v63  ;;  %v1247_v50 = vpop.f32.mrf.mxu0  ;;  %v6080_v45 = vpop.f32.mrf.mxu1 }
 0x24c   : > { %v2324_v18 = vadd.f32 %v2323_v49, %v2322_v4  ;;  %v2646_v14 = vadd.f32 %v2645_v16, %v2644_v33  ;;  %v3022_v41 = vadd.f32 %v3021_v54, %v3020_v17  ;;  %v1691_v39 = vadd.f32 %v1690_v55, %v1689_v57  ;;  %8670 = vst [vmem:[#allocation20_spill] sm:$0xff] %v6080_v45 }
 0x24d   : > { %v1683_v8 = vrot.slane %v1682_v40, 1  ;;  %v1843_v51 = vrot.slane %v1842_v28, 1  ;;  %v2057_v48 = vrot.slane %v2056_v20, 1  ;;  %v1850_v7 = vrot.slane %v1849_v5, 2 }
 0x24e   : > { %v2325_v38 = vrot.slane %v2324_v18, 1  ;;  %v2647_v0 = vrot.slane %v2646_v14, 1  ;;  %v3023_v25 = vrot.slane %v3022_v41, 1  ;;  %v1692_v31 = vrot.slane %v1691_v39, 1 }
 0x24f   : > { %v1684_v62 = vadd.f32 %v1683_v8, %v1682_v40  ;;  %v1844_v6 = vadd.f32 %v1843_v51, %v1842_v28  ;;  %v2058_v36 = vadd.f32 %v2057_v48, %v2056_v20  ;;  %v1851_v33 = vadd.f32 %v1850_v7, %v1849_v5 }
 0x250   : > { %v2326_v1 = vadd.f32 %v2325_v38, %v2324_v18  ;;  %v2648_v37 = vadd.f32 %v2647_v0, %v2646_v14  ;;  %v3024_v4 = vadd.f32 %v3023_v25, %v3022_v41  ;;  %v1693_v55 = vadd.f32 %v1692_v31, %v1691_v39  ;;  %v1249_v25 = vpop.f32.mrf.mxu0 }
 0x251   : > { %v1694_v17 = vmul.f32 0.35355338, %v1684_v62  ;;  %v6076_v58 = vmul.f32 0.35355338, %v1844_v6  ;;  %v6078_v63 = vmul.f32 0.35355338, %v2058_v36  ;;  %v2049_v20 = vmul.f32 %v6056_v56, %v8628_v9 }
 0x252   : > { %v6082_v29 = vmul.f32 0.35355338, %v2326_v1  ;;  %v6084_v57 = vmul.f32 0.35355338, %v2648_v37  ;;  %v6086_v28 = vmul.f32 0.35355338, %v3024_v4  ;;  %v8674_v40 = vmax.f32 %v8661_v22, %v5960_v46 }
 0x253   : > { %8669 = vst [vmem:[#allocation45_spill] sm:$0xff] %v6078_v63  ;;  %v1695_v16 = vmul.f32 0.35355338, %v1693_v55  ;;  %v1852_v54 = vrot.slane %v1851_v33, 1  ;;  %v2317_v18 = vmul.f32 %v6056_v56, %v8629_v43  ;;  %v2061_v14 = vadd.f32 %v6049_v23, %v2049_v20  ;;  %v6108_v23 = vpop.f32.mrf.mxu1  ;;  %v1251_v20 = vpop.f32.mrf.mxu0 }
 0x254   : > { %8671 = vst [vmem:[#allocation21_spill] sm:$0xff] %v6082_v29  ;;  %8672 = vst [vmem:[#allocation56_spill] sm:$0xff] %v6084_v57  ;;  %v1698_v49 = vmax.f32 %v8674_v40, %v1694_v17  ;;  %v2639_v41 = vmul.f32 %v6056_v56, %v8630_v47  ;;  %v3015_v5 = vmul.f32 %v6056_v56, %v8632_v15  ;;  %v8707_v29 = vld [vmem:[#allocation27_spill] sm:$0xff] }
 0x255   : > { %8673 = vst [vmem:[#allocation12_spill] sm:$0xff] %v6086_v28  ;;  %v6101_v8 = vmul.f32 %v1247_v50, %v8634_v13  ;;  %v8675_v38 = vmax.f32 %v8667_v34, %v5995_v32  ;;  %8676 = vst [vmem:[#allocation66_spill] sm:$0xff] %v6108_v23  ;;  %v1853_v7 = vadd.f32 %v1852_v54, %v1851_v33  ;;  %v2062_v62 = vrot.slane %v2061_v14, 4 }
 0x256   : > { %v1700_v51 = vsub.f32 %v8661_v22, %v1698_v49  ;;  %v1706_v48 = vsub.f32 %v5960_v46, %v1698_v49  ;;  %v1712_v39 = vsub.f32 %v1694_v17, %v1698_v49  ;;  %v2329_v6 = vadd.f32 %v6051_v24, %v2317_v18  ;;  %v6116_v24 = vpop.f32.mrf.mxu1 }
 0x257   : > { %v1699_v0 = vmax.f32 %v8675_v38, %v1695_v16  ;;  %v2651_v56 = vadd.f32 %v6053_v30, %v2639_v41  ;;  %v6114_v37 = vmul.f32 0.35355338, %v1853_v7  ;;  %v2063_v4 = vadd.f32 %v2062_v62, %v2061_v14  ;;  %8677 = vst [vmem:[#allocation67_spill] sm:$0xff] %v6116_v24 }
 0x258   : > { %v1702_v13 = vmul.f32 1.442695, %v1700_v51  ;;  %v1708_v36 = vmul.f32 1.442695, %v1706_v48  ;;  %v1714_v31 = vmul.f32 1.442695, %v1712_v39  ;;  %v2070_v18 = vmul.f32 %v1247_v50, %v8635_v52  ;;  %v1253_v39 = vpop.f32.mrf.mxu0 }
 0x259   : > { %v1701_v22 = vsub.f32 %v8667_v34, %v1699_v0  ;;  %v1707_v46 = vsub.f32 %v5995_v32, %v1699_v0  ;;  %v1713_v1 = vsub.f32 %v1695_v16, %v1699_v0  ;;  %v2330_v55 = vrot.slane %v2329_v6, 4  ;;  %v6121_v0 = vpop.f32.mrf.mxu1 }
 0x25a   : > { %5140 = vpow2.f32 %v1702_v13  ;;  %v2652_v33 = vrot.slane %v2651_v56, 4  ;;  %v2064_v49 = vrot.slane %v2063_v4, 2  ;;  %v3027_v32 = vadd.f32 %v6063_v61, %v3015_v5  ;;  %8678 = vst [vmem:[#allocation68_spill] sm:$0xff] %v6121_v0 }
 0x25b   : > { %v1704_v17 = vmul.f32 1.442695, %v1701_v22  ;;  %5142 = vpow2.f32 %v1708_v36  ;;  %v1710_v30 = vmul.f32 1.442695, %v1707_v46  ;;  %v1716_v40 = vmul.f32 1.442695, %v1713_v1 }
 0x25c   : > { %5144 = vpow2.f32 %v1714_v31  ;;  %v2331_v54 = vadd.f32 %v2330_v55, %v2329_v6  ;;  %v2653_v34 = vadd.f32 %v2652_v33, %v2651_v56  ;;  %v2065_v16 = vadd.f32 %v2064_v49, %v2063_v4  ;;  %v8679_v31 = vld [vmem:[#allocation37_spill] sm:$0xff]  ;;  %v8680_v46 = vld [vmem:[#allocation44_spill] sm:$0xff]  ;;  %v8681_v33 = vld [vmem:[#allocation51_spill] sm:$0xff] }
 0x25d   : > { %5146 = vpow2.f32 %v1704_v17  ;;  %v2338_v14 = vmul.f32 %v1247_v50, %v8637_v44  ;;  %v3028_v48 = vrot.slane %v3027_v32, 4  ;;  %v2660_v7 = vmul.f32 %v1247_v50, %v8638_v53 }
 0x25e   : > { %5148 = vpow2.f32 %v1710_v30  ;;  %v2332_v41 = vrot.slane %v2331_v54, 2  ;;  %v2654_v51 = vrot.slane %v2653_v34, 2  ;;  %v2066_v38 = vrot.slane %v2065_v16, 1 }
 0x25f   : > { %5150 = vpow2.f32 %v1716_v40  ;;  %v3036_v62 = vmul.f32 %v1247_v50, %v8642_v42  ;;  %v3029_v6 = vadd.f32 %v3028_v48, %v3027_v32  ;;  %v1857_v56 = vmul.f32 %v1249_v25, %v8644_v21  ;;  %v1257_v40 = vpop.f32.mrf.mxu0  ;;  %v6132_v50 = vpop.f32.mrf.mxu1  ;;  %v8685_v21 = vld [vmem:[#allocation31_spill] sm:$0xff] }
 0x260   : > { %v2333_v61 = vadd.f32 %v2332_v41, %v2331_v54  ;;  %v2655_v5 = vadd.f32 %v2654_v51, %v2653_v34  ;;  %v2067_v13 = vadd.f32 %v2066_v38, %v2065_v16  ;;  %v2071_v36 = vmul.f32 %v1249_v25, %v8645_v2  ;;  %8683 = vst [vmem:[#allocation44_spill] sm:$0xff] %v6132_v50  ;;  %v8684_v54 = vld [vmem:[#allocation25_spill] sm:$0xff]  ;;  %v8686_v16 = vld [vmem:[#allocation38_spill] sm:$0xff] }
 0x261   : > { %v2339_v22 = vmul.f32 %v1249_v25, %v8679_v31  ;;  %v2661_v1 = vmul.f32 %v1249_v25, %v8680_v46  ;;  %v3030_v55 = vrot.slane %v3029_v6, 2  ;;  %v3037_v30 = vmul.f32 %v1249_v25, %v8681_v33  ;;  %v1259_v23 = vpop.f32.mrf.mxu0 }
 0x262   : > { %v2334_v4 = vrot.slane %v2333_v61, 1  ;;  %v2656_v17 = vrot.slane %v2655_v5, 1  ;;  %v6130_v49 = vmul.f32 0.35355338, %v2067_v13  ;;  %v1858_v34 = vmul.f32 %v1251_v20, %v8684_v54 }
 0x263   : > { %v2072_v32 = vmul.f32 %v1251_v20, %v8685_v21  ;;  %v2340_v41 = vmul.f32 %v1251_v20, %v8686_v16  ;;  %v3031_v38 = vadd.f32 %v3030_v55, %v3029_v6  ;;  %v2662_v24 = vmul.f32 %v1251_v20, %v8650_v35 }
 0x264   : > { %8682 = vst [vmem:[#allocation37_spill] sm:$0xff] %v6130_v49  ;;  %v2335_v51 = vadd.f32 %v2334_v4, %v2333_v61  ;;  %v2657_v48 = vadd.f32 %v2656_v17, %v2655_v5  ;;  %v1864_v45 = vadd.f32 %v1858_v34, %v6101_v8  ;;  %v3038_v13 = vmul.f32 %v1251_v20, %v5766_v26  ;;  %v6146_v61 = vpop.f32.mrf.mxu1 }
 0x265   : > { %v2078_v0 = vadd.f32 %v2072_v32, %v2070_v18  ;;  %v2346_v25 = vadd.f32 %v2340_v41, %v2338_v14  ;;  %v3032_v54 = vrot.slane %v3031_v38, 1  ;;  %v2668_v57 = vadd.f32 %v2662_v24, %v2660_v7  ;;  %8690 = vst [vmem:[#allocation38_spill] sm:$0xff] %v6146_v61  ;;  %v8693_v32 = vld [vmem:[#allocation32_spill] sm:$0xff] }
 0x266   : > { %v6140_v28 = vmul.f32 0.35355338, %v2335_v51  ;;  %v6142_v50 = vmul.f32 0.35355338, %v2657_v48  ;;  %v3044_v5 = vadd.f32 %v3038_v13, %v3036_v62  ;;  %v1859_v6 = vmul.f32 %v1253_v39, %v5704_v59 }
 0x267   : > { %v6144_v10 = vpop.eup %5140  ;;  %v2073_v8 = vmul.f32 %v1253_v39, %v5720_v3  ;;  %v2341_v18 = vmul.f32 %v1253_v39, %v5736_v11  ;;  %v3033_v20 = vadd.f32 %v3032_v54, %v3031_v38  ;;  %v2663_v4 = vmul.f32 %v1253_v39, %v5752_v19  ;;  %v1261_v54 = vpop.f32.mrf.mxu0 }
 0x268   : > { %8687 = vst [vmem:[#allocation51_spill] sm:$0xff] %v6140_v28  ;;  %8688 = vst [vmem:[#allocation25_spill] sm:$0xff] %v6142_v50  ;;  %v6151_v14 = vpop.eup %5142  ;;  %v3039_v17 = vmul.f32 %v1253_v39, %v5768_v27  ;;  %v1860_v24 = vmul.f32 %v1257_v40, %v5706_v60  ;;  %v1873_v55 = vadd.f32 %v1859_v6, %v1857_v56  ;;  %v6165_v39 = vpop.f32.mrf.mxu1  ;;  %v8698_v56 = vld [vmem:[#allocation46_spill] sm:$0xff] }
 0x269   : > { %8689 = vst [vmem:[#allocation31_spill] sm:$0xff] %v6144_v10  ;;  %8691 = vst [vmem:[#allocation69_spill] sm:$0xff] %v6151_v14  ;;  %v6156_v7 = vpop.eup %5144  ;;  %v2087_v34 = vadd.f32 %v2073_v8, %v2071_v36  ;;  %v2355_v62 = vadd.f32 %v2341_v18, %v2339_v22  ;;  %v2074_v59 = vmul.f32 %v1257_v40, %v8693_v32  ;;  %v6161_v51 = vmul.f32 0.35355338, %v3033_v20  ;;  %v8699_v22 = vld [vmem:[#allocation52_spill] sm:$0xff]  ;;  %v8701_v18 = vld [vmem:[#allocation26_spill] sm:$0xff] }
 0x26a   : > { %8692 = vst [vmem:[#allocation70_spill] sm:$0xff] %v6156_v7  ;;  %v6159_v41 = vpop.eup %5146  ;;  %v2677_v48 = vadd.f32 %v2663_v4, %v2661_v1  ;;  %v3053_v13 = vadd.f32 %v3039_v17, %v3037_v30  ;;  %v1865_v38 = vadd.f32 %v1864_v45, %v1860_v24  ;;  %8697 = vst [vmem:[#allocation74_spill] sm:$0xff] %v6165_v39  ;;  %v8703_v30 = vld [vmem:[#allocation40_spill] sm:$0xff]  ;;  %v8704_v4 = vld [vmem:[#allocation47_spill] sm:$0xff] }
 0x26b   : > { %8694 = vst [vmem:[#allocation71_spill] sm:$0xff] %v6159_v41  ;;  %8695 = vst [vmem:[#allocation72_spill] sm:$0xff] %v6161_v51  ;;  %v6163_v14 = vpop.eup %5148  ;;  %v2079_v60 = vadd.f32 %v2078_v0, %v2074_v59  ;;  %v2342_v10 = vmul.f32 %v1257_v40, %v5738_v12  ;;  %v2664_v36 = vmul.f32 %v1257_v40, %v8698_v56  ;;  %v8702_v41 = vld [vmem:[#allocation33_spill] sm:$0xff]  ;;  %v8722_v56 = vld [vmem:[#allocation63_spill] sm:$0xff] }
 0x26c   : > { %8696 = vst [vmem:[#allocation73_spill] sm:$0xff] %v6163_v14  ;;  %v3040_v6 = vmul.f32 %v1257_v40, %v8699_v22  ;;  %v6170_v8 = vpop.eup %5150  ;;  %v1861_v20 = vmul.f32 %v1259_v23, %v8701_v18  ;;  %v2075_v1 = vmul.f32 %v1259_v23, %v8702_v41  ;;  %v2343_v45 = vmul.f32 %v1259_v23, %v8703_v30  ;;  %v8705_v0 = vld [vmem:[#allocation53_spill] sm:$0xff]  ;;  %v6183_v18 = vpop.f32.mrf.mxu1  ;;  %v8721_v22 = vld [vmem:[#allocation23_spill] sm:$0xff] }
 0x26d   : > { %8700 = vst [vmem:[#allocation75_spill] sm:$0xff] %v6170_v8  ;;  %v2665_v17 = vmul.f32 %v1259_v23, %v8704_v4  ;;  %v2347_v24 = vadd.f32 %v2346_v25, %v2342_v10  ;;  %v2669_v14 = vadd.f32 %v2668_v57, %v2664_v36  ;;  %v3041_v59 = vmul.f32 %v1259_v23, %v8705_v0  ;;  %v6181_v8 = vpop.f32.mrf.mxu0  ;;  %v8708_v4 = vld [vmem:[#allocation13_spill] sm:$0xff]  ;;  %v8710_v25 = vld [vmem:[#allocation34_spill] sm:$0xff]  ;;  %v8711_v23 = vld [vmem:[#allocation19_spill] sm:$0xff] }
 0x26e   : > { %v3045_v39 = vadd.f32 %v3044_v5, %v3040_v6  ;;  %v1874_v61 = vadd.f32 %v1873_v55, %v1861_v20  ;;  %v2088_v51 = vadd.f32 %v2087_v34, %v2075_v1  ;;  %v6177_v50 = vadd.f32 %v2355_v62, %v2343_v45  ;;  %8706 = vst [vmem:[#allocation26_spill] sm:$0xff] %v6183_v18  ;;  %v8709_v10 = vld [vmem:[#allocation57_spill] sm:$0xff]  ;;  %v8712_v55 = vld [vmem:[#allocation60_spill] sm:$0xff]  ;;  %v8715_v20 = vld [vmem:[#allocation54_spill] sm:$0xff] }
 0x26f   : > { %v6179_v40 = vadd.f32 %v2677_v48, %v2665_v17  ;;  %v6185_v28 = vadd.f32 %v3053_v13, %v3041_v59  ;;  %v1862_v30 = vmul.f32 %v1261_v54, %v8707_v29  ;;  %v1884_v57 = vmax.f32 %v8709_v10, %v8708_v4  ;;  %v8713_v62 = vld [vmem:[#allocation41_spill] sm:$0xff]  ;;  %v8714_v48 = vld [vmem:[#allocation48_spill] sm:$0xff] }
 0x270   : > { %v2076_v5 = vmul.f32 %v1261_v54, %v8710_v25  ;;  %v2126_v34 = vmax.f32 %v8712_v55, %v8711_v23  ;;  %v2344_v36 = vmul.f32 %v1261_v54, %v8713_v62  ;;  %v2666_v6 = vmul.f32 %v1261_v54, %v8714_v48  ;;  %v8716_v29 = vld [vmem:[#allocation28_spill] sm:$0xff]  ;;  %v6204_v55 = vpop.f32.mrf.mxu1 }
 0x271   : > { %v3042_v1 = vmul.f32 %v1261_v54, %v8715_v20  ;;  %v1866_v45 = vadd.f32 %v1865_v38, %v1862_v30  ;;  %v6197_v13 = vmax.f32 %v1884_v57, %v6076_v58  ;;  %v1863_v59 = vmul.f32 %v6181_v8, %v8716_v29  ;;  %8717 = vst [vmem:[#allocation27_spill] sm:$0xff] %v6204_v55  ;;  %v8718_v54 = vld [vmem:[#allocation17_spill] sm:$0xff]  ;;  %v8719_v38 = vld [vmem:[#allocation62_spill] sm:$0xff] }
 0x272   : > { %v2080_v17 = vadd.f32 %v2079_v60, %v2076_v5  ;;  %v6202_v18 = vmax.f32 %v2126_v34, %v6078_v63  ;;  %v2348_v25 = vadd.f32 %v2347_v24, %v2344_v36  ;;  %v2670_v0 = vadd.f32 %v2669_v14, %v2666_v6 }
 0x273   : > { %v3046_v23 = vadd.f32 %v3045_v39, %v3042_v1  ;;  %v1867_v62 = vrot.slane %v1866_v45, 4  ;;  %v1875_v41 = vadd.f32 %v1874_v61, %v1863_v59  ;;  %v1885_v30 = vmax.f32 %v8719_v38, %v8718_v54  ;;  %v6213_v61 = vpop.f32.mrf.mxu1 }
 0x274   : > { %v2081_v48 = vrot.slane %v2080_v17, 4  ;;  %v2349_v57 = vrot.slane %v2348_v25, 4  ;;  %v2671_v20 = vrot.slane %v2670_v0, 4  ;;  %v2077_v5 = vmul.f32 %v6181_v8, %v8628_v9  ;;  %8720 = vst [vmem:[#allocation13_spill] sm:$0xff] %v6213_v61 }
 0x275   : > { %v3047_v60 = vrot.slane %v3046_v23, 4  ;;  %v1868_v29 = vadd.f32 %v1867_v62, %v1866_v45  ;;  %v1876_v63 = vrot.slane %v1875_v41, 4  ;;  %v6211_v14 = vmax.f32 %v1885_v30, %v6114_v37 }
 0x276   : > { %v2082_v34 = vadd.f32 %v2081_v48, %v2080_v17  ;;  %v2350_v39 = vadd.f32 %v2349_v57, %v2348_v25  ;;  %v2672_v24 = vadd.f32 %v2671_v20, %v2670_v0  ;;  %v2089_v6 = vadd.f32 %v2088_v51, %v2077_v5 }
 0x277   : > { %v3048_v36 = vadd.f32 %v3047_v60, %v3046_v23  ;;  %v1869_v1 = vrot.slane %v1868_v29, 2  ;;  %v1877_v55 = vadd.f32 %v1876_v63, %v1875_v41  ;;  %v2127_v12 = vmax.f32 %v8722_v56, %v8721_v22  ;;  %v6220_v63 = vpop.f32.mrf.mxu1 }
 0x278   : > { %v2083_v59 = vrot.slane %v2082_v34, 2  ;;  %v2351_v32 = vrot.slane %v2350_v39, 2  ;;  %v2673_v9 = vrot.slane %v2672_v24, 2  ;;  %v2090_v48 = vrot.slane %v2089_v6, 4  ;;  %8723 = vst [vmem:[#allocation57_spill] sm:$0xff] %v6220_v63 }
 0x279   : > { %v3049_v62 = vrot.slane %v3048_v36, 2  ;;  %v1870_v45 = vadd.f32 %v1869_v1, %v1868_v29  ;;  %v1878_v30 = vrot.slane %v1877_v55, 2  ;;  %v6218_v25 = vmax.f32 %v2127_v12, %v6130_v49  ;;  %v6227_v63 = vpop.f32.mrf.mxu1 }
 0x27a   : > { %v2084_v17 = vadd.f32 %v2083_v59, %v2082_v34  ;;  %v2352_v0 = vadd.f32 %v2351_v32, %v2350_v39  ;;  %v2674_v51 = vadd.f32 %v2673_v9, %v2672_v24  ;;  %v2091_v20 = vadd.f32 %v2090_v48, %v2089_v6  ;;  %v1267_v9 = vpop.f32.mrf.mxu0  ;;  %8724 = vst [vmem:[#allocation28_spill] sm:$0xff] %v6227_v63 }
 0x27b   : > { %v3050_v23 = vadd.f32 %v3049_v62, %v3048_v36  ;;  %v1871_v57 = vrot.slane %v1870_v45, 1  ;;  %v1879_v41 = vadd.f32 %v1878_v30, %v1877_v55  ;;  %v2345_v5 = vmul.f32 %v6181_v8, %v8629_v43 }
 0x27c   : > { %v2085_v60 = vrot.slane %v2084_v17, 1  ;;  %v2353_v61 = vrot.slane %v2352_v0, 1  ;;  %v2675_v22 = vrot.slane %v2674_v51, 1  ;;  %v2092_v34 = vrot.slane %v2091_v20, 2 }
 0x27d   : > { %v3051_v29 = vrot.slane %v3050_v23, 1  ;;  %v1872_v1 = vadd.f32 %v1871_v57, %v1870_v45  ;;  %v1880_v12 = vrot.slane %v1879_v41, 1  ;;  %v2357_v32 = vadd.f32 %v6177_v50, %v2345_v5 }
 0x27e   : > { %v2086_v59 = vadd.f32 %v2085_v60, %v2084_v17  ;;  %v2354_v39 = vadd.f32 %v2353_v61, %v2352_v0  ;;  %v2676_v24 = vadd.f32 %v2675_v22, %v2674_v51  ;;  %v2093_v6 = vadd.f32 %v2092_v34, %v2091_v20  ;;  %v1269_v51 = vpop.f32.mrf.mxu0  ;;  %v6249_v34 = vpop.f32.mrf.mxu1 }
 0x27f   : > { %v3052_v36 = vadd.f32 %v3051_v29, %v3050_v23  ;;  %v1882_v62 = vmul.f32 0.35355338, %v1872_v1  ;;  %v1881_v55 = vadd.f32 %v1880_v12, %v1879_v41  ;;  %v2358_v30 = vrot.slane %v2357_v32, 4  ;;  %8728 = vst [vmem:[#allocation77_spill] sm:$0xff] %v6249_v34  ;;  %v8752_v34 = vld [vmem:[#allocation53_spill] sm:$0xff] }
 0x280   : > { %v6225_v48 = vmul.f32 0.35355338, %v2086_v59  ;;  %v6229_v49 = vmul.f32 0.35355338, %v2354_v39  ;;  %v6231_v56 = vmul.f32 0.35355338, %v2676_v24  ;;  %v2667_v50 = vmul.f32 %v6181_v8, %v8630_v47  ;;  %v1271_v24 = vpop.f32.mrf.mxu0 }
 0x281   : > { %v6233_v45 = vmul.f32 0.35355338, %v3052_v36  ;;  %v1888_v22 = vmax.f32 %v6197_v13, %v1882_v62  ;;  %v1883_v17 = vmul.f32 0.35355338, %v1881_v55  ;;  %v2094_v0 = vrot.slane %v2093_v6, 1 }
 0x282   : > { %8725 = vst [vmem:[#allocation17_spill] sm:$0xff] %v6229_v49  ;;  %8726 = vst [vmem:[#allocation62_spill] sm:$0xff] %v6231_v56  ;;  %v2359_v23 = vadd.f32 %v2358_v30, %v2357_v32  ;;  %v2679_v20 = vadd.f32 %v6179_v40, %v2667_v50  ;;  %v3043_v57 = vmul.f32 %v6181_v8, %v8632_v15 }
 0x283   : > { %8727 = vst [vmem:[#allocation76_spill] sm:$0xff] %v6233_v45  ;;  %v6244_v60 = vmul.f32 %v1267_v9, %v8635_v52  ;;  %v1890_v41 = vsub.f32 %v8709_v10, %v1888_v22  ;;  %v1896_v5 = vsub.f32 %v8708_v4, %v1888_v22  ;;  %v1902_v13 = vsub.f32 %v6076_v58, %v1888_v22  ;;  %v8760_v45 = vld [vmem:[#allocation22_spill] sm:$0xff] }
 0x284   : > { %v1908_v29 = vsub.f32 %v1882_v62, %v1888_v22  ;;  %v1889_v1 = vmax.f32 %v6211_v14, %v1883_v17  ;;  %v2095_v59 = vadd.f32 %v2094_v0, %v2093_v6  ;;  %v2360_v12 = vrot.slane %v2359_v23, 2  ;;  %v6258_v6 = vpop.f32.mrf.mxu1 }
 0x285   : > { %v2680_v40 = vrot.slane %v2679_v20, 4  ;;  %v1892_v32 = vmul.f32 1.442695, %v1890_v41  ;;  %v1898_v39 = vmul.f32 1.442695, %v1896_v5  ;;  %v3055_v52 = vadd.f32 %v6185_v28, %v3043_v57  ;;  %8729 = vst [vmem:[#allocation78_spill] sm:$0xff] %v6258_v6 }
 0x286   : > { %v1904_v8 = vmul.f32 1.442695, %v1902_v13  ;;  %v1910_v36 = vmul.f32 1.442695, %v1908_v29  ;;  %v1891_v10 = vsub.f32 %v8719_v38, %v1889_v1  ;;  %v1897_v4 = vsub.f32 %v8718_v54, %v1889_v1  ;;  %v1273_v54 = vpop.f32.mrf.mxu0  ;;  %v6265_v13 = vpop.f32.mrf.mxu1 }
 0x287   : > { %v1903_v58 = vsub.f32 %v6114_v37, %v1889_v1  ;;  %5152 = vpow2.f32 %v1892_v32  ;;  %v1909_v62 = vsub.f32 %v1883_v17, %v1889_v1  ;;  %v6256_v55 = vmul.f32 0.35355338, %v2095_v59  ;;  %8730 = vst [vmem:[#allocation79_spill] sm:$0xff] %v6265_v13  ;;  %v8751_v13 = vld [vmem:[#allocation47_spill] sm:$0xff] }
 0x288   : > { %v2361_v14 = vadd.f32 %v2360_v12, %v2359_v23  ;;  %5154 = vpow2.f32 %v1898_v39  ;;  %v1894_v30 = vmul.f32 1.442695, %v1891_v10  ;;  %v1900_v50 = vmul.f32 1.442695, %v1897_v4  ;;  %v1277_v32 = vpop.f32.mrf.mxu0  ;;  %v6277_v4 = vpop.f32.mrf.mxu1 }
 0x289   : > { %v1906_v22 = vmul.f32 1.442695, %v1903_v58  ;;  %5156 = vpow2.f32 %v1904_v8  ;;  %v1912_v28 = vmul.f32 1.442695, %v1909_v62  ;;  %v2681_v37 = vadd.f32 %v2680_v40, %v2679_v20  ;;  %8731 = vst [vmem:[#allocation80_spill] sm:$0xff] %v6277_v4 }
 0x28a   : > { %v2362_v0 = vrot.slane %v2361_v14, 1  ;;  %5158 = vpow2.f32 %v1910_v36  ;;  %v3056_v57 = vrot.slane %v3055_v52, 4  ;;  %v2366_v17 = vmul.f32 %v1267_v9, %v8637_v44  ;;  %v6289_v38 = vpop.f32.mrf.mxu1 }
 0x28b   : > { %5160 = vpow2.f32 %v1894_v30  ;;  %v2688_v41 = vmul.f32 %v1267_v9, %v8638_v53  ;;  %v3064_v5 = vmul.f32 %v1267_v9, %v8642_v42  ;;  %v2682_v29 = vrot.slane %v2681_v37, 2 }
 0x28c   : > { %v2363_v23 = vadd.f32 %v2362_v0, %v2361_v14  ;;  %5162 = vpow2.f32 %v1900_v50  ;;  %v3057_v1 = vadd.f32 %v3056_v57, %v3055_v52  ;;  %v2099_v59 = vmul.f32 %v1269_v51, %v8645_v2 }
 0x28d   : > { %5164 = vpow2.f32 %v1906_v22  ;;  %v2367_v20 = vmul.f32 %v1269_v51, %v8679_v31  ;;  %v2689_v40 = vmul.f32 %v1269_v51, %v8680_v46  ;;  %v2683_v39 = vadd.f32 %v2682_v29, %v2681_v37 }
 0x28e   : > { %v6268_v12 = vmul.f32 0.35355338, %v2363_v23  ;;  %5166 = vpow2.f32 %v1912_v28  ;;  %v3058_v8 = vrot.slane %v3057_v1, 2  ;;  %v3065_v9 = vmul.f32 %v1269_v51, %v8681_v33 }
 0x28f   : > { %v2100_v36 = vmul.f32 %v1271_v24, %v8685_v21  ;;  %v2368_v10 = vmul.f32 %v1271_v24, %v8686_v16  ;;  %v2690_v52 = vmul.f32 %v1271_v24, %v8650_v35  ;;  %v3066_v2 = vmul.f32 %v1271_v24, %v5766_v26  ;;  %v1279_v21 = vpop.f32.mrf.mxu0 }
 0x290   : > { %v2684_v58 = vrot.slane %v2683_v39, 1  ;;  %v3059_v62 = vadd.f32 %v3058_v8, %v3057_v1  ;;  %v2101_v14 = vmul.f32 %v1273_v54, %v5720_v3  ;;  %v2369_v30 = vmul.f32 %v1273_v54, %v5736_v11  ;;  %v8733_v3 = vld [vmem:[#allocation32_spill] sm:$0xff] }
 0x291   : > { %v2106_v50 = vadd.f32 %v2100_v36, %v6244_v60  ;;  %v2374_v22 = vadd.f32 %v2368_v10, %v2366_v17  ;;  %v2696_v51 = vadd.f32 %v2690_v52, %v2688_v41  ;;  %v3072_v28 = vadd.f32 %v3066_v2, %v3064_v5  ;;  %8734 = vst [vmem:[#allocation32_spill] sm:$0xff] %v6289_v38  ;;  %v8737_v5 = vld [vmem:[#allocation39_spill] sm:$0xff]  ;;  %v8740_v2 = vld [vmem:[#allocation52_spill] sm:$0xff] }
 0x292   : > { %v2685_v0 = vadd.f32 %v2684_v58, %v2683_v39  ;;  %v3060_v37 = vrot.slane %v3059_v62, 1  ;;  %v2115_v57 = vadd.f32 %v2101_v14, %v2099_v59  ;;  %v2383_v23 = vadd.f32 %v2369_v30, %v2367_v20  ;;  %v8738_v20 = vld [vmem:[#allocation46_spill] sm:$0xff]  ;;  %v1281_v14 = vpop.f32.mrf.mxu0 }
 0x293   : > { %v2691_v24 = vmul.f32 %v1273_v54, %v5752_v19  ;;  %v3067_v29 = vmul.f32 %v1273_v54, %v5768_v27  ;;  %v6286_v1 = vmul.f32 %v6156_v7, %v6277_v4  ;;  %v2102_v8 = vmul.f32 %v1277_v32, %v8733_v3 }
 0x294   : > { %v6291_v60 = vpop.eup %5152  ;;  %v6293_v17 = vmul.f32 0.35355338, %v2685_v0  ;;  %v3061_v41 = vadd.f32 %v3060_v37, %v3059_v62  ;;  %v2370_v59 = vmul.f32 %v1277_v32, %v8737_v5  ;;  %v2692_v39 = vmul.f32 %v1277_v32, %v8738_v20 }
 0x295   : > { %8732 = vst [vmem:[#allocation81_spill] sm:$0xff] %v6286_v1  ;;  %8735 = vst [vmem:[#allocation82_spill] sm:$0xff] %v6291_v60  ;;  %v6297_v36 = vpop.eup %5154  ;;  %v2705_v54 = vadd.f32 %v2691_v24, %v2689_v40  ;;  %v3081_v10 = vadd.f32 %v3067_v29, %v3065_v9  ;;  %v2107_v52 = vadd.f32 %v2106_v50, %v2102_v8  ;;  %v8747_v50 = vld [vmem:[#allocation33_spill] sm:$0xff]  ;;  %v6319_v29 = vpop.f32.mrf.mxu1 }
 0x296   : > { %8736 = vst [vmem:[#allocation83_spill] sm:$0xff] %v6293_v17  ;;  %8739 = vst [vmem:[#allocation39_spill] sm:$0xff] %v6297_v36  ;;  %v3068_v58 = vmul.f32 %v1277_v32, %v8740_v2  ;;  %v6300_v30 = vpop.eup %5156  ;;  %v6302_v3 = vmul.f32 0.35355338, %v3061_v41  ;;  %v6306_v0 = vmul.f32 %v6297_v36, %v6227_v63  ;;  %v6310_v62 = vmul.f32 %v6297_v36, %v6258_v6  ;;  %v8750_v41 = vld [vmem:[#allocation40_spill] sm:$0xff] }
 0x297   : > { %8741 = vst [vmem:[#allocation46_spill] sm:$0xff] %v6300_v30  ;;  %v2375_v37 = vadd.f32 %v2374_v22, %v2370_v59  ;;  %v6312_v61 = vpop.eup %5158  ;;  %v6316_v40 = vmul.f32 %v6300_v30, %v6277_v4  ;;  %v2697_v32 = vadd.f32 %v2696_v51, %v2692_v39  ;;  %v2103_v24 = vmul.f32 %v1279_v21, %v8747_v50  ;;  %v8756_v39 = vld [vmem:[#allocation34_spill] sm:$0xff]  ;;  %v8757_v50 = vld [vmem:[#allocation41_spill] sm:$0xff]  ;;  %v1283_v4 = vpop.f32.mrf.mxu0  ;;  %v8759_v17 = vld [vmem:[#allocation16_spill] sm:$0xff] }
 0x298   : > { %8742 = vst [vmem:[#allocation84_spill] sm:$0xff] %v6302_v3  ;;  %8743 = vst [vmem:[#allocation85_spill] sm:$0xff] %v6306_v0  ;;  %v3073_v9 = vadd.f32 %v3072_v28, %v3068_v58  ;;  %v6321_v8 = vpop.eup %5160  ;;  %v2371_v1 = vmul.f32 %v1279_v21, %v8750_v41  ;;  %v2693_v6 = vmul.f32 %v1279_v21, %v8751_v13 }
 0x299   : > { %8744 = vst [vmem:[#allocation86_spill] sm:$0xff] %v6310_v62  ;;  %8745 = vst [vmem:[#allocation87_spill] sm:$0xff] %v6312_v61  ;;  %v3069_v22 = vmul.f32 %v1279_v21, %v8752_v34  ;;  %v6328_v59 = vmul.f32 %v6156_v7, %v6319_v29  ;;  %v6330_v63 = vpop.eup %5162  ;;  %v2116_v51 = vadd.f32 %v2115_v57, %v2103_v24 }
 0x29a   : > { %8746 = vst [vmem:[#allocation88_spill] sm:$0xff] %v6316_v40  ;;  %8748 = vst [vmem:[#allocation33_spill] sm:$0xff] %v6319_v29  ;;  %v6334_v28 = vmul.f32 %v6300_v30, %v6319_v29  ;;  %v2104_v58 = vmul.f32 %v1281_v14, %v8756_v39  ;;  %v6338_v62 = vpop.eup %5164  ;;  %v2384_v0 = vadd.f32 %v2383_v23, %v2371_v1  ;;  %v8763_v39 = vld [vmem:[#allocation48_spill] sm:$0xff] }
 0x29b   : > { %8749 = vst [vmem:[#allocation89_spill] sm:$0xff] %v6321_v8  ;;  %8753 = vst [vmem:[#allocation40_spill] sm:$0xff] %v6328_v59  ;;  %v2372_v8 = vmul.f32 %v1281_v14, %v8757_v50  ;;  %v2706_v21 = vadd.f32 %v2705_v54, %v2693_v6  ;;  %v3082_v3 = vadd.f32 %v3081_v10, %v3069_v22  ;;  %v6342_v56 = vpop.eup %5166  ;;  %v8765_v50 = vld [vmem:[#allocation21_spill] sm:$0xff]  ;;  %v8766_v6 = vld [vmem:[#allocation54_spill] sm:$0xff] }
 0x29c   : > { %8754 = vst [vmem:[#allocation90_spill] sm:$0xff] %v6330_v63  ;;  %8755 = vst [vmem:[#allocation91_spill] sm:$0xff] %v6334_v28  ;;  %v2422_v59 = vmax.f32 %v8760_v45, %v8759_v17  ;;  %v6346_v57 = vmul.f32 %v6338_v62, %v6289_v38  ;;  %v2108_v24 = vadd.f32 %v2107_v52, %v2104_v58  ;;  %v6349_v28 = vpop.f32.mrf.mxu1  ;;  %v8768_v54 = vld [vmem:[#allocation35_spill] sm:$0xff] }
 0x29d   : > { %8758 = vst [vmem:[#allocation34_spill] sm:$0xff] %v6338_v62  ;;  %8761 = vst [vmem:[#allocation92_spill] sm:$0xff] %v6342_v56  ;;  %v2376_v63 = vadd.f32 %v2375_v37, %v2372_v8  ;;  %v2694_v29 = vmul.f32 %v1281_v14, %v8763_v39  ;;  %v3070_v23 = vmul.f32 %v1281_v14, %v8766_v6 }
 0x29e   : > { %8762 = vst [vmem:[#allocation93_spill] sm:$0xff] %v6346_v57  ;;  %8764 = vst [vmem:[#allocation94_spill] sm:$0xff] %v6349_v28  ;;  %v6352_v40 = vmax.f32 %v2422_v59, %v8765_v50  ;;  %v6357_v1 = vmul.f32 %v6338_v62, %v6349_v28  ;;  %v2105_v10 = vmul.f32 %v1283_v4, %v8768_v54  ;;  %v2109_v22 = vrot.slane %v2108_v24, 4  ;;  %v8769_v59 = vld [vmem:[#allocation29_spill] sm:$0xff]  ;;  %v8771_v54 = vld [vmem:[#allocation51_spill] sm:$0xff] }
 0x29f   : > { %v2377_v38 = vrot.slane %v2376_v63, 4  ;;  %v2698_v57 = vadd.f32 %v2697_v32, %v2694_v29  ;;  %v2373_v52 = vmul.f32 %v1283_v4, %v8629_v43  ;;  %v3074_v8 = vadd.f32 %v3073_v9, %v3070_v23  ;;  %v8770_v50 = vld [vmem:[#allocation65_spill] sm:$0xff] }
 0x2a0   : > { %8767 = vst [vmem:[#allocation95_spill] sm:$0xff] %v6357_v1  ;;  %v2426_v37 = vmax.f32 %v6352_v40, %v6229_v49  ;;  %v2117_v58 = vadd.f32 %v2116_v51, %v2105_v10  ;;  %v2423_v17 = vmax.f32 %v8770_v50, %v8769_v59  ;;  %v2110_v14 = vadd.f32 %v2109_v22, %v2108_v24 }
 0x2a1   : > { %v2378_v45 = vadd.f32 %v2377_v38, %v2376_v63  ;;  %v2699_v6 = vrot.slane %v2698_v57, 4  ;;  %v2385_v28 = vadd.f32 %v2384_v0, %v2373_v52  ;;  %v3075_v1 = vrot.slane %v3074_v8, 4 }
 0x2a2   : > { %v2118_v39 = vrot.slane %v2117_v58, 4  ;;  %v6366_v34 = vmax.f32 %v2423_v17, %v8771_v54  ;;  %v2695_v32 = vmul.f32 %v1283_v4, %v8630_v47  ;;  %v2111_v29 = vrot.slane %v2110_v14, 2 }
 0x2a3   : > { %v2379_v43 = vrot.slane %v2378_v45, 2  ;;  %v2700_v13 = vadd.f32 %v2699_v6, %v2698_v57  ;;  %v2386_v40 = vrot.slane %v2385_v28, 4  ;;  %v3076_v9 = vadd.f32 %v3075_v1, %v3074_v8 }
 0x2a4   : > { %v2119_v51 = vadd.f32 %v2118_v39, %v2117_v58  ;;  %v2707_v24 = vadd.f32 %v2706_v21, %v2695_v32  ;;  %v2112_v63 = vadd.f32 %v2111_v29, %v2110_v14  ;;  %v3071_v54 = vmul.f32 %v1283_v4, %v8632_v15 }
 0x2a5   : > { %v2380_v38 = vadd.f32 %v2379_v43, %v2378_v45  ;;  %v2701_v0 = vrot.slane %v2700_v13, 2  ;;  %v2387_v10 = vadd.f32 %v2386_v40, %v2385_v28  ;;  %v3077_v22 = vrot.slane %v3076_v9, 2  ;;  %v6372_v43 = vpop.f32.mrf.mxu0  ;;  %v6374_v40 = vpop.f32.mrf.mxu1 }
 0x2a6   : > { %v2120_v52 = vrot.slane %v2119_v51, 2  ;;  %v2708_v17 = vrot.slane %v2707_v24, 4  ;;  %v2113_v59 = vrot.slane %v2112_v63, 1  ;;  %v3083_v8 = vadd.f32 %v3082_v3, %v3071_v54  ;;  %8772 = vst [vmem:[#allocation35_spill] sm:$0xff] %v6374_v40 }
 0x2a7   : > { %v2381_v50 = vrot.slane %v2380_v38, 1  ;;  %v2702_v49 = vadd.f32 %v2701_v0, %v2700_v13  ;;  %v2388_v57 = vrot.slane %v2387_v10, 2  ;;  %v3078_v6 = vadd.f32 %v3077_v22, %v3076_v9 }
 0x2a8   : > { %v2121_v1 = vadd.f32 %v2120_v52, %v2119_v51  ;;  %v2709_v39 = vadd.f32 %v2708_v17, %v2707_v24  ;;  %v2114_v58 = vadd.f32 %v2113_v59, %v2112_v63  ;;  %v3084_v29 = vrot.slane %v3083_v8, 4  ;;  %v6388_v17 = vpop.f32.mrf.mxu1 }
 0x2a9   : > { %v2382_v23 = vadd.f32 %v2381_v50, %v2380_v38  ;;  %v2703_v21 = vrot.slane %v2702_v49, 1  ;;  %v2389_v14 = vadd.f32 %v2388_v57, %v2387_v10  ;;  %v3079_v45 = vrot.slane %v3078_v6, 1  ;;  %v1289_v10 = vpop.f32.mrf.mxu0  ;;  %8777 = vst [vmem:[#allocation99_spill] sm:$0xff] %v6388_v17  ;;  %v8778_v57 = vld [vmem:[#allocation60_spill] sm:$0xff] }
 0x2aa   : > { %v2122_v28 = vrot.slane %v2121_v1, 1  ;;  %v2710_v32 = vrot.slane %v2709_v39, 2  ;;  %v2124_v4 = vmul.f32 0.35355338, %v2114_v58  ;;  %v3085_v59 = vadd.f32 %v3084_v29, %v3083_v8 }
 0x2ab   : > { %v6376_v15 = vmul.f32 0.35355338, %v2382_v23  ;;  %v2704_v13 = vadd.f32 %v2703_v21, %v2702_v49  ;;  %v2390_v9 = vrot.slane %v2389_v14, 1  ;;  %v3080_v51 = vadd.f32 %v3079_v45, %v3078_v6 }
 0x2ac   : > { %v2123_v24 = vadd.f32 %v2122_v28, %v2121_v1  ;;  %v2711_v3 = vadd.f32 %v2710_v32, %v2709_v39  ;;  %v8774_v50 = vmax.f32 %v6202_v18, %v6225_v48  ;;  %v3086_v52 = vrot.slane %v3085_v59, 2  ;;  %v8779_v1 = vld [vmem:[#allocation19_spill] sm:$0xff]  ;;  %v8780_v18 = vld [vmem:[#allocation45_spill] sm:$0xff] }
 0x2ad   : > { %8773 = vst [vmem:[#allocation96_spill] sm:$0xff] %v6376_v15  ;;  %v6382_v63 = vmax.f32 %v2426_v37, %v6376_v15  ;;  %v6384_v38 = vmul.f32 0.35355338, %v2704_v13  ;;  %v2391_v0 = vadd.f32 %v2390_v9, %v2389_v14  ;;  %v6386_v22 = vmul.f32 0.35355338, %v3080_v51  ;;  %v1291_v51 = vpop.f32.mrf.mxu0 }
 0x2ae   : > { %v2132_v54 = vmax.f32 %v8774_v50, %v2124_v4  ;;  %v2125_v23 = vmul.f32 0.35355338, %v2123_v24  ;;  %v2712_v49 = vrot.slane %v2711_v3, 1  ;;  %v8781_v21 = vmax.f32 %v6218_v25, %v6256_v55 }
 0x2af   : > { %8775 = vst [vmem:[#allocation97_spill] sm:$0xff] %v6384_v38  ;;  %8776 = vst [vmem:[#allocation98_spill] sm:$0xff] %v6386_v22  ;;  %v6397_v45 = vmul.f32 0.35355338, %v2391_v0  ;;  %v3087_v9 = vadd.f32 %v3086_v52, %v3085_v59  ;;  %v8786_v59 = vmax.f32 %v6366_v34, %v6268_v12  ;;  %v6421_v34 = vmul.f32 %v6300_v30, %v6374_v40 }
 0x2b0   : > { %v2134_v6 = vsub.f32 %v8778_v57, %v2132_v54  ;;  %v2140_v39 = vsub.f32 %v8779_v1, %v2132_v54  ;;  %v2146_v8 = vsub.f32 %v8780_v18, %v2132_v54  ;;  %v2152_v37 = vsub.f32 %v6225_v48, %v2132_v54  ;;  %v8782_v57 = vld [vmem:[#allocation63_spill] sm:$0xff]  ;;  %v6401_v48 = vpop.f32.mrf.mxu1 }
 0x2b1   : > { %v2158_v58 = vsub.f32 %v2124_v4, %v2132_v54  ;;  %v2133_v14 = vmax.f32 %v8781_v21, %v2125_v23  ;;  %v2713_v28 = vadd.f32 %v2712_v49, %v2711_v3  ;;  %v8783_v18 = vld [vmem:[#allocation23_spill] sm:$0xff]  ;;  %8784 = vst [vmem:[#allocation60_spill] sm:$0xff] %v6401_v48  ;;  %v8785_v4 = vld [vmem:[#allocation37_spill] sm:$0xff]  ;;  %v6409_v52 = vmax.f32 %v8786_v59, %v6397_v45 }
 0x2b2   : > { %v2136_v32 = vmul.f32 1.442695, %v2134_v6  ;;  %v2142_v29 = vmul.f32 1.442695, %v2140_v39  ;;  %v2148_v13 = vmul.f32 1.442695, %v2146_v8 }
 0x2b3   : > { %v2154_v24 = vmul.f32 1.442695, %v2152_v37  ;;  %v2160_v50 = vmul.f32 1.442695, %v2158_v58  ;;  %v2135_v1 = vsub.f32 %v8782_v57, %v2133_v14  ;;  %v2141_v15 = vsub.f32 %v8783_v18, %v2133_v14  ;;  %v1293_v37 = vpop.f32.mrf.mxu0 }
 0x2b4   : > { %5168 = vpow2.f32 %v2136_v32  ;;  %v2147_v25 = vsub.f32 %v8785_v4, %v2133_v14  ;;  %v2153_v54 = vsub.f32 %v6256_v55, %v2133_v14  ;;  %v2159_v0 = vsub.f32 %v2125_v23, %v2133_v14 }
 0x2b5   : > { %5170 = vpow2.f32 %v2142_v29  ;;  %v2138_v3 = vmul.f32 1.442695, %v2135_v1  ;;  %v2144_v49 = vmul.f32 1.442695, %v2141_v15  ;;  %v6411_v58 = vmul.f32 0.35355338, %v2713_v28  ;;  %v6417_v15 = vpop.f32.mrf.mxu1 }
 0x2b6   : > { %5172 = vpow2.f32 %v2148_v13  ;;  %v2150_v6 = vmul.f32 1.442695, %v2147_v25  ;;  %v2156_v39 = vmul.f32 1.442695, %v2153_v54  ;;  %v2162_v8 = vmul.f32 1.442695, %v2159_v0 }
 0x2b7   : > { %5174 = vpow2.f32 %v2154_v24  ;;  %8787 = vst [vmem:[#allocation19_spill] sm:$0xff] %v6411_v58  ;;  %v3088_v21 = vrot.slane %v3087_v9, 1  ;;  %v6415_v55 = vmul.f32 %v6156_v7, %v6374_v40  ;;  %8789 = vst [vmem:[#allocation63_spill] sm:$0xff] %v6417_v15  ;;  %v2394_v23 = vmul.f32 %v6372_v43, %v8637_v44  ;;  %v1297_v44 = vpop.f32.mrf.mxu0  ;;  %v6446_v1 = vpop.f32.mrf.mxu1 }
 0x2b8   : > { %5176 = vpow2.f32 %v2160_v50  ;;  %v2716_v14 = vmul.f32 %v6372_v43, %v8638_v53  ;;  %v3092_v32 = vmul.f32 %v6372_v43, %v8642_v42  ;;  %v6431_v29 = vmul.f32 %v6338_v62, %v6388_v17  ;;  %8793 = vst [vmem:[#allocation101_spill] sm:$0xff] %v6446_v1 }
 0x2b9   : > { %8788 = vst [vmem:[#allocation45_spill] sm:$0xff] %v6415_v55  ;;  %5178 = vpow2.f32 %v2138_v3  ;;  %v3089_v28 = vadd.f32 %v3088_v21, %v3087_v9  ;;  %v2395_v13 = vmul.f32 %v1289_v10, %v8679_v31  ;;  %v2717_v24 = vmul.f32 %v1289_v10, %v8680_v46  ;;  %v8795_v21 = vld [vmem:[#allocation30_spill] sm:$0xff] }
 0x2ba   : > { %8790 = vst [vmem:[#allocation23_spill] sm:$0xff] %v6431_v29  ;;  %5180 = vpow2.f32 %v2144_v49  ;;  %v3093_v50 = vmul.f32 %v1289_v10, %v8681_v33  ;;  %v6440_v9 = vmul.f32 %v6156_v7, %v6401_v48  ;;  %v6444_v43 = vmul.f32 %v6300_v30, %v6401_v48  ;;  %v8804_v30 = vld [vmem:[#allocation88_spill] sm:$0xff]  ;;  %v8806_v29 = vld [vmem:[#allocation66_spill] sm:$0xff] }
 0x2bb   : > { %5182 = vpow2.f32 %v2150_v6  ;;  %v6436_v57 = vmul.f32 0.35355338, %v3089_v28  ;;  %v2396_v31 = vmul.f32 %v1291_v51, %v8686_v16  ;;  %v2718_v18 = vmul.f32 %v1291_v51, %v8650_v35  ;;  %v1299_v6 = vpop.f32.mrf.mxu0 }
 0x2bc   : > { %8792 = vst [vmem:[#allocation100_spill] sm:$0xff] %v6440_v9  ;;  %5184 = vpow2.f32 %v2156_v39  ;;  %v3094_v10 = vmul.f32 %v1291_v51, %v5766_v26  ;;  %v6453_v4 = vmul.f32 %v6338_v62, %v6417_v15  ;;  %v2397_v25 = vmul.f32 %v1293_v37, %v5736_v11  ;;  %v6462_v9 = vpop.f32.mrf.mxu1 }
 0x2bd   : > { %8791 = vst [vmem:[#allocation37_spill] sm:$0xff] %v6436_v57  ;;  %5186 = vpow2.f32 %v2162_v8  ;;  %v2719_v54 = vmul.f32 %v1293_v37, %v5752_v19  ;;  %v2402_v0 = vadd.f32 %v2396_v31, %v2394_v23  ;;  %v2724_v3 = vadd.f32 %v2718_v18, %v2716_v14  ;;  %v8796_v8 = vld [vmem:[#allocation26_spill] sm:$0xff]  ;;  %8797 = vst [vmem:[#allocation103_spill] sm:$0xff] %v6462_v9 }
 0x2be   : > { %8794 = vst [vmem:[#allocation102_spill] sm:$0xff] %v6453_v4  ;;  %v3100_v49 = vadd.f32 %v3094_v10, %v3092_v32  ;;  %v3095_v59 = vmul.f32 %v1293_v37, %v5768_v27  ;;  %v2411_v16 = vadd.f32 %v2397_v25, %v2395_v13  ;;  %v1920_v51 = vmul.f32 %v6291_v60, %v8795_v21  ;;  %v8801_v25 = vld [vmem:[#allocation47_spill] sm:$0xff]  ;;  %v6483_v4 = vpop.f32.mrf.mxu1 }
 0x2bf   : > { %v2733_v39 = vadd.f32 %v2719_v54, %v2717_v24  ;;  %v1928_v28 = vmul.f32 %v6297_v36, %v8796_v8  ;;  %v1960_v11 = vmul.f32 %v6312_v61, %v6446_v1  ;;  %v2398_v23 = vmul.f32 %v1297_v44, %v8737_v5  ;;  %v8802_v5 = vld [vmem:[#allocation53_spill] sm:$0xff]  ;;  %8805 = vst [vmem:[#allocation88_spill] sm:$0xff] %v6483_v4 }
 0x2c0   : > { %v3109_v55 = vadd.f32 %v3095_v59, %v3093_v50  ;;  %v2720_v14 = vmul.f32 %v1297_v44, %v8738_v20  ;;  %v3096_v13 = vmul.f32 %v1297_v44, %v8740_v2  ;;  %v6473_v24 = vmul.f32 %v6342_v56, %v6462_v9 }
 0x2c1   : > { %v6468_v37 = vpop.eup %5168  ;;  %v1936_v32 = vadd.f32 %v1928_v28, %v1920_v51  ;;  %v2399_v31 = vmul.f32 %v1299_v6, %v8750_v41  ;;  %v2403_v50 = vadd.f32 %v2402_v0, %v2398_v23  ;;  %v2721_v54 = vmul.f32 %v1299_v6, %v8801_v25  ;;  %v1301_v41 = vpop.f32.mrf.mxu0 }
 0x2c2   : > { %8798 = vst [vmem:[#allocation104_spill] sm:$0xff] %v6468_v37  ;;  %8799 = vst [vmem:[#allocation105_spill] sm:$0xff] %v6473_v24  ;;  %v6476_v18 = vpop.eup %5170  ;;  %v2725_v10 = vadd.f32 %v2724_v3, %v2720_v14  ;;  %v3097_v59 = vmul.f32 %v1299_v6, %v8802_v5  ;;  %v3101_v28 = vadd.f32 %v3100_v49, %v3096_v13  ;;  %v8813_v14 = vld [vmem:[#allocation13_spill] sm:$0xff] }
 0x2c3   : > { %8800 = vst [vmem:[#allocation106_spill] sm:$0xff] %v6476_v18  ;;  %v6480_v7 = vpop.eup %5172  ;;  %v1952_v51 = vadd.f32 %v8804_v30, %v1936_v32  ;;  %v2412_v44 = vadd.f32 %v2411_v16, %v2399_v31  ;;  %v1922_v24 = vmul.f32 %v6291_v60, %v8806_v29  ;;  %v2734_v6 = vadd.f32 %v2733_v39, %v2721_v54  ;;  %v8816_v39 = vld [vmem:[#allocation41_spill] sm:$0xff] }
 0x2c4   : > { %8803 = vst [vmem:[#allocation107_spill] sm:$0xff] %v6480_v7  ;;  %v6487_v62 = vpop.eup %5174  ;;  %v6491_v0 = vmul.f32 %v6480_v7, %v6374_v40  ;;  %v6495_v3 = vmul.f32 %v6480_v7, %v6401_v48  ;;  %v6497_v30 = vadd.f32 %v3109_v55, %v3097_v59  ;;  %v1930_v32 = vmul.f32 %v6297_v36, %v8813_v14  ;;  %v8822_v40 = vld [vmem:[#allocation48_spill] sm:$0xff]  ;;  %v8825_v14 = vld [vmem:[#allocation15_spill] sm:$0xff] }
 0x2c5   : > { %8807 = vst [vmem:[#allocation108_spill] sm:$0xff] %v6487_v62  ;;  %v6499_v49 = vpop.eup %5176  ;;  %v6501_v16 = vadd.f32 %v1960_v11, %v1952_v51  ;;  %v6505_v23 = vmul.f32 %v6487_v62, %v6446_v1  ;;  %v1962_v13 = vmul.f32 %v6312_v61, %v6483_v4  ;;  %v6515_v55 = vmul.f32 %v6487_v62, %v6483_v4  ;;  %v8817_v11 = vld [vmem:[#allocation58_spill] sm:$0xff]  ;;  %v6533_v4 = vpop.f32.mrf.mxu1 }
 0x2c6   : > { %8808 = vst [vmem:[#allocation109_spill] sm:$0xff] %v6491_v0  ;;  %8809 = vst [vmem:[#allocation110_spill] sm:$0xff] %v6495_v3  ;;  %v6511_v31 = vpop.eup %5178  ;;  %v2400_v54 = vmul.f32 %v1301_v41, %v8816_v39  ;;  %v6519_v59 = vmul.f32 0.35355338, %v8817_v11  ;;  %v8819_v51 = vld [vmem:[#allocation14_spill] sm:$0xff]  ;;  %v1938_v36 = vadd.f32 %v1930_v32, %v1922_v24  ;;  %v2722_v1 = vmul.f32 %v1301_v41, %v8822_v40  ;;  %v8823_v3 = vld [vmem:[#allocation59_spill] sm:$0xff] }
 0x2c7   : > { %8810 = vst [vmem:[#allocation111_spill] sm:$0xff] %v6499_v49  ;;  %8811 = vst [vmem:[#allocation112_spill] sm:$0xff] %v6501_v16  ;;  %v6522_v16 = vmul.f32 0.35355338, %v8819_v51  ;;  %v6524_v48 = vpop.eup %5180  ;;  %v6528_v0 = vmul.f32 0.35355338, %v8823_v3  ;;  %v6542_v24 = vmul.f32 %v6342_v56, %v6533_v4 }
 0x2c8   : > { %8812 = vst [vmem:[#allocation113_spill] sm:$0xff] %v6505_v23  ;;  %8814 = vst [vmem:[#allocation114_spill] sm:$0xff] %v6511_v31  ;;  %v6531_v29 = vmul.f32 0.35355338, %v8825_v14  ;;  %v6535_v39 = vpop.eup %5182  ;;  %v2404_v11 = vadd.f32 %v2403_v50, %v2400_v54  ;;  %v8834_v50 = vld [vmem:[#allocation91_spill] sm:$0xff]  ;;  %v2726_v40 = vadd.f32 %v2725_v10, %v2722_v1  ;;  %v8840_v10 = vld [vmem:[#allocation62_spill] sm:$0xff] }
 0x2c9   : > { %8815 = vst [vmem:[#allocation115_spill] sm:$0xff] %v6515_v55  ;;  %8818 = vst [vmem:[#allocation41_spill] sm:$0xff] %v6519_v59  ;;  %v2772_v51 = vmax.f32 %v6519_v59, %v6522_v16  ;;  %v8829_v55 = vld [vmem:[#allocation54_spill] sm:$0xff]  ;;  %v6544_v32 = vpop.eup %5184  ;;  %v6548_v3 = vmul.f32 %v6535_v39, %v6388_v17  ;;  %v6552_v14 = vmul.f32 %v6535_v39, %v6417_v15 }
 0x2ca   : > { %8820 = vst [vmem:[#allocation58_spill] sm:$0xff] %v6522_v16  ;;  %8821 = vst [vmem:[#allocation14_spill] sm:$0xff] %v6524_v48  ;;  %v3098_v5 = vmul.f32 %v1301_v41, %v8829_v55  ;;  %v1954_v54 = vadd.f32 %v8834_v50, %v1938_v36  ;;  %v1303_v16 = vpop.f32.mrf.mxu0  ;;  %v6555_v59 = vpop.eup %5186  ;;  %v6559_v41 = vmul.f32 %v6544_v32, %v6462_v9  ;;  %v8837_v55 = vld [vmem:[#allocation56_spill] sm:$0xff]  ;;  %v8841_v9 = vld [vmem:[#allocation42_spill] sm:$0xff] }
 0x2cb   : > { %8824 = vst [vmem:[#allocation59_spill] sm:$0xff] %v6528_v0  ;;  %8826 = vst [vmem:[#allocation15_spill] sm:$0xff] %v6531_v29  ;;  %v2774_v23 = vmax.f32 %v2772_v51, %v8837_v55  ;;  %v3176_v15 = vmax.f32 %v6528_v0, %v6531_v29  ;;  %v6568_v36 = vmul.f32 %v6544_v32, %v6533_v4 }
 0x2cc   : > { %8827 = vst [vmem:[#allocation116_spill] sm:$0xff] %v6533_v4  ;;  %8828 = vst [vmem:[#allocation117_spill] sm:$0xff] %v6535_v39  ;;  %v3102_v25 = vadd.f32 %v3101_v28, %v3098_v5  ;;  %v6562_v17 = vadd.f32 %v1962_v13, %v1954_v54  ;;  %v8842_v39 = vld [vmem:[#allocation12_spill] sm:$0xff]  ;;  %v8843_v5 = vld [vmem:[#allocation11_spill] sm:$0xff] }
 0x2cd   : > { %8830 = vst [vmem:[#allocation118_spill] sm:$0xff] %v6542_v24  ;;  %8831 = vst [vmem:[#allocation119_spill] sm:$0xff] %v6544_v32  ;;  %v2405_v24 = vrot.slane %v2404_v11, 4  ;;  %v2776_v50 = vmax.f32 %v2774_v23, %v8840_v10  ;;  %v3178_v51 = vmax.f32 %v3176_v15, %v8842_v39  ;;  %v6574_v28 = vmul.f32 0.35355338, %v8843_v5  ;;  %v8845_v13 = vld [vmem:[#allocation61_spill] sm:$0xff] }
 0x2ce   : > { %8832 = vst [vmem:[#allocation120_spill] sm:$0xff] %v6548_v3  ;;  %8833 = vst [vmem:[#allocation121_spill] sm:$0xff] %v6552_v14  ;;  %v2727_v3 = vrot.slane %v2726_v40, 4  ;;  %v3103_v14 = vrot.slane %v3102_v25, 4  ;;  %v6577_v54 = vmul.f32 0.35355338, %v8845_v13 }
 0x2cf   : > { %8835 = vst [vmem:[#allocation91_spill] sm:$0xff] %v6555_v59  ;;  %8836 = vst [vmem:[#allocation122_spill] sm:$0xff] %v6559_v41  ;;  %v2406_v1 = vadd.f32 %v2405_v24, %v2404_v11  ;;  %v2401_v41 = vmul.f32 %v1303_v16, %v8841_v9  ;;  %v6580_v29 = vmax.f32 %v2776_v50, %v6384_v38  ;;  %v8847_v23 = vld [vmem:[#allocation76_spill] sm:$0xff]  ;;  %v8851_v38 = vld [vmem:[#allocation50_spill] sm:$0xff] }
 0x2d0   : > { %8838 = vst [vmem:[#allocation123_spill] sm:$0xff] %v6562_v17  ;;  %8839 = vst [vmem:[#allocation124_spill] sm:$0xff] %v6568_v36  ;;  %v2728_v59 = vadd.f32 %v2727_v3, %v2726_v40  ;;  %v3104_v0 = vadd.f32 %v3103_v14, %v3102_v25  ;;  %v3180_v4 = vmax.f32 %v3178_v51, %v8847_v23  ;;  %v8848_v39 = vld [vmem:[#allocation64_spill] sm:$0xff]  ;;  %v6594_v55 = vmul.f32 0.35355338, %v8851_v38  ;;  %v8854_v36 = vld [vmem:[#allocation55_spill] sm:$0xff] }
 0x2d1   : > { %8844 = vst [vmem:[#allocation42_spill] sm:$0xff] %v6574_v28  ;;  %8846 = vst [vmem:[#allocation11_spill] sm:$0xff] %v6577_v54  ;;  %v2407_v17 = vrot.slane %v2406_v1, 2  ;;  %v2413_v11 = vadd.f32 %v2412_v44, %v2401_v41  ;;  %v2723_v9 = vmul.f32 %v1303_v16, %v8630_v47  ;;  %v2773_v40 = vmax.f32 %v6574_v28, %v6577_v54  ;;  %v8850_v44 = vld [vmem:[#allocation25_spill] sm:$0xff] }
 0x2d2   : > { %v2729_v24 = vrot.slane %v2728_v59, 2  ;;  %v3105_v3 = vrot.slane %v3104_v0, 2  ;;  %v6587_v13 = vmul.f32 0.35355338, %v8848_v39  ;;  %v6590_v50 = vmax.f32 %v3180_v4, %v6386_v22  ;;  %8852 = vst [vmem:[#allocation64_spill] sm:$0xff] %v6594_v55 }
 0x2d3   : > { %v2408_v15 = vadd.f32 %v2407_v17, %v2406_v1  ;;  %v2414_v5 = vrot.slane %v2413_v11, 4  ;;  %v2735_v25 = vadd.f32 %v2734_v6, %v2723_v9  ;;  %v2775_v14 = vmax.f32 %v2773_v40, %v8850_v44  ;;  %v8853_v1 = vld [vmem:[#allocation83_spill] sm:$0xff]  ;;  %v8865_v44 = vld [vmem:[#allocation96_spill] sm:$0xff] }
 0x2d4   : > { %8849 = vst [vmem:[#allocation61_spill] sm:$0xff] %v6587_v13  ;;  %v2730_v10 = vadd.f32 %v2729_v24, %v2728_v59  ;;  %v3106_v51 = vadd.f32 %v3105_v3, %v3104_v0  ;;  %v3099_v39 = vmul.f32 %v1303_v16, %v8854_v36  ;;  %v3177_v4 = vmax.f32 %v6587_v13, %v6594_v55  ;;  %v8863_v55 = vld [vmem:[#allocation21_spill] sm:$0xff] }
 0x2d5   : > { %v2409_v41 = vrot.slane %v2408_v15, 1  ;;  %v2415_v23 = vadd.f32 %v2414_v5, %v2413_v11  ;;  %v2736_v17 = vrot.slane %v2735_v25, 4  ;;  %v2777_v28 = vmax.f32 %v2775_v14, %v8853_v1  ;;  %v8855_v5 = vld [vmem:[#allocation72_spill] sm:$0xff] }
 0x2d6   : > { %v2731_v54 = vrot.slane %v2730_v10, 1  ;;  %v3107_v59 = vrot.slane %v3106_v51, 1  ;;  %v3111_v38 = vadd.f32 %v6497_v30, %v3099_v39  ;;  %v3179_v14 = vmax.f32 %v3177_v4, %v8855_v5  ;;  %v8860_v39 = vld [vmem:[#allocation85_spill] sm:$0xff] }
 0x2d7   : > { %v2410_v47 = vadd.f32 %v2409_v41, %v2408_v15  ;;  %v2416_v24 = vrot.slane %v2415_v23, 2  ;;  %v2737_v9 = vadd.f32 %v2736_v17, %v2735_v25  ;;  %v6601_v0 = vmax.f32 %v2777_v28, %v6411_v58  ;;  %v8857_v41 = vld [vmem:[#allocation68_spill] sm:$0xff]  ;;  %v1307_v58 = vpop.f32.mrf.mxu0 }
 0x2d8   : > { %v2732_v6 = vadd.f32 %v2731_v54, %v2730_v10  ;;  %v3108_v40 = vadd.f32 %v3107_v59, %v3106_v51  ;;  %v3112_v15 = vrot.slane %v3111_v38, 4  ;;  %v1924_v1 = vmul.f32 %v6291_v60, %v8857_v41  ;;  %v8858_v25 = vld [vmem:[#allocation84_spill] sm:$0xff]  ;;  %v6615_v51 = vpop.f32.mrf.mxu1 }
 0x2d9   : > { %v2420_v11 = vmul.f32 0.35355338, %v2410_v47  ;;  %v2417_v3 = vadd.f32 %v2416_v24, %v2415_v23  ;;  %v2738_v16 = vrot.slane %v2737_v9, 2  ;;  %v3181_v17 = vmax.f32 %v3179_v14, %v8858_v25  ;;  %8859 = vst [vmem:[#allocation125_spill] sm:$0xff] %v6615_v51  ;;  %v8861_v24 = vld [vmem:[#allocation22_spill] sm:$0xff] }
 0x2da   : > { %v6605_v22 = vmul.f32 0.35355338, %v2732_v6  ;;  %v6610_v54 = vmul.f32 0.35355338, %v3108_v40  ;;  %v3113_v23 = vadd.f32 %v3112_v15, %v3111_v38  ;;  %v1940_v59 = vadd.f32 %v8860_v39, %v1924_v1  ;;  %v8862_v6 = vld [vmem:[#allocation16_spill] sm:$0xff]  ;;  %v8864_v40 = vld [vmem:[#allocation17_spill] sm:$0xff] }
 0x2db   : > { %v2430_v10 = vmax.f32 %v6382_v63, %v2420_v11  ;;  %v2418_v28 = vrot.slane %v2417_v3, 1  ;;  %v2739_v30 = vadd.f32 %v2738_v16, %v2737_v9  ;;  %v6626_v1 = vmax.f32 %v3181_v17, %v6436_v57 }
 0x2dc   : > { %8856 = vst [vmem:[#allocation50_spill] sm:$0xff] %v6605_v22  ;;  %v1309_v22 = vpop.f32.mrf.mxu0 }
 0x2dd   : > { %v2432_v4 = vsub.f32 %v8861_v24, %v2430_v10  ;;  %v2438_v5 = vsub.f32 %v8862_v6, %v2430_v10  ;;  %v2444_v63 = vsub.f32 %v8863_v55, %v2430_v10  ;;  %v2450_v13 = vsub.f32 %v8864_v40, %v2430_v10  ;;  %v6629_v40 = vpop.f32.mrf.mxu1 }
 0x2de   : > { %v2456_v14 = vsub.f32 %v8865_v44, %v2430_v10  ;;  %v2462_v25 = vsub.f32 %v2420_v11, %v2430_v10  ;;  %v2419_v38 = vadd.f32 %v2418_v28, %v2417_v3  ;;  %v1956_v55 = vadd.f32 %v6421_v34, %v1940_v59  ;;  %8866 = vst [vmem:[#allocation85_spill] sm:$0xff] %v6629_v40 }
 0x2df   : > { %v2434_v16 = vmul.f32 1.442695, %v2432_v4  ;;  %v2440_v15 = vmul.f32 1.442695, %v2438_v5  ;;  %v2446_v47 = vmul.f32 1.442695, %v2444_v63  ;;  %v1964_v3 = vmul.f32 %v6312_v61, %v6615_v51  ;;  %v6646_v63 = vpop.f32.mrf.mxu1 }
 0x2e0   : > { %v2452_v39 = vmul.f32 1.442695, %v2450_v13  ;;  %v2458_v24 = vmul.f32 1.442695, %v2456_v14  ;;  %v2464_v6 = vmul.f32 1.442695, %v2462_v25  ;;  %v6635_v5 = vmul.f32 %v6487_v62, %v6615_v51 }
 0x2e1   : > { %5188 = vpow2.f32 %v2434_v16  ;;  %v2421_v44 = vmul.f32 0.35355338, %v2419_v38  ;;  %v2740_v11 = vrot.slane %v2739_v30, 1  ;;  %v3114_v10 = vrot.slane %v3113_v23, 2  ;;  %8869 = vst [vmem:[#allocation21_spill] sm:$0xff] %v6646_v63  ;;  %v8870_v14 = vld [vmem:[#allocation65_spill] sm:$0xff] }
 0x2e2   : > { %5190 = vpow2.f32 %v2440_v15  ;;  %v2744_v13 = vmul.f32 %v1307_v58, %v8638_v53  ;;  %v6639_v17 = vadd.f32 %v1964_v3, %v1956_v55  ;;  %v3120_v59 = vmul.f32 %v1307_v58, %v8642_v42  ;;  %v8871_v53 = vld [vmem:[#allocation29_spill] sm:$0xff]  ;;  %v8872_v16 = vld [vmem:[#allocation51_spill] sm:$0xff] }
 0x2e3   : > { %5192 = vpow2.f32 %v2446_v47  ;;  %v2431_v34 = vmax.f32 %v6409_v52, %v2421_v44  ;;  %v2741_v28 = vadd.f32 %v2740_v11, %v2739_v30  ;;  %v3115_v25 = vadd.f32 %v3114_v10, %v3113_v23  ;;  %v1311_v30 = vpop.f32.mrf.mxu0 }
 0x2e4   : > { %5194 = vpow2.f32 %v2452_v39  ;;  %8867 = vst [vmem:[#allocation22_spill] sm:$0xff] %v6639_v17  ;;  %v6644_v4 = vmul.f32 %v6342_v56, %v6629_v40  ;;  %v6655_v10 = vmul.f32 %v6544_v32, %v6629_v40 }
 0x2e5   : > { %5196 = vpow2.f32 %v2458_v24  ;;  %v2433_v38 = vsub.f32 %v8870_v14, %v2431_v34  ;;  %v2439_v47 = vsub.f32 %v8871_v53, %v2431_v34  ;;  %v2445_v52 = vsub.f32 %v8872_v16, %v2431_v34  ;;  %v6658_v16 = vpop.f32.mrf.mxu1 }
 0x2e6   : > { %8868 = vst [vmem:[#allocation16_spill] sm:$0xff] %v6644_v4  ;;  %5198 = vpow2.f32 %v2464_v6  ;;  %v2451_v23 = vsub.f32 %v6268_v12, %v2431_v34  ;;  %v2457_v15 = vsub.f32 %v6397_v45, %v2431_v34  ;;  %v2463_v58 = vsub.f32 %v2421_v44, %v2431_v34  ;;  %8873 = vst [vmem:[#allocation17_spill] sm:$0xff] %v6658_v16  ;;  %v1313_v44 = vpop.f32.mrf.mxu0  ;;  %v8874_v34 = vld [vmem:[#allocation38_spill] sm:$0xff]  ;;  %v8893_v4 = vld [vmem:[#allocation47_spill] sm:$0xff] }
 0x2e7   : > { %v2436_v39 = vmul.f32 1.442695, %v2433_v38  ;;  %v2442_v55 = vmul.f32 1.442695, %v2439_v47  ;;  %v2448_v11 = vmul.f32 1.442695, %v2445_v52  ;;  %v2745_v53 = vmul.f32 %v1309_v22, %v8680_v46 }
 0x2e8   : > { %v2454_v24 = vmul.f32 1.442695, %v2451_v23  ;;  %v2460_v3 = vmul.f32 1.442695, %v2457_v15  ;;  %v2466_v14 = vmul.f32 1.442695, %v2463_v58  ;;  %v3121_v45 = vmul.f32 %v1309_v22, %v8681_v33 }
 0x2e9   : > { %5200 = vpow2.f32 %v2436_v39  ;;  %v6660_v6 = vmul.f32 0.35355338, %v2741_v28  ;;  %v3116_v12 = vrot.slane %v3115_v25, 1  ;;  %v1926_v38 = vmul.f32 %v6291_v60, %v8874_v34  ;;  %v8875_v22 = vld [vmem:[#allocation86_spill] sm:$0xff]  ;;  %v8890_v60 = vld [vmem:[#allocation32_spill] sm:$0xff] }
 0x2ea   : > { %5202 = vpow2.f32 %v2442_v55  ;;  %v1966_v47 = vmul.f32 %v6312_v61, %v6646_v63  ;;  %v6669_v52 = vmul.f32 %v6487_v62, %v6646_v63  ;;  %v2746_v23 = vmul.f32 %v1311_v30, %v8650_v35  ;;  %v6680_v55 = vpop.f32.mrf.mxu1  ;;  %v1317_v35 = vpop.f32.mrf.mxu0 }
 0x2eb   : > { %5204 = vpow2.f32 %v2448_v11  ;;  %v3117_v28 = vadd.f32 %v3116_v12, %v3115_v25  ;;  %v1942_v15 = vadd.f32 %v8875_v22, %v1926_v38  ;;  %v3122_v58 = vmul.f32 %v1311_v30, %v5766_v26  ;;  %8877 = vst [vmem:[#allocation65_spill] sm:$0xff] %v6680_v55 }
 0x2ec   : > { %5206 = vpow2.f32 %v2454_v24  ;;  %v6678_v39 = vmul.f32 %v6342_v56, %v6658_v16  ;;  %v2752_v11 = vadd.f32 %v2746_v23, %v2744_v13  ;;  %v6686_v25 = vmul.f32 %v6544_v32, %v6658_v16  ;;  %v1319_v57 = vpop.f32.mrf.mxu0 }
 0x2ed   : > { %5208 = vpow2.f32 %v2460_v3  ;;  %v6682_v9 = vmul.f32 0.35355338, %v3117_v28  ;;  %v1958_v30 = vadd.f32 %v6444_v43, %v1942_v15  ;;  %v3128_v12 = vadd.f32 %v3122_v58, %v3120_v59  ;;  %v8882_v59 = vld [vmem:[#allocation80_spill] sm:$0xff]  ;;  %v6709_v58 = vpop.f32.mrf.mxu1 }
 0x2ee   : > { %8876 = vst [vmem:[#allocation96_spill] sm:$0xff] %v6678_v39  ;;  %8879 = vst [vmem:[#allocation51_spill] sm:$0xff] %v6686_v25  ;;  %v6688_v24 = vpop.eup %5188  ;;  %5210 = vpow2.f32 %v2466_v14  ;;  %v2747_v38 = vmul.f32 %v1313_v44, %v5752_v19  ;;  %v3123_v13 = vmul.f32 %v1313_v44, %v5768_v27  ;;  %v2172_v28 = vmul.f32 %v6468_v37, %v8795_v21  ;;  %v8897_v25 = vld [vmem:[#allocation66_spill] sm:$0xff] }
 0x2ef   : > { %8878 = vst [vmem:[#allocation29_spill] sm:$0xff] %v6682_v9  ;;  %v6692_v22 = vpop.eup %5190  ;;  %v2180_v23 = vmul.f32 %v6476_v18, %v8796_v8  ;;  %v6703_v14 = vadd.f32 %v1966_v47, %v1958_v30  ;;  %v2196_v19 = vmul.f32 %v6480_v7, %v8882_v59  ;;  %v2228_v15 = vmul.f32 %v6499_v49, %v6680_v55 }
 0x2f0   : > { %v6701_v46 = vpop.eup %5192  ;;  %v2761_v43 = vadd.f32 %v2747_v38, %v2745_v53  ;;  %8883 = vst [vmem:[#allocation127_spill] sm:$0xff] %v6709_v58  ;;  %v3137_v3 = vadd.f32 %v3123_v13, %v3121_v45  ;;  %v2748_v32 = vmul.f32 %v1317_v35, %v8738_v20  ;;  %v3124_v17 = vmul.f32 %v1317_v35, %v8740_v2  ;;  %v8886_v38 = vld [vmem:[#allocation20_spill] sm:$0xff]  ;;  %v8887_v45 = vld [vmem:[#allocation27_spill] sm:$0xff] }
 0x2f1   : > { %8880 = vst [vmem:[#allocation86_spill] sm:$0xff] %v6701_v46  ;;  %8881 = vst [vmem:[#allocation126_spill] sm:$0xff] %v6703_v14  ;;  %v6711_v44 = vpop.eup %5194  ;;  %v2188_v62 = vadd.f32 %v2180_v23, %v2172_v28  ;;  %v2173_v14 = vmul.f32 %v6511_v31, %v8886_v38  ;;  %v2181_v13 = vmul.f32 %v6524_v48, %v8887_v45  ;;  %v6740_v38 = vpop.f32.mrf.mxu1  ;;  %v8895_v45 = vld [vmem:[#allocation113_spill] sm:$0xff] }
 0x2f2   : > { %v6715_v47 = vpop.eup %5196  ;;  %v6719_v53 = vmul.f32 %v6711_v44, %v6615_v51  ;;  %v6723_v30 = vmul.f32 %v6711_v44, %v6646_v63  ;;  %v2753_v23 = vadd.f32 %v2752_v11, %v2748_v32  ;;  %v3129_v61 = vadd.f32 %v3128_v12, %v3124_v17  ;;  %v8891_v51 = vld [vmem:[#allocation117_spill] sm:$0xff]  ;;  %8894 = vst [vmem:[#allocation47_spill] sm:$0xff] %v6740_v38  ;;  %v1321_v11 = vpop.f32.mrf.mxu0 }
 0x2f3   : > { %v6729_v20 = vpop.eup %5198  ;;  %v2204_v35 = vadd.f32 %v2196_v19, %v2188_v62  ;;  %v6733_v28 = vmul.f32 %v6715_v47, %v6680_v55  ;;  %v2197_v63 = vmul.f32 %v8891_v51, %v8890_v60  ;;  %v2749_v56 = vmul.f32 %v1319_v57, %v8893_v4  ;;  %v8896_v62 = vld [vmem:[#allocation53_spill] sm:$0xff] }
 0x2f4   : > { %8884 = vst [vmem:[#allocation128_spill] sm:$0xff] %v6719_v53  ;;  %8885 = vst [vmem:[#allocation129_spill] sm:$0xff] %v6723_v30  ;;  %v2189_v53 = vadd.f32 %v2181_v13, %v2173_v14  ;;  %v8892_v30 = vld [vmem:[#allocation91_spill] sm:$0xff]  ;;  %v3125_v19 = vmul.f32 %v1319_v57, %v8896_v62  ;;  %v2174_v55 = vmul.f32 %v6468_v37, %v8897_v25  ;;  %v8898_v32 = vld [vmem:[#allocation13_spill] sm:$0xff] }
 0x2f5   : > { %8888 = vst [vmem:[#allocation130_spill] sm:$0xff] %v6729_v20  ;;  %8889 = vst [vmem:[#allocation131_spill] sm:$0xff] %v6733_v28  ;;  %v2229_v39 = vmul.f32 %v8892_v30, %v6709_v58  ;;  %v2220_v2 = vadd.f32 %v8895_v45, %v2204_v35  ;;  %v2182_v17 = vmul.f32 %v6476_v18, %v8898_v32  ;;  %v8900_v28 = vld [vmem:[#allocation33_spill] sm:$0xff]  ;;  %v8909_v20 = vld [vmem:[#allocation67_spill] sm:$0xff] }
 0x2f6   : > { %v6748_v12 = vpop.eup %5200  ;;  %v2205_v14 = vadd.f32 %v2197_v63, %v2189_v53  ;;  %v2762_v13 = vadd.f32 %v2761_v43, %v2749_v56  ;;  %v2198_v4 = vmul.f32 %v6480_v7, %v8900_v28  ;;  %v2230_v60 = vmul.f32 %v6499_v49, %v6740_v38  ;;  %v8905_v63 = vld [vmem:[#allocation122_spill] sm:$0xff]  ;;  %v8906_v43 = vld [vmem:[#allocation48_spill] sm:$0xff] }
 0x2f7   : > { %8899 = vst [vmem:[#allocation113_spill] sm:$0xff] %v6748_v12  ;;  %v6754_v45 = vpop.eup %5202  ;;  %v6756_v57 = vadd.f32 %v2228_v15, %v2220_v2  ;;  %v3138_v35 = vadd.f32 %v3137_v3, %v3125_v19  ;;  %v2190_v25 = vadd.f32 %v2182_v17, %v2174_v55  ;;  %v6760_v32 = vmul.f32 %v6715_v47, %v6740_v38  ;;  %v8907_v7 = vld [vmem:[#allocation54_spill] sm:$0xff]  ;;  %v6767_v12 = vpop.f32.mrf.mxu1  ;;  %v8911_v3 = vld [vmem:[#allocation57_spill] sm:$0xff] }
 0x2f8   : > { %8901 = vst [vmem:[#allocation132_spill] sm:$0xff] %v6754_v45  ;;  %v6762_v62 = vpop.eup %5204  ;;  %v2221_v56 = vadd.f32 %v8905_v63, %v2205_v14  ;;  %v2750_v53 = vmul.f32 %v1321_v11, %v8906_v43  ;;  %v3126_v28 = vmul.f32 %v1321_v11, %v8907_v7  ;;  %8908 = vst [vmem:[#allocation122_spill] sm:$0xff] %v6767_v12  ;;  %v8912_v17 = vld [vmem:[#allocation94_spill] sm:$0xff]  ;;  %v1323_v63 = vpop.f32.mrf.mxu0 }
 0x2f9   : > { %8902 = vst [vmem:[#allocation133_spill] sm:$0xff] %v6756_v57  ;;  %8903 = vst [vmem:[#allocation134_spill] sm:$0xff] %v6760_v32  ;;  %v2175_v2 = vmul.f32 %v6511_v31, %v8909_v20  ;;  %v6771_v15 = vpop.eup %5206  ;;  %v2206_v55 = vadd.f32 %v2198_v4, %v2190_v25  ;;  %v2183_v19 = vmul.f32 %v6524_v48, %v8911_v3 }
 0x2fa   : > { %8904 = vst [vmem:[#allocation135_spill] sm:$0xff] %v6762_v62  ;;  %8910 = vst [vmem:[#allocation48_spill] sm:$0xff] %v6771_v15  ;;  %v2199_v57 = vmul.f32 %v8891_v51, %v8912_v17  ;;  %v2231_v14 = vmul.f32 %v8892_v30, %v6767_v12  ;;  %v6779_v43 = vpop.eup %5208  ;;  %v6783_v11 = vmul.f32 %v6771_v15, %v6629_v40  ;;  %v8918_v17 = vld [vmem:[#allocation115_spill] sm:$0xff] }
 0x2fb   : > { %8913 = vst [vmem:[#allocation136_spill] sm:$0xff] %v6779_v43  ;;  %v6787_v32 = vmul.f32 %v6771_v15, %v6658_v16  ;;  %v6789_v25 = vadd.f32 %v2229_v39, %v2221_v56  ;;  %v2754_v4 = vadd.f32 %v2753_v23, %v2750_v53  ;;  %v6791_v3 = vpop.eup %5210  ;;  %v6795_v51 = vmul.f32 %v6779_v43, %v6709_v58  ;;  %v8920_v16 = vld [vmem:[#allocation49_spill] sm:$0xff]  ;;  %v6804_v23 = vpop.f32.mrf.mxu1 }
 0x2fc   : > { %8914 = vst [vmem:[#allocation137_spill] sm:$0xff] %v6783_v11  ;;  %8917 = vst [vmem:[#allocation140_spill] sm:$0xff] %v6791_v3  ;;  %v2222_v20 = vadd.f32 %v8918_v17, %v2206_v55  ;;  %v3130_v7 = vadd.f32 %v3129_v61, %v3126_v28  ;;  %v2191_v38 = vadd.f32 %v2183_v19, %v2175_v2  ;;  %v8923_v19 = vld [vmem:[#allocation28_spill] sm:$0xff]  ;;  %v1327_v11 = vpop.f32.mrf.mxu0 }
 0x2fd   : > { %8915 = vst [vmem:[#allocation138_spill] sm:$0xff] %v6787_v32  ;;  %8916 = vst [vmem:[#allocation139_spill] sm:$0xff] %v6789_v25  ;;  %v2755_v62 = vrot.slane %v2754_v4, 4  ;;  %v6800_v40 = vmul.f32 %v6779_v43, %v6767_v12  ;;  %v2751_v32 = vmul.f32 %v1323_v63, %v8920_v16  ;;  %v3127_v39 = vmul.f32 %v1323_v63, %v8854_v36  ;;  %v8924_v16 = vld [vmem:[#allocation124_spill] sm:$0xff]  ;;  %v8930_v36 = vld [vmem:[#allocation77_spill] sm:$0xff] }
 0x2fe   : > { %8921 = vst [vmem:[#allocation49_spill] sm:$0xff] %v6804_v23  ;;  %v6806_v56 = vadd.f32 %v2230_v60, %v2222_v20  ;;  %v3131_v53 = vrot.slane %v3130_v7, 4  ;;  %v2207_v25 = vadd.f32 %v2199_v57, %v2191_v38  ;;  %v2176_v55 = vmul.f32 %v6468_v37, %v8857_v41 }
 0x2ff   : > { %8919 = vst [vmem:[#allocation115_spill] sm:$0xff] %v6800_v40  ;;  %v2756_v61 = vadd.f32 %v2755_v62, %v2754_v4  ;;  %v2763_v28 = vadd.f32 %v2762_v13, %v2751_v32  ;;  %v3139_v2 = vadd.f32 %v3138_v35, %v3127_v39  ;;  %v2184_v17 = vmul.f32 %v6476_v18, %v8923_v19  ;;  %v6819_v32 = vpop.f32.mrf.mxu1  ;;  %v8928_v4 = vld [vmem:[#allocation44_spill] sm:$0xff] }
 0x300   : > { %8922 = vst [vmem:[#allocation141_spill] sm:$0xff] %v6806_v56  ;;  %v3132_v40 = vadd.f32 %v3131_v53, %v3130_v7  ;;  %v2223_v12 = vadd.f32 %v8924_v16, %v2207_v25  ;;  %v2232_v63 = vmul.f32 %v6499_v49, %v6804_v23  ;;  %v6817_v60 = vmul.f32 %v6715_v47, %v6804_v23  ;;  %v8929_v56 = vld [vmem:[#allocation109_spill] sm:$0xff] }
 0x301   : > { %v2757_v38 = vrot.slane %v2756_v61, 2  ;;  %v2764_v20 = vrot.slane %v2763_v28, 4  ;;  %v3140_v57 = vrot.slane %v3139_v2, 4  ;;  %v2192_v62 = vadd.f32 %v2184_v17, %v2176_v55  ;;  %8926 = vst [vmem:[#allocation142_spill] sm:$0xff] %v6819_v32 }
 0x302   : > { %8925 = vst [vmem:[#allocation124_spill] sm:$0xff] %v6817_v60  ;;  %v3133_v13 = vrot.slane %v3132_v40, 2  ;;  %v6821_v35 = vadd.f32 %v2231_v14, %v2223_v12  ;;  %v3148_v7 = vmul.f32 %v1327_v11, %v8642_v42  ;;  %v2177_v25 = vmul.f32 %v6511_v31, %v8928_v4  ;;  %v1329_v60 = vpop.f32.mrf.mxu0 }
 0x303   : > { %v2758_v39 = vadd.f32 %v2757_v38, %v2756_v61  ;;  %v2765_v53 = vadd.f32 %v2764_v20, %v2763_v28  ;;  %v3141_v16 = vadd.f32 %v3140_v57, %v3139_v2  ;;  %v2208_v19 = vadd.f32 %v8929_v56, %v2192_v62  ;;  %v6836_v28 = vpop.f32.mrf.mxu1 }
 0x304   : > { %8927 = vst [vmem:[#allocation143_spill] sm:$0xff] %v6821_v35  ;;  %v3134_v41 = vadd.f32 %v3133_v13, %v3132_v40  ;;  %v2185_v55 = vmul.f32 %v6524_v48, %v8930_v36  ;;  %v2233_v17 = vmul.f32 %v8892_v30, %v6819_v32  ;;  %v6833_v12 = vmul.f32 %v6779_v43, %v6819_v32  ;;  %v1331_v35 = vpop.f32.mrf.mxu0  ;;  %v8934_v36 = vld [vmem:[#allocation120_spill] sm:$0xff] }
 0x305   : > { %v2759_v42 = vrot.slane %v2758_v39, 1  ;;  %v2766_v14 = vrot.slane %v2765_v53, 2  ;;  %v3142_v11 = vrot.slane %v3141_v16, 2  ;;  %v2224_v61 = vadd.f32 %v6635_v5, %v2208_v19  ;;  %8932 = vst [vmem:[#allocation144_spill] sm:$0xff] %v6836_v28  ;;  %v8935_v5 = vld [vmem:[#allocation78_spill] sm:$0xff] }
 0x306   : > { %8931 = vst [vmem:[#allocation109_spill] sm:$0xff] %v6833_v12  ;;  %v3135_v56 = vrot.slane %v3134_v41, 1  ;;  %v2193_v2 = vadd.f32 %v2185_v55, %v2177_v25  ;;  %v6839_v40 = vmul.f32 %v1329_v60, %v8681_v33  ;;  %v2178_v38 = vmul.f32 %v6468_v37, %v8874_v34 }
 0x307   : > { %v2760_v20 = vadd.f32 %v2759_v42, %v2758_v39  ;;  %v2767_v57 = vadd.f32 %v2766_v14, %v2765_v53  ;;  %v3143_v62 = vadd.f32 %v3142_v11, %v3141_v16  ;;  %v6843_v13 = vadd.f32 %v2232_v63, %v2224_v61  ;;  %v8937_v16 = vld [vmem:[#allocation50_spill] sm:$0xff] }
 0x308   : > { %v3136_v12 = vadd.f32 %v3135_v56, %v3134_v41  ;;  %v2209_v4 = vadd.f32 %v8934_v36, %v2193_v2  ;;  %v2186_v19 = vmul.f32 %v6476_v18, %v8935_v5  ;;  %v2234_v25 = vmul.f32 %v6499_v49, %v6836_v28  ;;  %v8939_v56 = vld [vmem:[#allocation74_spill] sm:$0xff] }
 0x309   : > { %8933 = vst [vmem:[#allocation145_spill] sm:$0xff] %v6843_v13  ;;  %v2770_v33 = vmul.f32 0.35355338, %v2760_v20  ;;  %v2768_v60 = vrot.slane %v2767_v57, 1  ;;  %v3144_v55 = vrot.slane %v3143_v62, 1  ;;  %v6852_v39 = vmul.f32 %v6715_v47, %v6836_v28 }
 0x30a   : > { %v6854_v53 = vmul.f32 0.35355338, %v3136_v12  ;;  %v2225_v63 = vadd.f32 %v6655_v10, %v2209_v4  ;;  %v2194_v41 = vadd.f32 %v2186_v19, %v2178_v38  ;;  %v3150_v36 = vmul.f32 %v1331_v35, %v5766_v26  ;;  %v8942_v10 = vld [vmem:[#allocation110_spill] sm:$0xff]  ;;  %v8943_v35 = vld [vmem:[#allocation41_spill] sm:$0xff] }
 0x30b   : > { %8936 = vst [vmem:[#allocation120_spill] sm:$0xff] %v6852_v39  ;;  %v8938_v42 = vmax.f32 %v6580_v29, %v8937_v16  ;;  %v2769_v11 = vadd.f32 %v2768_v60, %v2767_v57  ;;  %v3145_v61 = vadd.f32 %v3144_v55, %v3143_v62  ;;  %v2179_v2 = vmul.f32 %v6511_v31, %v8939_v56  ;;  %v8944_v38 = vld [vmem:[#allocation58_spill] sm:$0xff]  ;;  %v8945_v62 = vld [vmem:[#allocation56_spill] sm:$0xff]  ;;  %v8987_v39 = vld [vmem:[#allocation13_spill] sm:$0xff] }
 0x30c   : > { %v8940_v20 = vmax.f32 %v6590_v50, %v6610_v54  ;;  %v6869_v13 = vadd.f32 %v2233_v17, %v2225_v63  ;;  %v2210_v4 = vadd.f32 %v8942_v10, %v2194_v41  ;;  %v6872_v26 = vadd.f32 %v3150_v36, %v3148_v7  ;;  %v8946_v60 = vld [vmem:[#allocation62_spill] sm:$0xff] }
 0x30d   : > { %v2782_v14 = vmax.f32 %v8938_v42, %v2770_v33  ;;  %v8947_v42 = vld [vmem:[#allocation97_spill] sm:$0xff]  ;;  %v2771_v18 = vmul.f32 0.35355338, %v2769_v11  ;;  %v8981_v31 = vld [vmem:[#allocation66_spill] sm:$0xff] }
 0x30e   : > { %v6867_v12 = vmax.f32 %v8940_v20, %v6854_v53  ;;  %8941 = vst [vmem:[#allocation50_spill] sm:$0xff] %v6869_v13  ;;  %v2226_v7 = vadd.f32 %v6669_v52, %v2210_v4 }
 0x30f   : > { %v2784_v29 = vsub.f32 %v8943_v35, %v2782_v14  ;;  %v2790_v57 = vsub.f32 %v8944_v38, %v2782_v14  ;;  %v2796_v19 = vsub.f32 %v8945_v62, %v2782_v14  ;;  %v2802_v55 = vsub.f32 %v8946_v60, %v2782_v14 }
 0x310   : > { %v2808_v49 = vsub.f32 %v8947_v42, %v2782_v14  ;;  %v2814_v50 = vsub.f32 %v8937_v16, %v2782_v14  ;;  %v2820_v20 = vsub.f32 %v2770_v33, %v2782_v14  ;;  %v8948_v35 = vmax.f32 %v6601_v0, %v6660_v6  ;;  %v8951_v33 = vld [vmem:[#allocation42_spill] sm:$0xff]  ;;  %v8952_v14 = vld [vmem:[#allocation11_spill] sm:$0xff] }
 0x311   : > { %v2786_v17 = vmul.f32 1.442695, %v2784_v29  ;;  %v2792_v63 = vmul.f32 1.442695, %v2790_v57  ;;  %v2798_v13 = vmul.f32 1.442695, %v2796_v19  ;;  %v6886_v42 = vadd.f32 %v2234_v25, %v2226_v7  ;;  %v6894_v25 = vpop.f32.mrf.mxu1 }
 0x312   : > { %v2804_v41 = vmul.f32 1.442695, %v2802_v55  ;;  %v2810_v36 = vmul.f32 1.442695, %v2808_v49  ;;  %v2816_v10 = vmul.f32 1.442695, %v2814_v50  ;;  %v2783_v38 = vmax.f32 %v8948_v35, %v2771_v18 }
 0x313   : > { %5212 = vpow2.f32 %v2786_v17  ;;  %v2822_v62 = vmul.f32 1.442695, %v2820_v20  ;;  %v6884_v60 = vmul.f32 0.35355338, %v3145_v61  ;;  %8950 = vst [vmem:[#allocation41_spill] sm:$0xff] %v6886_v42  ;;  %v8953_v29 = vld [vmem:[#allocation25_spill] sm:$0xff]  ;;  %v1333_v20 = vpop.f32.mrf.mxu0 }
 0x314   : > { %5214 = vpow2.f32 %v2792_v63  ;;  %v2785_v16 = vsub.f32 %v8951_v33, %v2783_v38  ;;  %v2791_v11 = vsub.f32 %v8952_v14, %v2783_v38  ;;  %v2797_v52 = vsub.f32 %v8953_v29, %v2783_v38  ;;  %v8954_v49 = vld [vmem:[#allocation83_spill] sm:$0xff]  ;;  %8956 = vst [vmem:[#allocation58_spill] sm:$0xff] %v6894_v25 }
 0x315   : > { %8949 = vst [vmem:[#allocation110_spill] sm:$0xff] %v6884_v60  ;;  %5216 = vpow2.f32 %v2798_v13  ;;  %v2803_v4 = vsub.f32 %v8954_v49, %v2783_v38  ;;  %v8955_v57 = vld [vmem:[#allocation19_spill] sm:$0xff]  ;;  %v2815_v0 = vsub.f32 %v6660_v6, %v2783_v38  ;;  %v2821_v35 = vsub.f32 %v2771_v18, %v2783_v38  ;;  %v1337_v29 = vpop.f32.mrf.mxu0 }
 0x316   : > { %v2809_v19 = vsub.f32 %v8955_v57, %v2783_v38  ;;  %5218 = vpow2.f32 %v2804_v41  ;;  %v2788_v55 = vmul.f32 1.442695, %v2785_v16  ;;  %v2794_v61 = vmul.f32 1.442695, %v2791_v11  ;;  %v8958_v6 = vld [vmem:[#allocation79_spill] sm:$0xff] }
 0x317   : > { %v2800_v50 = vmul.f32 1.442695, %v2797_v52  ;;  %5220 = vpow2.f32 %v2810_v36  ;;  %v2806_v17 = vmul.f32 1.442695, %v2803_v4  ;;  %v2818_v7 = vmul.f32 1.442695, %v2815_v0 }
 0x318   : > { %v2812_v63 = vmul.f32 1.442695, %v2809_v19  ;;  %5222 = vpow2.f32 %v2816_v10  ;;  %v8957_v13 = vmax.f32 %v6626_v1, %v6682_v9  ;;  %v2187_v41 = vmul.f32 %v6524_v48, %v8958_v6  ;;  %v8960_v52 = vld [vmem:[#allocation121_spill] sm:$0xff]  ;;  %v8963_v0 = vld [vmem:[#allocation130_spill] sm:$0xff]  ;;  %v8974_v42 = vld [vmem:[#allocation135_spill] sm:$0xff] }
 0x319   : > { %5224 = vpow2.f32 %v2822_v62  ;;  %v2235_v16 = vmul.f32 %v8892_v30, %v6894_v25  ;;  %v6908_v36 = vmul.f32 %v6779_v43, %v6894_v25  ;;  %v3151_v10 = vmul.f32 %v1333_v20, %v5768_v27  ;;  %v6919_v27 = vpop.f32.mrf.mxu1  ;;  %v8979_v30 = vld [vmem:[#allocation53_spill] sm:$0xff] }
 0x31a   : > { %v6900_v33 = vmax.f32 %v8957_v13, %v6884_v60  ;;  %5226 = vpow2.f32 %v2788_v55  ;;  %v2824_v18 = vmul.f32 1.442695, %v2821_v35  ;;  %v2195_v38 = vadd.f32 %v2187_v41, %v2179_v2  ;;  %8961 = vst [vmem:[#allocation62_spill] sm:$0xff] %v6919_v27  ;;  %v8965_v35 = vld [vmem:[#allocation52_spill] sm:$0xff] }
 0x31b   : > { %8959 = vst [vmem:[#allocation56_spill] sm:$0xff] %v6908_v36  ;;  %v2468_v1 = vadd.f32 %v6692_v22, %v6688_v24  ;;  %5228 = vpow2.f32 %v2794_v61  ;;  %v3165_v14 = vadd.f32 %v3151_v10, %v6839_v40  ;;  %v2478_v62 = vmul.f32 %v6688_v24, %v8795_v21  ;;  %v8962_v40 = vld [vmem:[#allocation101_spill] sm:$0xff]  ;;  %v8964_v61 = vld [vmem:[#allocation51_spill] sm:$0xff]  ;;  %v8966_v10 = vld [vmem:[#allocation20_spill] sm:$0xff] }
 0x31c   : > { %v2486_v11 = vmul.f32 %v6692_v22, %v8796_v8  ;;  %5230 = vpow2.f32 %v2800_v50  ;;  %v2211_v49 = vadd.f32 %v8960_v52, %v2195_v38  ;;  %v2502_v4 = vmul.f32 %v6701_v46, %v8882_v59  ;;  %v8967_v38 = vld [vmem:[#allocation113_spill] sm:$0xff] }
 0x31d   : > { %v2470_v2 = vadd.f32 %v6701_v46, %v2468_v1  ;;  %5232 = vpow2.f32 %v2806_v17  ;;  %v2518_v19 = vmul.f32 %v6711_v44, %v8962_v40  ;;  %v2550_v55 = vmul.f32 %v8963_v0, %v6919_v27  ;;  %v8968_v17 = vld [vmem:[#allocation27_spill] sm:$0xff] }
 0x31e   : > { %v2494_v57 = vadd.f32 %v2486_v11, %v2478_v62  ;;  %5234 = vpow2.f32 %v2812_v63  ;;  %v2227_v50 = vadd.f32 %v8964_v61, %v2211_v49  ;;  %v3152_v13 = vmul.f32 %v1337_v29, %v8965_v35  ;;  %v8973_v35 = vld [vmem:[#allocation32_spill] sm:$0xff] }
 0x31f   : > { %v2472_v20 = vadd.f32 %v6711_v44, %v2470_v2  ;;  %5236 = vpow2.f32 %v2818_v7  ;;  %v2479_v1 = vmul.f32 %v8967_v38, %v8966_v10  ;;  %v2487_v62 = vmul.f32 %v6754_v45, %v8968_v17  ;;  %v1339_v2 = vpop.f32.mrf.mxu0 }
 0x320   : > { %v2510_v41 = vadd.f32 %v2502_v4, %v2494_v57  ;;  %v6935_v11 = vpop.eup %5212  ;;  %5238 = vpow2.f32 %v2824_v18  ;;  %v6937_v52 = vadd.f32 %v2235_v16, %v2227_v50  ;;  %v6941_v49 = vadd.f32 %v6872_v26, %v3152_v13  ;;  %v6947_v57 = vpop.f32.mrf.mxu1  ;;  %v8976_v50 = vld [vmem:[#allocation103_spill] sm:$0xff] }
 0x321   : > { %8969 = vst [vmem:[#allocation97_spill] sm:$0xff] %v6935_v11  ;;  %v2474_v63 = vadd.f32 %v6715_v47, %v2472_v20  ;;  %v6943_v29 = vpop.eup %5214  ;;  %v2838_v4 = vmul.f32 %v6935_v11, %v8795_v21  ;;  %8972 = vst [vmem:[#allocation25_spill] sm:$0xff] %v6947_v57  ;;  %v2495_v61 = vadd.f32 %v2487_v62, %v2479_v1 }
 0x322   : > { %8970 = vst [vmem:[#allocation42_spill] sm:$0xff] %v6937_v52  ;;  %8971 = vst [vmem:[#allocation11_spill] sm:$0xff] %v6943_v29  ;;  %v2526_v7 = vadd.f32 %v2518_v19, %v2510_v41  ;;  %v2503_v18 = vmul.f32 %v8974_v42, %v8973_v35  ;;  %v6951_v16 = vpop.eup %5216  ;;  %v2846_v26 = vmul.f32 %v6943_v29, %v8796_v8  ;;  %v8978_v41 = vld [vmem:[#allocation131_spill] sm:$0xff] }
 0x323   : > { %8975 = vst [vmem:[#allocation83_spill] sm:$0xff] %v6951_v16  ;;  %v2476_v47 = vadd.f32 %v8963_v0, %v2474_v63  ;;  %v2519_v20 = vmul.f32 %v6771_v15, %v8976_v50  ;;  %v2551_v19 = vmul.f32 %v6791_v3, %v6947_v57  ;;  %v6960_v13 = vpop.eup %5218  ;;  %v2862_v62 = vmul.f32 %v6951_v16, %v8882_v59  ;;  %v6990_v59 = vpop.f32.mrf.mxu1 }
 0x324   : > { %8977 = vst [vmem:[#allocation19_spill] sm:$0xff] %v6960_v13  ;;  %v2542_v1 = vadd.f32 %v8978_v41, %v2526_v7  ;;  %v2511_v52 = vadd.f32 %v2503_v18, %v2495_v61  ;;  %v3153_v43 = vmul.f32 %v1339_v2, %v8979_v30  ;;  %v6966_v63 = vpop.eup %5220  ;;  %v2854_v37 = vadd.f32 %v2846_v26, %v2838_v4  ;;  %v8984_v2 = vld [vmem:[#allocation65_spill] sm:$0xff] }
 0x325   : > { %8980 = vst [vmem:[#allocation121_spill] sm:$0xff] %v6966_v63  ;;  %5240 = vrcp.f32 %v2476_v47  ;;  %v2878_v48 = vmul.f32 %v6960_v13, %v8962_v40  ;;  %v2480_v36 = vmul.f32 %v6688_v24, %v8981_v31  ;;  %v6972_v8 = vpop.eup %5222  ;;  %v6976_v7 = vmul.f32 %v6966_v63, %v6804_v23  ;;  %8986 = vst [vmem:[#allocation53_spill] sm:$0xff] %v6990_v59 }
 0x326   : > { %8982 = vst [vmem:[#allocation51_spill] sm:$0xff] %v6972_v8  ;;  %v6980_v61 = vmul.f32 %v6966_v63, %v6836_v28  ;;  %v2558_v30 = vadd.f32 %v2550_v55, %v2542_v1  ;;  %v2894_v4 = vmul.f32 %v6966_v63, %v8984_v2  ;;  %v6984_v18 = vpop.eup %5224  ;;  %v2870_v47 = vadd.f32 %v2862_v62, %v2854_v37  ;;  %v8988_v55 = vld [vmem:[#allocation33_spill] sm:$0xff]  ;;  %v8989_v2 = vld [vmem:[#allocation88_spill] sm:$0xff] }
 0x327   : > { %8985 = vst [vmem:[#allocation131_spill] sm:$0xff] %v6984_v18  ;;  %v2910_v26 = vmul.f32 %v6972_v8, %v6919_v27  ;;  %v2527_v41 = vadd.f32 %v2519_v20, %v2511_v52  ;;  %v6988_v40 = vadd.f32 %v3165_v14, %v3153_v43  ;;  %v6992_v21 = vpop.eup %5226  ;;  %v2504_v1 = vmul.f32 %v6701_v46, %v8988_v55 }
 0x328   : > { %8983 = vst [vmem:[#allocation52_spill] sm:$0xff] %v6980_v61  ;;  %v2488_v61 = vmul.f32 %v6692_v22, %v8987_v39  ;;  %v2520_v18 = vmul.f32 %v6711_v44, %v8989_v2  ;;  %v2552_v37 = vmul.f32 %v8963_v0, %v6990_v59  ;;  %v7002_v62 = vpop.eup %5228  ;;  %v2886_v43 = vadd.f32 %v2878_v48, %v2870_v47 }
 0x329   : > { %v2543_v14 = vadd.f32 %v6795_v51, %v2527_v41  ;;  %v2839_v52 = vmul.f32 %v6992_v21, %v8966_v10  ;;  %v2840_v20 = vmul.f32 %v6935_v11, %v8981_v31  ;;  %v7009_v27 = vpop.eup %5230  ;;  %v2847_v28 = vmul.f32 %v7002_v62, %v8968_v17 }
 0x32a   : > { %v2496_v44 = vadd.f32 %v2488_v61, %v2480_v36  ;;  %v2848_v5 = vmul.f32 %v6943_v29, %v8987_v39  ;;  %v2864_v48 = vmul.f32 %v6951_v16, %v8988_v55  ;;  %v7017_v47 = vpop.eup %5232  ;;  %v2902_v51 = vadd.f32 %v2894_v4, %v2886_v43  ;;  %v1341_v55 = vpop.f32.mrf.mxu0 }
 0x32b   : > { %v7019_v41 = vadd.f32 %v2551_v19, %v2543_v14  ;;  %v2863_v31 = vmul.f32 %v7009_v27, %v8973_v35  ;;  %v2880_v34 = vmul.f32 %v6960_v13, %v8989_v2  ;;  %v7025_v23 = vpop.eup %5234  ;;  %v2855_v36 = vadd.f32 %v2847_v28, %v2839_v52 }
 0x32c   : > { %8991 = vst [vmem:[#allocation147_spill] sm:$0xff] %v7025_v23  ;;  %v2879_v61 = vmul.f32 %v7017_v47, %v8976_v50  ;;  %v2512_v39 = vadd.f32 %v2504_v1, %v2496_v44  ;;  %v2856_v60 = vadd.f32 %v2848_v5, %v2840_v20  ;;  %v7029_v9 = vpop.eup %5236  ;;  %v7033_v19 = vmul.f32 %v7025_v23, %v6819_v32  ;;  %v8997_v44 = vld [vmem:[#allocation47_spill] sm:$0xff]  ;;  %v8998_v50 = vld [vmem:[#allocation54_spill] sm:$0xff]  ;;  %v9020_v32 = vld [vmem:[#allocation28_spill] sm:$0xff] }
 0x32d   : > { %8990 = vst [vmem:[#allocation146_spill] sm:$0xff] %v7019_v41  ;;  %8992 = vst [vmem:[#allocation148_spill] sm:$0xff] %v7029_v9  ;;  %v7037_v4 = vmul.f32 %v7025_v23, %v6894_v25  ;;  %v7039_v43 = vadd.f32 %v2910_v26, %v2902_v51  ;;  %v2895_v28 = vmul.f32 %v7025_v23, %v6709_v58  ;;  %v7043_v14 = vpop.eup %5238  ;;  %v8999_v51 = vld [vmem:[#allocation67_spill] sm:$0xff] }
 0x32e   : > { %8993 = vst [vmem:[#allocation149_spill] sm:$0xff] %v7033_v19  ;;  %8996 = vst [vmem:[#allocation152_spill] sm:$0xff] %v7043_v14  ;;  %v2871_v1 = vadd.f32 %v2863_v31, %v2855_v36  ;;  %v2911_v5 = vmul.f32 %v7029_v9, %v6947_v57  ;;  %v2528_v52 = vadd.f32 %v2520_v18, %v2512_v39  ;;  %v7055_v36 = vpop.f32.mrf.mxu1  ;;  %v9002_v57 = vld [vmem:[#allocation57_spill] sm:$0xff]  ;;  %v9003_v18 = vld [vmem:[#allocation94_spill] sm:$0xff] }
 0x32f   : > { %8994 = vst [vmem:[#allocation150_spill] sm:$0xff] %v7037_v4  ;;  %8995 = vst [vmem:[#allocation151_spill] sm:$0xff] %v7039_v43  ;;  %v2872_v20 = vadd.f32 %v2864_v48, %v2856_v60  ;;  %v2896_v41 = vmul.f32 %v6966_v63, %v8997_v44  ;;  %v2912_v2 = vmul.f32 %v6972_v8, %v6990_v59  ;;  %v9000_v4 = vld [vmem:[#allocation134_spill] sm:$0xff]  ;;  %v9004_v59 = vld [vmem:[#allocation116_spill] sm:$0xff] }
 0x330   : > { %v3154_v26 = vmul.f32 %v1341_v55, %v8998_v50  ;;  %v2481_v35 = vmul.f32 %v8967_v38, %v8999_v51  ;;  %v2887_v58 = vadd.f32 %v2879_v61, %v2871_v1  ;;  %v2544_v14 = vadd.f32 %v9000_v4, %v2528_v52  ;;  %9001 = vst [vmem:[#allocation54_spill] sm:$0xff] %v7055_v36 }
 0x331   : > { %v2888_v31 = vadd.f32 %v2880_v34, %v2872_v20  ;;  %v2489_v39 = vmul.f32 %v6754_v45, %v9002_v57  ;;  %v2505_v48 = vmul.f32 %v8974_v42, %v9003_v18  ;;  %v2521_v50 = vmul.f32 %v6771_v15, %v9004_v59 }
 0x332   : > { %v3158_v60 = vadd.f32 %v6941_v49, %v3154_v26  ;;  %v2553_v55 = vmul.f32 %v6791_v3, %v7055_v36  ;;  %v7066_v61 = vpop.eup %5240  ;;  %v2903_v4 = vadd.f32 %v2895_v28, %v2887_v58  ;;  %v2560_v34 = vadd.f32 %v2552_v37, %v2544_v14  ;;  %v9009_v14 = vld [vmem:[#allocation122_spill] sm:$0xff] }
 0x333   : > { %v2904_v1 = vadd.f32 %v2896_v41, %v2888_v31  ;;  %v2497_v52 = vadd.f32 %v2489_v39, %v2481_v35  ;;  %v7069_v20 = vmul.f32 %v7066_v61, %v2558_v30  ;;  %v2841_v49 = vmul.f32 %v6992_v21, %v8999_v51  ;;  %v9010_v39 = vld [vmem:[#allocation89_spill] sm:$0xff] }
 0x334   : > { %v3159_v44 = vrot.slane %v3158_v60, 4  ;;  %v2849_v26 = vmul.f32 %v7002_v62, %v9002_v57  ;;  %v7075_v15 = vadd.f32 %v2911_v5, %v2903_v4  ;;  %v7078_v63 = vmul.f32 %v7066_v61, %v2560_v34  ;;  %v9011_v4 = vld [vmem:[#allocation90_spill] sm:$0xff]  ;;  %v1343_v34 = vpop.f32.mrf.mxu0 }
 0x335   : > { %9005 = vst [vmem:[#allocation134_spill] sm:$0xff] %v7069_v20  ;;  %v7080_v43 = vadd.f32 %v2912_v2, %v2904_v1  ;;  %v2513_v58 = vadd.f32 %v2505_v48, %v2497_v52  ;;  %v2865_v30 = vmul.f32 %v7009_v27, %v9003_v18  ;;  %v2881_v41 = vmul.f32 %v7017_v47, %v9004_v59  ;;  %v9019_v18 = vld [vmem:[#allocation92_spill] sm:$0xff] }
 0x336   : > { %9006 = vst [vmem:[#allocation153_spill] sm:$0xff] %v7075_v15  ;;  %9007 = vst [vmem:[#allocation154_spill] sm:$0xff] %v7078_v63  ;;  %v3160_v37 = vadd.f32 %v3159_v44, %v3158_v60  ;;  %v2857_v35 = vadd.f32 %v2849_v26, %v2841_v49  ;;  %v2897_v31 = vmul.f32 %v7025_v23, %v9009_v14  ;;  %v9012_v60 = vld [vmem:[#allocation44_spill] sm:$0xff]  ;;  %v9013_v49 = vld [vmem:[#allocation115_spill] sm:$0xff] }
 0x337   : > { %9008 = vst [vmem:[#allocation155_spill] sm:$0xff] %v7080_v43  ;;  %v2529_v28 = vadd.f32 %v2521_v50, %v2513_v58  ;;  %v2913_v5 = vmul.f32 %v7029_v9, %v7055_v36  ;;  %v1915_v2 = vadd.f32 %v9011_v4, %v9010_v39  ;;  %v1925_v1 = vmul.f32 %v9010_v39, %v9012_v60  ;;  %v9014_v26 = vld [vmem:[#allocation34_spill] sm:$0xff]  ;;  %v9015_v63 = vld [vmem:[#allocation77_spill] sm:$0xff]  ;;  %v9016_v43 = vld [vmem:[#allocation55_spill] sm:$0xff] }
 0x338   : > { %v3161_v48 = vrot.slane %v3160_v37, 2  ;;  %v2873_v44 = vadd.f32 %v2865_v30, %v2857_v35  ;;  %v1927_v52 = vmul.f32 %v9010_v39, %v8939_v56  ;;  %v1933_v20 = vmul.f32 %v9011_v4, %v9015_v63  ;;  %v9017_v30 = vld [vmem:[#allocation68_spill] sm:$0xff] }
 0x339   : > { %v2545_v50 = vadd.f32 %v9013_v49, %v2529_v28  ;;  %v1917_v58 = vadd.f32 %v9014_v26, %v1915_v2  ;;  %v1935_v36 = vmul.f32 %v9011_v4, %v8958_v6  ;;  %v3155_v35 = vmul.f32 %v1343_v34, %v9016_v43  ;;  %v9023_v34 = vld [vmem:[#allocation35_spill] sm:$0xff] }
 0x33a   : > { %v3162_v14 = vadd.f32 %v3161_v48, %v3160_v37  ;;  %v2889_v59 = vadd.f32 %v2881_v41, %v2873_v44  ;;  %v2482_v23 = vmul.f32 %v6688_v24, %v9017_v30  ;;  %v1941_v28 = vadd.f32 %v1933_v20, %v1925_v1  ;;  %v9021_v37 = vld [vmem:[#allocation23_spill] sm:$0xff]  ;;  %v9022_v48 = vld [vmem:[#allocation102_spill] sm:$0xff]  ;;  %v9025_v20 = vld [vmem:[#allocation16_spill] sm:$0xff] }
 0x33b   : > { %v7105_v15 = vadd.f32 %v2553_v55, %v2545_v50  ;;  %v1919_v25 = vadd.f32 %v9019_v18, %v1917_v58  ;;  %v1943_v49 = vadd.f32 %v1935_v36, %v1927_v52  ;;  %v3167_v56 = vadd.f32 %v6988_v40, %v3155_v35  ;;  %v7117_v36 = vpop.f32.mrf.mxu1 }
 0x33c   : > { %v3163_v2 = vrot.slane %v3162_v14, 1  ;;  %v2905_v26 = vadd.f32 %v2897_v31, %v2889_v59  ;;  %v2490_v6 = vmul.f32 %v6692_v22, %v9020_v32  ;;  %v1957_v41 = vadd.f32 %v9021_v37, %v1941_v28  ;;  %v9026_v31 = vld [vmem:[#allocation96_spill] sm:$0xff] }
 0x33d   : > { %9018 = vst [vmem:[#allocation89_spill] sm:$0xff] %v7105_v15  ;;  %v1959_v43 = vadd.f32 %v9022_v48, %v1943_v49  ;;  %5242 = vrcp.f32 %v1919_v25  ;;  %v2506_v55 = vmul.f32 %v6701_v46, %v9023_v34  ;;  %v3168_v18 = vrot.slane %v3167_v56, 4  ;;  %v9030_v48 = vld [vmem:[#allocation128_spill] sm:$0xff]  ;;  %v9032_v15 = vld [vmem:[#allocation59_spill] sm:$0xff] }
 0x33e   : > { %v3164_v44 = vadd.f32 %v3163_v2, %v3162_v14  ;;  %v7115_v50 = vadd.f32 %v2913_v5, %v2905_v26  ;;  %v2498_v59 = vadd.f32 %v2490_v6, %v2482_v23  ;;  %v1973_v40 = vadd.f32 %v9025_v20, %v1957_v41  ;;  %v9027_v23 = vld [vmem:[#allocation125_spill] sm:$0xff]  ;;  %v9028_v2 = vld [vmem:[#allocation82_spill] sm:$0xff]  ;;  %v9029_v26 = vld [vmem:[#allocation39_spill] sm:$0xff] }
 0x33f   : > { %v1975_v1 = vadd.f32 %v9026_v31, %v1959_v43  ;;  %v2554_v52 = vmul.f32 %v8963_v0, %v7117_v36  ;;  %v2842_v25 = vmul.f32 %v6935_v11, %v9017_v30  ;;  %v3169_v35 = vadd.f32 %v3168_v18, %v3167_v56 }
 0x340   : > { %9024 = vst [vmem:[#allocation90_spill] sm:$0xff] %v7115_v50  ;;  %v3174_v58 = vmul.f32 0.35355338, %v3164_v44  ;;  %v2514_v28 = vadd.f32 %v2506_v55, %v2498_v59  ;;  %v2850_v14 = vmul.f32 %v6943_v29, %v9020_v32  ;;  %v2866_v5 = vmul.f32 %v6951_v16, %v9023_v34  ;;  %v9031_v44 = vld [vmem:[#allocation46_spill] sm:$0xff]  ;;  %v9037_v29 = vld [vmem:[#allocation124_spill] sm:$0xff] }
 0x341   : > { %v2882_v6 = vmul.f32 %v6960_v13, %v9027_v23  ;;  %v7133_v49 = vmul.f32 %v6972_v8, %v7117_v36  ;;  %v1914_v37 = vadd.f32 %v9029_v26, %v9028_v2  ;;  %v3170_v56 = vrot.slane %v3169_v35, 2  ;;  %v9033_v2 = vld [vmem:[#allocation15_spill] sm:$0xff]  ;;  %v9035_v8 = vld [vmem:[#allocation76_spill] sm:$0xff] }
 0x342   : > { %v3188_v41 = vmax.f32 %v6867_v12, %v3174_v58  ;;  %v2530_v43 = vadd.f32 %v9030_v48, %v2514_v28  ;;  %v2858_v55 = vadd.f32 %v2850_v14, %v2842_v25  ;;  %v1921_v59 = vmul.f32 %v9010_v39, %v8966_v10  ;;  %v9034_v12 = vld [vmem:[#allocation12_spill] sm:$0xff]  ;;  %v9036_v25 = vld [vmem:[#allocation98_spill] sm:$0xff] }
 0x343   : > { %v1916_v18 = vadd.f32 %v9031_v44, %v1914_v37  ;;  %v1923_v20 = vmul.f32 %v9010_v39, %v8999_v51  ;;  %v1929_v31 = vmul.f32 %v9011_v4, %v8968_v17  ;;  %v3171_v13 = vadd.f32 %v3170_v56, %v3169_v35 }
 0x344   : > { %v3190_v50 = vsub.f32 %v9032_v15, %v3188_v41  ;;  %v3196_v26 = vsub.f32 %v9033_v2, %v3188_v41  ;;  %v3202_v19 = vsub.f32 %v9034_v12, %v3188_v41  ;;  %v3208_v28 = vsub.f32 %v9035_v8, %v3188_v41 }
 0x345   : > { %v3214_v14 = vsub.f32 %v9036_v25, %v3188_v41  ;;  %v3220_v37 = vsub.f32 %v6610_v54, %v3188_v41  ;;  %v3226_v48 = vsub.f32 %v6854_v53, %v3188_v41  ;;  %v3232_v44 = vsub.f32 %v3174_v58, %v3188_v41  ;;  %v9038_v54 = vld [vmem:[#allocation87_spill] sm:$0xff] }
 0x346   : > { %v3192_v10 = vmul.f32 1.442695, %v3190_v50  ;;  %v3198_v39 = vmul.f32 1.442695, %v3196_v26  ;;  %v3204_v51 = vmul.f32 1.442695, %v3202_v19  ;;  %v2546_v2 = vadd.f32 %v9037_v29, %v2530_v43 }
 0x347   : > { %v3210_v17 = vmul.f32 1.442695, %v3208_v28  ;;  %v3216_v16 = vmul.f32 1.442695, %v3214_v14  ;;  %v3222_v15 = vmul.f32 1.442695, %v3220_v37  ;;  %v2874_v0 = vadd.f32 %v2866_v5, %v2858_v55 }
 0x348   : > { %5244 = vpow2.f32 %v3192_v10  ;;  %v3228_v12 = vmul.f32 1.442695, %v3226_v48  ;;  %v3234_v11 = vmul.f32 1.442695, %v3232_v44  ;;  %v3172_v8 = vrot.slane %v3171_v13, 1  ;;  %v9045_v55 = vld [vmem:[#allocation99_spill] sm:$0xff] }
 0x349   : > { %5246 = vpow2.f32 %v3198_v39  ;;  %v2562_v25 = vadd.f32 %v2554_v52, %v2546_v2  ;;  %v1918_v46 = vadd.f32 %v9038_v54, %v1916_v18  ;;  %v1931_v19 = vmul.f32 %v9011_v4, %v9002_v57  ;;  %v9048_v28 = vld [vmem:[#allocation72_spill] sm:$0xff]  ;;  %v9050_v37 = vld [vmem:[#allocation37_spill] sm:$0xff]  ;;  %v9052_v39 = vld [vmem:[#allocation110_spill] sm:$0xff] }
 0x34a   : > { %v5243_v53 = vpop.eup %5242  ;;  %5248 = vpow2.f32 %v3204_v51  ;;  %v3173_v50 = vadd.f32 %v3172_v8, %v3171_v13  ;;  %v1937_v58 = vadd.f32 %v1929_v31, %v1921_v59  ;;  %v2890_v5 = vadd.f32 %v2882_v6, %v2874_v0  ;;  %v9042_v51 = vld [vmem:[#allocation93_spill] sm:$0xff]  ;;  %v9047_v31 = vld [vmem:[#allocation64_spill] sm:$0xff] }
 0x34b   : > { %5250 = vpow2.f32 %v3210_v17  ;;  %v7157_v35 = vmul.f32 %v5243_v53, %v1973_v40  ;;  %v7159_v29 = vmul.f32 %v5243_v53, %v1975_v1  ;;  %v7162_v10 = vmul.f32 %v7066_v61, %v2562_v25  ;;  %v9043_v1 = vld [vmem:[#allocation95_spill] sm:$0xff]  ;;  %v9044_v0 = vld [vmem:[#allocation105_spill] sm:$0xff]  ;;  %v9049_v14 = vld [vmem:[#allocation84_spill] sm:$0xff] }
 0x34c   : > { %5252 = vpow2.f32 %v3216_v16  ;;  %v3175_v52 = vmul.f32 0.35355338, %v3173_v50  ;;  %v1939_v41 = vadd.f32 %v1931_v19, %v1923_v20  ;;  %v1953_v56 = vadd.f32 %v9042_v51, %v1937_v58  ;;  %v9046_v59 = vld [vmem:[#allocation61_spill] sm:$0xff] }
 0x34d   : > { %9039 = vst [vmem:[#allocation115_spill] sm:$0xff] %v7157_v35  ;;  %9040 = vst [vmem:[#allocation34_spill] sm:$0xff] %v7159_v29  ;;  %5254 = vpow2.f32 %v3222_v15  ;;  %v3429_v13 = vpack.c.bf16 %v7159_v29, %v7157_v35  ;;  %v2483_v17 = vmul.f32 %v8967_v38, %v9012_v60  ;;  %v2906_v40 = vadd.f32 %v6976_v7, %v2890_v5  ;;  %v9081_v29 = vld [vmem:[#allocation22_spill] sm:$0xff] }
 0x34e   : > { %9041 = vst [vmem:[#allocation55_spill] sm:$0xff] %v7162_v10  ;;  %5256 = vpow2.f32 %v3228_v12  ;;  %v3189_v4 = vmax.f32 %v6900_v33, %v3175_v52  ;;  %v1955_v43 = vadd.f32 %v9043_v1, %v1939_v41  ;;  %v1969_v16 = vadd.f32 %v9044_v0, %v1953_v56  ;;  %v7188_v56 = vpop.f32.mrf.mxu1  ;;  %v9083_v10 = vld [vmem:[#allocation126_spill] sm:$0xff] }
 0x34f   : > { %5258 = vpow2.f32 %v3234_v11  ;;  %3798 = vmatprep.subr.bf16.mxu1 %v3429_v13  ;;  %v2491_v6 = vmul.f32 %v6754_v45, %v9015_v63  ;;  %v2507_v18 = vmul.f32 %v8974_v42, %v9045_v55  ;;  %v9051_v11 = vld [vmem:[#allocation29_spill] sm:$0xff]  ;;  %v7185_v54 = vadd.f32 %v7133_v49, %v2906_v40  ;;  %v9054_v13 = vld [vmem:[#allocation118_spill] sm:$0xff] }
 0x350   : > { %v3191_v20 = vsub.f32 %v9046_v59, %v3189_v4  ;;  %v3197_v26 = vsub.f32 %v9047_v31, %v3189_v4  ;;  %v3203_v33 = vsub.f32 %v9048_v28, %v3189_v4  ;;  %v3209_v7 = vsub.f32 %v9049_v14, %v3189_v4  ;;  %v9061_v14 = vld [vmem:[#allocation137_spill] sm:$0xff] }
 0x351   : > { %v3215_v48 = vsub.f32 %v9050_v37, %v3189_v4  ;;  %v3221_v44 = vsub.f32 %v9051_v11, %v3189_v4  ;;  %v3227_v15 = vsub.f32 %v9052_v39, %v3189_v4  ;;  %v3233_v2 = vsub.f32 %v3175_v52, %v3189_v4  ;;  %9053 = vst [vmem:[#allocation68_spill] sm:$0xff] %v7185_v54  ;;  %v9079_v31 = vld [vmem:[#allocation149_spill] sm:$0xff] }
 0x352   : > { %v3194_v12 = vmul.f32 1.442695, %v3191_v20  ;;  %v3200_v8 = vmul.f32 1.442695, %v3197_v26  ;;  %v3206_v25 = vmul.f32 1.442695, %v3203_v33  ;;  %5260 = vrcp.f32 %v1918_v46 }
 0x353   : > { %v3212_v50 = vmul.f32 1.442695, %v3209_v7  ;;  %v3218_v19 = vmul.f32 1.442695, %v3215_v48  ;;  %v3224_v58 = vmul.f32 1.442695, %v3221_v44  ;;  %v1971_v51 = vadd.f32 %v9054_v13, %v1955_v43 }
 0x354   : > { %5262 = vpow2.f32 %v3194_v12  ;;  %v3230_v5 = vmul.f32 1.442695, %v3227_v15  ;;  %v3236_v41 = vmul.f32 1.442695, %v3233_v2  ;;  %v7192_v52 = vmul.f32 %v5243_v53, %v1969_v16  ;;  %v9063_v48 = vld [vmem:[#allocation49_spill] sm:$0xff]  ;;  %v1461_v15 = vpop.f32.mrf.mxu1 }
 0x355   : > { %v7190_v1 = vpop.eup %5244  ;;  %5264 = vpow2.f32 %v3200_v8  ;;  %v2499_v4 = vadd.f32 %v2491_v6, %v2483_v17  ;;  %v2555_v49 = vmul.f32 %v6791_v3, %v7188_v56  ;;  %v7200_v0 = vmul.f32 %v5243_v53, %v1971_v51  ;;  %v9064_v44 = vld [vmem:[#allocation85_spill] sm:$0xff]  ;;  %v9068_v51 = vld [vmem:[#allocation78_spill] sm:$0xff] }
 0x356   : > { %9055 = vst [vmem:[#allocation92_spill] sm:$0xff] %v7192_v52  ;;  %v7196_v40 = vpop.eup %5246  ;;  %5266 = vpow2.f32 %v3206_v25  ;;  %v3256_v46 = vmul.f32 %v7190_v1, %v9017_v30  ;;  %v2843_v43 = vmul.f32 %v6992_v21, %v9012_v60  ;;  %v2851_v6 = vmul.f32 %v7002_v62, %v9015_v63  ;;  %v9065_v8 = vld [vmem:[#allocation109_spill] sm:$0xff] }
 0x357   : > { %9056 = vst [vmem:[#allocation28_spill] sm:$0xff] %v7196_v40  ;;  %9057 = vst [vmem:[#allocation23_spill] sm:$0xff] %v7200_v0  ;;  %v7204_v59 = vpop.eup %5248  ;;  %5268 = vpow2.f32 %v3212_v50  ;;  %v3264_v17 = vmul.f32 %v7196_v40, %v9020_v32  ;;  %v2515_v16 = vadd.f32 %v2507_v18, %v2499_v4  ;;  %v2867_v26 = vmul.f32 %v7009_v27, %v9045_v55 }
 0x358   : > { %9058 = vst [vmem:[#allocation102_spill] sm:$0xff] %v7204_v59  ;;  %v7210_v20 = vpop.eup %5250  ;;  %5270 = vpow2.f32 %v3218_v19  ;;  %v3280_v53 = vmul.f32 %v7204_v59, %v9023_v34  ;;  %v2859_v11 = vadd.f32 %v2851_v6, %v2843_v43  ;;  %v2883_v39 = vmul.f32 %v7017_v47, %v9064_v44  ;;  %v9070_v43 = vld [vmem:[#allocation60_spill] sm:$0xff] }
 0x359   : > { %9059 = vst [vmem:[#allocation35_spill] sm:$0xff] %v7210_v20  ;;  %v7218_v28 = vpop.eup %5252  ;;  %5272 = vpow2.f32 %v3224_v58  ;;  %v3272_v33 = vadd.f32 %v3264_v17, %v3256_v46  ;;  %v3296_v18 = vmul.f32 %v7210_v20, %v9027_v23  ;;  %v2531_v7 = vadd.f32 %v9061_v14, %v2515_v16  ;;  %v9071_v17 = vld [vmem:[#allocation86_spill] sm:$0xff] }
 0x35a   : > { %9060 = vst [vmem:[#allocation16_spill] sm:$0xff] %v7218_v28  ;;  %v7223_v37 = vpop.eup %5254  ;;  %5274 = vpow2.f32 %v3230_v5  ;;  %v3312_v34 = vmul.f32 %v7218_v28, %v9063_v48  ;;  %v2875_v19 = vadd.f32 %v2867_v26, %v2859_v11  ;;  %v2915_v58 = vmul.f32 %v7029_v9, %v7188_v56  ;;  %v9067_v5 = vld [vmem:[#allocation38_spill] sm:$0xff]  ;;  %v9073_v26 = vld [vmem:[#allocation97_spill] sm:$0xff]  ;;  %v9075_v11 = vld [vmem:[#allocation83_spill] sm:$0xff] }
 0x35b   : > { %9062 = vst [vmem:[#allocation96_spill] sm:$0xff] %v7223_v37  ;;  %v7229_v2 = vpop.eup %5256  ;;  %5276 = vpow2.f32 %v3236_v41  ;;  %v3288_v12 = vadd.f32 %v3280_v53, %v3272_v33  ;;  %v3328_v23 = vmul.f32 %v7223_v37, %v7117_v36  ;;  %v2547_v25 = vadd.f32 %v9065_v8, %v2531_v7  ;;  %v9072_v16 = vld [vmem:[#allocation130_spill] sm:$0xff]  ;;  %v9074_v7 = vld [vmem:[#allocation11_spill] sm:$0xff] }
 0x35c   : > { %v7234_v50 = vpop.eup %5258  ;;  %v2484_v13 = vmul.f32 %v6688_v24, %v9067_v5  ;;  %v2492_v4 = vmul.f32 %v6692_v22, %v9068_v51  ;;  %v2508_v36 = vmul.f32 %v9071_v17, %v9070_v43  ;;  %v2556_v6 = vmul.f32 %v9072_v16, %v1461_v15  ;;  %v9078_v8 = vld [vmem:[#allocation51_spill] sm:$0xff] }
 0x35d   : > { %9066 = vst [vmem:[#allocation125_spill] sm:$0xff] %v7234_v50  ;;  %v3304_v46 = vadd.f32 %v3296_v18, %v3288_v12  ;;  %v7242_v41 = vadd.f32 %v2555_v49, %v2547_v25  ;;  %v2891_v53 = vadd.f32 %v2883_v39, %v2875_v19  ;;  %v2844_v14 = vmul.f32 %v9073_v26, %v9067_v5  ;;  %v9076_v18 = vld [vmem:[#allocation21_spill] sm:$0xff]  ;;  %v9077_v49 = vld [vmem:[#allocation19_spill] sm:$0xff] }
 0x35e   : > { %v2500_v33 = vadd.f32 %v2492_v4, %v2484_v13  ;;  %v2852_v48 = vmul.f32 %v9074_v7, %v9068_v51  ;;  %v2868_v22 = vmul.f32 %v9075_v11, %v9070_v43  ;;  %v2884_v12 = vmul.f32 %v9077_v49, %v9076_v18 }
 0x35f   : > { %9069 = vst [vmem:[#allocation82_spill] sm:$0xff] %v7242_v41  ;;  %v3320_v24 = vadd.f32 %v3312_v34, %v3304_v46  ;;  %v2916_v25 = vmul.f32 %v9078_v8, %v1461_v15  ;;  %v5261_v17 = vpop.eup %5260  ;;  %v2907_v16 = vadd.f32 %v9079_v31, %v2891_v53  ;;  %v3258_v13 = vmul.f32 %v7190_v1, %v9067_v5  ;;  %v5086_v34 = vld [vmem:[%s8195_s2 + $0x4] ss:$8 sps:$4 sm:$0xff]  }
 0x360   : > { %v2516_v39 = vadd.f32 %v2508_v36, %v2500_v33  ;;  %v2860_v19 = vadd.f32 %v2852_v48, %v2844_v14  ;;  %v7267_v35 = vmul.f32 %v5261_v17, %v9081_v29  ;;  %v7270_v41 = vmul.f32 %v5261_v17, %v9083_v10  ;;  %v9086_v14 = vld [vmem:[#allocation129_spill] sm:$0xff]  ;;  %3830 = vmatprep.mubr.bf16.mxu1 %v5086_v34 }
 0x361   : > { %v7262_v4 = vpop.eup %5262  ;;  %v7264_v46 = vadd.f32 %v3328_v23, %v3320_v24  ;;  %v3266_v31 = vmul.f32 %v7196_v40, %v9068_v51  ;;  %v7276_v53 = vadd.f32 %v2915_v58, %v2907_v16  ;;  %v3282_v58 = vmul.f32 %v7204_v59, %v9070_v43 }
 0x362   : > { %9082 = vst [vmem:[#allocation128_spill] sm:$0xff] %v7267_v35  ;;  %9084 = vst [vmem:[#allocation46_spill] sm:$0xff] %v7270_v41  ;;  %v7274_v36 = vpop.eup %5264  ;;  %v3257_v33 = vmul.f32 %v7262_v4, %v9012_v60  ;;  %v2532_v48 = vadd.f32 %v9086_v14, %v2516_v39  ;;  %v2876_v23 = vadd.f32 %v2868_v22, %v2860_v19  ;;  %v9087_v39 = vld [vmem:[#allocation120_spill] sm:$0xff]  ;;  %v1463_v14 = vpop.f32.mrf.mxu1 }
 0x363   : > { %9080 = vst [vmem:[#allocation39_spill] sm:$0xff] %v7264_v46  ;;  %9085 = vst [vmem:[#allocation59_spill] sm:$0xff] %v7276_v53  ;;  %v7281_v24 = vpop.eup %5266  ;;  %v3428_v29 = vpack.c.bf16 %v7270_v41, %v7267_v35  ;;  %v3265_v10 = vmul.f32 %v7274_v36, %v9015_v63  ;;  %v3274_v50 = vadd.f32 %v3266_v31, %v3258_v13  ;;  %v9088_v31 = vld [vmem:[#allocation144_spill] sm:$0xff] }
 0x364   : > { %v7289_v16 = vpop.eup %5268  ;;  %v3281_v53 = vmul.f32 %v7281_v24, %v9045_v55  ;;  %v2548_v22 = vadd.f32 %v9087_v39, %v2532_v48  ;;  %v2892_v19 = vadd.f32 %v2884_v12, %v2876_v23  ;;  %v3298_v34 = vmul.f32 %v7210_v20, %v9076_v18  ;;  %v9090_v48 = vld [vmem:[#allocation142_spill] sm:$0xff]  ;;  %v9091_v39 = vld [vmem:[#allocation52_spill] sm:$0xff] }
 0x365   : > { %v7296_v41 = vpop.eup %5270  ;;  %3799 = vmatpush1.bf16.msra.mxu1 %v3428_v29  ;;  %v3273_v35 = vadd.f32 %v3265_v10, %v3257_v33  ;;  %v3297_v13 = vmul.f32 %v7289_v16, %v9064_v44  ;;  %v3290_v43 = vadd.f32 %v3282_v58, %v3274_v50  ;;  %v3314_v46 = vmul.f32 %v7218_v28, %v9088_v31  ;;  %v9092_v31 = vld [vmem:[#allocation112_spill] sm:$0xff] }
 0x366   : > { %v7302_v54 = vpop.eup %5272  ;;  %v9089_v12 = vpack.c.bf16 %v7200_v0, %v7192_v52  ;;  %v3313_v18 = vmul.f32 %v7296_v41, %v9090_v48  ;;  %v2564_v23 = vadd.f32 %v2556_v6, %v2548_v22  ;;  %v2908_v29 = vadd.f32 %v9091_v39, %v2892_v19  ;;  %v9097_v22 = vld [vmem:[#allocation123_spill] sm:$0xff]  ;;  %v9100_v48 = vld [vmem:[#allocation73_spill] sm:$0xff]  ;;  %v9101_v39 = vld [vmem:[#allocation74_spill] sm:$0xff] }
 0x367   : > { %v3330_v33 = vmul.f32 %v7223_v37, %v1461_v15  ;;  %v7311_v10 = vpop.eup %5274  ;;  %v3289_v44 = vadd.f32 %v3281_v53, %v3273_v35  ;;  %v3329_v50 = vmul.f32 %v7302_v54, %v7188_v56  ;;  %v3306_v58 = vadd.f32 %v3298_v34, %v3290_v43  ;;  %v9099_v15 = vld [vmem:[#allocation71_spill] sm:$0xff]  ;;  %v7330_v53 = vpop.f32.mrf.mxu1 }
 0x368   : > { %3800 = vmatprep.subr.bf16.mxu1 %v9089_v12  ;;  %v7316_v57 = vmul.f32 %v5261_v17, %v9092_v31  ;;  %v7318_v0 = vpop.eup %5276  ;;  %v7321_v12 = vmul.f32 %v7066_v61, %v2564_v23  ;;  %v7323_v6 = vadd.f32 %v2916_v25, %v2908_v29  ;;  %v7326_v19 = vmul.f32 %v5261_v17, %v9097_v22  ;;  %v9102_v25 = vld [vmem:[#allocation75_spill] sm:$0xff] }
 0x369   : > { %9094 = vst [vmem:[#allocation12_spill] sm:$0xff] %v7318_v0  ;;  %v1719_v35 = vadd.f32 %v9100_v48, %v9099_v15  ;;  %v3305_v56 = vadd.f32 %v3297_v13, %v3289_v44  ;;  %v3322_v34 = vadd.f32 %v3314_v46, %v3306_v58  ;;  %v1727_v43 = vmul.f32 %v9099_v15, %v9012_v60  ;;  %v9103_v29 = vld [vmem:[#allocation79_spill] sm:$0xff] }
 0x36a   : > { %9093 = vst [vmem:[#allocation15_spill] sm:$0xff] %v7316_v57  ;;  %9095 = vst [vmem:[#allocation76_spill] sm:$0xff] %v7321_v12  ;;  %v1729_v31 = vmul.f32 %v9099_v15, %v9101_v39  ;;  %v3426_v61 = vpack.c.bf16 %v7326_v19, %v7316_v57  ;;  %v1735_v17 = vmul.f32 %v9100_v48, %v9015_v63  ;;  %v9105_v44 = vld [vmem:[#allocation63_spill] sm:$0xff]  ;;  %v7351_v57 = vpop.f32.mrf.mxu1  ;;  %v9113_v63 = vld [vmem:[#allocation80_spill] sm:$0xff] }
 0x36b   : > { %9096 = vst [vmem:[#allocation98_spill] sm:$0xff] %v7323_v6  ;;  %9098 = vst [vmem:[#allocation124_spill] sm:$0xff] %v7326_v19  ;;  %v1721_v23 = vadd.f32 %v9102_v25, %v1719_v35  ;;  %v1737_v22 = vmul.f32 %v9100_v48, %v9103_v29  ;;  %v3321_v52 = vadd.f32 %v3313_v18, %v3305_v56 }
 0x36c   : > { %v7343_v13 = vadd.f32 %v3330_v33, %v3322_v34  ;;  %v1751_v46 = vmul.f32 %v9102_v25, %v9045_v55  ;;  %v1753_v58 = vmul.f32 %v9102_v25, %v9105_v44  ;;  %3801 = vmatpush1.bf16.msra.mxu1 %v3426_v61  ;;  %v1743_v12 = vadd.f32 %v1735_v17, %v1727_v43 }
 0x36d   : > { %v1745_v19 = vadd.f32 %v1737_v22, %v1729_v31  ;;  %5278 = vrcp.f32 %v1721_v23  ;;  %v2485_v35 = vmul.f32 %v8967_v38, %v9101_v39  ;;  %v7353_v0 = vadd.f32 %v3329_v50, %v3321_v52  ;;  %v9107_v50 = vld [vmem:[#allocation17_spill] sm:$0xff] }
 0x36e   : > { %9104 = vst [vmem:[#allocation87_spill] sm:$0xff] %v7343_v13  ;;  %v2493_v18 = vmul.f32 %v6754_v45, %v9103_v29  ;;  %v2509_v55 = vmul.f32 %v8974_v42, %v9105_v44  ;;  %v2557_v33 = vmul.f32 %v6791_v3, %v1463_v14  ;;  %v1759_v56 = vadd.f32 %v1751_v46, %v1743_v12  ;;  %v9108_v3 = vld [vmem:[#allocation58_spill] sm:$0xff]  ;;  %v9109_v13 = vld [vmem:[#allocation131_spill] sm:$0xff] }
 0x36f   : > { %9106 = vst [vmem:[#allocation93_spill] sm:$0xff] %v7353_v0  ;;  %v1761_v34 = vadd.f32 %v1753_v58, %v1745_v19  ;;  %v2845_v43 = vmul.f32 %v6992_v21, %v9101_v39  ;;  %v2853_v31 = vmul.f32 %v7002_v62, %v9103_v29  ;;  %v2869_v52 = vmul.f32 %v7009_v27, %v9105_v44  ;;  %v7375_v58 = vpop.f32.mrf.mxu1 }
 0x370   : > { %v2501_v61 = vadd.f32 %v2493_v18, %v2485_v35  ;;  %v2885_v23 = vmul.f32 %v7017_v47, %v9107_v50  ;;  %v2917_v17 = vmul.f32 %v7029_v9, %v1463_v14  ;;  %v3259_v12 = vmul.f32 %v7262_v4, %v9101_v39  ;;  %v9116_v39 = vld [vmem:[#allocation101_spill] sm:$0xff]  ;;  %v9118_v9 = vld [vmem:[#allocation150_spill] sm:$0xff] }
 0x371   : > { %v2861_v22 = vadd.f32 %v2853_v31, %v2845_v43  ;;  %v3267_v19 = vmul.f32 %v7274_v36, %v9103_v29  ;;  %v3283_v46 = vmul.f32 %v7281_v24, %v9105_v44  ;;  %v3299_v18 = vmul.f32 %v7289_v16, %v9107_v50  ;;  %v9110_v44 = vld [vmem:[#allocation138_spill] sm:$0xff] }
 0x372   : > { %v2517_v35 = vadd.f32 %v2509_v55, %v2501_v61  ;;  %v3315_v42 = vmul.f32 %v7296_v41, %v9108_v3  ;;  %v3331_v43 = vmul.f32 %v7302_v54, %v1463_v14  ;;  %v2826_v38 = vadd.f32 %v9074_v7, %v9073_v26  ;;  %v9111_v29 = vld [vmem:[#allocation30_spill] sm:$0xff]  ;;  %v7397_v7 = vpop.f32.mrf.mxu1 }
 0x373   : > { %v2877_v31 = vadd.f32 %v2869_v52, %v2861_v22  ;;  %v3275_v45 = vadd.f32 %v3267_v19, %v3259_v12  ;;  %v2926_v6 = vmul.f32 %v9109_v13, %v7330_v53  ;;  %v3252_v55 = vmul.f32 %v7190_v1, %v9111_v29  ;;  %v9112_v61 = vld [vmem:[#allocation26_spill] sm:$0xff]  ;;  %v9114_v12 = vld [vmem:[#allocation151_spill] sm:$0xff]  ;;  %v9115_v19 = vld [vmem:[#allocation56_spill] sm:$0xff] }
 0x374   : > { %v2533_v0 = vadd.f32 %v9110_v44, %v2517_v35  ;;  %v3260_v50 = vmul.f32 %v7196_v40, %v9112_v61  ;;  %v3276_v3 = vmul.f32 %v7204_v59, %v9113_v63  ;;  %v2828_v22 = vadd.f32 %v9075_v11, %v2826_v38  ;;  %v9117_v29 = vld [vmem:[#allocation65_spill] sm:$0xff]  ;;  %v9119_v38 = vld [vmem:[#allocation62_spill] sm:$0xff] }
 0x375   : > { %v2893_v14 = vadd.f32 %v2885_v23, %v2877_v31  ;;  %v3291_v52 = vadd.f32 %v3283_v46, %v3275_v45  ;;  %v7395_v26 = vadd.f32 %v2926_v6, %v9114_v12  ;;  %v3292_v60 = vmul.f32 %v7210_v20, %v9116_v39  ;;  %v9121_v31 = vld [vmem:[#allocation31_spill] sm:$0xff]  ;;  %v9124_v12 = vld [vmem:[#allocation121_spill] sm:$0xff] }
 0x376   : > { %v2549_v35 = vadd.f32 %v9115_v19, %v2533_v0  ;;  %v3268_v44 = vadd.f32 %v3260_v50, %v3252_v55  ;;  %v3308_v61 = vmul.f32 %v7218_v28, %v9117_v29  ;;  %v2830_v45 = vadd.f32 %v9077_v49, %v2828_v22  ;;  %v9122_v55 = vld [vmem:[#allocation69_spill] sm:$0xff] }
 0x377   : > { %v2909_v63 = vadd.f32 %v9118_v9, %v2893_v14  ;;  %v3307_v23 = vadd.f32 %v3299_v18, %v3291_v52  ;;  %v3324_v11 = vmul.f32 %v7223_v37, %v9119_v38  ;;  %v3340_v0 = vmul.f32 %v7229_v2, %v7330_v53  ;;  %v7419_v18 = vpop.f32.mrf.mxu1  ;;  %v9125_v52 = vld [vmem:[#allocation70_spill] sm:$0xff]  ;;  %v9129_v38 = vld [vmem:[#allocation20_spill] sm:$0xff] }
 0x378   : > { %v7408_v6 = vadd.f32 %v2557_v33, %v2549_v35  ;;  %v3284_v46 = vadd.f32 %v3276_v3, %v3268_v44  ;;  %v1718_v39 = vadd.f32 %v9122_v55, %v9121_v31  ;;  %v2832_v9 = vadd.f32 %v9124_v12, %v2830_v45  ;;  %v9132_v12 = vld [vmem:[#allocation27_spill] sm:$0xff] }
 0x379   : > { %v7414_v50 = vadd.f32 %v2917_v17, %v2909_v63  ;;  %v3323_v29 = vadd.f32 %v3315_v42, %v3307_v23  ;;  %v1726_v49 = vmul.f32 %v9121_v31, %v9017_v30  ;;  %v1728_v53 = vmul.f32 %v9121_v31, %v9067_v5 }
 0x37a   : > { %9120 = vst [vmem:[#allocation95_spill] sm:$0xff] %v7408_v6  ;;  %v5279_v14 = vpop.eup %5278  ;;  %v3300_v33 = vadd.f32 %v3292_v60, %v3284_v46  ;;  %v1720_v3 = vadd.f32 %v9125_v52, %v1718_v39  ;;  %v1734_v22 = vmul.f32 %v9122_v55, %v9020_v32  ;;  %v2834_v35 = vadd.f32 %v9078_v8, %v2832_v9  ;;  %v7442_v46 = vpop.f32.mrf.mxu1  ;;  %v9131_v39 = vld [vmem:[#allocation45_spill] sm:$0xff]  ;;  %v9134_v52 = vld [vmem:[#allocation32_spill] sm:$0xff]  ;;  %v9151_v6 = vld [vmem:[#allocation47_spill] sm:$0xff] }
 0x37b   : > { %9123 = vst [vmem:[#allocation105_spill] sm:$0xff] %v7414_v50  ;;  %v7426_v17 = vmul.f32 %v5279_v14, %v1759_v56  ;;  %v7428_v42 = vmul.f32 %v5279_v14, %v1761_v34  ;;  %v7430_v19 = vadd.f32 %v3331_v43, %v3323_v29  ;;  %v1736_v60 = vmul.f32 %v9122_v55, %v9068_v51  ;;  %v9130_v34 = vld [vmem:[#allocation67_spill] sm:$0xff]  ;;  %v9153_v50 = vld [vmem:[#allocation53_spill] sm:$0xff] }
 0x37c   : > { %v3316_v44 = vadd.f32 %v3308_v61, %v3300_v33  ;;  %v1742_v63 = vadd.f32 %v1734_v22, %v1726_v49  ;;  %5280 = vrcp.f32 %v1720_v3  ;;  %v2836_v45 = vadd.f32 %v9109_v13, %v2834_v35  ;;  %v9133_v49 = vld [vmem:[#allocation57_spill] sm:$0xff]  ;;  %v9135_v22 = vld [vmem:[#allocation94_spill] sm:$0xff] }
 0x37d   : > { %9126 = vst [vmem:[#allocation99_spill] sm:$0xff] %v7426_v17  ;;  %9127 = vst [vmem:[#allocation61_spill] sm:$0xff] %v7428_v42  ;;  %v3425_v23 = vpack.c.bf16 %v7428_v42, %v7426_v17  ;;  %v1723_v56 = vmul.f32 %v9099_v15, %v9129_v38  ;;  %v1725_v43 = vmul.f32 %v9099_v15, %v9130_v34  ;;  %v7464_v42 = vpop.f32.mrf.mxu1 }
 0x37e   : > { %9128 = vst [vmem:[#allocation64_spill] sm:$0xff] %v7430_v19  ;;  %v3332_v8 = vadd.f32 %v3324_v11, %v3316_v44  ;;  %v1744_v61 = vadd.f32 %v1736_v60, %v1728_v53  ;;  %v1758_v29 = vadd.f32 %v9131_v39, %v1742_v63  ;;  %v1731_v9 = vmul.f32 %v9100_v48, %v9132_v12  ;;  %v9137_v11 = vld [vmem:[#allocation100_spill] sm:$0xff] }
 0x37f   : > { %3802 = vmatprep.subr.bf16.mxu1 %v3425_v23  ;;  %5282 = vrcp.f32 %v2836_v45  ;;  %v1733_v33 = vmul.f32 %v9100_v48, %v9133_v49  ;;  %v1747_v3 = vmul.f32 %v9102_v25, %v9134_v52  ;;  %v1749_v15 = vmul.f32 %v9102_v25, %v9135_v22  ;;  %v9138_v23 = vld [vmem:[#allocation152_spill] sm:$0xff] }
 0x380   : > { %v7453_v35 = vadd.f32 %v3340_v0, %v3332_v8  ;;  %v1760_v53 = vadd.f32 %v9137_v11, %v1744_v61  ;;  %v1739_v44 = vadd.f32 %v1731_v9, %v1723_v56  ;;  %v2827_v60 = vadd.f32 %v7002_v62, %v6992_v21  ;;  %v9139_v8 = vld [vmem:[#allocation103_spill] sm:$0xff]  ;;  %v9152_v19 = vld [vmem:[#allocation148_spill] sm:$0xff] }
 0x381   : > { %v1741_v63 = vadd.f32 %v1733_v33, %v1725_v43  ;;  %v2927_v45 = vmul.f32 %v9138_v23, %v7351_v57  ;;  %v3253_v48 = vmul.f32 %v7262_v4, %v9129_v38  ;;  %v3261_v39 = vmul.f32 %v7274_v36, %v9132_v12  ;;  %v9140_v43 = vld [vmem:[#allocation153_spill] sm:$0xff]  ;;  %v9141_v33 = vld [vmem:[#allocation127_spill] sm:$0xff] }
 0x382   : > { %9136 = vst [vmem:[#allocation72_spill] sm:$0xff] %v7453_v35  ;;  %v1755_v25 = vadd.f32 %v1747_v3, %v1739_v44  ;;  %v2829_v0 = vadd.f32 %v7009_v27, %v2827_v60  ;;  %v3277_v56 = vmul.f32 %v7281_v24, %v9134_v52  ;;  %v3293_v21 = vmul.f32 %v7289_v16, %v9139_v8  ;;  %v9143_v44 = vld [vmem:[#allocation25_spill] sm:$0xff] }
 0x383   : > { %v1757_v62 = vadd.f32 %v1749_v15, %v1741_v63  ;;  %v7472_v61 = vadd.f32 %v2927_v45, %v9140_v43  ;;  %v3269_v9 = vadd.f32 %v3261_v39, %v3253_v48  ;;  %v3309_v11 = vmul.f32 %v7296_v41, %v9141_v33  ;;  %v9145_v45 = vld [vmem:[#allocation66_spill] sm:$0xff]  ;;  %v7489_v39 = vpop.f32.mrf.mxu1  ;;  %v9148_v43 = vld [vmem:[#allocation33_spill] sm:$0xff] }
 0x384   : > { %v7476_v17 = vmul.f32 %v5279_v14, %v1755_v25  ;;  %v2831_v3 = vadd.f32 %v7017_v47, %v2829_v0  ;;  %v3325_v27 = vmul.f32 %v7302_v54, %v9143_v44  ;;  %v3341_v52 = vmul.f32 %v7311_v10, %v7351_v57  ;;  %v9146_v25 = vld [vmem:[#allocation147_spill] sm:$0xff]  ;;  %v9147_v47 = vld [vmem:[#allocation13_spill] sm:$0xff]  ;;  %v9149_v57 = vld [vmem:[#allocation88_spill] sm:$0xff] }
 0x385   : > { %v7483_v60 = vmul.f32 %v5279_v14, %v1757_v62  ;;  %v3285_v15 = vadd.f32 %v3277_v56, %v3269_v9  ;;  %v2928_v63 = vmul.f32 %v9109_v13, %v7375_v58  ;;  %v3254_v48 = vmul.f32 %v7190_v1, %v9145_v45  ;;  %v9150_v9 = vld [vmem:[#allocation155_spill] sm:$0xff] }
 0x386   : > { %9142 = vst [vmem:[#allocation84_spill] sm:$0xff] %v7476_v17  ;;  %v2833_v8 = vadd.f32 %v9146_v25, %v2831_v3  ;;  %v3262_v0 = vmul.f32 %v7196_v40, %v9147_v47  ;;  %v3278_v33 = vmul.f32 %v7204_v59, %v9148_v43  ;;  %v3294_v14 = vmul.f32 %v7210_v20, %v9149_v57  ;;  %v9154_v20 = vld [vmem:[#allocation30_spill] sm:$0xff] }
 0x387   : > { %9144 = vst [vmem:[#allocation37_spill] sm:$0xff] %v7483_v60  ;;  %v3423_v56 = vpack.c.bf16 %v7483_v60, %v7476_v17  ;;  %v3301_v62 = vadd.f32 %v3293_v21, %v3285_v15  ;;  %v2936_v44 = vadd.f32 %v2928_v63, %v9150_v9  ;;  %v3310_v35 = vmul.f32 %v7218_v28, %v9151_v6  ;;  %v9155_v15 = vld [vmem:[#allocation26_spill] sm:$0xff]  ;;  %v7514_v63 = vpop.f32.mrf.mxu1  ;;  %v9159_v9 = vld [vmem:[#allocation24_spill] sm:$0xff] }
 0x388   : > { %v2835_v3 = vadd.f32 %v9152_v19, %v2833_v8  ;;  %v3270_v25 = vadd.f32 %v3262_v0, %v3254_v48  ;;  %v3326_v40 = vmul.f32 %v7223_v37, %v9153_v50  ;;  %v3342_v43 = vmul.f32 %v7229_v2, %v7375_v58 }
 0x389   : > { %v5281_v59 = vpop.eup %5280  ;;  %v3317_v57 = vadd.f32 %v3309_v11, %v3301_v62  ;;  %v1722_v60 = vmul.f32 %v9121_v31, %v9154_v20  ;;  %v1724_v21 = vmul.f32 %v9121_v31, %v9145_v45  ;;  %v1730_v6 = vmul.f32 %v9122_v55, %v9155_v15  ;;  %v9158_v62 = vld [vmem:[#allocation18_spill] sm:$0xff] }
 0x38a   : > { %v7516_v19 = vmul.f32 %v5281_v59, %v1758_v29  ;;  %v7518_v48 = vmul.f32 %v5281_v59, %v1760_v53  ;;  %v2837_v50 = vadd.f32 %v9138_v23, %v2835_v3  ;;  %v3286_v58 = vadd.f32 %v3278_v33, %v3270_v25  ;;  %v9160_v53 = vld [vmem:[#allocation44_spill] sm:$0xff]  ;;  %v7540_v3 = vpop.f32.mrf.mxu1 }
 0x38b   : > { %v3333_v8 = vadd.f32 %v3325_v27, %v3317_v57  ;;  %v1732_v11 = vmul.f32 %v9122_v55, %v9147_v47  ;;  %v1738_v0 = vadd.f32 %v1730_v6, %v1722_v60  ;;  %v1577_v31 = vadd.f32 %v9159_v9, %v9158_v62  ;;  %v9163_v57 = vld [vmem:[#allocation81_spill] sm:$0xff] }
 0x38c   : > { %9156 = vst [vmem:[#allocation29_spill] sm:$0xff] %v7516_v19  ;;  %9157 = vst [vmem:[#allocation110_spill] sm:$0xff] %v7518_v48  ;;  %v7525_v17 = vpop.eup %5282  ;;  %v3424_v37 = vpack.c.bf16 %v7518_v48, %v7516_v19  ;;  %5284 = vrcp.f32 %v2837_v50  ;;  %v3302_v29 = vadd.f32 %v3294_v14, %v3286_v58  ;;  %v1583_v28 = vmul.f32 %v9158_v62, %v9160_v53  ;;  %v9164_v14 = vld [vmem:[#allocation74_spill] sm:$0xff]  ;;  %v9165_v58 = vld [vmem:[#allocation77_spill] sm:$0xff] }
 0x38d   : > { %v7533_v27 = vmul.f32 %v7525_v17, %v7395_v26  ;;  %v7535_v33 = vadd.f32 %v3341_v52, %v3333_v8  ;;  %v7538_v55 = vmul.f32 %v7525_v17, %v2936_v44  ;;  %v1740_v60 = vadd.f32 %v1732_v11, %v1724_v21  ;;  %v9166_v26 = vld [vmem:[#allocation40_spill] sm:$0xff]  ;;  %v9167_v8 = vld [vmem:[#allocation79_spill] sm:$0xff] }
 0x38e   : > { %3803 = vmatpush1.bf16.msra.mxu1 %v3424_v37  ;;  %v3318_v25 = vadd.f32 %v3310_v35, %v3302_v29  ;;  %v1754_v6 = vadd.f32 %v9163_v57, %v1738_v0  ;;  %v1585_v50 = vmul.f32 %v9158_v62, %v9164_v14  ;;  %v1591_v48 = vmul.f32 %v9159_v9, %v9165_v58 }
 0x38f   : > { %9161 = vst [vmem:[#allocation118_spill] sm:$0xff] %v7533_v27  ;;  %9162 = vst [vmem:[#allocation137_spill] sm:$0xff] %v7538_v55  ;;  %3804 = vmatprep.subr.bf16.mxu1 %v3423_v56  ;;  %v1756_v52 = vadd.f32 %v9166_v26, %v1740_v60  ;;  %v1593_v44 = vmul.f32 %v9159_v9, %v9167_v8  ;;  %5286 = vrcp.f32 %v1577_v31  ;;  %v9170_v56 = vld [vmem:[#allocation90_spill] sm:$0xff]  ;;  %v7561_v26 = vpop.f32.mrf.mxu1 }
 0x390   : > { %v2929_v21 = vmul.f32 %v9138_v23, %v7397_v7  ;;  %v3334_v37 = vadd.f32 %v3326_v40, %v3318_v25  ;;  %v7552_v35 = vmul.f32 %v5281_v59, %v1754_v6  ;;  %v1599_v11 = vadd.f32 %v1591_v48, %v1583_v28  ;;  %v9171_v25 = vld [vmem:[#allocation116_spill] sm:$0xff]  ;;  %v9172_v48 = vld [vmem:[#allocation122_spill] sm:$0xff] }
 0x391   : > { %v3255_v0 = vmul.f32 %v7262_v4, %v9130_v34  ;;  %v7556_v29 = vmul.f32 %v5281_v59, %v1756_v52  ;;  %v1601_v57 = vadd.f32 %v1593_v44, %v1585_v50  ;;  %v3263_v60 = vmul.f32 %v7274_v36, %v9133_v49  ;;  %v9173_v52 = vld [vmem:[#allocation54_spill] sm:$0xff] }
 0x392   : > { %9168 = vst [vmem:[#allocation49_spill] sm:$0xff] %v7552_v35  ;;  %v2937_v58 = vadd.f32 %v2929_v21, %v9170_v56  ;;  %v7563_v31 = vadd.f32 %v3342_v43, %v3334_v37  ;;  %v3279_v40 = vmul.f32 %v7281_v24, %v9135_v22  ;;  %v3295_v28 = vmul.f32 %v7289_v16, %v9171_v25  ;;  %v9174_v21 = vld [vmem:[#allocation36_spill] sm:$0xff]  ;;  %v9175_v37 = vld [vmem:[#allocation43_spill] sm:$0xff] }
 0x393   : > { %9169 = vst [vmem:[#allocation85_spill] sm:$0xff] %v7556_v29  ;;  %v3311_v59 = vmul.f32 %v7296_v41, %v9172_v48  ;;  %v3422_v6 = vpack.c.bf16 %v7556_v29, %v7552_v35  ;;  %v3271_v50 = vadd.f32 %v3263_v60, %v3255_v0  ;;  %v3327_v8 = vmul.f32 %v7302_v54, %v9173_v52  ;;  %v7591_v52 = vpop.f32.mrf.mxu1  ;;  %v9177_v29 = vld [vmem:[#allocation39_spill] sm:$0xff] }
 0x394   : > { %v3343_v43 = vmul.f32 %v7311_v10, %v7397_v7  ;;  %v2930_v44 = vmul.f32 %v9109_v13, %v7419_v18  ;;  %v3344_v22 = vmul.f32 %v7229_v2, %v7419_v18  ;;  %v1576_v56 = vadd.f32 %v9175_v37, %v9174_v21  ;;  %v9176_v18 = vld [vmem:[#allocation68_spill] sm:$0xff] }
 0x395   : > { %v1582_v25 = vmul.f32 %v9174_v21, %v9017_v30  ;;  %3805 = vmatpush1.bf16.msra.mxu1 %v3422_v6  ;;  %v3287_v0 = vadd.f32 %v3279_v40, %v3271_v50  ;;  %v1584_v60 = vmul.f32 %v9174_v21, %v9067_v5  ;;  %v1590_v7 = vmul.f32 %v9175_v37, %v9020_v32 }
 0x396   : > { %v1592_v48 = vmul.f32 %v9175_v37, %v9068_v51  ;;  %v2938_v19 = vadd.f32 %v2930_v44, %v9176_v18  ;;  %v7595_v35 = vadd.f32 %v3344_v22, %v9177_v29  ;;  %5288 = vrcp.f32 %v1576_v56 }
 0x397   : > { %v1579_v40 = vmul.f32 %v9158_v62, %v9129_v38  ;;  %v3303_v6 = vadd.f32 %v3295_v28, %v3287_v0  ;;  %v1598_v50 = vadd.f32 %v1590_v7, %v1582_v25  ;;  %v1581_v32 = vmul.f32 %v9158_v62, %v9130_v34  ;;  %v1497_v25 = vpop.f32.mrf.mxu1  ;;  %v9179_v7 = vld [vmem:[#allocation59_spill] sm:$0xff] }
 0x398   : > { %v1600_v55 = vadd.f32 %v1592_v48, %v1584_v60  ;;  %v7602_v27 = vmul.f32 %v7525_v17, %v2938_v19  ;;  %v1587_v51 = vmul.f32 %v9159_v9, %v9132_v12  ;;  %v1589_v29 = vmul.f32 %v9159_v9, %v9133_v49  ;;  %v9180_v48 = vld [vmem:[#allocation93_spill] sm:$0xff] }
 0x399   : > { %v2931_v44 = vmul.f32 %v9138_v23, %v7442_v46  ;;  %v5285_v22 = vpop.eup %5284  ;;  %v3319_v56 = vadd.f32 %v3311_v59, %v3303_v6  ;;  %v3345_v28 = vmul.f32 %v7311_v10, %v7442_v46  ;;  %v2932_v62 = vmul.f32 %v9109_v13, %v7464_v42  ;;  %v9181_v46 = vld [vmem:[#allocation98_spill] sm:$0xff]  ;;  %v9182_v13 = vld [vmem:[#allocation87_spill] sm:$0xff] }
 0x39a   : > { %9178 = vst [vmem:[#allocation109_spill] sm:$0xff] %v7602_v27  ;;  %v3346_v19 = vmul.f32 %v7229_v2, %v7464_v42  ;;  %v7617_v12 = vmul.f32 %v5285_v22, %v7472_v61  ;;  %v7619_v0 = vmul.f32 %v5285_v22, %v2937_v58  ;;  %v1595_v49 = vadd.f32 %v1587_v51, %v1579_v40 }
 0x39b   : > { %v1597_v9 = vadd.f32 %v1589_v29, %v1581_v32  ;;  %v3335_v60 = vadd.f32 %v3327_v8, %v3319_v56  ;;  %v2939_v59 = vadd.f32 %v2931_v44, %v9179_v7  ;;  %v3353_v18 = vadd.f32 %v3345_v28, %v9180_v48  ;;  %v1499_v29 = vpop.f32.mrf.mxu1 }
 0x39c   : > { %v2940_v6 = vadd.f32 %v2932_v62, %v9181_v46  ;;  %v5287_v27 = vpop.eup %5286  ;;  %v3354_v34 = vadd.f32 %v3346_v19, %v9182_v13  ;;  %v1578_v42 = vmul.f32 %v9174_v21, %v9154_v20  ;;  %v1580_v61 = vmul.f32 %v9174_v21, %v9145_v45  ;;  %v9183_v62 = vld [vmem:[#allocation28_spill] sm:$0xff] }
 0x39d   : > { %v1586_v58 = vmul.f32 %v9175_v37, %v9155_v15  ;;  %v7631_v40 = vmul.f32 %v5287_v27, %v1599_v11  ;;  %v7633_v8 = vmul.f32 %v5287_v27, %v1601_v57  ;;  %v3351_v32 = vadd.f32 %v3343_v43, %v3335_v60  ;;  %v9186_v60 = vld [vmem:[#allocation64_spill] sm:$0xff] }
 0x39e   : > { %v7635_v51 = vmul.f32 %v5287_v27, %v1595_v49  ;;  %v7637_v44 = vmul.f32 %v5287_v27, %v1597_v9  ;;  %v7639_v56 = vmul.f32 %v5285_v22, %v2939_v59  ;;  %v7642_v28 = vmul.f32 %v7525_v17, %v2940_v6  ;;  %v9184_v17 = vld [vmem:[#allocation105_spill] sm:$0xff]  ;;  %v9187_v59 = vld [vmem:[#allocation102_spill] sm:$0xff] }
 0x39f   : > { %v1588_v21 = vmul.f32 %v9175_v37, %v9147_v47  ;;  %v3421_v15 = vpack.c.bf16 %v7633_v8, %v7631_v40  ;;  %v1594_v11 = vadd.f32 %v1586_v58, %v1578_v42  ;;  %v2933_v57 = vmul.f32 %v9138_v23, %v7489_v39  ;;  %v9185_v9 = vld [vmem:[#allocation125_spill] sm:$0xff]  ;;  %v1501_v37 = vpop.f32.mrf.mxu1 }
 0x3a0   : > { %v3347_v27 = vmul.f32 %v7311_v10, %v7489_v39  ;;  %v3238_v19 = vadd.f32 %v9183_v62, %v7190_v1  ;;  %v3356_v47 = vmul.f32 %v9185_v9, %v7514_v63  ;;  %v3239_v23 = vadd.f32 %v7274_v36, %v7262_v4  ;;  %v9188_v39 = vld [vmem:[#allocation72_spill] sm:$0xff]  ;;  %v9190_v4 = vld [vmem:[#allocation35_spill] sm:$0xff] }
 0x3a1   : > { %v1596_v43 = vadd.f32 %v1588_v21, %v1580_v61  ;;  %3806 = vmatprep.subr.bf16.mxu1 %v3421_v15  ;;  %v2941_v49 = vadd.f32 %v2933_v57, %v9184_v17  ;;  %v9189_v1 = vld [vmem:[#allocation12_spill] sm:$0xff]  ;;  %v3358_v63 = vmul.f32 %v9185_v9, %v7561_v26 }
 0x3a2   : > { %v3355_v7 = vadd.f32 %v3347_v27, %v9186_v60  ;;  %v3240_v48 = vadd.f32 %v9187_v59, %v3238_v19  ;;  %v7664_v13 = vadd.f32 %v3356_v47, %v9188_v39  ;;  %v3357_v42 = vmul.f32 %v9189_v1, %v7540_v3  ;;  %v1503_v27 = vpop.f32.mrf.mxu1  ;;  %v9192_v47 = vld [vmem:[#allocation96_spill] sm:$0xff] }
 0x3a3   : > { %v5289_v46 = vpop.eup %5288  ;;  %v7661_v6 = vmul.f32 %v5285_v22, %v2941_v49  ;;  %v3241_v22 = vadd.f32 %v7281_v24, %v3239_v23  ;;  %v7684_v3 = vadd.f32 %v3358_v63, %v7563_v31  ;;  %v3361_v62 = vmul.f32 %v9189_v1, %v1499_v29  ;;  %v9194_v23 = vld [vmem:[#allocation132_spill] sm:$0xff] }
 0x3a4   : > { %v7670_v61 = vmul.f32 %v5289_v46, %v1598_v50  ;;  %v7672_v58 = vmul.f32 %v5289_v46, %v1600_v55  ;;  %v7674_v21 = vmul.f32 %v5289_v46, %v1594_v11  ;;  %v7676_v15 = vmul.f32 %v5289_v46, %v1596_v43  ;;  %v9191_v43 = vld [vmem:[#allocation16_spill] sm:$0xff] }
 0x3a5   : > { %v3242_v36 = vadd.f32 %v9190_v4, %v3240_v48  ;;  %v7681_v57 = vadd.f32 %v3357_v42, %v7535_v33  ;;  %v3419_v55 = vpack.c.bf16 %v7637_v44, %v7635_v51  ;;  %v3359_v50 = vmul.f32 %v9189_v1, %v7591_v52  ;;  %v9193_v48 = vld [vmem:[#allocation113_spill] sm:$0xff]  ;;  %v9197_v42 = vld [vmem:[#allocation104_spill] sm:$0xff] }
 0x3a6   : > { %v3420_v26 = vpack.c.bf16 %v7672_v58, %v7670_v61  ;;  %v3360_v11 = vmul.f32 %v9185_v9, %v1497_v25  ;;  %v3243_v33 = vadd.f32 %v7289_v16, %v3241_v22  ;;  %v3362_v31 = vmul.f32 %v9185_v9, %v1501_v37 }
 0x3a7   : > { %v3244_v24 = vadd.f32 %v9191_v43, %v3242_v36  ;;  %v7697_v19 = vadd.f32 %v3359_v50, %v3351_v32  ;;  %v3363_v49 = vmul.f32 %v9189_v1, %v1503_v27  ;;  %v3369_v60 = vadd.f32 %v3361_v62, %v3353_v18  ;;  %v9196_v18 = vld [vmem:[#allocation14_spill] sm:$0xff]  ;;  %v9199_v36 = vld [vmem:[#allocation135_spill] sm:$0xff] }
 0x3a8   : > { %3807 = vmatpush1.bf16.msra.mxu1 %v3420_v26  ;;  %v3368_v17 = vadd.f32 %v3360_v11, %v7595_v35  ;;  %v3245_v25 = vadd.f32 %v7296_v41, %v3243_v33  ;;  %v3370_v59 = vadd.f32 %v3362_v31, %v3354_v34  ;;  %v3418_v16 = vpack.c.bf16 %v7676_v15, %v7674_v21  ;;  %v3446_v41 = vld [vmem:[%s8196_s3] sm:$0xff]  ;;  %v9195_v34 = vld [vmem:[#allocation114_spill] sm:$0xff]  ;;  %v3447_v31 = vld [vmem:[%s8196_s3 + $0x8] sm:$0xff] }
 0x3a9   : > { %3808 = vmatprep.subr.bf16.mxu1 %v3419_v55  ;;  %v3246_v52 = vadd.f32 %v9192_v47, %v3244_v24  ;;  %v3371_v29 = vadd.f32 %v3363_v49, %v3355_v7  ;;  %v3417_v37 = vpack.c.bf16 %v9164_v14, %v9160_v53  ;;  %v2469_v46 = vadd.f32 %v9194_v23, %v9193_v48  ;;  %v9198_v7 = vld [vmem:[#allocation106_spill] sm:$0xff]  ;;  %v9200_v55 = vld [vmem:[#allocation117_spill] sm:$0xff]  ;;  %v9201_v11 = vld [vmem:[#allocation107_spill] sm:$0xff] }
 0x3aa   : > { %v3247_v35 = vadd.f32 %v7302_v54, %v3245_v25  ;;  %v2165_v39 = vadd.f32 %v9196_v18, %v9195_v34  ;;  %v2164_v63 = vadd.f32 %v9198_v7, %v9197_v42  ;;  %v5461_v27 = vmov 0   ;;  %v9202_v24 = vld [vmem:[#allocation67_spill] sm:$0xff]  ;;  %v3449_v34 = vld [vmem:[%s8196_s3 + $0x18] sm:$0xff]  ;;  %v3451_v42 = vld [vmem:[%s8196_s3 + $0x28] sm:$0xff] }
 0x3ab   : > { %v3248_v32 = vadd.f32 %v7229_v2, %v3246_v52  ;;  %v3448_v2 = vld [vmem:[%s8196_s3 + $0x10] sm:$0xff]  ;;  %v2471_v22 = vadd.f32 %v9199_v36, %v2469_v46  ;;  %4906 = vset.pattern.permute.xlu0 %v5461_v27  ;;  %v3416_v26 = vpack.c.bf16 %v9067_v5, %v9017_v30  ;;  %4907 = vset.pattern.permute.xlu1 %v5461_v27  ;;  %v9204_v49 = vld [vmem:[#allocation119_spill] sm:$0xff]  ;;  %v9205_v52 = vld [vmem:[#allocation108_spill] sm:$0xff] }
 0x3ac   : > { %3809 = vmatpush1.bf16.msra.mxu1 %v3418_v16  ;;  %v3249_v4 = vadd.f32 %v7311_v10, %v3247_v35  ;;  %v2167_v50 = vadd.f32 %v9200_v55, %v2165_v39  ;;  %v2166_v43 = vadd.f32 %v9201_v11, %v2164_v63  ;;  %3480 = vperm.xlu0 %4906, %v3446_v41   ;;  %v9203_v10 = vld [vmem:[#allocation48_spill] sm:$0xff]  ;;  %v9208_v48 = vld [vmem:[#allocation111_spill] sm:$0xff]  ;;  %v3452_v7 = vld [vmem:[%s8196_s3 + $0x30] sm:$0xff] }
 0x3ad   : > { %3810 = vmatprep.subr.bf16.mxu1 %v3417_v37  ;;  %v3250_v54 = vadd.f32 %v9185_v9, %v3248_v32  ;;  %v3415_v33 = vpack.c.bf16 %v9202_v24, %v9129_v38  ;;  %v2473_v62 = vadd.f32 %v9203_v10, %v2471_v22  ;;  %3490 = vperm.xlu1 %4907, %v3448_v2   ;;  %v9206_v16 = vld [vmem:[#allocation136_spill] sm:$0xff]  ;;  %v3450_v18 = vld [vmem:[%s8196_s3 + $0x20] sm:$0xff] }
 0x3ae   : > { %v3251_v9 = vadd.f32 %v9189_v1, %v3249_v4  ;;  %v2169_v47 = vadd.f32 %v9204_v49, %v2167_v50  ;;  %v2168_v25 = vadd.f32 %v9205_v52, %v2166_v43  ;;  %v3414_v32 = vpack.c.bf16 %v9145_v45, %v9154_v20  ;;  %v9207_v1 = vld [vmem:[#allocation91_spill] sm:$0xff]  ;;  %v9209_v46 = vld [vmem:[#allocation140_spill] sm:$0xff]  ;;  %v9217_v50 = vld [vmem:[#allocation50_spill] sm:$0xff] }
 0x3af   : > { %5290 = vrcp.f32 %v3250_v54  ;;  %v2475_v37 = vadd.f32 %v9206_v16, %v2473_v62  ;;  %v9221_v10 = vld [vmem:[#allocation95_spill] sm:$0xff]  ;;  %v9224_v16 = vld [vmem:[#allocation145_spill] sm:$0xff] }
 0x3b0   : > { %3811 = vmatpush1.bf16.msra.mxu1 %v3416_v26  ;;  %5292 = vrcp.f32 %v3251_v9  ;;  %v2171_v35 = vadd.f32 %v9207_v1, %v2169_v47  ;;  %v2170_v23 = vadd.f32 %v9208_v48, %v2168_v25  ;;  %3485 = vperm.xlu0 %4906, %v3447_v31   ;;  %v9222_v31 = vld [vmem:[#allocation146_spill] sm:$0xff]  ;;  %v9223_v47 = vld [vmem:[#allocation89_spill] sm:$0xff] }
 0x3b1   : > { %3812 = vmatprep.subr.bf16.mxu1 %v3415_v33  ;;  %v2477_v41 = vadd.f32 %v9209_v46, %v2475_v37  ;;  %3495 = vperm.xlu1 %4907, %v3449_v34   ;;  %v3454_v46 = vld [vmem:[%s8196_s3 + $0x40] sm:$0xff] }
 0x3b2   : > { %5294 = vrcp.f32 %v2171_v35  ;;  %v9226_v35 = vld [vmem:[#allocation143_spill] sm:$0xff] }
 0x3b3   : > { %5296 = vrcp.f32 %v2477_v41  ;;  %v9227_v41 = vld [vmem:[#allocation133_spill] sm:$0xff] }
 0x3b4   : > { %3813 = vmatpush1.bf16.msra.mxu1 %v3414_v32  ;;  %5298 = vrcp.f32 %v2170_v23  ;;  %3500 = vperm.xlu0 %4906, %v3450_v18   ;;  %v9225_v32 = vld [vmem:[#allocation41_spill] sm:$0xff]  ;;  %v3453_v23 = vld [vmem:[%s8196_s3 + $0x38] sm:$0xff] }
 0x3b5   : > { %3505 = vperm.xlu1 %4907, %v3451_v42   ;;  %v9228_v18 = vld [vmem:[#allocation141_spill] sm:$0xff] }
 0x3b8   : > { %3510 = vperm.xlu0 %4906, %v3452_v7   ;;  %v3441_v7 = vpack.c.bf16 %v7661_v6, %v7639_v56 }
 0x3b9   : > { %3515 = vperm.xlu1 %4907, %v3453_v23  }
 0x3bc   : > { %v5291_v39 = vpop.eup %5290  ;;  %3520 = vperm.xlu0 %4906, %v3454_v46  }
 0x3bd   : > { %v7756_v63 = vmul.f32 %v5291_v39, %v7664_v13  ;;  %v7759_v2 = vmul.f32 %v5291_v39, %v7684_v3  ;;  %v7761_v54 = vmul.f32 %v5291_v39, %v3368_v17  ;;  %v7763_v4 = vmul.f32 %v5291_v39, %v3370_v59  ;;  %v5293_v36 = vpop.eup %5292 }
 0x3be   : > { %v7766_v22 = vmul.f32 %v5293_v36, %v7681_v57  ;;  %v7769_v27 = vmul.f32 %v5293_v36, %v7697_v19  ;;  %v7771_v26 = vmul.f32 %v5293_v36, %v3369_v60  ;;  %v7773_v13 = vmul.f32 %v5293_v36, %v3371_v29  ;;  %v9218_v57 = vld [vmem:[#allocation42_spill] sm:$0xff]  ;;  %v9219_v19 = vld [vmem:[#allocation139_spill] sm:$0xff]  ;;  %v9229_v36 = vld [vmem:[#allocation109_spill] sm:$0xff] }
 0x3bf   : > { %9210 = vst [vmem:[#allocation38_spill] sm:$0xff] %v7759_v2  ;;  %9211 = vst [vmem:[#allocation78_spill] sm:$0xff] %v7761_v54  ;;  %v5295_v55 = vpop.eup %5294  ;;  %v3444_v3 = vpack.c.bf16 %v7763_v4, %v7761_v54  ;;  %v9220_v29 = vld [vmem:[#allocation82_spill] sm:$0xff]  ;;  %v3442_v42 = vpack.c.bf16 %v7759_v2, %v7756_v63  ;;  %v5301_v54 = vld [vmem:[%s5624_s13 + $0x8] sm:$0xff] }
 0x3c0   : > { %9212 = vst [vmem:[#allocation60_spill] sm:$0xff] %v7763_v4  ;;  %9213 = vst [vmem:[#allocation86_spill] sm:$0xff] %v7766_v22  ;;  %v5297_v17 = vpop.eup %5296  ;;  %v3445_v59 = vpack.c.bf16 %v7773_v13, %v7771_v26  ;;  %v7780_v11 = vmul.f32 %v5295_v55, %v9217_v50  ;;  %v7783_v43 = vmul.f32 %v5295_v55, %v9218_v57  ;;  %v9230_v50 = vld [vmem:[#allocation118_spill] sm:$0xff]  ;;  %v9231_v57 = vld [vmem:[#allocation137_spill] sm:$0xff] }
 0x3c1   : > { %9214 = vst [vmem:[#allocation130_spill] sm:$0xff] %v7769_v27  ;;  %9215 = vst [vmem:[#allocation97_spill] sm:$0xff] %v7771_v26  ;;  %v7786_v33 = vmul.f32 %v5295_v55, %v9219_v19  ;;  %v5299_v60 = vpop.eup %5298  ;;  %v7789_v9 = vmul.f32 %v5297_v17, %v9220_v29  ;;  %v7792_v62 = vmul.f32 %v5297_v17, %v9221_v10  ;;  %v9232_v29 = vld [vmem:[#allocation55_spill] sm:$0xff]  ;;  %v9233_v10 = vld [vmem:[#allocation76_spill] sm:$0xff] }
 0x3c2   : > { %9216 = vst [vmem:[#allocation11_spill] sm:$0xff] %v7773_v13  ;;  %v7795_v49 = vmul.f32 %v5297_v17, %v9222_v31  ;;  %v7798_v52 = vmul.f32 %v5297_v17, %v9223_v47  ;;  %3814 = vmatprep.subr.bf16.mxu1 %v3445_v59  ;;  %v3443_v25 = vpack.c.bf16 %v7769_v27, %v7766_v22  ;;  %v3455_v17 = vld [vmem:[%s8196_s3 + $0x48] sm:$0xff]  ;;  %v3456_v59 = vld [vmem:[%s8196_s3 + $0x50] sm:$0xff]  ;;  %v4121_v27 = vunpack.c.l.bf16 %v5301_v54 }
 0x3c3   : > { %v7803_v37 = vmul.f32 %v5299_v60, %v9224_v16  ;;  %v7806_v1 = vmul.f32 %v5299_v60, %v9225_v32  ;;  %v7809_v48 = vmul.f32 %v5295_v55, %v9226_v35  ;;  %3815 = vmatpush2.bf16.msra.mxu1 %v3444_v3  ;;  %v7818_v34 = vmul.f32 %v5299_v60, %v9227_v41  ;;  %v3458_v16 = vld [vmem:[%s8196_s3 + $0x60] sm:$0xff]  ;;  %v9234_v32 = vld [vmem:[#allocation134_spill] sm:$0xff] }
 0x3c4   : > { %v7821_v39 = vmul.f32 %v5299_v60, %v9228_v18  ;;  %3816 = vmatprep.subr.bf16.mxu1 %v3443_v25  ;;  %v3440_v55 = vpack.c.bf16 %v7642_v28, %v9229_v36  ;;  %v3439_v3 = vpack.c.bf16 %v7619_v0, %v7617_v12  ;;  %3525 = vperm.xlu1 %4907, %v3455_v17   ;;  %v3457_v25 = vld [vmem:[%s8196_s3 + $0x58] sm:$0xff]  ;;  %v3462_v17 = vld [vmem:[%s8196_s3 + $0x80] sm:$0xff] }
 0x3c5   : > { %3530 = vperm.xlu0 %4906, %v3456_v59   ;;  %v3438_v19 = vpack.c.bf16 %v9231_v57, %v9230_v50  ;;  %v3437_v60 = vpack.c.bf16 %v7792_v62, %v7789_v9  ;;  %v3436_v31 = vpack.c.bf16 %v9233_v10, %v9232_v29  ;;  %v3435_v47 = vpack.c.bf16 %v7798_v52, %v7795_v49  ;;  %v9235_v35 = vld [vmem:[#allocation154_spill] sm:$0xff]  ;;  %v5084_v59 = vld [vmem:[%s8195_s2] ss:$8 sps:$4 sm:$0xff]  }
 0x3c6   : > { %v3434_v23 = vpack.c.bf16 %v9235_v35, %v9234_v32  ;;  %v3433_v46 = vpack.c.bf16 %v7783_v43, %v7780_v11  ;;  %v3432_v41 = vpack.c.bf16 %v7806_v1, %v7803_v37  ;;  %v3431_v18 = vpack.c.bf16 %v7809_v48, %v7786_v33 }
 0x3c7   : > { %3817 = vmatpush2.bf16.msra.mxu1 %v3442_v42  ;;  %v3459_v42 = vld [vmem:[%s8196_s3 + $0x68] sm:$0xff] }
 0x3c8   : > { %3818 = vmatprep.subr.bf16.mxu1 %v3441_v7  ;;  %3535 = vperm.xlu1 %4907, %v3457_v25   ;;  %v3460_v7 = vld [vmem:[%s8196_s3 + $0x70] sm:$0xff]  ;;  %v3466_v25 = vld [vmem:[%s8196_s3 + $0xa0] sm:$0xff] }
 0x3c9   : > { %3540 = vperm.xlu0 %4906, %v3458_v16   ;;  %v5089_v16 = vld [vmem:[%s8195_s2 + $0x10] ss:$8 sps:$4 sm:$0xff]  }
 0x3cb   : > { %3819 = vmatpush2.bf16.msra.mxu1 %v3440_v55  ;;  %v3461_v55 = vld [vmem:[%s8196_s3 + $0x78] sm:$0xff] }
 0x3cc   : > { %3820 = vmatprep.subr.bf16.mxu1 %v3439_v3  ;;  %3545 = vperm.xlu1 %4907, %v3459_v42   ;;  %v3430_v3 = vpack.c.bf16 %v7821_v39, %v7818_v34  ;;  %v3470_v42 = vld [vmem:[%s8196_s3 + $0xc0] sm:$0xff] }
 0x3cd   : > { %3550 = vperm.xlu0 %4906, %v3460_v7   ;;  %v5092_v7 = vld [vmem:[%s8195_s2 + $0x20] ss:$8 sps:$4 sm:$0xff]  }
 0x3cf   : > { %3821 = vmatpush2.bf16.msra.mxu1 %v3438_v19  ;;  %v5087_v19 = vld [vmem:[%s8195_s2 + $0x14] ss:$8 sps:$4 sm:$0xff]  }
 0x3d0   : > { %3822 = vmatprep.subr.bf16.mxu1 %v3437_v60  ;;  %3555 = vperm.xlu1 %4907, %v3461_v55   ;;  %v3463_v60 = vld [vmem:[%s8196_s3 + $0x88] sm:$0xff]  ;;  %v5093_v55 = vld [vmem:[%s8195_s2 + $0x34] ss:$8 sps:$4 sm:$0xff]  }
 0x3d1   : > { %3560 = vperm.xlu0 %4906, %v3462_v17   ;;  %v3472_v17 = vld [vmem:[%s8196_s3 + $0xd0] sm:$0xff] }
 0x3d3   : > { %3823 = vmatpush2.bf16.msra.mxu1 %v3436_v31  ;;  %v3464_v31 = vld [vmem:[%s8196_s3 + $0x90] sm:$0xff] }
 0x3d4   : > { %3824 = vmatprep.subr.bf16.mxu1 %v3435_v47  ;;  %3565 = vperm.xlu1 %4907, %v3463_v60   ;;  %v3465_v47 = vld [vmem:[%s8196_s3 + $0x98] sm:$0xff] }
 0x3d5   : > { %3570 = vperm.xlu0 %4906, %v3464_v31   ;;  %v5095_v60 = vld [vmem:[%s8195_s2 + $0x30] ss:$8 sps:$4 sm:$0xff]   ;;  %v5096_v31 = vld [vmem:[%s8195_s2 + $0x44] ss:$8 sps:$4 sm:$0xff]  }
 0x3d7   : > { %3825 = vmatpush2.bf16.msra.mxu1 %v3434_v23  ;;  %v5090_v23 = vld [vmem:[%s8195_s2 + $0x24] ss:$8 sps:$4 sm:$0xff]  }
 0x3d8   : > { %3826 = vmatprep.subr.bf16.mxu1 %v3433_v46  ;;  %3575 = vperm.xlu1 %4907, %v3465_v47   ;;  %v3467_v46 = vld [vmem:[%s8196_s3 + $0xa8] sm:$0xff] }
 0x3d9   : > { %3580 = vperm.xlu0 %4906, %v3466_v25   ;;  %v3475_v47 = vld [vmem:[%s8196_s3 + $0xe8] sm:$0xff]  ;;  %v3476_v25 = vld [vmem:[%s8196_s3 + $0xf0] sm:$0xff] }
 0x3db   : > { %3827 = vmatpush2.bf16.msra.mxu1 %v3432_v41  ;;  %v3468_v41 = vld [vmem:[%s8196_s3 + $0xb0] sm:$0xff] }
 0x3dc   : > { %3828 = vmatprep.subr.bf16.mxu1 %v3431_v18  ;;  %3585 = vperm.xlu1 %4907, %v3467_v46   ;;  %v3469_v18 = vld [vmem:[%s8196_s3 + $0xb8] sm:$0xff] }
 0x3dd   : > { %3590 = vperm.xlu0 %4906, %v3468_v41   ;;  %v5099_v46 = vld [vmem:[%s8195_s2 + $0x54] ss:$8 sps:$4 sm:$0xff]   ;;  %v5101_v41 = vld [vmem:[%s8195_s2 + $0x50] ss:$8 sps:$4 sm:$0xff]  }
 0x3df   : > { %3829 = vmatpush2.bf16.msra.mxu1 %v3430_v3  ;;  %v3471_v3 = vld [vmem:[%s8196_s3 + $0xc8] sm:$0xff] }
 0x3e0   : > { %3595 = vperm.xlu1 %4907, %v3469_v18   ;;  %v5102_v18 = vld [vmem:[%s8195_s2 + $0x64] ss:$8 sps:$4 sm:$0xff]  }
 0x3e1   : > { %3600 = vperm.xlu0 %4906, %v3470_v42   ;;  %v5104_v42 = vld [vmem:[%s8195_s2 + $0x60] ss:$8 sps:$4 sm:$0xff]  }
 0x3e2   : > { %3831 = vmatmul.mubr.bf16.vlgmr.msra.gmra.mxu1 %v5084_v59  ;;  %v3473_v59 = vld [vmem:[%s8196_s3 + $0xd8] sm:$0xff] }
 0x3e3   : > { %3840 = vmatprep.mubr.bf16.mxu1 %v5087_v19  ;;  %v3474_v19 = vld [vmem:[%s8196_s3 + $0xe0] sm:$0xff] }
 0x3e4   : > { %3605 = vperm.xlu1 %4907, %v3471_v3   ;;  %v5108_v3 = vld [vmem:[%s8195_s2 + $0x84] ss:$8 sps:$4 sm:$0xff]  }
 0x3e5   : > { %3610 = vperm.xlu0 %4906, %v3472_v17   ;;  %v5110_v17 = vld [vmem:[%s8195_s2 + $0x80] ss:$8 sps:$4 sm:$0xff]  }
 0x3e8   : > { %3615 = vperm.xlu1 %4907, %v3473_v59   ;;  %v5111_v59 = vld [vmem:[%s8195_s2 + $0x94] ss:$8 sps:$4 sm:$0xff]  }
 0x3e9   : > { %3620 = vperm.xlu0 %4906, %v3474_v19   ;;  %v5113_v19 = vld [vmem:[%s8195_s2 + $0x90] ss:$8 sps:$4 sm:$0xff]  }
 0x3ea   : > { %3841 = vmatmul.mubr.bf16.gmra.mxu1 %v5089_v16  ;;  %v3477_v16 = vld [vmem:[%s8196_s3 + $0xf8] sm:$0xff] }
 0x3eb   : > { %3850 = vmatprep.mubr.bf16.mxu1 %v5090_v23  ;;  %v5098_v23 = vld [vmem:[%s8195_s2 + $0x40] ss:$8 sps:$4 sm:$0xff]  }
 0x3ec   : > { %3625 = vperm.xlu1 %4907, %v3475_v47   ;;  %v5117_v47 = vld [vmem:[%s8195_s2 + $0xb4] ss:$8 sps:$4 sm:$0xff]  }
 0x3ed   : > { %3630 = vperm.xlu0 %4906, %v3476_v25   ;;  %v5119_v25 = vld [vmem:[%s8195_s2 + $0xb0] ss:$8 sps:$4 sm:$0xff]  }
 0x3f0   : > { %3635 = vperm.xlu1 %4907, %v3477_v16   ;;  %v5122_v16 = vld [vmem:[%s8195_s2 + $0xc4] ss:$8 sps:$4 sm:$0xff]  }
 0x3f2   : > { %3851 = vmatmul.mubr.bf16.gmra.mxu1 %v5092_v7  ;;  %v5105_v7 = vld [vmem:[%s8195_s2 + $0x74] ss:$8 sps:$4 sm:$0xff]  }
 0x3f3   : > { %3860 = vmatprep.mubr.bf16.mxu1 %v5093_v55  ;;  %v5107_v55 = vld [vmem:[%s8195_s2 + $0x70] ss:$8 sps:$4 sm:$0xff]  }
 0x3fa   : > { %3861 = vmatmul.mubr.bf16.gmra.mxu1 %v5095_v60  ;;  %v5114_v60 = vld [vmem:[%s8195_s2 + $0xa4] ss:$8 sps:$4 sm:$0xff]  }
 0x3fb   : > { %3870 = vmatprep.mubr.bf16.mxu1 %v5096_v31  ;;  %v5116_v31 = vld [vmem:[%s8195_s2 + $0xa0] ss:$8 sps:$4 sm:$0xff]  }
 0x402   : > { %3871 = vmatmul.mubr.bf16.gmra.mxu1 %v5098_v23  ;;  %v5120_v23 = vld [vmem:[%s8195_s2 + $0xc0] ss:$8 sps:$4 sm:$0xff]  }
 0x403   : > { %3880 = vmatprep.mubr.bf16.mxu1 %v5099_v46  ;;  %v5125_v46 = vld [vmem:[%s8195_s2 + $0xd4] ss:$8 sps:$4 sm:$0xff]  }
 0x40a   : > { %3881 = vmatmul.mubr.bf16.gmra.mxu1 %v5101_v41  ;;  %v5123_v41 = vld [vmem:[%s8195_s2 + $0xd0] ss:$8 sps:$4 sm:$0xff]  }
 0x40b   : > { %3890 = vmatprep.mubr.bf16.mxu1 %v5102_v18  ;;  %v5128_v18 = vld [vmem:[%s8195_s2 + $0xe4] ss:$8 sps:$4 sm:$0xff]  }
 0x412   : > { %3891 = vmatmul.mubr.bf16.gmra.mxu1 %v5104_v42  ;;  %v5126_v42 = vld [vmem:[%s8195_s2 + $0xe0] ss:$8 sps:$4 sm:$0xff]  }
 0x413   : > { %3900 = vmatprep.mubr.bf16.mxu1 %v5105_v7  ;;  %v5131_v7 = vld [vmem:[%s8195_s2 + $0xf4] ss:$8 sps:$4 sm:$0xff]  }
 0x41a   : > { %3901 = vmatmul.mubr.bf16.gmra.mxu1 %v5107_v55  ;;  %v5129_v55 = vld [vmem:[%s8195_s2 + $0xf0] ss:$8 sps:$4 sm:$0xff]  }
 0x41b   : > { %3910 = vmatprep.mubr.bf16.mxu1 %v5108_v3 }
 0x422   : > { %3911 = vmatmul.mubr.bf16.gmra.mxu1 %v5110_v17 }
 0x423   : > { %3920 = vmatprep.mubr.bf16.mxu1 %v5111_v59 }
 0x427   : > { %v3481_v3 = vpop.permute.xlu0 %3480 }
 0x428   : > { %v3491_v13 = vpop.permute.xlu1 %3490 }
 0x42a   : > { %3921 = vmatmul.mubr.bf16.gmra.mxu1 %v5113_v19 }
 0x42b   : > { %3930 = vmatprep.mubr.bf16.mxu1 %v5114_v60  ;;  %v3486_v60 = vpop.permute.xlu0 %3485 }
 0x432   : > { %3931 = vmatmul.mubr.bf16.gmra.mxu1 %v5116_v31 }
 0x433   : > { %3940 = vmatprep.mubr.bf16.mxu1 %v5117_v47 }
 0x43a   : > { %3941 = vmatmul.mubr.bf16.gmra.mxu1 %v5119_v25  ;;  %v5300_v25 = vld [vmem:[%s5624_s13] sm:$0xff] }
 0x43b   : > { %3950 = vmatprep.mubr.bf16.mxu1 %v5122_v16  ;;  %v4119_v16 = vunpack.c.l.bf16 %v5300_v25 }
 0x442   : > { %3951 = vmatmul.mubr.bf16.gmra.mxu1 %v5120_v23 }
 0x443   : > { %3960 = vmatprep.mubr.bf16.mxu1 %v5125_v46 }
 0x44a   : > { %3961 = vmatmul.mubr.bf16.gmra.mxu1 %v5123_v41 }
 0x44b   : > { %3970 = vmatprep.mubr.bf16.mxu1 %v5128_v18  ;;  %v4120_v18 = vunpack.c.h.bf16 %v5300_v25 }
 0x452   : > { %3971 = vmatmul.mubr.bf16.gmra.mxu1 %v5126_v42 }
 0x453   : > { %3980 = vmatprep.mubr.bf16.mxu1 %v5131_v7 }
 0x45a   : > { %3981 = vmatmul.mubr.bf16.gmra.mxu1 %v5129_v55 }
 0x4a2   : > { %v3832_v17 = vpop.f32.mrf.mxu1 }
 0x4a3   : > { %v3833_v59 = vadd.f32 %v3832_v17, %v3481_v3 }
 0x4a4   : > { %v3834_v19 = vpop.f32.mrf.mxu1 }
 0x4a5   : > { %v3991_v31 = vmax.f32 %v3833_v59, 0.0  ;;  %v3835_v47 = vadd.f32 %v3834_v19, %v3481_v3  ;;  %v4122_v59 = vunpack.c.h.bf16 %v5301_v54 }
 0x4a6   : > { %v3836_v23 = vpop.f32.mrf.mxu1 }
 0x4a7   : > { %v4055_v46 = vadd.f32 %v3991_v31, %v9154_v20  ;;  %v3992_v41 = vmax.f32 %v3835_v47, 0.0  ;;  %v3837_v42 = vadd.f32 %v3836_v23, %v3486_v60 }
 0x4a8   : > { %v3838_v7 = vpop.f32.mrf.mxu1 }
 0x4a9   : > { %v4056_v55 = vadd.f32 %v3992_v41, %v9129_v38  ;;  %v3993_v4 = vmax.f32 %v3837_v42, 0.0  ;;  %v3839_v26 = vadd.f32 %v3838_v7, %v3486_v60  ;;  %v4183_v17 = vadd.f32 %v4119_v16, %v4055_v46  ;;  %v3496_v41 = vpop.permute.xlu1 %3495 }
 0x4aa   : > { %v3842_v3 = vpop.f32.mrf.mxu1 }
 0x4ab   : > { %v4184_v19 = vadd.f32 %v4120_v18, %v4056_v55  ;;  %v4057_v2 = vadd.f32 %v3993_v4, %v9145_v45  ;;  %v3994_v20 = vmax.f32 %v3839_v26, 0.0  ;;  %v3843_v31 = vadd.f32 %v3842_v3, %v3491_v13  ;;  %v5302_v26 = vld [vmem:[%s5624_s13 + $0x10] sm:$0xff]  ;;  %v5303_v3 = vld [vmem:[%s5624_s13 + $0x18] sm:$0xff] }
 0x4ac   : > { %v3844_v47 = vpop.f32.mrf.mxu1  ;;  %v4123_v46 = vunpack.c.l.bf16 %v5302_v26 }
 0x4ad   : > { %v4777_v25 = vpack.c.bf16 %v4184_v19, %v4183_v17  ;;  %v4058_v23 = vadd.f32 %v3994_v20, %v9202_v24  ;;  %v3995_v22 = vmax.f32 %v3843_v31, 0.0  ;;  %v3845_v38 = vadd.f32 %v3844_v47, %v3491_v13  ;;  %v3501_v20 = vpop.permute.xlu0 %3500 }
 0x4ae   : > { %v3846_v60 = vpop.f32.mrf.mxu1  ;;  %v4185_v54 = vadd.f32 %v4121_v27, %v4057_v2  ;;  %v4124_v24 = vunpack.c.h.bf16 %v5302_v26  ;;  %v4125_v19 = vunpack.c.l.bf16 %v5303_v3  ;;  %v3506_v26 = vpop.permute.xlu1 %3505 }
 0x4af   : > { %4439 = vst [vmem:[%s8019_s9] sm:$0xff] %v4777_v25  ;;  %v4186_v16 = vadd.f32 %v4122_v59, %v4058_v23  ;;  %v3847_v45 = vadd.f32 %v3846_v60, %v3496_v41  ;;  %v4059_v4 = vadd.f32 %v3995_v22, %v9017_v30  ;;  %v3996_v18 = vmax.f32 %v3845_v38, 0.0 }
 0x4b0   : > { %v3848_v42 = vpop.f32.mrf.mxu1  ;;  %v4126_v30 = vunpack.c.h.bf16 %v5303_v3 }
 0x4b1   : > { %v4778_v13 = vpack.c.bf16 %v4186_v16, %v4185_v54  ;;  %v3997_v7 = vmax.f32 %v3847_v45, 0.0  ;;  %v3849_v55 = vadd.f32 %v3848_v42, %v3496_v41  ;;  %v4060_v17 = vadd.f32 %v3996_v18, %v9160_v53  ;;  %v5304_v54 = vld [vmem:[%s5624_s13 + $0x20] sm:$0xff] }
 0x4b2   : > { %v3852_v2 = vpop.f32.mrf.mxu1  ;;  %v4187_v31 = vadd.f32 %v4123_v46, %v4059_v4  ;;  %v4127_v16 = vunpack.c.l.bf16 %v5304_v54  ;;  %v4128_v45 = vunpack.c.h.bf16 %v5304_v54 }
 0x4b3   : > { %4440 = vst [vmem:[%s8019_s9 + $0x8] sm:$0xff] %v4778_v13  ;;  %v4061_v27 = vadd.f32 %v3997_v7, %v9067_v5  ;;  %v3998_v59 = vmax.f32 %v3849_v55, 0.0  ;;  %v3853_v22 = vadd.f32 %v3852_v2, %v3501_v20  ;;  %v4188_v47 = vadd.f32 %v4124_v24, %v4060_v17  ;;  %v3511_v17 = vpop.permute.xlu0 %3510 }
 0x4b4   : > { %v3854_v25 = vpop.f32.mrf.mxu1 }
 0x4b5   : > { %v4062_v23 = vadd.f32 %v3998_v59, %v9164_v14  ;;  %v3999_v38 = vmax.f32 %v3853_v22, 0.0  ;;  %v3855_v41 = vadd.f32 %v3854_v25, %v3501_v20  ;;  %v4779_v53 = vpack.c.bf16 %v4188_v47, %v4187_v31 }
 0x4b6   : > { %v4189_v60 = vadd.f32 %v4125_v19, %v4061_v27  ;;  %v3856_v18 = vpop.f32.mrf.mxu1  ;;  %v5305_v27 = vld [vmem:[%s5624_s13 + $0x28] sm:$0xff] }
 0x4b7   : > { %v4190_v5 = vadd.f32 %v4126_v30, %v4062_v23  ;;  %v4063_v42 = vadd.f32 %v3999_v38, %v7674_v21  ;;  %v4000_v4 = vmax.f32 %v3855_v41, 0.0  ;;  %v3857_v46 = vadd.f32 %v3856_v18, %v3506_v26  ;;  %4441 = vst [vmem:[%s8019_s9 + $0x10] sm:$0xff] %v4779_v53  ;;  %v5306_v38 = vld [vmem:[%s5624_s13 + $0x30] sm:$0xff]  ;;  %v3516_v53 = vpop.permute.xlu1 %3515 }
 0x4b8   : > { %v3858_v24 = vpop.f32.mrf.mxu1  ;;  %v4129_v59 = vunpack.c.l.bf16 %v5305_v27  ;;  %v4130_v22 = vunpack.c.h.bf16 %v5305_v27  ;;  %v4131_v41 = vunpack.c.l.bf16 %v5306_v38 }
 0x4b9   : > { %v4780_v13 = vpack.c.bf16 %v4190_v5, %v4189_v60  ;;  %v4064_v14 = vadd.f32 %v4000_v4, %v7635_v51  ;;  %v4001_v7 = vmax.f32 %v3857_v46, 0.0  ;;  %v3859_v55 = vadd.f32 %v3858_v24, %v3506_v26 }
 0x4ba   : > { %v3862_v3 = vpop.f32.mrf.mxu1  ;;  %v4191_v19 = vadd.f32 %v4127_v16, %v4063_v42 }
 0x4bb   : > { %4442 = vst [vmem:[%s8019_s9 + $0x18] sm:$0xff] %v4780_v13  ;;  %v4192_v20 = vadd.f32 %v4128_v45, %v4064_v14  ;;  %v3863_v2 = vadd.f32 %v3862_v3, %v3511_v17  ;;  %v4065_v21 = vadd.f32 %v4001_v7, %v7676_v15  ;;  %v4002_v30 = vmax.f32 %v3859_v55, 0.0  ;;  %v5307_v13 = vld [vmem:[%s5624_s13 + $0x38] sm:$0xff]  ;;  %v3521_v55 = vpop.permute.xlu0 %3520 }
 0x4bc   : > { %v3864_v31 = vpop.f32.mrf.mxu1  ;;  %v4132_v15 = vunpack.c.h.bf16 %v5306_v38  ;;  %v4133_v14 = vunpack.c.l.bf16 %v5307_v13  ;;  %v4134_v7 = vunpack.c.h.bf16 %v5307_v13 }
 0x4bd   : > { %v4781_v47 = vpack.c.bf16 %v4192_v20, %v4191_v19  ;;  %v4003_v25 = vmax.f32 %v3863_v2, 0.0  ;;  %v3865_v51 = vadd.f32 %v3864_v31, %v3511_v17  ;;  %v4066_v23 = vadd.f32 %v4002_v30, %v7637_v44  ;;  %v3526_v30 = vpop.permute.xlu1 %3525 }
 0x4be   : > { %v3866_v60 = vpop.f32.mrf.mxu1  ;;  %v4193_v26 = vadd.f32 %v4129_v59, %v4065_v21 }
 0x4bf   : > { %4443 = vst [vmem:[%s8019_s9 + $0x20] sm:$0xff] %v4781_v47  ;;  %v4067_v54 = vadd.f32 %v4003_v25, %v7670_v61  ;;  %v4004_v16 = vmax.f32 %v3865_v51, 0.0  ;;  %v3867_v45 = vadd.f32 %v3866_v60, %v3516_v53  ;;  %v4194_v18 = vadd.f32 %v4130_v22, %v4066_v23  ;;  %v9236_v51 = vld [vmem:[#allocation49_spill] sm:$0xff]  ;;  %v5308_v23 = vld [vmem:[%s5624_s13 + $0x40] sm:$0xff] }
 0x4c0   : > { %v3868_v5 = vpop.f32.mrf.mxu1  ;;  %v4135_v38 = vunpack.c.l.bf16 %v5308_v23 }
 0x4c1   : > { %v4068_v42 = vadd.f32 %v4004_v16, %v7631_v40  ;;  %v4005_v4 = vmax.f32 %v3867_v45, 0.0  ;;  %v3869_v46 = vadd.f32 %v3868_v5, %v3516_v53  ;;  %v4782_v44 = vpack.c.bf16 %v4194_v18, %v4193_v26  ;;  %v5309_v26 = vld [vmem:[%s5624_s13 + $0x48] sm:$0xff]  ;;  %v3531_v5 = vpop.permute.xlu0 %3530 }
 0x4c2   : > { %v4195_v24 = vadd.f32 %v4131_v41, %v4067_v54  ;;  %v3872_v17 = vpop.f32.mrf.mxu1  ;;  %v4136_v53 = vunpack.c.h.bf16 %v5308_v23  ;;  %v4137_v18 = vunpack.c.l.bf16 %v5309_v26 }
 0x4c3   : > { %v4196_v61 = vadd.f32 %v4132_v15, %v4068_v42  ;;  %v4069_v3 = vadd.f32 %v4005_v4, %v7672_v58  ;;  %v4006_v19 = vmax.f32 %v3869_v46, 0.0  ;;  %v3873_v20 = vadd.f32 %v3872_v17, %v3521_v55  ;;  %4444 = vst [vmem:[%s8019_s9 + $0x28] sm:$0xff] %v4782_v44  ;;  %v9237_v15 = vld [vmem:[#allocation84_spill] sm:$0xff]  ;;  %v9238_v4 = vld [vmem:[#allocation85_spill] sm:$0xff] }
 0x4c4   : > { %v3874_v2 = vpop.f32.mrf.mxu1  ;;  %v9239_v17 = vld [vmem:[#allocation37_spill] sm:$0xff] }
 0x4c5   : > { %v4783_v21 = vpack.c.bf16 %v4196_v61, %v4195_v24  ;;  %v4070_v40 = vadd.f32 %v4006_v19, %v7633_v8  ;;  %v4007_v27 = vmax.f32 %v3873_v20, 0.0  ;;  %v3875_v59 = vadd.f32 %v3874_v2, %v3521_v55 }
 0x4c6   : > { %v3876_v22 = vpop.f32.mrf.mxu1  ;;  %v4197_v31 = vadd.f32 %v4133_v14, %v4069_v3  ;;  %v4138_v24 = vunpack.c.h.bf16 %v5309_v26  ;;  %v9242_v26 = vld [vmem:[#allocation110_spill] sm:$0xff] }
 0x4c7   : > { %4445 = vst [vmem:[%s8019_s9 + $0x30] sm:$0xff] %v4783_v21  ;;  %v4198_v47 = vadd.f32 %v4134_v7, %v4070_v40  ;;  %v3877_v25 = vadd.f32 %v3876_v22, %v3526_v30  ;;  %v4071_v58 = vadd.f32 %v4007_v27, %v9236_v51  ;;  %v4008_v41 = vmax.f32 %v3875_v59, 0.0  ;;  %v5310_v21 = vld [vmem:[%s5624_s13 + $0x50] sm:$0xff]  ;;  %v3536_v59 = vpop.permute.xlu1 %3535 }
 0x4c8   : > { %v3878_v60 = vpop.f32.mrf.mxu1  ;;  %v4139_v40 = vunpack.c.l.bf16 %v5310_v21  ;;  %v4140_v27 = vunpack.c.h.bf16 %v5310_v21 }
 0x4c9   : > { %v4784_v54 = vpack.c.bf16 %v4198_v47, %v4197_v31  ;;  %v4009_v16 = vmax.f32 %v3877_v25, 0.0  ;;  %v3879_v8 = vadd.f32 %v3878_v60, %v3526_v30  ;;  %v4072_v45 = vadd.f32 %v4008_v41, %v9237_v15  ;;  %v9240_v31 = vld [vmem:[#allocation29_spill] sm:$0xff] }
 0x4ca   : > { %v3882_v42 = vpop.f32.mrf.mxu1  ;;  %v4199_v14 = vadd.f32 %v4135_v38, %v4071_v58  ;;  %v9241_v38 = vld [vmem:[#allocation99_spill] sm:$0xff] }
 0x4cb   : > { %4446 = vst [vmem:[%s8019_s9 + $0x38] sm:$0xff] %v4784_v54  ;;  %v4073_v46 = vadd.f32 %v4009_v16, %v9238_v4  ;;  %v4010_v44 = vmax.f32 %v3879_v8, 0.0  ;;  %v3883_v13 = vadd.f32 %v3882_v42, %v3531_v5  ;;  %v4200_v7 = vadd.f32 %v4136_v53, %v4072_v45  ;;  %v3541_v54 = vpop.permute.xlu0 %3540 }
 0x4cc   : > { %v3884_v55 = vpop.f32.mrf.mxu1 }
 0x4cd   : > { %v4074_v61 = vadd.f32 %v4010_v44, %v9239_v17  ;;  %v4011_v3 = vmax.f32 %v3883_v13, 0.0  ;;  %v3885_v19 = vadd.f32 %v3884_v55, %v3531_v5  ;;  %v4785_v20 = vpack.c.bf16 %v4200_v7, %v4199_v14  ;;  %v5311_v5 = vld [vmem:[%s5624_s13 + $0x58] sm:$0xff]  ;;  %v9243_v7 = vld [vmem:[#allocation61_spill] sm:$0xff]  ;;  %v5312_v17 = vld [vmem:[%s5624_s13 + $0x60] sm:$0xff] }
 0x4ce   : > { %v4201_v2 = vadd.f32 %v4137_v18, %v4073_v46  ;;  %v3886_v30 = vpop.f32.mrf.mxu1  ;;  %v4141_v42 = vunpack.c.l.bf16 %v5311_v5  ;;  %v4142_v46 = vunpack.c.h.bf16 %v5311_v5 }
 0x4cf   : > { %v4202_v22 = vadd.f32 %v4138_v24, %v4074_v61  ;;  %v4075_v47 = vadd.f32 %v4011_v3, %v9240_v31  ;;  %v4012_v25 = vmax.f32 %v3885_v19, 0.0  ;;  %v3887_v51 = vadd.f32 %v3886_v30, %v3536_v59  ;;  %4447 = vst [vmem:[%s8019_s9 + $0x40] sm:$0xff] %v4785_v20  ;;  %v3546_v3 = vpop.permute.xlu1 %3545  ;;  %v9244_v20 = vld [vmem:[#allocation15_spill] sm:$0xff]  ;;  %v9245_v31 = vld [vmem:[#allocation92_spill] sm:$0xff] }
 0x4d0   : > { %v3888_v58 = vpop.f32.mrf.mxu1  ;;  %v4143_v61 = vunpack.c.l.bf16 %v5312_v17 }
 0x4d1   : > { %v4786_v23 = vpack.c.bf16 %v4202_v22, %v4201_v2  ;;  %v4076_v41 = vadd.f32 %v4012_v25, %v9241_v38  ;;  %v4013_v53 = vmax.f32 %v3887_v51, 0.0  ;;  %v3889_v60 = vadd.f32 %v3888_v58, %v3536_v59  ;;  %v5313_v38 = vld [vmem:[%s5624_s13 + $0x68] sm:$0xff] }
 0x4d2   : > { %v3892_v16 = vpop.f32.mrf.mxu1  ;;  %v4203_v8 = vadd.f32 %v4139_v40, %v4075_v47  ;;  %v4144_v40 = vunpack.c.h.bf16 %v5312_v17  ;;  %v9248_v17 = vld [vmem:[#allocation128_spill] sm:$0xff] }
 0x4d3   : > { %4448 = vst [vmem:[%s8019_s9 + $0x48] sm:$0xff] %v4786_v23  ;;  %v4204_v15 = vadd.f32 %v4140_v27, %v4076_v41  ;;  %v3893_v45 = vadd.f32 %v3892_v16, %v3541_v54  ;;  %v4077_v18 = vadd.f32 %v4013_v53, %v9242_v26  ;;  %v4014_v4 = vmax.f32 %v3889_v60, 0.0  ;;  %v3551_v60 = vpop.permute.xlu0 %3550 }
 0x4d4   : > { %v3894_v44 = vpop.f32.mrf.mxu1  ;;  %v4145_v41 = vunpack.c.l.bf16 %v5313_v38  ;;  %v4146_v53 = vunpack.c.h.bf16 %v5313_v38 }
 0x4d5   : > { %v4787_v24 = vpack.c.bf16 %v4204_v15, %v4203_v8  ;;  %v4015_v13 = vmax.f32 %v3893_v45, 0.0  ;;  %v3895_v14 = vadd.f32 %v3894_v44, %v3541_v54  ;;  %v4078_v55 = vadd.f32 %v4014_v4, %v9243_v7  ;;  %v9246_v8 = vld [vmem:[#allocation124_spill] sm:$0xff] }
 0x4d6   : > { %v3896_v19 = vpop.f32.mrf.mxu1  ;;  %v4205_v59 = vadd.f32 %v4141_v42, %v4077_v18  ;;  %v9247_v42 = vld [vmem:[#allocation23_spill] sm:$0xff] }
 0x4d7   : > { %4449 = vst [vmem:[%s8019_s9 + $0x50] sm:$0xff] %v4787_v24  ;;  %v4079_v2 = vadd.f32 %v4015_v13, %v9244_v20  ;;  %v4016_v21 = vmax.f32 %v3895_v14, 0.0  ;;  %v3897_v27 = vadd.f32 %v3896_v19, %v3546_v3  ;;  %v4206_v30 = vadd.f32 %v4142_v46, %v4078_v55  ;;  %v3556_v24 = vpop.permute.xlu1 %3555 }
 0x4d8   : > { %v3898_v22 = vpop.f32.mrf.mxu1 }
 0x4d9   : > { %v4080_v47 = vadd.f32 %v4016_v21, %v9245_v31  ;;  %v4017_v25 = vmax.f32 %v3897_v27, 0.0  ;;  %v3899_v51 = vadd.f32 %v3898_v22, %v3546_v3  ;;  %v4788_v58 = vpack.c.bf16 %v4206_v30, %v4205_v59  ;;  %v5314_v3 = vld [vmem:[%s5624_s13 + $0x70] sm:$0xff]  ;;  %v9249_v30 = vld [vmem:[#allocation115_spill] sm:$0xff]  ;;  %v5315_v31 = vld [vmem:[%s5624_s13 + $0x78] sm:$0xff] }
 0x4da   : > { %v4207_v23 = vadd.f32 %v4143_v61, %v4079_v2  ;;  %v3902_v54 = vpop.f32.mrf.mxu1  ;;  %v4147_v19 = vunpack.c.l.bf16 %v5314_v3  ;;  %v4148_v2 = vunpack.c.h.bf16 %v5314_v3 }
 0x4db   : > { %v4208_v16 = vadd.f32 %v4144_v40, %v4080_v47  ;;  %v4081_v15 = vadd.f32 %v4017_v25, %v9246_v8  ;;  %v4018_v45 = vmax.f32 %v3899_v51, 0.0  ;;  %v3903_v26 = vadd.f32 %v3902_v54, %v3551_v60  ;;  %4450 = vst [vmem:[%s8019_s9 + $0x58] sm:$0xff] %v4788_v58  ;;  %v3561_v25 = vpop.permute.xlu0 %3560  ;;  %v9250_v58 = vld [vmem:[#allocation46_spill] sm:$0xff] }
 0x4dc   : > { %v3904_v18 = vpop.f32.mrf.mxu1  ;;  %v4149_v47 = vunpack.c.l.bf16 %v5315_v31  ;;  %v9251_v8 = vld [vmem:[#allocation34_spill] sm:$0xff] }
 0x4dd   : > { %v4789_v5 = vpack.c.bf16 %v4208_v16, %v4207_v23  ;;  %v4082_v4 = vadd.f32 %v4018_v45, %v9247_v42  ;;  %v4019_v46 = vmax.f32 %v3903_v26, 0.0  ;;  %v3905_v44 = vadd.f32 %v3904_v18, %v3551_v60  ;;  %v5316_v42 = vld [vmem:[%s5624_s13 + $0x80] sm:$0xff] }
 0x4de   : > { %v3906_v13 = vpop.f32.mrf.mxu1  ;;  %v4209_v14 = vadd.f32 %v4145_v41, %v4081_v15  ;;  %v4150_v41 = vunpack.c.h.bf16 %v5315_v31 }
 0x4df   : > { %4451 = vst [vmem:[%s8019_s9 + $0x60] sm:$0xff] %v4789_v5  ;;  %v4210_v7 = vadd.f32 %v4146_v53, %v4082_v4  ;;  %v3907_v55 = vadd.f32 %v3906_v13, %v3556_v24  ;;  %v4083_v61 = vadd.f32 %v4019_v46, %v9248_v17  ;;  %v4020_v20 = vmax.f32 %v3905_v44, 0.0  ;;  %v3566_v44 = vpop.permute.xlu1 %3565 }
 0x4e0   : > { %v3908_v21 = vpop.f32.mrf.mxu1  ;;  %v4151_v4 = vunpack.c.l.bf16 %v5316_v42  ;;  %v4152_v46 = vunpack.c.h.bf16 %v5316_v42 }
 0x4e1   : > { %v4790_v40 = vpack.c.bf16 %v4210_v7, %v4209_v14  ;;  %v4021_v27 = vmax.f32 %v3907_v55, 0.0  ;;  %v3909_v59 = vadd.f32 %v3908_v21, %v3556_v24  ;;  %v4084_v22 = vadd.f32 %v4020_v20, %v9249_v30  ;;  %v5317_v30 = vld [vmem:[%s5624_s13 + $0x88] sm:$0xff] }
 0x4e2   : > { %v3912_v51 = vpop.f32.mrf.mxu1  ;;  %v4211_v60 = vadd.f32 %v4147_v19, %v4083_v61 }
 0x4e3   : > { %4452 = vst [vmem:[%s8019_s9 + $0x68] sm:$0xff] %v4790_v40  ;;  %v4085_v23 = vadd.f32 %v4021_v27, %v9250_v58  ;;  %v4022_v38 = vmax.f32 %v3909_v59, 0.0  ;;  %v3913_v53 = vadd.f32 %v3912_v51, %v3561_v25  ;;  %v4212_v54 = vadd.f32 %v4148_v2, %v4084_v22  ;;  %v3571_v2 = vpop.permute.xlu0 %3570 }
 0x4e4   : > { %v3914_v16 = vpop.f32.mrf.mxu1  ;;  %v4153_v22 = vunpack.c.l.bf16 %v5317_v30 }
 0x4e5   : > { %v4086_v15 = vadd.f32 %v4022_v38, %v9251_v8  ;;  %v4023_v45 = vmax.f32 %v3913_v53, 0.0  ;;  %v3915_v26 = vadd.f32 %v3914_v16, %v3561_v25  ;;  %v4791_v18 = vpack.c.bf16 %v4212_v54, %v4211_v60  ;;  %v5318_v38 = vld [vmem:[%s5624_s13 + $0x90] sm:$0xff]  ;;  %v3576_v53 = vpop.permute.xlu1 %3575 }
 0x4e6   : > { %v4213_v5 = vadd.f32 %v4149_v47, %v4085_v23  ;;  %v3916_v24 = vpop.f32.mrf.mxu1  ;;  %v4154_v47 = vunpack.c.h.bf16 %v5317_v30 }
 0x4e7   : > { %v4214_v13 = vadd.f32 %v4150_v41, %v4086_v15  ;;  %v4087_v14 = vadd.f32 %v4023_v45, %v7818_v34  ;;  %v4024_v7 = vmax.f32 %v3915_v26, 0.0  ;;  %v3917_v55 = vadd.f32 %v3916_v24, %v3566_v44  ;;  %4453 = vst [vmem:[%s8019_s9 + $0x70] sm:$0xff] %v4791_v18 }
 0x4e8   : > { %v3918_v17 = vpop.f32.mrf.mxu1  ;;  %v4155_v41 = vunpack.c.l.bf16 %v5318_v38 }
 0x4e9   : > { %v4792_v61 = vpack.c.bf16 %v4214_v13, %v4213_v5  ;;  %v4088_v3 = vadd.f32 %v4024_v7, %v7786_v33  ;;  %v4025_v19 = vmax.f32 %v3917_v55, 0.0  ;;  %v3919_v20 = vadd.f32 %v3918_v17, %v3566_v44  ;;  %v3581_v13 = vpop.permute.xlu0 %3580 }
 0x4ea   : > { %v3922_v21 = vpop.f32.mrf.mxu1  ;;  %v4215_v40 = vadd.f32 %v4151_v4, %v4087_v14 }
 0x4eb   : > { %4454 = vst [vmem:[%s8019_s9 + $0x78] sm:$0xff] %v4792_v61  ;;  %v4216_v27 = vadd.f32 %v4152_v46, %v4088_v3  ;;  %v3923_v59 = vadd.f32 %v3922_v21, %v3571_v2  ;;  %v4089_v34 = vadd.f32 %v4025_v19, %v7821_v39  ;;  %v4026_v31 = vmax.f32 %v3919_v20, 0.0  ;;  %v5319_v46 = vld [vmem:[%s5624_s13 + $0x98] sm:$0xff]  ;;  %v3586_v20 = vpop.permute.xlu1 %3585 }
 0x4ec   : > { %v3924_v25 = vpop.f32.mrf.mxu1  ;;  %v4156_v39 = vunpack.c.h.bf16 %v5318_v38  ;;  %v4157_v44 = vunpack.c.l.bf16 %v5319_v46  ;;  %v4158_v24 = vunpack.c.h.bf16 %v5319_v46 }
 0x4ed   : > { %v4793_v51 = vpack.c.bf16 %v4216_v27, %v4215_v40  ;;  %v4027_v58 = vmax.f32 %v3923_v59, 0.0  ;;  %v3925_v33 = vadd.f32 %v3924_v25, %v3571_v2  ;;  %v4090_v23 = vadd.f32 %v4026_v31, %v7809_v48 }
 0x4ee   : > { %v3926_v60 = vpop.f32.mrf.mxu1  ;;  %v4217_v15 = vadd.f32 %v4153_v22, %v4089_v34  ;;  %v5320_v34 = vld [vmem:[%s5624_s13 + $0xa0] sm:$0xff] }
 0x4ef   : > { %4455 = vst [vmem:[%s8019_s9 + $0x80] sm:$0xff] %v4793_v51  ;;  %v4091_v54 = vadd.f32 %v4027_v58, %v7803_v37  ;;  %v4028_v16 = vmax.f32 %v3925_v33, 0.0  ;;  %v3927_v8 = vadd.f32 %v3926_v60, %v3576_v53  ;;  %v4218_v45 = vadd.f32 %v4154_v47, %v4090_v23  ;;  %v3591_v33 = vpop.permute.xlu0 %3590  ;;  %v5321_v23 = vld [vmem:[%s5624_s13 + $0xa8] sm:$0xff] }
 0x4f0   : > { %v3928_v26 = vpop.f32.mrf.mxu1  ;;  %v4159_v30 = vunpack.c.l.bf16 %v5320_v34  ;;  %v4160_v31 = vunpack.c.h.bf16 %v5320_v34  ;;  %v4161_v38 = vunpack.c.l.bf16 %v5321_v23 }
 0x4f1   : > { %v4092_v18 = vadd.f32 %v4028_v16, %v7780_v11  ;;  %v4029_v5 = vmax.f32 %v3927_v8, 0.0  ;;  %v3929_v42 = vadd.f32 %v3928_v26, %v3576_v53  ;;  %v4794_v48 = vpack.c.bf16 %v4218_v45, %v4217_v15 }
 0x4f2   : > { %v4219_v4 = vadd.f32 %v4155_v41, %v4091_v54  ;;  %v3932_v14 = vpop.f32.mrf.mxu1 }
 0x4f3   : > { %v4220_v37 = vadd.f32 %v4156_v39, %v4092_v18  ;;  %v4093_v7 = vadd.f32 %v4029_v5, %v7806_v1  ;;  %v4030_v55 = vmax.f32 %v3929_v42, 0.0  ;;  %v3933_v17 = vadd.f32 %v3932_v14, %v3581_v13  ;;  %4456 = vst [vmem:[%s8019_s9 + $0x88] sm:$0xff] %v4794_v48  ;;  %v3596_v18 = vpop.permute.xlu1 %3595  ;;  %v5322_v42 = vld [vmem:[%s5624_s13 + $0xb0] sm:$0xff] }
 0x4f4   : > { %v3934_v61 = vpop.f32.mrf.mxu1  ;;  %v4163_v48 = vunpack.c.l.bf16 %v5322_v42 }
 0x4f5   : > { %v4795_v3 = vpack.c.bf16 %v4220_v37, %v4219_v4  ;;  %v4094_v11 = vadd.f32 %v4030_v55, %v7783_v43  ;;  %v4031_v19 = vmax.f32 %v3933_v17, 0.0  ;;  %v3935_v2 = vadd.f32 %v3934_v61, %v3581_v13  ;;  %v3601_v55 = vpop.permute.xlu0 %3600 }
 0x4f6   : > { %v3936_v21 = vpop.f32.mrf.mxu1  ;;  %v4221_v40 = vadd.f32 %v4157_v44, %v4093_v7  ;;  %v4164_v4 = vunpack.c.h.bf16 %v5322_v42 }
 0x4f7   : > { %4457 = vst [vmem:[%s8019_s9 + $0x90] sm:$0xff] %v4795_v3  ;;  %v4222_v27 = vadd.f32 %v4158_v24, %v4094_v11  ;;  %v3937_v59 = vadd.f32 %v3936_v21, %v3586_v20  ;;  %v4095_v1 = vadd.f32 %v4031_v19, %v9234_v32  ;;  %v4032_v22 = vmax.f32 %v3935_v2, 0.0  ;;  %v3606_v34 = vpop.permute.xlu1 %3605 }
 0x4f8   : > { %v3938_v47 = vpop.f32.mrf.mxu1  ;;  %v4162_v32 = vunpack.c.h.bf16 %v5321_v23 }
 0x4f9   : > { %v4796_v25 = vpack.c.bf16 %v4222_v27, %v4221_v40  ;;  %v4033_v51 = vmax.f32 %v3937_v59, 0.0  ;;  %v3939_v43 = vadd.f32 %v3938_v47, %v3586_v20  ;;  %v4096_v58 = vadd.f32 %v4032_v22, %v7795_v49  ;;  %v5323_v20 = vld [vmem:[%s5624_s13 + $0xb8] sm:$0xff]  ;;  %v5324_v22 = vld [vmem:[%s5624_s13 + $0xc0] sm:$0xff] }
 0x4fa   : > { %v3942_v41 = vpop.f32.mrf.mxu1  ;;  %v4223_v16 = vadd.f32 %v4159_v30, %v4095_v1  ;;  %v4165_v2 = vunpack.c.l.bf16 %v5323_v20  ;;  %v4166_v40 = vunpack.c.h.bf16 %v5323_v20 }
 0x4fb   : > { %4458 = vst [vmem:[%s8019_s9 + $0x98] sm:$0xff] %v4796_v25  ;;  %v4097_v53 = vadd.f32 %v4033_v51, %v9235_v35  ;;  %v4034_v60 = vmax.f32 %v3939_v43, 0.0  ;;  %v3943_v54 = vadd.f32 %v3942_v41, %v3591_v33  ;;  %v4224_v39 = vadd.f32 %v4160_v31, %v4096_v58  ;;  %v3616_v42 = vpop.permute.xlu1 %3615 }
 0x4fc   : > { %v3944_v8 = vpop.f32.mrf.mxu1  ;;  %v4167_v31 = vunpack.c.l.bf16 %v5324_v22 }
 0x4fd   : > { %v4098_v15 = vadd.f32 %v4034_v60, %v7798_v52  ;;  %v4035_v45 = vmax.f32 %v3943_v54, 0.0  ;;  %v3945_v26 = vadd.f32 %v3944_v8, %v3591_v33  ;;  %v4797_v49 = vpack.c.bf16 %v4224_v39, %v4223_v16  ;;  %v3611_v60 = vpop.permute.xlu0 %3610  ;;  %v5325_v54 = vld [vmem:[%s5624_s13 + $0xc8] sm:$0xff] }
 0x4fe   : > { %v4225_v5 = vadd.f32 %v4161_v38, %v4097_v53  ;;  %v3946_v46 = vpop.f32.mrf.mxu1  ;;  %v4169_v16 = vunpack.c.l.bf16 %v5325_v54  ;;  %v4170_v39 = vunpack.c.h.bf16 %v5325_v54 }
 0x4ff   : > { %v4226_v35 = vadd.f32 %v4162_v32, %v4098_v15  ;;  %v4099_v44 = vadd.f32 %v4035_v45, %v9232_v29  ;;  %v4036_v24 = vmax.f32 %v3945_v26, 0.0  ;;  %v3947_v13 = vadd.f32 %v3946_v46, %v3596_v18  ;;  %4459 = vst [vmem:[%s8019_s9 + $0xa0] sm:$0xff] %v4797_v49 }
 0x500   : > { %v3948_v14 = vpop.f32.mrf.mxu1 }
 0x501   : > { %v4798_v37 = vpack.c.bf16 %v4226_v35, %v4225_v5  ;;  %v4100_v52 = vadd.f32 %v4036_v24, %v7789_v9  ;;  %v4037_v7 = vmax.f32 %v3947_v13, 0.0  ;;  %v3949_v17 = vadd.f32 %v3948_v14, %v3596_v18  ;;  %v5326_v24 = vld [vmem:[%s5624_s13 + $0xd0] sm:$0xff] }
 0x502   : > { %v3952_v61 = vpop.f32.mrf.mxu1  ;;  %v4227_v3 = vadd.f32 %v4163_v48, %v4099_v44  ;;  %v4171_v13 = vunpack.c.l.bf16 %v5326_v24 }
 0x503   : > { %4460 = vst [vmem:[%s8019_s9 + $0xa8] sm:$0xff] %v4798_v37  ;;  %v4228_v11 = vadd.f32 %v4164_v4, %v4100_v52  ;;  %v3953_v19 = vadd.f32 %v3952_v61, %v3601_v55  ;;  %v4101_v29 = vadd.f32 %v4037_v7, %v9233_v10  ;;  %v4038_v21 = vmax.f32 %v3949_v17, 0.0  ;;  %v3621_v17 = vpop.permute.xlu0 %3620 }
 0x504   : > { %v3954_v27 = vpop.f32.mrf.mxu1  ;;  %v4168_v10 = vunpack.c.h.bf16 %v5324_v22  ;;  %v4172_v37 = vunpack.c.h.bf16 %v5326_v24  ;;  %v5328_v22 = vld [vmem:[%s5624_s13 + $0xe0] sm:$0xff] }
 0x505   : > { %v4799_v59 = vpack.c.bf16 %v4228_v11, %v4227_v3  ;;  %v4039_v1 = vmax.f32 %v3953_v19, 0.0  ;;  %v3955_v9 = vadd.f32 %v3954_v27, %v3601_v55  ;;  %v4102_v30 = vadd.f32 %v4038_v21, %v7792_v62  ;;  %v5327_v3 = vld [vmem:[%s5624_s13 + $0xd8] sm:$0xff] }
 0x506   : > { %v3956_v47 = vpop.f32.mrf.mxu1  ;;  %v4229_v58 = vadd.f32 %v4165_v2, %v4101_v29  ;;  %v4173_v11 = vunpack.c.l.bf16 %v5327_v3 }
 0x507   : > { %4461 = vst [vmem:[%s8019_s9 + $0xb0] sm:$0xff] %v4799_v59  ;;  %v4103_v25 = vadd.f32 %v4039_v1, %v9230_v50  ;;  %v4040_v51 = vmax.f32 %v3955_v9, 0.0  ;;  %v3957_v43 = vadd.f32 %v3956_v47, %v3606_v34  ;;  %v4230_v33 = vadd.f32 %v4166_v40, %v4102_v30 }
 0x508   : > { %v3958_v23 = vpop.f32.mrf.mxu1  ;;  %v4176_v47 = vunpack.c.h.bf16 %v5328_v22 }
 0x509   : > { %v4104_v38 = vadd.f32 %v4040_v51, %v7617_v12  ;;  %v4041_v41 = vmax.f32 %v3957_v43, 0.0  ;;  %v3959_v53 = vadd.f32 %v3958_v23, %v3606_v34  ;;  %v4800_v62 = vpack.c.bf16 %v4230_v33, %v4229_v58  ;;  %v3626_v34 = vpop.permute.xlu1 %3625 }
 0x50a   : > { %v4231_v32 = vadd.f32 %v4167_v31, %v4103_v25  ;;  %v3962_v8 = vpop.f32.mrf.mxu1  ;;  %v4175_v31 = vunpack.c.l.bf16 %v5328_v22 }
 0x50b   : > { %v4232_v50 = vadd.f32 %v4168_v10, %v4104_v38  ;;  %v4105_v15 = vadd.f32 %v4041_v41, %v9231_v57  ;;  %v4042_v45 = vmax.f32 %v3959_v53, 0.0  ;;  %v3963_v26 = vadd.f32 %v3962_v8, %v3611_v60  ;;  %4462 = vst [vmem:[%s8019_s9 + $0xb8] sm:$0xff] %v4800_v62  ;;  %v3631_v41 = vpop.permute.xlu0 %3630 }
 0x50c   : > { %v3964_v49 = vpop.f32.mrf.mxu1 }
 0x50d   : > { %v4801_v18 = vpack.c.bf16 %v4232_v50, %v4231_v32  ;;  %v4106_v12 = vadd.f32 %v4042_v45, %v7619_v0  ;;  %v4043_v5 = vmax.f32 %v3963_v26, 0.0  ;;  %v3965_v48 = vadd.f32 %v3964_v49, %v3611_v60 }
 0x50e   : > { %v3966_v4 = vpop.f32.mrf.mxu1  ;;  %v4233_v46 = vadd.f32 %v4169_v16, %v4105_v15  ;;  %v9253_v16 = vld [vmem:[#allocation38_spill] sm:$0xff] }
 0x50f   : > { %4463 = vst [vmem:[%s8019_s9 + $0xc0] sm:$0xff] %v4801_v18  ;;  %v4234_v35 = vadd.f32 %v4170_v39, %v4106_v12  ;;  %v3967_v44 = vadd.f32 %v3966_v4, %v3616_v42  ;;  %v4107_v57 = vadd.f32 %v4043_v5, %v9229_v36  ;;  %v4044_v14 = vmax.f32 %v3965_v48, 0.0  ;;  %v5329_v39 = vld [vmem:[%s5624_s13 + $0xe8] sm:$0xff]  ;;  %v3636_v12 = vpop.permute.xlu1 %3635  ;;  %v9254_v5 = vld [vmem:[#allocation130_spill] sm:$0xff]  ;;  %v5330_v48 = vld [vmem:[%s5624_s13 + $0xf0] sm:$0xff] }
 0x510   : > { %v3968_v52 = vpop.f32.mrf.mxu1  ;;  %v4174_v36 = vunpack.c.h.bf16 %v5327_v3  ;;  %v4177_v8 = vunpack.c.l.bf16 %v5329_v39  ;;  %v4178_v15 = vunpack.c.h.bf16 %v5329_v39  ;;  %v4179_v4 = vunpack.c.l.bf16 %v5330_v48  ;;  %v5331_v3 = vld [vmem:[%s5624_s13 + $0xf8] sm:$0xff] }
 0x511   : > { %v4802_v7 = vpack.c.bf16 %v4234_v35, %v4233_v46  ;;  %v4045_v55 = vmax.f32 %v3967_v44, 0.0  ;;  %v3969_v0 = vadd.f32 %v3968_v52, %v3616_v42  ;;  %v4108_v61 = vadd.f32 %v4044_v14, %v7639_v56  ;;  %v9255_v35 = vld [vmem:[#allocation78_spill] sm:$0xff] }
 0x512   : > { %v3972_v19 = vpop.f32.mrf.mxu1  ;;  %v4235_v21 = vadd.f32 %v4171_v13, %v4107_v57  ;;  %v4180_v24 = vunpack.c.h.bf16 %v5330_v48 }
 0x513   : > { %4464 = vst [vmem:[%s8019_s9 + $0xc8] sm:$0xff] %v4802_v7  ;;  %v4109_v29 = vadd.f32 %v4045_v55, %v7642_v28  ;;  %v4046_v20 = vmax.f32 %v3969_v0, 0.0  ;;  %v3973_v2 = vadd.f32 %v3972_v19, %v3621_v17  ;;  %v4236_v40 = vadd.f32 %v4172_v37, %v4108_v61  ;;  %v9256_v7 = vld [vmem:[#allocation97_spill] sm:$0xff] }
 0x514   : > { %v3974_v27 = vpop.f32.mrf.mxu1  ;;  %v4182_v19 = vunpack.c.h.bf16 %v5331_v3 }
 0x515   : > { %v4110_v59 = vadd.f32 %v4046_v20, %v7661_v6  ;;  %v4047_v1 = vmax.f32 %v3973_v2, 0.0  ;;  %v3975_v9 = vadd.f32 %v3974_v27, %v3621_v17  ;;  %v4803_v56 = vpack.c.bf16 %v4236_v40, %v4235_v21  ;;  %v9252_v6 = vld [vmem:[#allocation86_spill] sm:$0xff]  ;;  %v9258_v27 = vld [vmem:[#allocation11_spill] sm:$0xff] }
 0x516   : > { %v4237_v30 = vadd.f32 %v4173_v11, %v4109_v29  ;;  %v3976_v25 = vpop.f32.mrf.mxu1  ;;  %v4181_v11 = vunpack.c.l.bf16 %v5331_v3 }
 0x517   : > { %v4238_v28 = vadd.f32 %v4174_v36, %v4110_v59  ;;  %v4111_v51 = vadd.f32 %v4047_v1, %v7756_v63  ;;  %v4048_v10 = vmax.f32 %v3975_v9, 0.0  ;;  %v3977_v43 = vadd.f32 %v3976_v25, %v3626_v34  ;;  %4465 = vst [vmem:[%s8019_s9 + $0xd0] sm:$0xff] %v4803_v56  ;;  %v9257_v36 = vld [vmem:[#allocation60_spill] sm:$0xff] }
 0x518   : > { %v3978_v58 = vpop.f32.mrf.mxu1 }
 0x519   : > { %v4804_v33 = vpack.c.bf16 %v4238_v28, %v4237_v30  ;;  %v4112_v23 = vadd.f32 %v4048_v10, %v9252_v6  ;;  %v4049_v38 = vmax.f32 %v3977_v43, 0.0  ;;  %v3979_v53 = vadd.f32 %v3978_v58, %v3626_v34 }
 0x51a   : > { %v3982_v60 = vpop.f32.mrf.mxu1  ;;  %v4239_v62 = vadd.f32 %v4175_v31, %v4111_v51 }
 0x51b   : > { %4466 = vst [vmem:[%s8019_s9 + $0xd8] sm:$0xff] %v4804_v33  ;;  %v4240_v32 = vadd.f32 %v4176_v47, %v4112_v23  ;;  %v3983_v54 = vadd.f32 %v3982_v60, %v3631_v41  ;;  %v4113_v63 = vadd.f32 %v4049_v38, %v9253_v16  ;;  %v4050_v50 = vmax.f32 %v3979_v53, 0.0 }
 0x51c   : > { %v3984_v45 = vpop.f32.mrf.mxu1 }
 0x51d   : > { %v4805_v26 = vpack.c.bf16 %v4240_v32, %v4239_v62  ;;  %v4051_v49 = vmax.f32 %v3983_v54, 0.0  ;;  %v3985_v18 = vadd.f32 %v3984_v45, %v3631_v41  ;;  %v4114_v42 = vadd.f32 %v4050_v50, %v9254_v5 }
 0x51e   : > { %v3986_v46 = vpop.f32.mrf.mxu1  ;;  %v4241_v14 = vadd.f32 %v4177_v8, %v4113_v63 }
 0x51f   : > { %4467 = vst [vmem:[%s8019_s9 + $0xe0] sm:$0xff] %v4805_v26  ;;  %v4115_v44 = vadd.f32 %v4051_v49, %v9255_v35  ;;  %v4052_v57 = vmax.f32 %v3985_v18, 0.0  ;;  %v3987_v13 = vadd.f32 %v3986_v46, %v3636_v12  ;;  %v4242_v37 = vadd.f32 %v4178_v15, %v4114_v42 }
 0x520   : > { %v3988_v52 = vpop.f32.mrf.mxu1 }
 0x521   : > { %v4116_v55 = vadd.f32 %v4052_v57, %v9256_v7  ;;  %v4053_v0 = vmax.f32 %v3987_v13, 0.0  ;;  %v3989_v17 = vadd.f32 %v3988_v52, %v3636_v12  ;;  %v4806_v61 = vpack.c.bf16 %v4242_v37, %v4241_v14 }
 0x522   : > { %v4243_v29 = vadd.f32 %v4179_v4, %v4115_v44 }
 0x523   : > { %v4244_v20 = vadd.f32 %v4180_v24, %v4116_v55  ;;  %v4117_v2 = vadd.f32 %v4053_v0, %v9257_v36  ;;  %v4054_v21 = vmax.f32 %v3989_v17, 0.0  ;;  %4468 = vst [vmem:[%s8019_s9 + $0xe8] sm:$0xff] %v4806_v61 }
 0x525   : > { %v4807_v40 = vpack.c.bf16 %v4244_v20, %v4243_v29  ;;  %v4118_v59 = vadd.f32 %v4054_v21, %v9258_v27  ;;  %v4245_v1 = vadd.f32 %v4181_v11, %v4117_v2 }
 0x527   : > { %4469 = vst [vmem:[%s8019_s9 + $0xf0] sm:$0xff] %v4807_v40  ;;  %v4246_v9 = vadd.f32 %v4182_v19, %v4118_v59 }
 0x529   : > { %v4808_v34 = vpack.c.bf16 %v4246_v9, %v4245_v1 }
 0x52b   : > { %4470 = vst [vmem:[%s8019_s9 + $0xf8] sm:$0xff] %v4808_v34 }
 0x52c   : > { %5399 = shalt.err (!%p5396_p10)
}
 0x52d   : > { %s5400_s6 = scalar_lea.hbm %s8147_s8, 4096  ;;  %s5404_s22 = scalar_lea.hbm %s8197_s4, 8192 }
 0x52e   : > { %p5401_p5 = scmp.ne.s32.totalorder %s8147_s8, %s5400_s6  ;;  %p5405_p4 = scmp.lt.s32.totalorder %s8147_s8, %s8197_s4 }
 0x52f   : > { %p5406_p0 = scmp.lt.s32.totalorder %s5404_s22, %s5400_s6 }
 0x530   : > { %p5402_p11 = pnand %p5401_p5, %p9259_p13 }
 0x531   : > { %p5407_p1 = por %p5406_p0, %p5405_p4 }
 0x532   : > { %p5403_p6 = pneg %p5402_p11 }
 0x534   : > { %p5408_p12 = pnand %p5407_p1, %p5403_p6 }
 0x536   : > { %5411 = shalt.err (!%p5408_p12)
}
 0x537   : > { %s5463_s9 = smov 128   ;;  %s5464_s20 = smov 256  }
 0x538   : > { %s5465_s13 = smov 8  }
 0x539   : > { %4848 = dma.vmem_to_hbm [thread:$0]  (%p9259_p13), %s8149_s10, 4096, %s8147_s8, %s4472_s19, %s5463_s9, %s5464_s20, %s5465_s13  }
 0x53a PF: > { %s4500_s30 = sand.u32 1, %s5442_s15   ;;  %p9260_p2 = scmp.ne.s32.totalorder %s8519_s28, 0 }
 0x53b   : > { %p9261_p3 = scmp.ge.s32.totalorder %s5454_s18, 2  ;;  %s4501_s25 = scalar_lea.sflag [#allocation4], %s4500_s30 }
 0x53d   : > { %p4859_p7 = pnand %p9261_p3, %p9260_p2 }
 0x53f   : > { %p4860_p8 = pneg %p4859_p7 }
 0x541   : > { %5437 = dma.done.wait (%p4860_p8), %s4501_s25, 4096  }
 0x542   : > { %5439 = vsyncadd (%p4860_p8), %s4501_s25, 4294963200  ;;  %p18_p9 = scmp.ge.s32.totalorder %s5516_s21, 4   ;;  %s9262_s15 = smov %s5446_s16 }
 0x543   : > { %s9263_s16 = smov %s5450_s17  ;;  %s9264_s17 = smov %s5528_s24 }
 0x544   : > { %s9265_s18 = smov %s5516_s21  ;;  %20 = sbr.rel (!%p18_p9) target bundleno = 6 (0x6), region = 85 }
 0x549   :  { %4506 = vsyncpa [#allocation3], 1 }
 0x54a   :  { %4508 = vsyncpa [#allocation3 + $0x1], 1 }
 0x54b   :  { %4509 = vsyncpa [#allocation6], 1 }
 0x54c   :  { %4510 = vsyncpa [#allocation4], 1 }
 0x54d   :  { %4512 = vsyncpa [#allocation4 + $0x1], 1 }

</bundles_post_ra>
